<compile_context>
chip_gen: v6e
topology: v6e:2x2x1
jax: 0.10.0
libtpu: 0.0.40
codegen_flags: <defaults>
</compile_context>

<pallas_src>
import functools

import jax
import jax.numpy as jnp
from jax.experimental import pallas as pl
from jax.experimental.pallas import tpu as pltpu

N_INPUTS = 3
HIDDEN = 1000          # logical hidden width (PyTorch module)
HIDDEN_P = 1024        # zero-padded hidden width (multiple of 128 lanes)
N_OUTPUTS = 1
TN = 256               # w2 column-chunk (streamed over the "arbitrary" grid axis)
N_CHUNKS = HIDDEN_P // TN


def _round_up(a, m):
    return (a + m - 1) // m * m


def mlp_kernel(xt_ref, w1_ref, b1_ref, w2_ref, b2_ref, w3_ref, b3_ref,
               o_ref, h1_ref, acc_ref):
    # xt_ref : (3, tb)            f32   (batch on lanes)
    # w1_ref : (HIDDEN_P, 3)      f32      b1_ref: (HIDDEN_P, 1) f32
    # w2_ref : (TN, HIDDEN_P)     bf16     b2_ref: (TN, 1)       f32
    # w3_ref : (TN, 1)            f32      b3_ref: (1, 1)        f32 in SMEM
    # o_ref  : (1, tb)            f32   (lane-dense output tile)
    # h1_ref : (HIDDEN_P, tb)     bf16  VMEM scratch (layer-1 activations)
    # acc_ref: (1, tb)            f32   VMEM scratch (layer-3 partial sums)
    j = pl.program_id(1)

    @pl.when(j == 0)
    def _():
        # --- Layer 1: K=3 contraction is degenerate on the MXU; do it on the VPU.
        xt = xt_ref[...]                         # (3, tb)
        w1 = w1_ref[...]                         # (HIDDEN_P, 3)
        h1 = (w1[:, 0:1] * xt[0:1, :]
              + w1[:, 1:2] * xt[1:2, :]
              + w1[:, 2:3] * xt[2:3, :]
              + b1_ref[...])                     # (HIDDEN_P, tb) f32
        h1_ref[...] = jnp.maximum(h1, 0.0).astype(h1_ref.dtype)
        acc_ref[...] = jnp.zeros_like(acc_ref)

    # --- Layer 2 (chunk j): the real matmul. bf16 MXU inputs, f32 accumulation.
    h2 = jnp.dot(w2_ref[...], h1_ref[...],
                 preferred_element_type=jnp.float32) + b2_ref[...]
    h2 = jnp.maximum(h2, 0.0)                    # (TN, tb)

    # --- Layer 3 partial: N=1 output -> VPU multiply + XLU sublane reduction.
    acc_ref[...] += jnp.sum(h2 * w3_ref[...], axis=0, keepdims=True)

    @pl.when(j == pl.num_programs(1) - 1)
    def _():
        y = acc_ref[...] + b3_ref[0, 0]          # scalar bias from SMEM
        o_ref[...] = jnp.maximum(y, 0.0).astype(o_ref.dtype)


@jax.jit
def neural_net_forward(x, w1t, b1c, w2t, b2c, w3c, b3):
    """Forward pass. Params must already be packed via `pack_params`."""
    B = x.shape[0]
    if B <= 512:
        tb = _round_up(B, 128)                       # single tile, lane-aligned
    else:
        # >=2 tiles so the "parallel" batch axis shards across both v7x cores;
        # tiles up to 1024 rows amortize per-grid-step overhead.
        tb = min(1024, _round_up(-(-B // 2), 128))
    n_tiles = -(-B // tb)
    B_pad = n_tiles * tb

    xt = jnp.pad(x, ((0, B_pad - B), (0, 0))).T      # (3, B_pad), batch on lanes

    def rep(shape):
        # Constant-index parameter block: fetched once, stays resident.
        return pl.BlockSpec(shape, lambda i, j: (0, 0))

    out = pl.pallas_call(
        mlp_kernel,
        out_shape=jax.ShapeDtypeStruct((1, B_pad), jnp.float32),
        grid_spec=pltpu.PrefetchScalarGridSpec(
            num_scalar_prefetch=0,
            grid=(n_tiles, N_CHUNKS),                 # batch tiles x w2 column chunks
            in_specs=[
                pl.BlockSpec((N_INPUTS, tb), lambda i, j: (0, i)),   # x^T tile
                rep((HIDDEN_P, N_INPUTS)),                           # w1  (f32)
                rep((HIDDEN_P, 1)),                                  # b1  (f32)
                pl.BlockSpec((TN, HIDDEN_P), lambda i, j: (j, 0)),   # w2 chunk (bf16)
                pl.BlockSpec((TN, 1), lambda i, j: (j, 0)),          # b2 chunk (f32)
                pl.BlockSpec((TN, 1), lambda i, j: (j, 0)),          # w3 chunk (f32)
                pl.BlockSpec(memory_space=pltpu.MemorySpace.SMEM),   # b3 scalar
            ],
            out_specs=pl.BlockSpec((1, tb), lambda i, j: (0, i)),    # lane-dense
            scratch_shapes=[
                pltpu.VMEM((HIDDEN_P, tb), jnp.bfloat16),            # h1^T
                pltpu.VMEM((1, tb), jnp.float32),                    # layer-3 acc
            ],
        ),
        compiler_params=pltpu.CompilerParams(
            dimension_semantics=("parallel", "arbitrary"),
        ),
    )(xt, w1t, b1c, w2t, b2c, w3c, b3)

    return out[0, :B].reshape(B, N_OUTPUTS)


def init_params(key):
    """PyTorch nn.Linear-style init (uniform +-1/sqrt(fan_in)), (out, in) layout."""
    k1, k2, k3, k4, k5, k6 = jax.random.split(key, 6)

    def lin(kw, kb, fan_in, fan_out):
        bound = 1.0 / jnp.sqrt(float(fan_in))
        w = jax.random.uniform(kw, (fan_out, fan_in), jnp.float32, -bound, bound)
        b = jax.random.uniform(kb, (fan_out,), jnp.float32, -bound, bound)
        return w, b

    w1, b1 = lin(k1, k2, N_INPUTS, HIDDEN)
    w2, b2 = lin(k3, k4, HIDDEN, HIDDEN)
    w3, b3 = lin(k5, k6, HIDDEN, N_OUTPUTS)
    return w1, b1, w2, b2, w3, b3


def pack_params(w1, b1, w2, b2, w3, b3):
    """Zero-pad hidden dim 1000 -> 1024 and lay params out feature-major.

    bf16 storage of w2 (and the h1 -> bf16 cast) is an intentional accuracy
    trade-off: it halves the dominant HBM fetch; f32 accumulation is kept.
    Zero padding is numerically inert through the ReLUs.
    """
    w1t = jnp.zeros((HIDDEN_P, N_INPUTS), jnp.float32).at[:HIDDEN].set(w1)
    b1c = jnp.zeros((HIDDEN_P, 1), jnp.float32).at[:HIDDEN, 0].set(b1)
    w2t = (jnp.zeros((HIDDEN_P, HIDDEN_P), jnp.float32)
           .at[:HIDDEN, :HIDDEN].set(w2).astype(jnp.bfloat16))
    b2c = jnp.zeros((HIDDEN_P, 1), jnp.float32).at[:HIDDEN, 0].set(b2)
    w3c = jnp.zeros((HIDDEN_P, 1), jnp.float32).at[:HIDDEN, 0].set(w3[0])
    b3s = b3.reshape(1, 1).astype(jnp.float32)
    return w1t, b1c, w2t, b2c, w3c, b3s


def reference_forward(x, w1t, b1c, w2t, b2c, w3c, b3):
    """Pure-JAX reference mirroring the kernel's numerics (padded + bf16 w2)."""
    h1 = jnp.maximum(x @ w1t.T + b1c.T, 0.0)
    h2 = jnp.dot(h1.astype(jnp.bfloat16), w2t.T,
                 preferred_element_type=jnp.float32) + b2c.T
    h2 = jnp.maximum(h2, 0.0)
    y = h2 @ w3c + b3
    return jnp.maximum(y, 0.0)


if __name__ == "__main__":
    key = jax.random.PRNGKey(0)
    kx, kp = jax.random.split(key)
    params = pack_params(*init_params(kp))

    # Small batch: single-tile path.
    B = 16
    x = jax.random.normal(kx, (B, N_INPUTS), jnp.float32)
    out = jax.block_until_ready(neural_net_forward(x, *params))
    ref = reference_forward(x, *params)
    assert out.shape == (B, N_OUTPUTS)
    assert jnp.allclose(out, ref, atol=2e-3, rtol=2e-3), "mismatch (small batch)"

    # Larger batch: multi-tile (megacore) path with batch padding.
    B2 = 640
    x2 = jax.random.normal(jax.random.PRNGKey(1), (B2, N_INPUTS), jnp.float32)
    out2 = jax.block_until_ready(neural_net_forward(x2, *params))
    ref2 = reference_forward(x2, *params)
    assert out2.shape == (B2, N_OUTPUTS)
    assert jnp.allclose(out2, ref2, atol=2e-3, rtol=2e-3), "mismatch (large batch)"

    print("KERNEL_OK")
</pallas_src>

<mosaic_0001>
module attributes {stable_mosaic.version = 11 : i64} {
  func.func @mlp_kernel(%arg0: i32, %arg1: i32, %arg2: memref<3x128xf32, #tpu.memory_space<vmem>>, %arg3: memref<1024x3xf32, #tpu.memory_space<vmem>>, %arg4: memref<1024x1xf32, #tpu.memory_space<vmem>>, %arg5: memref<256x1024xbf16, #tpu.memory_space<vmem>>, %arg6: memref<256x1xf32, #tpu.memory_space<vmem>>, %arg7: memref<256x1xf32, #tpu.memory_space<vmem>>, %arg8: memref<1x1xf32, #tpu.memory_space<smem>>, %arg9: memref<1x128xf32, #tpu.memory_space<vmem>>, %arg10: memref<1024x128xbf16, #tpu.memory_space<vmem>>, %arg11: memref<1x128xf32, #tpu.memory_space<vmem>>) attributes {dimension_semantics = [#tpu.dimension_semantics<parallel>, #tpu.dimension_semantics<arbitrary>], iteration_bounds = array<i64: 1, 4>, scalar_prefetch = 0 : i64, scratch_operands = 2 : i64, tpu.core_type = #tpu.core_type<tc>, window_params = [{transform_indices = @transform_0, window_bounds = array<i64: 3, 128>}, {pipeline_mode = #tpu.pipeline_mode<synchronous>, transform_indices = @transform_1, window_bounds = array<i64: 1024, 3>}, {pipeline_mode = #tpu.pipeline_mode<synchronous>, transform_indices = @transform_2, window_bounds = array<i64: 1024, 1>}, {transform_indices = @transform_3, window_bounds = array<i64: 256, 1024>}, {transform_indices = @transform_4, window_bounds = array<i64: 256, 1>}, {transform_indices = @transform_5, window_bounds = array<i64: 256, 1>}, {transform_indices = @transform_6, window_bounds = array<i64: 1, 1>}, {transform_indices = @transform_7, window_bounds = array<i64: 1, 128>}]} {
    %c0_i32 = arith.constant 0 : i32
    %0 = arith.cmpi eq, %arg1, %c0_i32 : i32
    %1 = arith.extui %0 : i1 to i32
    %c0_i32_0 = arith.constant 0 : i32
    %2 = arith.cmpi ne, %1, %c0_i32_0 : i32
    scf.if %2 {
      %c0_15 = arith.constant 0 : index
      %c0_16 = arith.constant 0 : index
      %22 = vector.load %arg2[%c0_15, %c0_16] : memref<3x128xf32, #tpu.memory_space<vmem>>, vector<3x128xf32>
      %c0_17 = arith.constant 0 : index
      %c0_18 = arith.constant 0 : index
      %23 = vector.load %arg3[%c0_17, %c0_18] : memref<1024x3xf32, #tpu.memory_space<vmem>>, vector<1024x3xf32>
      %24 = vector.extract_strided_slice %23 {offsets = [0, 0], sizes = [1024, 1], strides = [1, 1]} : vector<1024x3xf32> to vector<1024x1xf32>
      %25 = vector.extract_strided_slice %22 {offsets = [0, 0], sizes = [1, 128], strides = [1, 1]} : vector<3x128xf32> to vector<1x128xf32>
      %26 = vector.broadcast %24 : vector<1024x1xf32> to vector<1024x128xf32>
      %27 = vector.broadcast %25 : vector<1x128xf32> to vector<1024x128xf32>
      %28 = arith.mulf %26, %27 : vector<1024x128xf32>
      %29 = vector.extract_strided_slice %23 {offsets = [0, 1], sizes = [1024, 1], strides = [1, 1]} : vector<1024x3xf32> to vector<1024x1xf32>
      %30 = vector.extract_strided_slice %22 {offsets = [1, 0], sizes = [1, 128], strides = [1, 1]} : vector<3x128xf32> to vector<1x128xf32>
      %31 = vector.broadcast %29 : vector<1024x1xf32> to vector<1024x128xf32>
      %32 = vector.broadcast %30 : vector<1x128xf32> to vector<1024x128xf32>
      %33 = arith.mulf %31, %32 : vector<1024x128xf32>
      %34 = arith.addf %28, %33 : vector<1024x128xf32>
      %35 = vector.extract_strided_slice %23 {offsets = [0, 2], sizes = [1024, 1], strides = [1, 1]} : vector<1024x3xf32> to vector<1024x1xf32>
      %36 = vector.extract_strided_slice %22 {offsets = [2, 0], sizes = [1, 128], strides = [1, 1]} : vector<3x128xf32> to vector<1x128xf32>
      %37 = vector.broadcast %35 : vector<1024x1xf32> to vector<1024x128xf32>
      %38 = vector.broadcast %36 : vector<1x128xf32> to vector<1024x128xf32>
      %39 = arith.mulf %37, %38 : vector<1024x128xf32>
      %40 = arith.addf %34, %39 : vector<1024x128xf32>
      %c0_19 = arith.constant 0 : index
      %c0_20 = arith.constant 0 : index
      %41 = vector.load %arg4[%c0_19, %c0_20] : memref<1024x1xf32, #tpu.memory_space<vmem>>, vector<1024x1xf32>
      %42 = vector.broadcast %41 : vector<1024x1xf32> to vector<1024x128xf32>
      %43 = arith.addf %40, %42 : vector<1024x128xf32>
      %cst_21 = arith.constant 0.000000e+00 : f32
      %44 = vector.broadcast %cst_21 : f32 to vector<1024x128xf32>
      %45 = arith.maximumf %43, %44 : vector<1024x128xf32>
      %46 = arith.truncf %45 : vector<1024x128xf32> to vector<1024x128xbf16>
      %c0_22 = arith.constant 0 : index
      %c0_23 = arith.constant 0 : index
      %47 = vector.load %arg10[%c0_22, %c0_23] : memref<1024x128xbf16, #tpu.memory_space<vmem>>, vector<1024x128xbf16>
      tpu.vector_store %arg10[%c0_22, %c0_23], %46 {strides = array<i32>} : memref<1024x128xbf16, #tpu.memory_space<vmem>>, vector<1024x128xbf16>,
      %cst_24 = arith.constant 0.000000e+00 : f32
      %48 = vector.broadcast %cst_24 : f32 to vector<1x128xf32>
      %c0_25 = arith.constant 0 : index
      %c0_26 = arith.constant 0 : index
      %49 = vector.load %arg11[%c0_25, %c0_26] : memref<1x128xf32, #tpu.memory_space<vmem>>, vector<1x128xf32>
      tpu.vector_store %arg11[%c0_25, %c0_26], %48 {strides = array<i32>} : memref<1x128xf32, #tpu.memory_space<vmem>>, vector<1x128xf32>,
    } else {
    }
    %c0 = arith.constant 0 : index
    %c0_1 = arith.constant 0 : index
    %3 = vector.load %arg5[%c0, %c0_1] : memref<256x1024xbf16, #tpu.memory_space<vmem>>, vector<256x1024xbf16>
    %c0_2 = arith.constant 0 : index
    %c0_3 = arith.constant 0 : index
    %4 = vector.load %arg10[%c0_2, %c0_3] : memref<1024x128xbf16, #tpu.memory_space<vmem>>, vector<1024x128xbf16>
    %cst = arith.constant dense<0.000000e+00> : vector<256x128xf32>
    %5 = tpu.matmul %3, %4, %cst {dimension_numbers = #tpu.dot_dimension_numbers<[1], [0], [0], [1], [0, 0, 1, 1], [], []>} : vector<256x1024xbf16>, vector<1024x128xbf16>, vector<256x128xf32> -> vector<256x128xf32>
    %c0_4 = arith.constant 0 : index
    %c0_5 = arith.constant 0 : index
    %6 = vector.load %arg6[%c0_4, %c0_5] : memref<256x1xf32, #tpu.memory_space<vmem>>, vector<256x1xf32>
    %7 = vector.broadcast %6 : vector<256x1xf32> to vector<256x128xf32>
    %8 = arith.addf %5, %7 : vector<256x128xf32>
    %cst_6 = arith.constant 0.000000e+00 : f32
    %9 = vector.broadcast %cst_6 : f32 to vector<256x128xf32>
    %10 = arith.maximumf %8, %9 : vector<256x128xf32>
    %c0_7 = arith.constant 0 : index
    %c0_8 = arith.constant 0 : index
    %11 = vector.load %arg11[%c0_7, %c0_8] : memref<1x128xf32, #tpu.memory_space<vmem>>, vector<1x128xf32>
    %c0_9 = arith.constant 0 : index
    %c0_10 = arith.constant 0 : index
    %12 = vector.load %arg7[%c0_9, %c0_10] : memref<256x1xf32, #tpu.memory_space<vmem>>, vector<256x1xf32>
    %13 = vector.broadcast %12 : vector<256x1xf32> to vector<256x128xf32>
    %14 = arith.mulf %10, %13 : vector<256x128xf32>
    %cst_11 = arith.constant dense<0.000000e+00> : vector<128xf32>
    %15 = vector.multi_reduction <add>, %14, %cst_11 [0] : vector<256x128xf32> to vector<128xf32>
    %16 = vector.shape_cast %15 : vector<128xf32> to vector<1x128xf32>
    %17 = arith.addf %11, %16 : vector<1x128xf32>
    %c0_12 = arith.constant 0 : index
    %c0_13 = arith.constant 0 : index
    %18 = vector.load %arg11[%c0_12, %c0_13] : memref<1x128xf32, #tpu.memory_space<vmem>>, vector<1x128xf32>
    tpu.vector_store %arg11[%c0_12, %c0_13], %17 {strides = array<i32>} : memref<1x128xf32, #tpu.memory_space<vmem>>, vector<1x128xf32>,
    %c3_i32 = arith.constant 3 : i32
    %19 = arith.cmpi eq, %arg1, %c3_i32 : i32
    %20 = arith.extui %19 : i1 to i32
    %c0_i32_14 = arith.constant 0 : i32
    %21 = arith.cmpi ne, %20, %c0_i32_14 : i32
    scf.if %21 {
      %c0_15 = arith.constant 0 : index
      %c0_16 = arith.constant 0 : index
      %22 = vector.load %arg11[%c0_15, %c0_16] : memref<1x128xf32, #tpu.memory_space<vmem>>, vector<1x128xf32>
      %c0_17 = arith.constant 0 : index
      %c0_18 = arith.constant 0 : index
      %23 = memref.load %arg8[%c0_17, %c0_18] : memref<1x1xf32, #tpu.memory_space<smem>>
      %24 = vector.broadcast %23 : f32 to vector<1x128xf32>
      %25 = arith.addf %22, %24 : vector<1x128xf32>
      %cst_19 = arith.constant 0.000000e+00 : f32
      %26 = vector.broadcast %cst_19 : f32 to vector<1x128xf32>
      %27 = arith.maximumf %25, %26 : vector<1x128xf32>
      %c0_20 = arith.constant 0 : index
      %c0_21 = arith.constant 0 : index
      %28 = vector.load %arg9[%c0_20, %c0_21] : memref<1x128xf32, #tpu.memory_space<vmem>>, vector<1x128xf32>
      tpu.vector_store %arg9[%c0_20, %c0_21], %27 {strides = array<i32>} : memref<1x128xf32, #tpu.memory_space<vmem>>, vector<1x128xf32>,
    } else {
    }
    return
  }
  func.func @transform_0(%arg0: i32, %arg1: i32) -> (i32, i32) {
    %c0_i32 = arith.constant 0 : i32
    %c0_i32_0 = arith.constant 0 : i32
    return %c0_i32, %arg0 : i32, i32
  }
  func.func @transform_1(%arg0: i32, %arg1: i32) -> (i32, i32) {
    %c0_i32 = arith.constant 0 : i32
    %c0_i32_0 = arith.constant 0 : i32
    %c0_i32_1 = arith.constant 0 : i32
    return %c0_i32, %c0_i32_0 : i32, i32
  }
  func.func @transform_2(%arg0: i32, %arg1: i32) -> (i32, i32) {
    %c0_i32 = arith.constant 0 : i32
    %c0_i32_0 = arith.constant 0 : i32
    %c0_i32_1 = arith.constant 0 : i32
    return %c0_i32, %c0_i32_0 : i32, i32
  }
  func.func @transform_3(%arg0: i32, %arg1: i32) -> (i32, i32) {
    %c0_i32 = arith.constant 0 : i32
    %c0_i32_0 = arith.constant 0 : i32
    return %arg1, %c0_i32 : i32, i32
  }
  func.func @transform_4(%arg0: i32, %arg1: i32) -> (i32, i32) {
    %c0_i32 = arith.constant 0 : i32
    %c0_i32_0 = arith.constant 0 : i32
    return %arg1, %c0_i32 : i32, i32
  }
  func.func @transform_5(%arg0: i32, %arg1: i32) -> (i32, i32) {
    %c0_i32 = arith.constant 0 : i32
    %c0_i32_0 = arith.constant 0 : i32
    return %arg1, %c0_i32 : i32, i32
  }
  func.func @transform_6(%arg0: i32, %arg1: i32) -> (i32, i32) {
    %c0_i32 = arith.constant 0 : i32
    %c0_i32_0 = arith.constant 0 : i32
    %c0_i32_1 = arith.constant 0 : i32
    return %c0_i32, %c0_i32_0 : i32, i32
  }
  func.func @transform_7(%arg0: i32, %arg1: i32) -> (i32, i32) {
    %c0_i32 = arith.constant 0 : i32
    %c0_i32_0 = arith.constant 0 : i32
    return %c0_i32, %arg0 : i32, i32
  }
}

</mosaic_0001>

<bundles_post_ra>
// kernel: neural_net_forward.1
= control target key start
LH: loop header
LB: loop body
LE: loop exit
PB: predicated region body
PF: predicated region fallthrough
CT: control target
= control target key end

     0   :  { %s8519_s26 = smov 0   ;;  %s8521_s27 = smov 0   ;;  %s11769_s0 = inlined_call_operand.vmem [shape: f32[3,128], index: 0, kind: input, shape index: {}]   ;;  %s11770_s1 = inlined_call_operand.vmem [shape: f32[1024,3], index: 1, kind: input, shape index: {}]   ;;  %s11771_s2 = inlined_call_operand.vmem [shape: f32[1024,1], index: 2, kind: input, shape index: {}]   ;;  %s11772_s3 = inlined_call_operand.vmem [shape: bf16[1024,1024], index: 3, kind: input, shape index: {}]   ;;  %s11773_s4 = inlined_call_operand.vmem [shape: f32[1024,1], index: 4, kind: input, shape index: {}]   ;;  %s11774_s5 = inlined_call_operand.vmem [shape: f32[1024,1], index: 5, kind: input, shape index: {}]   ;;  %s11775_s6 = inlined_call_operand.<no memory space> [shape: f32[1,1], index: 6, kind: input, shape index: {}]   ;;  %s11776_s7 = inlined_call_operand.vmem [shape: f32[1,128], index: 7, kind: output, shape index: {}]  }
   0x1   :  { %12 = sst [smem:[#allocation4]] %s11775_s6  ;;  %s8523_s28 = smov 0  }
   0x2 LB: > { %s27_s6 = sadd.s32 1, %s8465_s27  ;;  %p6987_p0 = scmp.ge.s32.totalorder %s8469_s28, 1  ;;  %s8469_s28 = sphi %s8523_s28, %s18_s28   ;;  %s8465_s27 = sphi %s8521_s27, %s12503_s27   ;;  %s8461_s26 = sphi %s8519_s26, %s12502_s26  }
   0x3   : > { %p28_p1 = scmp.ge.s32.totalorder %s27_s6, 4  ;;  %p283_p2 = scmp.lt.s32.totalorder %s8469_s28, 5 }
   0x5   : > { %s12505_s6 = smov (%p28_p1, %s27_s6), 0  ;;  %p284_p3 = pnand %p6987_p0, %p283_p2 }
   0x7   : > { %287 = sbr.rel (%p284_p3) target bundleno = 1699 (0x6a3), region = 48 }
   0xc   : > { %s6988_s29 = sshll.u32 %s8461_s26, 5  ;;  %p6995_p5 = scmp.ne.s32.totalorder %s8461_s26, 0 }
   0xd   : > { %p333_p4 = scmp.lt.s32.totalorder %s6988_s29, 127 }
   0xe   : > { %358 = sbr.rel (%p6995_p5) target bundleno = 1179 (0x49b), region = 52 }
   0xf   : > { %s12507_s29 = smov (!%p333_p4, %s6988_s29), 127 }
  0x10   : > { %s7320_s30 = sshll.u32 %s12507_s29, 5  ;;  %s6992_s8 = sshll.u32 %s12507_s29, 3 }
  0x11   : > { %s8543_s11 = scalar_lea.vmem %s11772_s3, %s7320_s30  ;;  %s8548_s14 = scalar_lea.vmem %s11773_s4, %s6992_s8 }
  0x12   : > { %s8553_s17 = scalar_lea.vmem %s11774_s5, %s6992_s8 }
  0x13   : > { %v8559_v0 = vld [vmem:[%s11770_s1 + $0x10] sm:$0xff]  ;;  %v360_v1 = vld [vmem:[%s11770_s1] sm:$0xff]  ;;  %v11779_v2 = vmov 1   ;;  %v11777_v3 = vmov 0   ;;  %v363_v4 = vld [vmem:[%s11770_s1 + $0x18] sm:$0xff] }
  0x14   : > { %8310 = vset.pattern.permute.xlu0 %v11779_v2  ;;  %8309 = vset.pattern.permute.xlu1 %v11777_v3  ;;  %v365_v5 = vld [vmem:[%s11770_s1 + $0x28] sm:$0xff]  ;;  %v367_v6 = vld [vmem:[%s11770_s1 + $0x38] sm:$0xff] }
  0x15   : > { %500 = vperm.xlu1 %8309, %v8559_v0   ;;  %1261 = vperm.xlu0 %8310, %v360_v1   ;;  %v369_v7 = vld [vmem:[%s11770_s1 + $0x48] sm:$0xff]  ;;  %v371_v8 = vld [vmem:[%s11770_s1 + $0x58] sm:$0xff] }
  0x16   : > { %v373_v9 = vld [vmem:[%s11770_s1 + $0x68] sm:$0xff]  ;;  %v375_v10 = vld [vmem:[%s11770_s1 + $0x78] sm:$0xff] }
  0x17   : > { %v377_v11 = vld [vmem:[%s11770_s1 + $0x88] sm:$0xff]  ;;  %v379_v12 = vld [vmem:[%s11770_s1 + $0x98] sm:$0xff] }
  0x18   : > { %v381_v13 = vld [vmem:[%s11770_s1 + $0xa8] sm:$0xff]  ;;  %v383_v14 = vld [vmem:[%s11770_s1 + $0xb8] sm:$0xff] }
  0x19   : > { %505 = vperm.xlu1 %8309, %v363_v4   ;;  %1273 = vperm.xlu0 %8310, %v363_v4   ;;  %v385_v15 = vld [vmem:[%s11770_s1 + $0xc8] sm:$0xff]  ;;  %v387_v16 = vld [vmem:[%s11770_s1 + $0xd8] sm:$0xff] }
  0x1a   : > { %v389_v17 = vld [vmem:[%s11770_s1 + $0xe8] sm:$0xff]  ;;  %v391_v18 = vld [vmem:[%s11770_s1 + $0xf8] sm:$0xff] }
  0x1b   : > { %v393_v19 = vld [vmem:[%s11770_s1 + $0x108] sm:$0xff]  ;;  %v395_v20 = vld [vmem:[%s11770_s1 + $0x118] sm:$0xff] }
  0x1c   : > { %v397_v21 = vld [vmem:[%s11770_s1 + $0x128] sm:$0xff]  ;;  %v399_v22 = vld [vmem:[%s11770_s1 + $0x138] sm:$0xff] }
  0x1d   : > { %515 = vperm.xlu1 %8309, %v365_v5   ;;  %1281 = vperm.xlu0 %8310, %v365_v5   ;;  %v401_v23 = vld [vmem:[%s11770_s1 + $0x148] sm:$0xff]  ;;  %v403_v24 = vld [vmem:[%s11770_s1 + $0x158] sm:$0xff] }
  0x1e   : > { %v405_v25 = vld [vmem:[%s11770_s1 + $0x168] sm:$0xff]  ;;  %v407_v26 = vld [vmem:[%s11770_s1 + $0x178] sm:$0xff] }
  0x1f   : > { %v409_v27 = vld [vmem:[%s11770_s1 + $0x188] sm:$0xff]  ;;  %v411_v28 = vld [vmem:[%s11770_s1 + $0x198] sm:$0xff] }
  0x20   : > { %v413_v29 = vld [vmem:[%s11770_s1 + $0x1a8] sm:$0xff]  ;;  %v415_v30 = vld [vmem:[%s11770_s1 + $0x1b8] sm:$0xff] }
  0x21   : > { %525 = vperm.xlu1 %8309, %v367_v6   ;;  %1289 = vperm.xlu0 %8310, %v367_v6   ;;  %v417_v31 = vld [vmem:[%s11770_s1 + $0x1c8] sm:$0xff]  ;;  %v419_v32 = vld [vmem:[%s11770_s1 + $0x1d8] sm:$0xff] }
  0x22   : > { %v421_v33 = vld [vmem:[%s11770_s1 + $0x1e8] sm:$0xff]  ;;  %v423_v34 = vld [vmem:[%s11770_s1 + $0x1f8] sm:$0xff] }
  0x23   : > { %v425_v37 = vld [vmem:[%s11770_s1 + $0x208] sm:$0xff]  ;;  %v427_v40 = vld [vmem:[%s11770_s1 + $0x218] sm:$0xff] }
  0x24   : > { %v429_v43 = vld [vmem:[%s11770_s1 + $0x228] sm:$0xff]  ;;  %v431_v46 = vld [vmem:[%s11770_s1 + $0x238] sm:$0xff] }
  0x25   : > { %535 = vperm.xlu1 %8309, %v369_v7   ;;  %1297 = vperm.xlu0 %8310, %v369_v7   ;;  %v433_v49 = vld [vmem:[%s11770_s1 + $0x248] sm:$0xff]  ;;  %v435_v52 = vld [vmem:[%s11770_s1 + $0x258] sm:$0xff] }
  0x26   : > { %v437_v55 = vld [vmem:[%s11770_s1 + $0x268] sm:$0xff]  ;;  %v439_v58 = vld [vmem:[%s11770_s1 + $0x278] sm:$0xff] }
  0x27   : > { %v441_v61 = vld [vmem:[%s11770_s1 + $0x288] sm:$0xff]  ;;  %v443_v1 = vld [vmem:[%s11770_s1 + $0x298] sm:$0xff] }
  0x28   : > { %v445_v6 = vld [vmem:[%s11770_s1 + $0x2a8] sm:$0xff] }
  0x29   : > { %545 = vperm.xlu1 %8309, %v371_v8   ;;  %1305 = vperm.xlu0 %8310, %v371_v8  }
  0x2d   : > { %555 = vperm.xlu1 %8309, %v373_v9   ;;  %1313 = vperm.xlu0 %8310, %v373_v9   ;;  %v447_v9 = vld [vmem:[%s11770_s1 + $0x2b8] sm:$0xff] }
  0x31   : > { %565 = vperm.xlu1 %8309, %v375_v10   ;;  %1321 = vperm.xlu0 %8310, %v375_v10  }
  0x35   : > { %575 = vperm.xlu1 %8309, %v377_v11   ;;  %1329 = vperm.xlu0 %8310, %v377_v11  }
  0x39   : > { %585 = vperm.xlu1 %8309, %v379_v12   ;;  %1337 = vperm.xlu0 %8310, %v379_v12   ;;  %v449_v12 = vld [vmem:[%s11770_s1 + $0x2c8] sm:$0xff] }
  0x3d   : > { %595 = vperm.xlu1 %8309, %v381_v13   ;;  %1345 = vperm.xlu0 %8310, %v381_v13  }
  0x41   : > { %605 = vperm.xlu1 %8309, %v383_v14   ;;  %1353 = vperm.xlu0 %8310, %v383_v14  }
  0x45   : > { %615 = vperm.xlu1 %8309, %v385_v15   ;;  %1361 = vperm.xlu0 %8310, %v385_v15   ;;  %v451_v15 = vld [vmem:[%s11770_s1 + $0x2d8] sm:$0xff] }
  0x49   : > { %625 = vperm.xlu1 %8309, %v387_v16   ;;  %1369 = vperm.xlu0 %8310, %v387_v16  }
  0x4d   : > { %635 = vperm.xlu1 %8309, %v389_v17   ;;  %1377 = vperm.xlu0 %8310, %v389_v17  }
  0x51   : > { %645 = vperm.xlu1 %8309, %v391_v18   ;;  %1385 = vperm.xlu0 %8310, %v391_v18   ;;  %v453_v18 = vld [vmem:[%s11770_s1 + $0x2e8] sm:$0xff] }
  0x55   : > { %655 = vperm.xlu1 %8309, %v393_v19   ;;  %1393 = vperm.xlu0 %8310, %v393_v19  }
  0x59   : > { %665 = vperm.xlu1 %8309, %v395_v20   ;;  %1401 = vperm.xlu0 %8310, %v395_v20  }
  0x5d   : > { %675 = vperm.xlu1 %8309, %v397_v21   ;;  %1409 = vperm.xlu0 %8310, %v397_v21   ;;  %v455_v21 = vld [vmem:[%s11770_s1 + $0x2f8] sm:$0xff] }
  0x61   : > { %685 = vperm.xlu1 %8309, %v399_v22   ;;  %1417 = vperm.xlu0 %8310, %v399_v22  }
  0x65   : > { %695 = vperm.xlu1 %8309, %v401_v23   ;;  %1425 = vperm.xlu0 %8310, %v401_v23  }
  0x69   : > { %705 = vperm.xlu1 %8309, %v403_v24   ;;  %1433 = vperm.xlu0 %8310, %v403_v24   ;;  %v457_v24 = vld [vmem:[%s11770_s1 + $0x308] sm:$0xff] }
  0x6d   : > { %715 = vperm.xlu1 %8309, %v405_v25   ;;  %1441 = vperm.xlu0 %8310, %v405_v25  }
  0x71   : > { %725 = vperm.xlu1 %8309, %v407_v26   ;;  %1449 = vperm.xlu0 %8310, %v407_v26  }
  0x75   : > { %735 = vperm.xlu1 %8309, %v409_v27   ;;  %1457 = vperm.xlu0 %8310, %v409_v27   ;;  %v459_v27 = vld [vmem:[%s11770_s1 + $0x318] sm:$0xff] }
  0x79   : > { %745 = vperm.xlu1 %8309, %v411_v28   ;;  %1465 = vperm.xlu0 %8310, %v411_v28  }
  0x7d   : > { %755 = vperm.xlu1 %8309, %v413_v29   ;;  %1473 = vperm.xlu0 %8310, %v413_v29  }
  0x81   : > { %765 = vperm.xlu1 %8309, %v415_v30   ;;  %1481 = vperm.xlu0 %8310, %v415_v30   ;;  %v461_v30 = vld [vmem:[%s11770_s1 + $0x328] sm:$0xff] }
  0x85   : > { %775 = vperm.xlu1 %8309, %v417_v31   ;;  %1489 = vperm.xlu0 %8310, %v417_v31  }
  0x89   : > { %785 = vperm.xlu1 %8309, %v419_v32   ;;  %1497 = vperm.xlu0 %8310, %v419_v32  }
  0x8d   : > { %795 = vperm.xlu1 %8309, %v421_v33   ;;  %1505 = vperm.xlu0 %8310, %v421_v33   ;;  %v463_v33 = vld [vmem:[%s11770_s1 + $0x338] sm:$0xff] }
  0x90   : > { %v8660_v35 = vpop.permute.xlu1 %500  ;;  %v8662_v36 = vpop.permute.xlu0 %1261 }
  0x91   : > { %11788 = vst [vmem:[#allocation5_spill] sm:$0xff] %v8660_v35  ;;  %11789 = vst [vmem:[#allocation6_spill] sm:$0xff] %v8662_v36  ;;  %805 = vperm.xlu1 %8309, %v423_v34   ;;  %1513 = vperm.xlu0 %8310, %v423_v34  }
  0x94   : > { %v8667_v38 = vpop.permute.xlu1 %505  ;;  %v8669_v39 = vpop.permute.xlu0 %1273 }
  0x95   : > { %11790 = vst [vmem:[#allocation7_spill] sm:$0xff] %v8667_v38  ;;  %11791 = vst [vmem:[#allocation8_spill] sm:$0xff] %v8669_v39  ;;  %815 = vperm.xlu1 %8309, %v425_v37   ;;  %1521 = vperm.xlu0 %8310, %v425_v37  }
  0x98   : > { %v8674_v41 = vpop.permute.xlu1 %515  ;;  %v8676_v42 = vpop.permute.xlu0 %1281 }
  0x99   : > { %11792 = vst [vmem:[#allocation9_spill] sm:$0xff] %v8674_v41  ;;  %11793 = vst [vmem:[#allocation10_spill] sm:$0xff] %v8676_v42  ;;  %825 = vperm.xlu1 %8309, %v427_v40   ;;  %1529 = vperm.xlu0 %8310, %v427_v40   ;;  %v465_v40 = vld [vmem:[%s11770_s1 + $0x348] sm:$0xff] }
  0x9c   : > { %v8681_v44 = vpop.permute.xlu1 %525  ;;  %v8683_v45 = vpop.permute.xlu0 %1289 }
  0x9d   : > { %11794 = vst [vmem:[#allocation11_spill] sm:$0xff] %v8681_v44  ;;  %11795 = vst [vmem:[#allocation12_spill] sm:$0xff] %v8683_v45  ;;  %835 = vperm.xlu1 %8309, %v429_v43   ;;  %1537 = vperm.xlu0 %8310, %v429_v43  }
  0xa0   : > { %v8688_v47 = vpop.permute.xlu1 %535  ;;  %v8690_v48 = vpop.permute.xlu0 %1297 }
  0xa1   : > { %11796 = vst [vmem:[#allocation13_spill] sm:$0xff] %v8688_v47  ;;  %11797 = vst [vmem:[#allocation14_spill] sm:$0xff] %v8690_v48  ;;  %845 = vperm.xlu1 %8309, %v431_v46   ;;  %1545 = vperm.xlu0 %8310, %v431_v46  }
  0xa4   : > { %v8695_v50 = vpop.permute.xlu1 %545  ;;  %v8697_v51 = vpop.permute.xlu0 %1305 }
  0xa5   : > { %11798 = vst [vmem:[#allocation15_spill] sm:$0xff] %v8695_v50  ;;  %11799 = vst [vmem:[#allocation16_spill] sm:$0xff] %v8697_v51  ;;  %855 = vperm.xlu1 %8309, %v433_v49   ;;  %1553 = vperm.xlu0 %8310, %v433_v49   ;;  %v467_v49 = vld [vmem:[%s11770_s1 + $0x358] sm:$0xff] }
  0xa8   : > { %v8702_v53 = vpop.permute.xlu1 %555  ;;  %v8704_v54 = vpop.permute.xlu0 %1313 }
  0xa9   : > { %11800 = vst [vmem:[#allocation17_spill] sm:$0xff] %v8702_v53  ;;  %11801 = vst [vmem:[#allocation18_spill] sm:$0xff] %v8704_v54  ;;  %865 = vperm.xlu1 %8309, %v435_v52   ;;  %1561 = vperm.xlu0 %8310, %v435_v52  }
  0xac   : > { %v8709_v56 = vpop.permute.xlu1 %565  ;;  %v8711_v57 = vpop.permute.xlu0 %1321 }
  0xad   : > { %11802 = vst [vmem:[#allocation19_spill] sm:$0xff] %v8709_v56  ;;  %11803 = vst [vmem:[#allocation20_spill] sm:$0xff] %v8711_v57  ;;  %875 = vperm.xlu1 %8309, %v437_v55   ;;  %1569 = vperm.xlu0 %8310, %v437_v55   ;;  %v9300_v56 = vld [vmem:[%s11770_s1 + $0x260] sm:$0xff] }
  0xb0   : > { %v8716_v59 = vpop.permute.xlu1 %575  ;;  %v8718_v60 = vpop.permute.xlu0 %1329 }
  0xb1   : > { %11804 = vst [vmem:[#allocation21_spill] sm:$0xff] %v8716_v59  ;;  %11805 = vst [vmem:[#allocation22_spill] sm:$0xff] %v8718_v60  ;;  %885 = vperm.xlu1 %8309, %v439_v58   ;;  %1577 = vperm.xlu0 %8310, %v439_v58   ;;  %v469_v58 = vld [vmem:[%s11770_s1 + $0x368] sm:$0xff]  ;;  %v9289_v60 = vld [vmem:[%s11770_s1 + $0x250] sm:$0xff] }
  0xb4   : > { %v8723_v62 = vpop.permute.xlu1 %585  ;;  %v8725_v63 = vpop.permute.xlu0 %1337 }
  0xb5   : > { %11806 = vst [vmem:[#allocation23_spill] sm:$0xff] %v8723_v62  ;;  %11807 = vst [vmem:[#allocation24_spill] sm:$0xff] %v8725_v63  ;;  %895 = vperm.xlu1 %8309, %v441_v61   ;;  %1585 = vperm.xlu0 %8310, %v441_v61  }
  0xb8   : > { %v8730_v4 = vpop.permute.xlu1 %595  ;;  %v8732_v5 = vpop.permute.xlu0 %1345 }
  0xb9   : > { %11808 = vst [vmem:[#allocation25_spill] sm:$0xff] %v8730_v4  ;;  %11809 = vst [vmem:[#allocation26_spill] sm:$0xff] %v8732_v5  ;;  %905 = vperm.xlu1 %8309, %v443_v1   ;;  %1593 = vperm.xlu0 %8310, %v443_v1   ;;  %v9278_v4 = vld [vmem:[%s11770_s1 + $0x240] sm:$0xff] }
  0xbc   : > { %v8737_v7 = vpop.permute.xlu1 %605  ;;  %v8739_v8 = vpop.permute.xlu0 %1353 }
  0xbd   : > { %11810 = vst [vmem:[#allocation27_spill] sm:$0xff] %v8737_v7  ;;  %11811 = vst [vmem:[#allocation28_spill] sm:$0xff] %v8739_v8  ;;  %915 = vperm.xlu1 %8309, %v445_v6   ;;  %1601 = vperm.xlu0 %8310, %v445_v6   ;;  %v471_v6 = vld [vmem:[%s11770_s1 + $0x378] sm:$0xff]  ;;  %v9267_v8 = vld [vmem:[%s11770_s1 + $0x230] sm:$0xff] }
  0xc0   : > { %v8744_v10 = vpop.permute.xlu1 %615  ;;  %v8746_v11 = vpop.permute.xlu0 %1361 }
  0xc1   : > { %11812 = vst [vmem:[#allocation29_spill] sm:$0xff] %v8744_v10  ;;  %11813 = vst [vmem:[#allocation30_spill] sm:$0xff] %v8746_v11  ;;  %925 = vperm.xlu1 %8309, %v447_v9   ;;  %1609 = vperm.xlu0 %8310, %v447_v9  }
  0xc4   : > { %v8751_v13 = vpop.permute.xlu1 %625  ;;  %v8753_v14 = vpop.permute.xlu0 %1369 }
  0xc5   : > { %11814 = vst [vmem:[#allocation31_spill] sm:$0xff] %v8751_v13  ;;  %11815 = vst [vmem:[#allocation32_spill] sm:$0xff] %v8753_v14  ;;  %935 = vperm.xlu1 %8309, %v449_v12   ;;  %1617 = vperm.xlu0 %8310, %v449_v12   ;;  %v9256_v13 = vld [vmem:[%s11770_s1 + $0x220] sm:$0xff] }
  0xc8   : > { %v8758_v16 = vpop.permute.xlu1 %635  ;;  %v8760_v17 = vpop.permute.xlu0 %1377 }
  0xc9   : > { %11816 = vst [vmem:[#allocation33_spill] sm:$0xff] %v8758_v16  ;;  %11817 = vst [vmem:[#allocation34_spill] sm:$0xff] %v8760_v17  ;;  %945 = vperm.xlu1 %8309, %v451_v15   ;;  %1625 = vperm.xlu0 %8310, %v451_v15   ;;  %v473_v15 = vld [vmem:[%s11770_s1 + $0x388] sm:$0xff] }
  0xcc   : > { %v8765_v19 = vpop.permute.xlu1 %645  ;;  %v8767_v20 = vpop.permute.xlu0 %1385 }
  0xcd   : > { %11818 = vst [vmem:[#allocation35_spill] sm:$0xff] %v8765_v19  ;;  %11819 = vst [vmem:[#allocation36_spill] sm:$0xff] %v8767_v20  ;;  %955 = vperm.xlu1 %8309, %v453_v18   ;;  %1633 = vperm.xlu0 %8310, %v453_v18  }
  0xd0   : > { %v8772_v22 = vpop.permute.xlu1 %655  ;;  %v8774_v23 = vpop.permute.xlu0 %1393 }
  0xd1   : > { %11820 = vst [vmem:[#allocation37_spill] sm:$0xff] %v8772_v22  ;;  %11821 = vst [vmem:[#allocation38_spill] sm:$0xff] %v8774_v23  ;;  %965 = vperm.xlu1 %8309, %v455_v21   ;;  %1641 = vperm.xlu0 %8310, %v455_v21  }
  0xd4   : > { %v8779_v25 = vpop.permute.xlu1 %665  ;;  %v8781_v26 = vpop.permute.xlu0 %1401 }
  0xd5   : > { %11822 = vst [vmem:[#allocation39_spill] sm:$0xff] %v8779_v25  ;;  %11823 = vst [vmem:[#allocation40_spill] sm:$0xff] %v8781_v26  ;;  %975 = vperm.xlu1 %8309, %v457_v24   ;;  %1649 = vperm.xlu0 %8310, %v457_v24   ;;  %v475_v24 = vld [vmem:[%s11770_s1 + $0x398] sm:$0xff] }
  0xd8   : > { %v8786_v28 = vpop.permute.xlu1 %675  ;;  %v8788_v29 = vpop.permute.xlu0 %1409 }
  0xd9   : > { %11824 = vst [vmem:[#allocation41_spill] sm:$0xff] %v8786_v28  ;;  %11825 = vst [vmem:[#allocation42_spill] sm:$0xff] %v8788_v29  ;;  %985 = vperm.xlu1 %8309, %v459_v27   ;;  %1657 = vperm.xlu0 %8310, %v459_v27  }
  0xdc   : > { %v8793_v31 = vpop.permute.xlu1 %685  ;;  %v8795_v32 = vpop.permute.xlu0 %1417 }
  0xdd   : > { %11826 = vst [vmem:[#allocation43_spill] sm:$0xff] %v8793_v31  ;;  %11827 = vst [vmem:[#allocation44_spill] sm:$0xff] %v8795_v32  ;;  %995 = vperm.xlu1 %8309, %v461_v30   ;;  %1665 = vperm.xlu0 %8310, %v461_v30  }
  0xe0   : > { %v8800_v34 = vpop.permute.xlu1 %695  ;;  %v8802_v37 = vpop.permute.xlu0 %1425 }
  0xe1   : > { %11828 = vst [vmem:[#allocation45_spill] sm:$0xff] %v8800_v34  ;;  %11829 = vst [vmem:[#allocation46_spill] sm:$0xff] %v8802_v37  ;;  %1005 = vperm.xlu1 %8309, %v463_v33   ;;  %1673 = vperm.xlu0 %8310, %v463_v33   ;;  %v477_v33 = vld [vmem:[%s11770_s1 + $0x3a8] sm:$0xff] }
  0xe4   : > { %v8807_v43 = vpop.permute.xlu1 %705  ;;  %v8809_v46 = vpop.permute.xlu0 %1433 }
  0xe5   : > { %11830 = vst [vmem:[#allocation47_spill] sm:$0xff] %v8807_v43  ;;  %11831 = vst [vmem:[#allocation48_spill] sm:$0xff] %v8809_v46  ;;  %1015 = vperm.xlu1 %8309, %v465_v40   ;;  %1681 = vperm.xlu0 %8310, %v465_v40  }
  0xe8   : > { %v8814_v52 = vpop.permute.xlu1 %715  ;;  %v8816_v55 = vpop.permute.xlu0 %1441 }
  0xe9   : > { %11832 = vst [vmem:[#allocation49_spill] sm:$0xff] %v8814_v52  ;;  %11833 = vst [vmem:[#allocation50_spill] sm:$0xff] %v8816_v55  ;;  %1025 = vperm.xlu1 %8309, %v467_v49   ;;  %1689 = vperm.xlu0 %8310, %v467_v49  }
  0xec   : > { %v8821_v61 = vpop.permute.xlu1 %725  ;;  %v8823_v1 = vpop.permute.xlu0 %1449 }
  0xed   : > { %11834 = vst [vmem:[#allocation51_spill] sm:$0xff] %v8821_v61  ;;  %11835 = vst [vmem:[#allocation52_spill] sm:$0xff] %v8823_v1  ;;  %1035 = vperm.xlu1 %8309, %v469_v58   ;;  %1697 = vperm.xlu0 %8310, %v469_v58   ;;  %v479_v58 = vld [vmem:[%s11770_s1 + $0x3b8] sm:$0xff] }
  0xf0   : > { %v8828_v9 = vpop.permute.xlu1 %735  ;;  %v8830_v12 = vpop.permute.xlu0 %1457 }
  0xf1   : > { %11836 = vst [vmem:[#allocation53_spill] sm:$0xff] %v8828_v9  ;;  %11837 = vst [vmem:[#allocation54_spill] sm:$0xff] %v8830_v12  ;;  %1045 = vperm.xlu1 %8309, %v471_v6   ;;  %1705 = vperm.xlu0 %8310, %v471_v6  }
  0xf4   : > { %v8835_v18 = vpop.permute.xlu1 %745  ;;  %v8837_v21 = vpop.permute.xlu0 %1465 }
  0xf5   : > { %11838 = vst [vmem:[#allocation55_spill] sm:$0xff] %v8835_v18  ;;  %11839 = vst [vmem:[#allocation56_spill] sm:$0xff] %v8837_v21  ;;  %1055 = vperm.xlu1 %8309, %v473_v15   ;;  %1713 = vperm.xlu0 %8310, %v473_v15  }
  0xf8   : > { %v8842_v27 = vpop.permute.xlu1 %755  ;;  %v8844_v30 = vpop.permute.xlu0 %1473 }
  0xf9   : > { %11840 = vst [vmem:[#allocation57_spill] sm:$0xff] %v8842_v27  ;;  %11841 = vst [vmem:[#allocation58_spill] sm:$0xff] %v8844_v30  ;;  %1065 = vperm.xlu1 %8309, %v475_v24   ;;  %1721 = vperm.xlu0 %8310, %v475_v24   ;;  %v481_v24 = vld [vmem:[%s11770_s1 + $0x3c8] sm:$0xff] }
  0xfc   : > { %v8849_v40 = vpop.permute.xlu1 %765  ;;  %v8851_v49 = vpop.permute.xlu0 %1481 }
  0xfd   : > { %11842 = vst [vmem:[#allocation59_spill] sm:$0xff] %v8849_v40  ;;  %11843 = vst [vmem:[#allocation60_spill] sm:$0xff] %v8851_v49  ;;  %1075 = vperm.xlu1 %8309, %v477_v33   ;;  %1729 = vperm.xlu0 %8310, %v477_v33   ;;  %v483_v33 = vld [vmem:[%s11770_s1 + $0x3d8] sm:$0xff] }
 0x100   : > { %v8856_v6 = vpop.permute.xlu1 %775  ;;  %v8858_v15 = vpop.permute.xlu0 %1489 }
 0x101   : > { %11844 = vst [vmem:[#allocation61_spill] sm:$0xff] %v8856_v6  ;;  %11845 = vst [vmem:[#allocation62_spill] sm:$0xff] %v8858_v15  ;;  %1085 = vperm.xlu1 %8309, %v479_v58   ;;  %1737 = vperm.xlu0 %8310, %v479_v58   ;;  %v485_v58 = vld [vmem:[%s11770_s1 + $0x3e8] sm:$0xff] }
 0x104   : > { %v8863_v3 = vpop.permute.xlu1 %785  ;;  %v8865_v2 = vpop.permute.xlu0 %1497 }
 0x105   : > { %11846 = vst [vmem:[#allocation63_spill] sm:$0xff] %v8863_v3  ;;  %11847 = vst [vmem:[#allocation64_spill] sm:$0xff] %v8865_v2  ;;  %1095 = vperm.xlu1 %8309, %v481_v24   ;;  %1745 = vperm.xlu0 %8310, %v481_v24   ;;  %v487_v24 = vld [vmem:[%s11770_s1 + $0x3f8] sm:$0xff] }
 0x108   : > { %v8870_v49 = vpop.permute.xlu1 %795  ;;  %v8872_v6 = vpop.permute.xlu0 %1505 }
 0x109   : > { %11848 = vst [vmem:[#allocation65_spill] sm:$0xff] %v8870_v49  ;;  %11849 = vst [vmem:[#allocation66_spill] sm:$0xff] %v8872_v6  ;;  %1105 = vperm.xlu1 %8309, %v483_v33   ;;  %1753 = vperm.xlu0 %8310, %v483_v33   ;;  %v8891_v33 = vld [vmem:[%s11770_s1 + $0x8] sm:$0xff]  ;;  %v11780_v6 = vmov 2  }
 0x10c   : > { %v8877_v15 = vpop.permute.xlu1 %805  ;;  %v8879_v3 = vpop.permute.xlu0 %1513 }
 0x10d   : > { %11850 = vst [vmem:[#allocation67_spill] sm:$0xff] %v8877_v15  ;;  %11851 = vst [vmem:[#allocation68_spill] sm:$0xff] %v8879_v3  ;;  %1115 = vperm.xlu1 %8309, %v485_v58   ;;  %1761 = vperm.xlu0 %8310, %v485_v58   ;;  %v11856_v58 = vmov 1  }
 0x110   : > { %v8884_v2 = vpop.permute.xlu1 %815  ;;  %v8886_v49 = vpop.permute.xlu0 %1521 }
 0x111   : > { %11852 = vst [vmem:[#allocation69_spill] sm:$0xff] %v8884_v2  ;;  %11853 = vst [vmem:[#allocation70_spill] sm:$0xff] %v8886_v49  ;;  %1125 = vperm.xlu1 %8309, %v487_v24   ;;  %1769 = vperm.xlu0 %8310, %v487_v24   ;;  %v8904_v24 = vld [vmem:[%s11770_s1 + $0x20] sm:$0xff] }
 0x114   : > { %v8893_v15 = vpop.permute.xlu1 %825  ;;  %v8895_v3 = vpop.permute.xlu0 %1529 }
 0x115   : > { %11854 = vst [vmem:[#allocation71_spill] sm:$0xff] %v8893_v15  ;;  %11855 = vst [vmem:[#allocation72_spill] sm:$0xff] %v8895_v3  ;;  %8311 = vset.pattern.permute.xlu1 %v11856_v58  ;;  %8313 = vset.pattern.permute.xlu0 %v11780_v6  ;;  %v8915_v58 = vld [vmem:[%s11770_s1 + $0x30] sm:$0xff] }
 0x116   : > { %1265 = vperm.xlu1 %8311, %v8891_v33   ;;  %2037 = vperm.xlu0 %8313, %v8891_v33  }
 0x118   : > { %v8906_v49 = vpop.permute.xlu1 %835  ;;  %v8908_v2 = vpop.permute.xlu0 %1537 }
 0x119   : > { %11857 = vst [vmem:[#allocation73_spill] sm:$0xff] %v8906_v49  ;;  %11858 = vst [vmem:[#allocation74_spill] sm:$0xff] %v8908_v2  ;;  %v8926_v2 = vld [vmem:[%s11770_s1 + $0x40] sm:$0xff] }
 0x11a   : > { %1269 = vperm.xlu1 %8311, %v8559_v0   ;;  %2049 = vperm.xlu0 %8313, %v8904_v24  }
 0x11c   : > { %v8917_v6 = vpop.permute.xlu1 %845  ;;  %v8919_v3 = vpop.permute.xlu0 %1545 }
 0x11d   : > { %11859 = vst [vmem:[#allocation75_spill] sm:$0xff] %v8917_v6  ;;  %11860 = vst [vmem:[#allocation76_spill] sm:$0xff] %v8919_v3  ;;  %v8937_v3 = vld [vmem:[%s11770_s1 + $0x50] sm:$0xff] }
 0x11e   : > { %1277 = vperm.xlu1 %8311, %v8904_v24   ;;  %2057 = vperm.xlu0 %8313, %v8915_v58  }
 0x120   : > { %v8928_v0 = vpop.permute.xlu1 %855  ;;  %v8930_v49 = vpop.permute.xlu0 %1553 }
 0x121   : > { %11861 = vst [vmem:[#allocation77_spill] sm:$0xff] %v8928_v0  ;;  %11862 = vst [vmem:[#allocation78_spill] sm:$0xff] %v8930_v49  ;;  %v8948_v49 = vld [vmem:[%s11770_s1 + $0x60] sm:$0xff] }
 0x122   : > { %1285 = vperm.xlu1 %8311, %v8915_v58   ;;  %2065 = vperm.xlu0 %8313, %v8926_v2  }
 0x124   : > { %v8939_v6 = vpop.permute.xlu1 %865  ;;  %v8941_v15 = vpop.permute.xlu0 %1561 }
 0x125   : > { %11863 = vst [vmem:[#allocation79_spill] sm:$0xff] %v8939_v6  ;;  %11864 = vst [vmem:[#allocation80_spill] sm:$0xff] %v8941_v15  ;;  %v8959_v15 = vld [vmem:[%s11770_s1 + $0x70] sm:$0xff] }
 0x126   : > { %1293 = vperm.xlu1 %8311, %v8926_v2   ;;  %2073 = vperm.xlu0 %8313, %v8937_v3  }
 0x128   : > { %v8950_v0 = vpop.permute.xlu1 %875  ;;  %v8952_v40 = vpop.permute.xlu0 %1569 }
 0x129   : > { %11865 = vst [vmem:[#allocation81_spill] sm:$0xff] %v8950_v0  ;;  %11866 = vst [vmem:[#allocation82_spill] sm:$0xff] %v8952_v40  ;;  %v8970_v40 = vld [vmem:[%s11770_s1 + $0x80] sm:$0xff] }
 0x12a   : > { %1301 = vperm.xlu1 %8311, %v8937_v3   ;;  %2081 = vperm.xlu0 %8313, %v8948_v49  }
 0x12c   : > { %v8961_v6 = vpop.permute.xlu1 %885  ;;  %v8963_v30 = vpop.permute.xlu0 %1577 }
 0x12d   : > { %11867 = vst [vmem:[#allocation83_spill] sm:$0xff] %v8961_v6  ;;  %11868 = vst [vmem:[#allocation84_spill] sm:$0xff] %v8963_v30  ;;  %v8981_v30 = vld [vmem:[%s11770_s1 + $0x90] sm:$0xff] }
 0x12e   : > { %1309 = vperm.xlu1 %8311, %v8948_v49   ;;  %2089 = vperm.xlu0 %8313, %v8959_v15  }
 0x130   : > { %v8972_v0 = vpop.permute.xlu1 %895  ;;  %v8974_v27 = vpop.permute.xlu0 %1585 }
 0x131   : > { %11869 = vst [vmem:[#allocation85_spill] sm:$0xff] %v8972_v0  ;;  %11870 = vst [vmem:[#allocation86_spill] sm:$0xff] %v8974_v27  ;;  %v8992_v27 = vld [vmem:[%s11770_s1 + $0xa0] sm:$0xff] }
 0x132   : > { %1317 = vperm.xlu1 %8311, %v8959_v15   ;;  %2097 = vperm.xlu0 %8313, %v8970_v40  }
 0x134   : > { %v8983_v6 = vpop.permute.xlu1 %905  ;;  %v8985_v21 = vpop.permute.xlu0 %1593 }
 0x135   : > { %11871 = vst [vmem:[#allocation87_spill] sm:$0xff] %v8983_v6  ;;  %11872 = vst [vmem:[#allocation88_spill] sm:$0xff] %v8985_v21  ;;  %v9003_v21 = vld [vmem:[%s11770_s1 + $0xb0] sm:$0xff] }
 0x136   : > { %1325 = vperm.xlu1 %8311, %v8970_v40   ;;  %2105 = vperm.xlu0 %8313, %v8981_v30  }
 0x138   : > { %v8994_v0 = vpop.permute.xlu1 %915  ;;  %v8996_v18 = vpop.permute.xlu0 %1601 }
 0x139   : > { %11873 = vst [vmem:[#allocation89_spill] sm:$0xff] %v8994_v0  ;;  %11874 = vst [vmem:[#allocation90_spill] sm:$0xff] %v8996_v18  ;;  %v9014_v18 = vld [vmem:[%s11770_s1 + $0xc0] sm:$0xff] }
 0x13a   : > { %1333 = vperm.xlu1 %8311, %v8981_v30   ;;  %2113 = vperm.xlu0 %8313, %v8992_v27  }
 0x13c   : > { %v9005_v6 = vpop.permute.xlu1 %925  ;;  %v9007_v12 = vpop.permute.xlu0 %1609 }
 0x13d   : > { %11875 = vst [vmem:[#allocation91_spill] sm:$0xff] %v9005_v6  ;;  %11876 = vst [vmem:[#allocation92_spill] sm:$0xff] %v9007_v12  ;;  %v9025_v12 = vld [vmem:[%s11770_s1 + $0xd0] sm:$0xff] }
 0x13e   : > { %1341 = vperm.xlu1 %8311, %v8992_v27   ;;  %2121 = vperm.xlu0 %8313, %v9003_v21  }
 0x140   : > { %v9016_v0 = vpop.permute.xlu1 %935  ;;  %v9018_v9 = vpop.permute.xlu0 %1617 }
 0x141   : > { %11877 = vst [vmem:[#allocation93_spill] sm:$0xff] %v9016_v0  ;;  %11878 = vst [vmem:[#allocation94_spill] sm:$0xff] %v9018_v9  ;;  %v9036_v9 = vld [vmem:[%s11770_s1 + $0xe0] sm:$0xff] }
 0x142   : > { %1349 = vperm.xlu1 %8311, %v9003_v21   ;;  %2129 = vperm.xlu0 %8313, %v9014_v18  }
 0x144   : > { %v9027_v6 = vpop.permute.xlu1 %945  ;;  %v9029_v1 = vpop.permute.xlu0 %1625 }
 0x145   : > { %11879 = vst [vmem:[#allocation95_spill] sm:$0xff] %v9027_v6  ;;  %11880 = vst [vmem:[#allocation96_spill] sm:$0xff] %v9029_v1  ;;  %v9047_v1 = vld [vmem:[%s11770_s1 + $0xf0] sm:$0xff] }
 0x146   : > { %1357 = vperm.xlu1 %8311, %v9014_v18   ;;  %2137 = vperm.xlu0 %8313, %v9025_v12  }
 0x148   : > { %v9038_v0 = vpop.permute.xlu1 %955  ;;  %v9040_v61 = vpop.permute.xlu0 %1633 }
 0x149   : > { %11881 = vst [vmem:[#allocation97_spill] sm:$0xff] %v9038_v0  ;;  %11882 = vst [vmem:[#allocation98_spill] sm:$0xff] %v9040_v61  ;;  %v9058_v61 = vld [vmem:[%s11770_s1 + $0x100] sm:$0xff] }
 0x14a   : > { %1365 = vperm.xlu1 %8311, %v9025_v12   ;;  %2145 = vperm.xlu0 %8313, %v9036_v9  }
 0x14c   : > { %v9049_v6 = vpop.permute.xlu1 %965  ;;  %v9051_v55 = vpop.permute.xlu0 %1641 }
 0x14d   : > { %11883 = vst [vmem:[#allocation99_spill] sm:$0xff] %v9049_v6  ;;  %11884 = vst [vmem:[#allocation100_spill] sm:$0xff] %v9051_v55  ;;  %v9069_v55 = vld [vmem:[%s11770_s1 + $0x110] sm:$0xff] }
 0x14e   : > { %1373 = vperm.xlu1 %8311, %v9036_v9   ;;  %2153 = vperm.xlu0 %8313, %v9047_v1  }
 0x150   : > { %v9060_v0 = vpop.permute.xlu1 %975  ;;  %v9062_v52 = vpop.permute.xlu0 %1649 }
 0x151   : > { %11885 = vst [vmem:[#allocation101_spill] sm:$0xff] %v9060_v0  ;;  %11886 = vst [vmem:[#allocation102_spill] sm:$0xff] %v9062_v52  ;;  %v9080_v52 = vld [vmem:[%s11770_s1 + $0x120] sm:$0xff] }
 0x152   : > { %1381 = vperm.xlu1 %8311, %v9047_v1   ;;  %2161 = vperm.xlu0 %8313, %v9058_v61  }
 0x154   : > { %v9071_v6 = vpop.permute.xlu1 %985  ;;  %v9073_v46 = vpop.permute.xlu0 %1657 }
 0x155   : > { %11887 = vst [vmem:[#allocation103_spill] sm:$0xff] %v9071_v6  ;;  %11888 = vst [vmem:[#allocation104_spill] sm:$0xff] %v9073_v46  ;;  %v9091_v46 = vld [vmem:[%s11770_s1 + $0x130] sm:$0xff] }
 0x156   : > { %1389 = vperm.xlu1 %8311, %v9058_v61   ;;  %2169 = vperm.xlu0 %8313, %v9069_v55  }
 0x158   : > { %v9082_v0 = vpop.permute.xlu1 %995  ;;  %v9084_v43 = vpop.permute.xlu0 %1665 }
 0x159   : > { %11889 = vst [vmem:[#allocation105_spill] sm:$0xff] %v9082_v0  ;;  %11890 = vst [vmem:[#allocation106_spill] sm:$0xff] %v9084_v43  ;;  %v9102_v43 = vld [vmem:[%s11770_s1 + $0x140] sm:$0xff] }
 0x15a   : > { %1397 = vperm.xlu1 %8311, %v9069_v55   ;;  %2177 = vperm.xlu0 %8313, %v9080_v52  }
 0x15c   : > { %v9093_v6 = vpop.permute.xlu1 %1005  ;;  %v9095_v37 = vpop.permute.xlu0 %1673 }
 0x15d   : > { %11891 = vst [vmem:[#allocation107_spill] sm:$0xff] %v9093_v6  ;;  %11892 = vst [vmem:[#allocation108_spill] sm:$0xff] %v9095_v37  ;;  %v9113_v37 = vld [vmem:[%s11770_s1 + $0x150] sm:$0xff] }
 0x15e   : > { %1405 = vperm.xlu1 %8311, %v9080_v52   ;;  %2185 = vperm.xlu0 %8313, %v9091_v46  }
 0x160   : > { %v9104_v0 = vpop.permute.xlu1 %1015  ;;  %v9106_v34 = vpop.permute.xlu0 %1681 }
 0x161   : > { %11893 = vst [vmem:[#allocation109_spill] sm:$0xff] %v9104_v0  ;;  %11894 = vst [vmem:[#allocation110_spill] sm:$0xff] %v9106_v34  ;;  %v9124_v34 = vld [vmem:[%s11770_s1 + $0x160] sm:$0xff] }
 0x162   : > { %1413 = vperm.xlu1 %8311, %v9091_v46   ;;  %2193 = vperm.xlu0 %8313, %v9102_v43  }
 0x164   : > { %v9115_v6 = vpop.permute.xlu1 %1025  ;;  %v9117_v32 = vpop.permute.xlu0 %1689 }
 0x165   : > { %11895 = vst [vmem:[#allocation111_spill] sm:$0xff] %v9115_v6  ;;  %11896 = vst [vmem:[#allocation112_spill] sm:$0xff] %v9117_v32  ;;  %v9135_v32 = vld [vmem:[%s11770_s1 + $0x170] sm:$0xff] }
 0x166   : > { %1421 = vperm.xlu1 %8311, %v9102_v43   ;;  %2201 = vperm.xlu0 %8313, %v9113_v37  }
 0x168   : > { %v9126_v0 = vpop.permute.xlu1 %1035  ;;  %v9128_v31 = vpop.permute.xlu0 %1697 }
 0x169   : > { %11897 = vst [vmem:[#allocation113_spill] sm:$0xff] %v9126_v0  ;;  %11898 = vst [vmem:[#allocation114_spill] sm:$0xff] %v9128_v31  ;;  %v9146_v31 = vld [vmem:[%s11770_s1 + $0x180] sm:$0xff] }
 0x16a   : > { %1429 = vperm.xlu1 %8311, %v9113_v37   ;;  %2209 = vperm.xlu0 %8313, %v9124_v34  }
 0x16c   : > { %v9137_v6 = vpop.permute.xlu1 %1045  ;;  %v9139_v29 = vpop.permute.xlu0 %1705 }
 0x16d   : > { %11899 = vst [vmem:[#allocation115_spill] sm:$0xff] %v9137_v6  ;;  %11900 = vst [vmem:[#allocation116_spill] sm:$0xff] %v9139_v29  ;;  %v9157_v29 = vld [vmem:[%s11770_s1 + $0x190] sm:$0xff] }
 0x16e   : > { %1437 = vperm.xlu1 %8311, %v9124_v34   ;;  %2217 = vperm.xlu0 %8313, %v9135_v32  }
 0x170   : > { %v9148_v0 = vpop.permute.xlu1 %1055  ;;  %v9150_v28 = vpop.permute.xlu0 %1713 }
 0x171   : > { %11901 = vst [vmem:[#allocation117_spill] sm:$0xff] %v9148_v0  ;;  %11902 = vst [vmem:[#allocation118_spill] sm:$0xff] %v9150_v28  ;;  %v9168_v28 = vld [vmem:[%s11770_s1 + $0x1a0] sm:$0xff] }
 0x172   : > { %1445 = vperm.xlu1 %8311, %v9135_v32   ;;  %2225 = vperm.xlu0 %8313, %v9146_v31  }
 0x174   : > { %v9159_v6 = vpop.permute.xlu1 %1065  ;;  %v9161_v26 = vpop.permute.xlu0 %1721 }
 0x175   : > { %11903 = vst [vmem:[#allocation119_spill] sm:$0xff] %v9159_v6  ;;  %11904 = vst [vmem:[#allocation120_spill] sm:$0xff] %v9161_v26  ;;  %v9179_v26 = vld [vmem:[%s11770_s1 + $0x1b0] sm:$0xff] }
 0x176   : > { %1453 = vperm.xlu1 %8311, %v9146_v31   ;;  %2233 = vperm.xlu0 %8313, %v9157_v29  }
 0x178   : > { %v9170_v0 = vpop.permute.xlu1 %1075  ;;  %v9172_v25 = vpop.permute.xlu0 %1729 }
 0x179   : > { %11905 = vst [vmem:[#allocation121_spill] sm:$0xff] %v9170_v0  ;;  %11906 = vst [vmem:[#allocation122_spill] sm:$0xff] %v9172_v25  ;;  %v9190_v25 = vld [vmem:[%s11770_s1 + $0x1c0] sm:$0xff] }
 0x17a   : > { %1461 = vperm.xlu1 %8311, %v9157_v29   ;;  %2241 = vperm.xlu0 %8313, %v9168_v28  }
 0x17c   : > { %v9181_v6 = vpop.permute.xlu1 %1085  ;;  %v9183_v23 = vpop.permute.xlu0 %1737 }
 0x17d   : > { %11907 = vst [vmem:[#allocation123_spill] sm:$0xff] %v9181_v6  ;;  %11908 = vst [vmem:[#allocation124_spill] sm:$0xff] %v9183_v23  ;;  %v9201_v23 = vld [vmem:[%s11770_s1 + $0x1d0] sm:$0xff] }
 0x17e   : > { %1469 = vperm.xlu1 %8311, %v9168_v28   ;;  %2249 = vperm.xlu0 %8313, %v9179_v26  }
 0x180   : > { %v9192_v0 = vpop.permute.xlu1 %1095  ;;  %v9194_v22 = vpop.permute.xlu0 %1745 }
 0x181   : > { %11909 = vst [vmem:[#allocation125_spill] sm:$0xff] %v9192_v0  ;;  %11910 = vst [vmem:[#allocation126_spill] sm:$0xff] %v9194_v22  ;;  %v9212_v22 = vld [vmem:[%s11770_s1 + $0x1e0] sm:$0xff] }
 0x182   : > { %1477 = vperm.xlu1 %8311, %v9179_v26   ;;  %2257 = vperm.xlu0 %8313, %v9190_v25  }
 0x184   : > { %v9203_v6 = vpop.permute.xlu1 %1105  ;;  %v9205_v20 = vpop.permute.xlu0 %1753 }
 0x185   : > { %11911 = vst [vmem:[#allocation127_spill] sm:$0xff] %v9203_v6  ;;  %11912 = vst [vmem:[#allocation128_spill] sm:$0xff] %v9205_v20  ;;  %v9223_v20 = vld [vmem:[%s11770_s1 + $0x1f0] sm:$0xff] }
 0x186   : > { %1485 = vperm.xlu1 %8311, %v9190_v25   ;;  %2265 = vperm.xlu0 %8313, %v9201_v23  }
 0x188   : > { %v9214_v0 = vpop.permute.xlu1 %1115  ;;  %v9216_v19 = vpop.permute.xlu0 %1761 }
 0x189   : > { %11913 = vst [vmem:[#allocation129_spill] sm:$0xff] %v9214_v0  ;;  %11914 = vst [vmem:[#allocation130_spill] sm:$0xff] %v9216_v19  ;;  %v9234_v19 = vld [vmem:[%s11770_s1 + $0x200] sm:$0xff] }
 0x18a   : > { %1493 = vperm.xlu1 %8311, %v9201_v23   ;;  %2273 = vperm.xlu0 %8313, %v9212_v22  }
 0x18c   : > { %v9225_v6 = vpop.permute.xlu1 %1125  ;;  %v9227_v17 = vpop.permute.xlu0 %1769 }
 0x18d   : > { %11915 = vst [vmem:[#allocation131_spill] sm:$0xff] %v9225_v6  ;;  %11916 = vst [vmem:[#allocation132_spill] sm:$0xff] %v9227_v17  ;;  %v9245_v17 = vld [vmem:[%s11770_s1 + $0x210] sm:$0xff] }
 0x18e   : > { %1501 = vperm.xlu1 %8311, %v9212_v22   ;;  %2281 = vperm.xlu0 %8313, %v9223_v20  }
 0x191   : > { %v9236_v0 = vpop.permute.xlu1 %1265  ;;  %v9238_v16 = vpop.permute.xlu0 %2037 }
 0x192   : > { %11917 = vst [vmem:[#allocation133_spill] sm:$0xff] %v9236_v0  ;;  %11918 = vst [vmem:[#allocation134_spill] sm:$0xff] %v9238_v16  ;;  %1509 = vperm.xlu1 %8311, %v9223_v20   ;;  %2289 = vperm.xlu0 %8313, %v9234_v19  }
 0x195   : > { %v9247_v6 = vpop.permute.xlu1 %1269  ;;  %v9249_v14 = vpop.permute.xlu0 %2049 }
 0x196   : > { %11919 = vst [vmem:[#allocation135_spill] sm:$0xff] %v9247_v6  ;;  %11920 = vst [vmem:[#allocation136_spill] sm:$0xff] %v9249_v14  ;;  %1517 = vperm.xlu1 %8311, %v9234_v19   ;;  %2297 = vperm.xlu0 %8313, %v9245_v17  }
 0x199   : > { %v9258_v11 = vpop.permute.xlu1 %1277  ;;  %v9260_v10 = vpop.permute.xlu0 %2057 }
 0x19a   : > { %11921 = vst [vmem:[#allocation137_spill] sm:$0xff] %v9258_v11  ;;  %11922 = vst [vmem:[#allocation138_spill] sm:$0xff] %v9260_v10  ;;  %1525 = vperm.xlu1 %8311, %v9245_v17   ;;  %2305 = vperm.xlu0 %8313, %v9256_v13  }
 0x19d   : > { %v9269_v7 = vpop.permute.xlu1 %1285  ;;  %v9271_v5 = vpop.permute.xlu0 %2065 }
 0x19e   : > { %11923 = vst [vmem:[#allocation139_spill] sm:$0xff] %v9269_v7  ;;  %11924 = vst [vmem:[#allocation140_spill] sm:$0xff] %v9271_v5  ;;  %1533 = vperm.xlu1 %8311, %v9256_v13   ;;  %2313 = vperm.xlu0 %8313, %v9267_v8  }
 0x1a1   : > { %v9280_v63 = vpop.permute.xlu1 %1293  ;;  %v9282_v62 = vpop.permute.xlu0 %2073 }
 0x1a2   : > { %11925 = vst [vmem:[#allocation141_spill] sm:$0xff] %v9280_v63  ;;  %11926 = vst [vmem:[#allocation142_spill] sm:$0xff] %v9282_v62  ;;  %1541 = vperm.xlu1 %8311, %v9267_v8   ;;  %2321 = vperm.xlu0 %8313, %v9278_v4  }
 0x1a5   : > { %v9291_v59 = vpop.permute.xlu1 %1301  ;;  %v9293_v57 = vpop.permute.xlu0 %2081 }
 0x1a6   : > { %11927 = vst [vmem:[#allocation143_spill] sm:$0xff] %v9291_v59  ;;  %11928 = vst [vmem:[#allocation144_spill] sm:$0xff] %v9293_v57  ;;  %1549 = vperm.xlu1 %8311, %v9278_v4   ;;  %2329 = vperm.xlu0 %8313, %v9289_v60   ;;  %v9311_v57 = vld [vmem:[%s11770_s1 + $0x270] sm:$0xff] }
 0x1a9   : > { %v9302_v62 = vpop.permute.xlu1 %1309  ;;  %v9304_v5 = vpop.permute.xlu0 %2089 }
 0x1aa   : > { %11929 = vst [vmem:[#allocation145_spill] sm:$0xff] %v9302_v62  ;;  %11930 = vst [vmem:[#allocation146_spill] sm:$0xff] %v9304_v5  ;;  %1557 = vperm.xlu1 %8311, %v9289_v60   ;;  %2337 = vperm.xlu0 %8313, %v9300_v56   ;;  %v9322_v5 = vld [vmem:[%s11770_s1 + $0x280] sm:$0xff] }
 0x1ad   : > { %v9313_v59 = vpop.permute.xlu1 %1317  ;;  %v9315_v54 = vpop.permute.xlu0 %2097 }
 0x1ae   : > { %11931 = vst [vmem:[#allocation147_spill] sm:$0xff] %v9313_v59  ;;  %11932 = vst [vmem:[#allocation148_spill] sm:$0xff] %v9315_v54  ;;  %1565 = vperm.xlu1 %8311, %v9300_v56   ;;  %2345 = vperm.xlu0 %8313, %v9311_v57   ;;  %v9333_v54 = vld [vmem:[%s11770_s1 + $0x290] sm:$0xff] }
 0x1b1   : > { %v9324_v62 = vpop.permute.xlu1 %1325  ;;  %v9326_v53 = vpop.permute.xlu0 %2105 }
 0x1b2   : > { %11933 = vst [vmem:[#allocation149_spill] sm:$0xff] %v9324_v62  ;;  %11934 = vst [vmem:[#allocation150_spill] sm:$0xff] %v9326_v53  ;;  %1573 = vperm.xlu1 %8311, %v9311_v57   ;;  %2353 = vperm.xlu0 %8313, %v9322_v5   ;;  %v9344_v53 = vld [vmem:[%s11770_s1 + $0x2a0] sm:$0xff] }
 0x1b5   : > { %v9335_v59 = vpop.permute.xlu1 %1333  ;;  %v9337_v51 = vpop.permute.xlu0 %2113 }
 0x1b6   : > { %11935 = vst [vmem:[#allocation151_spill] sm:$0xff] %v9335_v59  ;;  %11936 = vst [vmem:[#allocation152_spill] sm:$0xff] %v9337_v51  ;;  %1581 = vperm.xlu1 %8311, %v9322_v5   ;;  %2361 = vperm.xlu0 %8313, %v9333_v54   ;;  %v9355_v51 = vld [vmem:[%s11770_s1 + $0x2b0] sm:$0xff] }
 0x1b9   : > { %v9346_v62 = vpop.permute.xlu1 %1341  ;;  %v9348_v50 = vpop.permute.xlu0 %2121 }
 0x1ba   : > { %11937 = vst [vmem:[#allocation153_spill] sm:$0xff] %v9346_v62  ;;  %11938 = vst [vmem:[#allocation154_spill] sm:$0xff] %v9348_v50  ;;  %1589 = vperm.xlu1 %8311, %v9333_v54   ;;  %2369 = vperm.xlu0 %8313, %v9344_v53   ;;  %v9366_v50 = vld [vmem:[%s11770_s1 + $0x2c0] sm:$0xff] }
 0x1bd   : > { %v9357_v59 = vpop.permute.xlu1 %1349  ;;  %v9359_v63 = vpop.permute.xlu0 %2129 }
 0x1be   : > { %11939 = vst [vmem:[#allocation155_spill] sm:$0xff] %v9357_v59  ;;  %11940 = vst [vmem:[#allocation156_spill] sm:$0xff] %v9359_v63  ;;  %1597 = vperm.xlu1 %8311, %v9344_v53   ;;  %2377 = vperm.xlu0 %8313, %v9355_v51   ;;  %v9377_v63 = vld [vmem:[%s11770_s1 + $0x2d0] sm:$0xff] }
 0x1c1   : > { %v9368_v62 = vpop.permute.xlu1 %1357  ;;  %v9370_v10 = vpop.permute.xlu0 %2137 }
 0x1c2   : > { %11941 = vst [vmem:[#allocation157_spill] sm:$0xff] %v9368_v62  ;;  %11942 = vst [vmem:[#allocation158_spill] sm:$0xff] %v9370_v10  ;;  %1605 = vperm.xlu1 %8311, %v9355_v51   ;;  %2385 = vperm.xlu0 %8313, %v9366_v50   ;;  %v9388_v10 = vld [vmem:[%s11770_s1 + $0x2e0] sm:$0xff] }
 0x1c5   : > { %v9379_v59 = vpop.permute.xlu1 %1365  ;;  %v9381_v7 = vpop.permute.xlu0 %2145 }
 0x1c6   : > { %11943 = vst [vmem:[#allocation159_spill] sm:$0xff] %v9379_v59  ;;  %11944 = vst [vmem:[#allocation160_spill] sm:$0xff] %v9381_v7  ;;  %1613 = vperm.xlu1 %8311, %v9366_v50   ;;  %2393 = vperm.xlu0 %8313, %v9377_v63   ;;  %v9399_v7 = vld [vmem:[%s11770_s1 + $0x2f0] sm:$0xff] }
 0x1c9   : > { %v9390_v62 = vpop.permute.xlu1 %1373  ;;  %v9392_v14 = vpop.permute.xlu0 %2153 }
 0x1ca   : > { %11945 = vst [vmem:[#allocation161_spill] sm:$0xff] %v9390_v62  ;;  %11946 = vst [vmem:[#allocation162_spill] sm:$0xff] %v9392_v14  ;;  %1621 = vperm.xlu1 %8311, %v9377_v63   ;;  %2401 = vperm.xlu0 %8313, %v9388_v10   ;;  %v9410_v14 = vld [vmem:[%s11770_s1 + $0x300] sm:$0xff] }
 0x1cd   : > { %v9401_v59 = vpop.permute.xlu1 %1381  ;;  %v9403_v48 = vpop.permute.xlu0 %2161 }
 0x1ce   : > { %11947 = vst [vmem:[#allocation163_spill] sm:$0xff] %v9401_v59  ;;  %11948 = vst [vmem:[#allocation164_spill] sm:$0xff] %v9403_v48  ;;  %1629 = vperm.xlu1 %8311, %v9388_v10   ;;  %2409 = vperm.xlu0 %8313, %v9399_v7   ;;  %v9421_v48 = vld [vmem:[%s11770_s1 + $0x310] sm:$0xff] }
 0x1d1   : > { %v9412_v62 = vpop.permute.xlu1 %1389  ;;  %v9414_v47 = vpop.permute.xlu0 %2169 }
 0x1d2   : > { %11949 = vst [vmem:[#allocation165_spill] sm:$0xff] %v9412_v62  ;;  %11950 = vst [vmem:[#allocation166_spill] sm:$0xff] %v9414_v47  ;;  %1637 = vperm.xlu1 %8311, %v9399_v7   ;;  %2417 = vperm.xlu0 %8313, %v9410_v14   ;;  %v9432_v47 = vld [vmem:[%s11770_s1 + $0x320] sm:$0xff] }
 0x1d5   : > { %v9423_v59 = vpop.permute.xlu1 %1397  ;;  %v9425_v45 = vpop.permute.xlu0 %2177 }
 0x1d6   : > { %11951 = vst [vmem:[#allocation167_spill] sm:$0xff] %v9423_v59  ;;  %11952 = vst [vmem:[#allocation168_spill] sm:$0xff] %v9425_v45  ;;  %1645 = vperm.xlu1 %8311, %v9410_v14   ;;  %2425 = vperm.xlu0 %8313, %v9421_v48   ;;  %v9443_v45 = vld [vmem:[%s11770_s1 + $0x330] sm:$0xff] }
 0x1d9   : > { %v9434_v62 = vpop.permute.xlu1 %1405  ;;  %v9436_v44 = vpop.permute.xlu0 %2185 }
 0x1da   : > { %11953 = vst [vmem:[#allocation169_spill] sm:$0xff] %v9434_v62  ;;  %11954 = vst [vmem:[#allocation170_spill] sm:$0xff] %v9436_v44  ;;  %1653 = vperm.xlu1 %8311, %v9421_v48   ;;  %2433 = vperm.xlu0 %8313, %v9432_v47   ;;  %v9454_v44 = vld [vmem:[%s11770_s1 + $0x340] sm:$0xff] }
 0x1dd   : > { %v9445_v59 = vpop.permute.xlu1 %1413  ;;  %v9447_v11 = vpop.permute.xlu0 %2193 }
 0x1de   : > { %11955 = vst [vmem:[#allocation171_spill] sm:$0xff] %v9445_v59  ;;  %11956 = vst [vmem:[#allocation172_spill] sm:$0xff] %v9447_v11  ;;  %1661 = vperm.xlu1 %8311, %v9432_v47   ;;  %2441 = vperm.xlu0 %8313, %v9443_v45   ;;  %v9465_v11 = vld [vmem:[%s11770_s1 + $0x350] sm:$0xff] }
 0x1e1   : > { %v9456_v62 = vpop.permute.xlu1 %1421  ;;  %v9458_v35 = vpop.permute.xlu0 %2201 }
 0x1e2   : > { %11957 = vst [vmem:[#allocation173_spill] sm:$0xff] %v9456_v62  ;;  %11958 = vst [vmem:[#allocation174_spill] sm:$0xff] %v9458_v35  ;;  %1669 = vperm.xlu1 %8311, %v9443_v45   ;;  %2449 = vperm.xlu0 %8313, %v9454_v44   ;;  %v9476_v35 = vld [vmem:[%s11770_s1 + $0x360] sm:$0xff] }
 0x1e5   : > { %v9467_v59 = vpop.permute.xlu1 %1429  ;;  %v9469_v16 = vpop.permute.xlu0 %2209 }
 0x1e6   : > { %11959 = vst [vmem:[#allocation175_spill] sm:$0xff] %v9467_v59  ;;  %11960 = vst [vmem:[#allocation176_spill] sm:$0xff] %v9469_v16  ;;  %1677 = vperm.xlu1 %8311, %v9454_v44   ;;  %2457 = vperm.xlu0 %8313, %v9465_v11   ;;  %v9487_v16 = vld [vmem:[%s11770_s1 + $0x370] sm:$0xff] }
 0x1e9   : > { %v9478_v62 = vpop.permute.xlu1 %1437  ;;  %v9480_v42 = vpop.permute.xlu0 %2217 }
 0x1ea   : > { %11961 = vst [vmem:[#allocation177_spill] sm:$0xff] %v9478_v62  ;;  %11962 = vst [vmem:[#allocation178_spill] sm:$0xff] %v9480_v42  ;;  %1685 = vperm.xlu1 %8311, %v9465_v11   ;;  %2465 = vperm.xlu0 %8313, %v9476_v35   ;;  %v9498_v42 = vld [vmem:[%s11770_s1 + $0x380] sm:$0xff] }
 0x1ed   : > { %v9489_v59 = vpop.permute.xlu1 %1445  ;;  %v9491_v6 = vpop.permute.xlu0 %2225 }
 0x1ee   : > { %11963 = vst [vmem:[#allocation179_spill] sm:$0xff] %v9489_v59  ;;  %11964 = vst [vmem:[#allocation180_spill] sm:$0xff] %v9491_v6  ;;  %1693 = vperm.xlu1 %8311, %v9476_v35   ;;  %2473 = vperm.xlu0 %8313, %v9487_v16   ;;  %v9509_v6 = vld [vmem:[%s11770_s1 + $0x390] sm:$0xff] }
 0x1ef   : > { %11967 = vst [vmem:[#allocation183_spill] sm:$0xff] %v9509_v6 }
 0x1f1   : > { %v9500_v62 = vpop.permute.xlu1 %1453  ;;  %v9502_v41 = vpop.permute.xlu0 %2233 }
 0x1f2   : > { %11965 = vst [vmem:[#allocation181_spill] sm:$0xff] %v9500_v62  ;;  %11966 = vst [vmem:[#allocation182_spill] sm:$0xff] %v9502_v41  ;;  %1701 = vperm.xlu1 %8311, %v9487_v16   ;;  %2481 = vperm.xlu0 %8313, %v9498_v42   ;;  %v9520_v41 = vld [vmem:[%s11770_s1 + $0x3a0] sm:$0xff] }
 0x1f3   : > { %11970 = vst [vmem:[#allocation186_spill] sm:$0xff] %v9520_v41 }
 0x1f5   : > { %v9511_v59 = vpop.permute.xlu1 %1461  ;;  %v9513_v39 = vpop.permute.xlu0 %2241 }
 0x1f6   : > { %11968 = vst [vmem:[#allocation184_spill] sm:$0xff] %v9511_v59  ;;  %11969 = vst [vmem:[#allocation185_spill] sm:$0xff] %v9513_v39  ;;  %1709 = vperm.xlu1 %8311, %v9498_v42   ;;  %2489 = vperm.xlu0 %8313, %v9509_v6   ;;  %v9531_v39 = vld [vmem:[%s11770_s1 + $0x3b0] sm:$0xff] }
 0x1f7   : > { %11973 = vst [vmem:[#allocation189_spill] sm:$0xff] %v9531_v39 }
 0x1f9   : > { %v9522_v62 = vpop.permute.xlu1 %1469  ;;  %v9524_v38 = vpop.permute.xlu0 %2249 }
 0x1fa   : > { %11971 = vst [vmem:[#allocation187_spill] sm:$0xff] %v9522_v62  ;;  %11972 = vst [vmem:[#allocation188_spill] sm:$0xff] %v9524_v38  ;;  %1717 = vperm.xlu1 %8311, %v9509_v6   ;;  %2497 = vperm.xlu0 %8313, %v9520_v41   ;;  %v9542_v38 = vld [vmem:[%s11770_s1 + $0x3c0] sm:$0xff] }
 0x1fb   : > { %11976 = vst [vmem:[#allocation192_spill] sm:$0xff] %v9542_v38  ;;  %v8316_v6 = vld [vmem:[%s11770_s1] sm:$0xff] }
 0x1fd   : > { %v9533_v59 = vpop.permute.xlu1 %1477  ;;  %v9535_v0 = vpop.permute.xlu0 %2257 }
 0x1fe   : > { %11974 = vst [vmem:[#allocation190_spill] sm:$0xff] %v9533_v59  ;;  %11975 = vst [vmem:[#allocation191_spill] sm:$0xff] %v9535_v0  ;;  %1725 = vperm.xlu1 %8311, %v9520_v41   ;;  %2505 = vperm.xlu0 %8313, %v9531_v39   ;;  %v9553_v0 = vld [vmem:[%s11770_s1 + $0x3d0] sm:$0xff] }
 0x1ff   : > { %11979 = vst [vmem:[#allocation195_spill] sm:$0xff] %v9553_v0 }
 0x201   : > { %v9544_v62 = vpop.permute.xlu1 %1485  ;;  %v9546_v36 = vpop.permute.xlu0 %2265 }
 0x202   : > { %11977 = vst [vmem:[#allocation193_spill] sm:$0xff] %v9544_v62  ;;  %11978 = vst [vmem:[#allocation194_spill] sm:$0xff] %v9546_v36  ;;  %1733 = vperm.xlu1 %8311, %v9531_v39   ;;  %2513 = vperm.xlu0 %8313, %v9542_v38   ;;  %v9564_v36 = vld [vmem:[%s11770_s1 + $0x3e0] sm:$0xff] }
 0x203   : > { %11982 = vst [vmem:[#allocation198_spill] sm:$0xff] %v9564_v36 }
 0x205   : > { %v9555_v59 = vpop.permute.xlu1 %1493  ;;  %v9557_v41 = vpop.permute.xlu0 %2273 }
 0x206   : > { %11980 = vst [vmem:[#allocation196_spill] sm:$0xff] %v9555_v59  ;;  %11981 = vst [vmem:[#allocation197_spill] sm:$0xff] %v9557_v41  ;;  %1741 = vperm.xlu1 %8311, %v9542_v38   ;;  %2521 = vperm.xlu0 %8313, %v9553_v0   ;;  %v9575_v41 = vld [vmem:[%s11770_s1 + $0x3f0] sm:$0xff] }
 0x207   : > { %11985 = vst [vmem:[#allocation201_spill] sm:$0xff] %v9575_v41 }
 0x209   : > { %v9566_v62 = vpop.permute.xlu1 %1501  ;;  %v9568_v39 = vpop.permute.xlu0 %2281 }
 0x20a   : > { %11983 = vst [vmem:[#allocation199_spill] sm:$0xff] %v9566_v62  ;;  %11984 = vst [vmem:[#allocation200_spill] sm:$0xff] %v9568_v39  ;;  %1749 = vperm.xlu1 %8311, %v9553_v0   ;;  %2529 = vperm.xlu0 %8313, %v9564_v36   ;;  %v11990_v0 = vmov 0  }
 0x20d   : > { %v9577_v59 = vpop.permute.xlu1 %1509  ;;  %v9579_v38 = vpop.permute.xlu0 %2289 }
 0x20e   : > { %11986 = vst [vmem:[#allocation202_spill] sm:$0xff] %v9577_v59  ;;  %11987 = vst [vmem:[#allocation203_spill] sm:$0xff] %v9579_v38  ;;  %1757 = vperm.xlu1 %8311, %v9564_v36   ;;  %2537 = vperm.xlu0 %8313, %v9575_v41   ;;  %v11993_v36 = vmov 2  }
 0x211   : > { %v9583_v62 = vpop.permute.xlu1 %1517  ;;  %v9585_v39 = vpop.permute.xlu0 %2297 }
 0x212   : > { %11988 = vst [vmem:[#allocation204_spill] sm:$0xff] %v9583_v62  ;;  %11989 = vst [vmem:[#allocation205_spill] sm:$0xff] %v9585_v39  ;;  %1765 = vperm.xlu1 %8311, %v9575_v41   ;;  %8314 = vset.pattern.permute.xlu0 %v11990_v0  ;;  %v8317_v0 = vld [vmem:[%s11770_s1 + $0x10] sm:$0xff] }
 0x213   : > { %490 = vperm.xlu0 %8314, %v8316_v6  }
 0x215   : > { %v9592_v59 = vpop.permute.xlu1 %1525  ;;  %v9594_v38 = vpop.permute.xlu0 %2305 }
 0x216   : > { %11991 = vst [vmem:[#allocation206_spill] sm:$0xff] %v9592_v59  ;;  %11992 = vst [vmem:[#allocation207_spill] sm:$0xff] %v9594_v38  ;;  %8312 = vset.pattern.permute.xlu1 %v11993_v36  ;;  %v8318_v36 = vld [vmem:[%s11770_s1 + $0x18] sm:$0xff] }
 0x217   : > { %2033 = vperm.xlu1 %8312, %v8316_v6   ;;  %495 = vperm.xlu0 %8314, %v8891_v33  }
 0x219   : > { %v9598_v62 = vpop.permute.xlu1 %1533  ;;  %v9600_v39 = vpop.permute.xlu0 %2313 }
 0x21a   : > { %11994 = vst [vmem:[#allocation208_spill] sm:$0xff] %v9598_v62  ;;  %11995 = vst [vmem:[#allocation209_spill] sm:$0xff] %v9600_v39 }
 0x21b   : > { %2041 = vperm.xlu1 %8312, %v8317_v0   ;;  %510 = vperm.xlu0 %8314, %v8904_v24   ;;  %v8319_v0 = vld [vmem:[%s11770_s1 + $0x28] sm:$0xff] }
 0x21d   : > { %v9606_v41 = vpop.permute.xlu1 %1541  ;;  %v9608_v59 = vpop.permute.xlu0 %2321 }
 0x21e   : > { %11996 = vst [vmem:[#allocation210_spill] sm:$0xff] %v9606_v41  ;;  %11997 = vst [vmem:[#allocation211_spill] sm:$0xff] %v9608_v59 }
 0x21f   : > { %2045 = vperm.xlu1 %8312, %v8318_v36   ;;  %520 = vperm.xlu0 %8314, %v8915_v58   ;;  %v8320_v36 = vld [vmem:[%s11770_s1 + $0x38] sm:$0xff] }
 0x221   : > { %v9614_v6 = vpop.permute.xlu1 %1549  ;;  %v9616_v33 = vpop.permute.xlu0 %2329 }
 0x222   : > { %11998 = vst [vmem:[#allocation212_spill] sm:$0xff] %v9614_v6  ;;  %11999 = vst [vmem:[#allocation213_spill] sm:$0xff] %v9616_v33 }
 0x223   : > { %2053 = vperm.xlu1 %8312, %v8319_v0   ;;  %530 = vperm.xlu0 %8314, %v8926_v2   ;;  %v8321_v0 = vld [vmem:[%s11770_s1 + $0x48] sm:$0xff] }
 0x225   : > { %v9622_v24 = vpop.permute.xlu1 %1557  ;;  %v9624_v59 = vpop.permute.xlu0 %2337 }
 0x226   : > { %12000 = vst [vmem:[#allocation214_spill] sm:$0xff] %v9622_v24  ;;  %12001 = vst [vmem:[#allocation215_spill] sm:$0xff] %v9624_v59 }
 0x227   : > { %2061 = vperm.xlu1 %8312, %v8320_v36   ;;  %540 = vperm.xlu0 %8314, %v8937_v3   ;;  %v8322_v36 = vld [vmem:[%s11770_s1 + $0x58] sm:$0xff] }
 0x229   : > { %v9630_v58 = vpop.permute.xlu1 %1565  ;;  %v9632_v33 = vpop.permute.xlu0 %2345 }
 0x22a   : > { %12002 = vst [vmem:[#allocation216_spill] sm:$0xff] %v9630_v58  ;;  %12003 = vst [vmem:[#allocation217_spill] sm:$0xff] %v9632_v33 }
 0x22b   : > { %2069 = vperm.xlu1 %8312, %v8321_v0   ;;  %550 = vperm.xlu0 %8314, %v8948_v49   ;;  %v8323_v0 = vld [vmem:[%s11770_s1 + $0x68] sm:$0xff] }
 0x22d   : > { %v9638_v2 = vpop.permute.xlu1 %1573  ;;  %v9640_v59 = vpop.permute.xlu0 %2353 }
 0x22e   : > { %12004 = vst [vmem:[#allocation218_spill] sm:$0xff] %v9638_v2  ;;  %12005 = vst [vmem:[#allocation219_spill] sm:$0xff] %v9640_v59 }
 0x22f   : > { %2077 = vperm.xlu1 %8312, %v8322_v36   ;;  %560 = vperm.xlu0 %8314, %v8959_v15   ;;  %v8324_v36 = vld [vmem:[%s11770_s1 + $0x78] sm:$0xff] }
 0x231   : > { %v9646_v3 = vpop.permute.xlu1 %1581  ;;  %v9648_v33 = vpop.permute.xlu0 %2361 }
 0x232   : > { %12006 = vst [vmem:[#allocation220_spill] sm:$0xff] %v9646_v3  ;;  %12007 = vst [vmem:[#allocation221_spill] sm:$0xff] %v9648_v33 }
 0x233   : > { %2085 = vperm.xlu1 %8312, %v8323_v0   ;;  %570 = vperm.xlu0 %8314, %v8970_v40   ;;  %v8325_v0 = vld [vmem:[%s11770_s1 + $0x88] sm:$0xff] }
 0x235   : > { %v9654_v49 = vpop.permute.xlu1 %1589  ;;  %v9656_v59 = vpop.permute.xlu0 %2369 }
 0x236   : > { %12008 = vst [vmem:[#allocation222_spill] sm:$0xff] %v9654_v49  ;;  %12009 = vst [vmem:[#allocation223_spill] sm:$0xff] %v9656_v59 }
 0x237   : > { %2093 = vperm.xlu1 %8312, %v8324_v36   ;;  %580 = vperm.xlu0 %8314, %v8981_v30   ;;  %v8326_v36 = vld [vmem:[%s11770_s1 + $0x98] sm:$0xff] }
 0x239   : > { %v9662_v15 = vpop.permute.xlu1 %1597  ;;  %v9664_v33 = vpop.permute.xlu0 %2377 }
 0x23a   : > { %12010 = vst [vmem:[#allocation224_spill] sm:$0xff] %v9662_v15  ;;  %12011 = vst [vmem:[#allocation225_spill] sm:$0xff] %v9664_v33 }
 0x23b   : > { %2101 = vperm.xlu1 %8312, %v8325_v0   ;;  %590 = vperm.xlu0 %8314, %v8992_v27   ;;  %v8327_v0 = vld [vmem:[%s11770_s1 + $0xa8] sm:$0xff] }
 0x23d   : > { %v9670_v40 = vpop.permute.xlu1 %1605  ;;  %v9672_v59 = vpop.permute.xlu0 %2385 }
 0x23e   : > { %12012 = vst [vmem:[#allocation226_spill] sm:$0xff] %v9670_v40  ;;  %12013 = vst [vmem:[#allocation227_spill] sm:$0xff] %v9672_v59 }
 0x23f   : > { %2109 = vperm.xlu1 %8312, %v8326_v36   ;;  %600 = vperm.xlu0 %8314, %v9003_v21   ;;  %v8328_v36 = vld [vmem:[%s11770_s1 + $0xb8] sm:$0xff] }
 0x241   : > { %v9678_v30 = vpop.permute.xlu1 %1613  ;;  %v9680_v33 = vpop.permute.xlu0 %2393 }
 0x242   : > { %12014 = vst [vmem:[#allocation228_spill] sm:$0xff] %v9678_v30  ;;  %12015 = vst [vmem:[#allocation229_spill] sm:$0xff] %v9680_v33 }
 0x243   : > { %2117 = vperm.xlu1 %8312, %v8327_v0   ;;  %610 = vperm.xlu0 %8314, %v9014_v18   ;;  %v8329_v0 = vld [vmem:[%s11770_s1 + $0xc8] sm:$0xff] }
 0x245   : > { %v9686_v27 = vpop.permute.xlu1 %1621  ;;  %v9688_v59 = vpop.permute.xlu0 %2401 }
 0x246   : > { %12016 = vst [vmem:[#allocation230_spill] sm:$0xff] %v9686_v27  ;;  %12017 = vst [vmem:[#allocation231_spill] sm:$0xff] %v9688_v59 }
 0x247   : > { %2125 = vperm.xlu1 %8312, %v8328_v36   ;;  %620 = vperm.xlu0 %8314, %v9025_v12   ;;  %v8330_v36 = vld [vmem:[%s11770_s1 + $0xd8] sm:$0xff] }
 0x249   : > { %v9694_v21 = vpop.permute.xlu1 %1629  ;;  %v9696_v33 = vpop.permute.xlu0 %2409 }
 0x24a   : > { %12018 = vst [vmem:[#allocation232_spill] sm:$0xff] %v9694_v21  ;;  %12019 = vst [vmem:[#allocation233_spill] sm:$0xff] %v9696_v33 }
 0x24b   : > { %2133 = vperm.xlu1 %8312, %v8329_v0   ;;  %630 = vperm.xlu0 %8314, %v9036_v9   ;;  %v8331_v0 = vld [vmem:[%s11770_s1 + $0xe8] sm:$0xff] }
 0x24d   : > { %v9702_v18 = vpop.permute.xlu1 %1637  ;;  %v9704_v59 = vpop.permute.xlu0 %2417 }
 0x24e   : > { %12020 = vst [vmem:[#allocation234_spill] sm:$0xff] %v9702_v18  ;;  %12021 = vst [vmem:[#allocation235_spill] sm:$0xff] %v9704_v59 }
 0x24f   : > { %2141 = vperm.xlu1 %8312, %v8330_v36   ;;  %640 = vperm.xlu0 %8314, %v9047_v1   ;;  %v8332_v36 = vld [vmem:[%s11770_s1 + $0xf8] sm:$0xff] }
 0x251   : > { %v9710_v12 = vpop.permute.xlu1 %1645  ;;  %v9712_v33 = vpop.permute.xlu0 %2425 }
 0x252   : > { %12022 = vst [vmem:[#allocation236_spill] sm:$0xff] %v9710_v12  ;;  %12023 = vst [vmem:[#allocation237_spill] sm:$0xff] %v9712_v33 }
 0x253   : > { %2149 = vperm.xlu1 %8312, %v8331_v0   ;;  %650 = vperm.xlu0 %8314, %v9058_v61   ;;  %v8333_v0 = vld [vmem:[%s11770_s1 + $0x108] sm:$0xff] }
 0x255   : > { %v9718_v9 = vpop.permute.xlu1 %1653  ;;  %v9720_v59 = vpop.permute.xlu0 %2433 }
 0x256   : > { %12024 = vst [vmem:[#allocation238_spill] sm:$0xff] %v9718_v9  ;;  %12025 = vst [vmem:[#allocation239_spill] sm:$0xff] %v9720_v59 }
 0x257   : > { %2157 = vperm.xlu1 %8312, %v8332_v36   ;;  %660 = vperm.xlu0 %8314, %v9069_v55   ;;  %v8334_v36 = vld [vmem:[%s11770_s1 + $0x118] sm:$0xff] }
 0x259   : > { %v9726_v1 = vpop.permute.xlu1 %1661  ;;  %v9728_v33 = vpop.permute.xlu0 %2441 }
 0x25a   : > { %12026 = vst [vmem:[#allocation240_spill] sm:$0xff] %v9726_v1  ;;  %12027 = vst [vmem:[#allocation241_spill] sm:$0xff] %v9728_v33 }
 0x25b   : > { %2165 = vperm.xlu1 %8312, %v8333_v0   ;;  %670 = vperm.xlu0 %8314, %v9080_v52   ;;  %v8335_v0 = vld [vmem:[%s11770_s1 + $0x128] sm:$0xff] }
 0x25d   : > { %v9734_v61 = vpop.permute.xlu1 %1669  ;;  %v9736_v59 = vpop.permute.xlu0 %2449 }
 0x25e   : > { %12028 = vst [vmem:[#allocation242_spill] sm:$0xff] %v9734_v61  ;;  %12029 = vst [vmem:[#allocation243_spill] sm:$0xff] %v9736_v59 }
 0x25f   : > { %2173 = vperm.xlu1 %8312, %v8334_v36   ;;  %680 = vperm.xlu0 %8314, %v9091_v46   ;;  %v8336_v36 = vld [vmem:[%s11770_s1 + $0x138] sm:$0xff] }
 0x261   : > { %v9742_v55 = vpop.permute.xlu1 %1677  ;;  %v9744_v33 = vpop.permute.xlu0 %2457 }
 0x262   : > { %12030 = vst [vmem:[#allocation244_spill] sm:$0xff] %v9742_v55  ;;  %12031 = vst [vmem:[#allocation245_spill] sm:$0xff] %v9744_v33 }
 0x263   : > { %2181 = vperm.xlu1 %8312, %v8335_v0   ;;  %690 = vperm.xlu0 %8314, %v9102_v43   ;;  %v8337_v0 = vld [vmem:[%s11770_s1 + $0x148] sm:$0xff] }
 0x265   : > { %v9750_v52 = vpop.permute.xlu1 %1685  ;;  %v9752_v59 = vpop.permute.xlu0 %2465 }
 0x266   : > { %12032 = vst [vmem:[#allocation246_spill] sm:$0xff] %v9750_v52  ;;  %12033 = vst [vmem:[#allocation247_spill] sm:$0xff] %v9752_v59 }
 0x267   : > { %2189 = vperm.xlu1 %8312, %v8336_v36   ;;  %700 = vperm.xlu0 %8314, %v9113_v37   ;;  %v8338_v36 = vld [vmem:[%s11770_s1 + $0x158] sm:$0xff] }
 0x269   : > { %v9758_v46 = vpop.permute.xlu1 %1693  ;;  %v9760_v33 = vpop.permute.xlu0 %2473 }
 0x26a   : > { %12034 = vst [vmem:[#allocation248_spill] sm:$0xff] %v9758_v46  ;;  %12035 = vst [vmem:[#allocation249_spill] sm:$0xff] %v9760_v33 }
 0x26b   : > { %2197 = vperm.xlu1 %8312, %v8337_v0   ;;  %710 = vperm.xlu0 %8314, %v9124_v34   ;;  %v8339_v0 = vld [vmem:[%s11770_s1 + $0x168] sm:$0xff] }
 0x26d   : > { %v9766_v43 = vpop.permute.xlu1 %1701  ;;  %v9768_v59 = vpop.permute.xlu0 %2481 }
 0x26e   : > { %12036 = vst [vmem:[#allocation250_spill] sm:$0xff] %v9766_v43  ;;  %12037 = vst [vmem:[#allocation251_spill] sm:$0xff] %v9768_v59 }
 0x26f   : > { %2205 = vperm.xlu1 %8312, %v8338_v36   ;;  %720 = vperm.xlu0 %8314, %v9135_v32   ;;  %v8340_v36 = vld [vmem:[%s11770_s1 + $0x178] sm:$0xff] }
 0x271   : > { %v9774_v37 = vpop.permute.xlu1 %1709  ;;  %v9776_v33 = vpop.permute.xlu0 %2489 }
 0x272   : > { %12038 = vst [vmem:[#allocation252_spill] sm:$0xff] %v9774_v37  ;;  %12039 = vst [vmem:[#allocation253_spill] sm:$0xff] %v9776_v33 }
 0x273   : > { %2213 = vperm.xlu1 %8312, %v8339_v0   ;;  %730 = vperm.xlu0 %8314, %v9146_v31   ;;  %v8341_v0 = vld [vmem:[%s11770_s1 + $0x188] sm:$0xff] }
 0x275   : > { %v9782_v34 = vpop.permute.xlu1 %1717  ;;  %v9784_v59 = vpop.permute.xlu0 %2497 }
 0x276   : > { %12040 = vst [vmem:[#allocation254_spill] sm:$0xff] %v9782_v34  ;;  %12041 = vst [vmem:[#allocation255_spill] sm:$0xff] %v9784_v59 }
 0x277   : > { %2221 = vperm.xlu1 %8312, %v8340_v36   ;;  %740 = vperm.xlu0 %8314, %v9157_v29   ;;  %v8342_v36 = vld [vmem:[%s11770_s1 + $0x198] sm:$0xff] }
 0x279   : > { %v9790_v32 = vpop.permute.xlu1 %1725  ;;  %v9792_v33 = vpop.permute.xlu0 %2505 }
 0x27a   : > { %12042 = vst [vmem:[#allocation256_spill] sm:$0xff] %v9790_v32  ;;  %12043 = vst [vmem:[#allocation257_spill] sm:$0xff] %v9792_v33 }
 0x27b   : > { %2229 = vperm.xlu1 %8312, %v8341_v0   ;;  %750 = vperm.xlu0 %8314, %v9168_v28   ;;  %v8343_v0 = vld [vmem:[%s11770_s1 + $0x1a8] sm:$0xff] }
 0x27d   : > { %v9798_v31 = vpop.permute.xlu1 %1733  ;;  %v9800_v59 = vpop.permute.xlu0 %2513 }
 0x27e   : > { %12044 = vst [vmem:[#allocation258_spill] sm:$0xff] %v9798_v31  ;;  %12045 = vst [vmem:[#allocation259_spill] sm:$0xff] %v9800_v59 }
 0x27f   : > { %2237 = vperm.xlu1 %8312, %v8342_v36   ;;  %760 = vperm.xlu0 %8314, %v9179_v26   ;;  %v8344_v36 = vld [vmem:[%s11770_s1 + $0x1b8] sm:$0xff] }
 0x281   : > { %v9806_v29 = vpop.permute.xlu1 %1741  ;;  %v9808_v33 = vpop.permute.xlu0 %2521 }
 0x282   : > { %12046 = vst [vmem:[#allocation260_spill] sm:$0xff] %v9806_v29  ;;  %12047 = vst [vmem:[#allocation261_spill] sm:$0xff] %v9808_v33 }
 0x283   : > { %2245 = vperm.xlu1 %8312, %v8343_v0   ;;  %770 = vperm.xlu0 %8314, %v9190_v25   ;;  %v8345_v0 = vld [vmem:[%s11770_s1 + $0x1c8] sm:$0xff] }
 0x285   : > { %v9814_v28 = vpop.permute.xlu1 %1749  ;;  %v9816_v59 = vpop.permute.xlu0 %2529 }
 0x286   : > { %12048 = vst [vmem:[#allocation262_spill] sm:$0xff] %v9814_v28  ;;  %12049 = vst [vmem:[#allocation263_spill] sm:$0xff] %v9816_v59 }
 0x287   : > { %2253 = vperm.xlu1 %8312, %v8344_v36   ;;  %780 = vperm.xlu0 %8314, %v9201_v23   ;;  %v8346_v36 = vld [vmem:[%s11770_s1 + $0x1d8] sm:$0xff] }
 0x289   : > { %v9822_v26 = vpop.permute.xlu1 %1757  ;;  %v9824_v33 = vpop.permute.xlu0 %2537 }
 0x28a   : > { %12050 = vst [vmem:[#allocation264_spill] sm:$0xff] %v9822_v26  ;;  %12051 = vst [vmem:[#allocation265_spill] sm:$0xff] %v9824_v33 }
 0x28b   : > { %2261 = vperm.xlu1 %8312, %v8345_v0   ;;  %790 = vperm.xlu0 %8314, %v9212_v22   ;;  %v8347_v0 = vld [vmem:[%s11770_s1 + $0x1e8] sm:$0xff] }
 0x28d   : > { %v9830_v25 = vpop.permute.xlu1 %1765 }
 0x28e   : > { %12052 = vst [vmem:[#allocation266_spill] sm:$0xff] %v9830_v25  ;;  %v9832_v59 = vpop.permute.xlu0 %490 }
 0x28f   : > { %2269 = vperm.xlu1 %8312, %v8346_v36   ;;  %800 = vperm.xlu0 %8314, %v9223_v20   ;;  %v8348_v36 = vld [vmem:[%s11770_s1 + $0x1f8] sm:$0xff] }
 0x292   : > { %v9838_v23 = vpop.permute.xlu1 %2033  ;;  %v9840_v33 = vpop.permute.xlu0 %495 }
 0x293   : > { %2277 = vperm.xlu1 %8312, %v8347_v0   ;;  %810 = vperm.xlu0 %8314, %v9234_v19   ;;  %v8349_v0 = vld [vmem:[%s11770_s1 + $0x208] sm:$0xff] }
 0x296   : > { %v9846_v22 = vpop.permute.xlu1 %2041  ;;  %v9848_v25 = vpop.permute.xlu0 %510 }
 0x297   : > { %2285 = vperm.xlu1 %8312, %v8348_v36   ;;  %820 = vperm.xlu0 %8314, %v9245_v17   ;;  %v8350_v36 = vld [vmem:[%s11770_s1 + $0x218] sm:$0xff] }
 0x29a   : > { %v9854_v20 = vpop.permute.xlu1 %2045  ;;  %v9856_v26 = vpop.permute.xlu0 %520 }
 0x29b   : > { %2293 = vperm.xlu1 %8312, %v8349_v0   ;;  %830 = vperm.xlu0 %8314, %v9256_v13   ;;  %v8351_v0 = vld [vmem:[%s11770_s1 + $0x228] sm:$0xff] }
 0x29e   : > { %v9862_v19 = vpop.permute.xlu1 %2053  ;;  %v9864_v28 = vpop.permute.xlu0 %530 }
 0x29f   : > { %2301 = vperm.xlu1 %8312, %v8350_v36   ;;  %840 = vperm.xlu0 %8314, %v9267_v8   ;;  %v8352_v36 = vld [vmem:[%s11770_s1 + $0x238] sm:$0xff] }
 0x2a2   : > { %v9870_v17 = vpop.permute.xlu1 %2061  ;;  %v9872_v29 = vpop.permute.xlu0 %540 }
 0x2a3   : > { %2309 = vperm.xlu1 %8312, %v8351_v0   ;;  %850 = vperm.xlu0 %8314, %v9278_v4   ;;  %v8353_v0 = vld [vmem:[%s11770_s1 + $0x248] sm:$0xff] }
 0x2a6   : > { %v9878_v13 = vpop.permute.xlu1 %2069  ;;  %v9880_v31 = vpop.permute.xlu0 %550 }
 0x2a7   : > { %2317 = vperm.xlu1 %8312, %v8352_v36   ;;  %860 = vperm.xlu0 %8314, %v9289_v60   ;;  %v8354_v36 = vld [vmem:[%s11770_s1 + $0x258] sm:$0xff] }
 0x2aa   : > { %v9886_v8 = vpop.permute.xlu1 %2077  ;;  %v9888_v32 = vpop.permute.xlu0 %560 }
 0x2ab   : > { %2325 = vperm.xlu1 %8312, %v8353_v0   ;;  %870 = vperm.xlu0 %8314, %v9300_v56   ;;  %v8355_v0 = vld [vmem:[%s11770_s1 + $0x268] sm:$0xff] }
 0x2ae   : > { %v9894_v4 = vpop.permute.xlu1 %2085  ;;  %v9896_v34 = vpop.permute.xlu0 %570 }
 0x2af   : > { %2333 = vperm.xlu1 %8312, %v8354_v36   ;;  %880 = vperm.xlu0 %8314, %v9311_v57   ;;  %v8356_v36 = vld [vmem:[%s11770_s1 + $0x278] sm:$0xff] }
 0x2b2   : > { %v9902_v60 = vpop.permute.xlu1 %2093  ;;  %v9904_v37 = vpop.permute.xlu0 %580 }
 0x2b3   : > { %2341 = vperm.xlu1 %8312, %v8355_v0   ;;  %890 = vperm.xlu0 %8314, %v9322_v5   ;;  %v8357_v0 = vld [vmem:[%s11770_s1 + $0x288] sm:$0xff] }
 0x2b6   : > { %v9910_v56 = vpop.permute.xlu1 %2101  ;;  %v9912_v43 = vpop.permute.xlu0 %590 }
 0x2b7   : > { %2349 = vperm.xlu1 %8312, %v8356_v36   ;;  %900 = vperm.xlu0 %8314, %v9333_v54   ;;  %v8358_v36 = vld [vmem:[%s11770_s1 + $0x298] sm:$0xff] }
 0x2ba   : > { %v9918_v57 = vpop.permute.xlu1 %2109  ;;  %v9920_v46 = vpop.permute.xlu0 %600 }
 0x2bb   : > { %2357 = vperm.xlu1 %8312, %v8357_v0   ;;  %910 = vperm.xlu0 %8314, %v9344_v53   ;;  %v8359_v0 = vld [vmem:[%s11770_s1 + $0x2a8] sm:$0xff] }
 0x2be   : > { %v9926_v5 = vpop.permute.xlu1 %2117  ;;  %v9928_v52 = vpop.permute.xlu0 %610 }
 0x2bf   : > { %2365 = vperm.xlu1 %8312, %v8358_v36   ;;  %920 = vperm.xlu0 %8314, %v9355_v51   ;;  %v8360_v36 = vld [vmem:[%s11770_s1 + $0x2b8] sm:$0xff] }
 0x2c2   : > { %v9934_v54 = vpop.permute.xlu1 %2125  ;;  %v9936_v55 = vpop.permute.xlu0 %620 }
 0x2c3   : > { %2373 = vperm.xlu1 %8312, %v8359_v0   ;;  %930 = vperm.xlu0 %8314, %v9366_v50   ;;  %v8361_v0 = vld [vmem:[%s11770_s1 + $0x2c8] sm:$0xff] }
 0x2c6   : > { %v9942_v53 = vpop.permute.xlu1 %2133  ;;  %v9944_v61 = vpop.permute.xlu0 %630 }
 0x2c7   : > { %2381 = vperm.xlu1 %8312, %v8360_v36   ;;  %940 = vperm.xlu0 %8314, %v9377_v63   ;;  %v8362_v36 = vld [vmem:[%s11770_s1 + $0x2d8] sm:$0xff] }
 0x2ca   : > { %v9950_v51 = vpop.permute.xlu1 %2141  ;;  %v9952_v1 = vpop.permute.xlu0 %640 }
 0x2cb   : > { %2389 = vperm.xlu1 %8312, %v8361_v0   ;;  %950 = vperm.xlu0 %8314, %v9388_v10   ;;  %v8363_v0 = vld [vmem:[%s11770_s1 + $0x2e8] sm:$0xff] }
 0x2ce   : > { %v9958_v50 = vpop.permute.xlu1 %2149  ;;  %v9960_v9 = vpop.permute.xlu0 %650 }
 0x2cf   : > { %2397 = vperm.xlu1 %8312, %v8362_v36   ;;  %960 = vperm.xlu0 %8314, %v9399_v7   ;;  %v8364_v36 = vld [vmem:[%s11770_s1 + $0x2f8] sm:$0xff] }
 0x2d2   : > { %v9966_v63 = vpop.permute.xlu1 %2157  ;;  %v9968_v12 = vpop.permute.xlu0 %660 }
 0x2d3   : > { %2405 = vperm.xlu1 %8312, %v8363_v0   ;;  %970 = vperm.xlu0 %8314, %v9410_v14   ;;  %v8365_v0 = vld [vmem:[%s11770_s1 + $0x308] sm:$0xff] }
 0x2d6   : > { %v9974_v10 = vpop.permute.xlu1 %2165  ;;  %v9976_v18 = vpop.permute.xlu0 %670 }
 0x2d7   : > { %2413 = vperm.xlu1 %8312, %v8364_v36   ;;  %980 = vperm.xlu0 %8314, %v9421_v48   ;;  %v8366_v36 = vld [vmem:[%s11770_s1 + $0x318] sm:$0xff] }
 0x2da   : > { %v9982_v7 = vpop.permute.xlu1 %2173  ;;  %v9984_v21 = vpop.permute.xlu0 %680 }
 0x2db   : > { %12053 = vst [vmem:[#allocation267_spill] sm:$0xff] %v9984_v21  ;;  %2421 = vperm.xlu1 %8312, %v8365_v0   ;;  %990 = vperm.xlu0 %8314, %v9432_v47   ;;  %v8367_v0 = vld [vmem:[%s11770_s1 + $0x328] sm:$0xff] }
 0x2de   : > { %v9990_v14 = vpop.permute.xlu1 %2181  ;;  %v9992_v27 = vpop.permute.xlu0 %690 }
 0x2df   : > { %12054 = vst [vmem:[#allocation268_spill] sm:$0xff] %v9992_v27  ;;  %2429 = vperm.xlu1 %8312, %v8366_v36   ;;  %1000 = vperm.xlu0 %8314, %v9443_v45   ;;  %v8368_v36 = vld [vmem:[%s11770_s1 + $0x338] sm:$0xff]  ;;  %v12158_v27 = vld [vmem:[#allocation134_spill] sm:$0xff] }
 0x2e2   : > { %v9998_v48 = vpop.permute.xlu1 %2189  ;;  %v10000_v30 = vpop.permute.xlu0 %700 }
 0x2e3   : > { %12055 = vst [vmem:[#allocation269_spill] sm:$0xff] %v9998_v48  ;;  %12056 = vst [vmem:[#allocation270_spill] sm:$0xff] %v10000_v30  ;;  %2437 = vperm.xlu1 %8312, %v8367_v0   ;;  %1010 = vperm.xlu0 %8314, %v9454_v44   ;;  %v8369_v0 = vld [vmem:[%s11770_s1 + $0x348] sm:$0xff] }
 0x2e4   : > { %v12157_v30 = vld [vmem:[#allocation10_spill] sm:$0xff] }
 0x2e6   : > { %v10006_v47 = vpop.permute.xlu1 %2197  ;;  %v10008_v40 = vpop.permute.xlu0 %710 }
 0x2e7   : > { %12057 = vst [vmem:[#allocation271_spill] sm:$0xff] %v10006_v47  ;;  %12058 = vst [vmem:[#allocation272_spill] sm:$0xff] %v10008_v40  ;;  %2445 = vperm.xlu1 %8312, %v8368_v36   ;;  %1020 = vperm.xlu0 %8314, %v9465_v11   ;;  %v8370_v36 = vld [vmem:[%s11770_s1 + $0x358] sm:$0xff]  ;;  %v12156_v40 = vld [vmem:[#allocation135_spill] sm:$0xff] }
 0x2ea   : > { %v10014_v45 = vpop.permute.xlu1 %2205  ;;  %v10016_v15 = vpop.permute.xlu0 %720 }
 0x2eb   : > { %12059 = vst [vmem:[#allocation273_spill] sm:$0xff] %v10014_v45  ;;  %12060 = vst [vmem:[#allocation274_spill] sm:$0xff] %v10016_v15  ;;  %2453 = vperm.xlu1 %8312, %v8369_v0   ;;  %1030 = vperm.xlu0 %8314, %v9476_v35   ;;  %v8371_v0 = vld [vmem:[%s11770_s1 + $0x368] sm:$0xff] }
 0x2ee   : > { %v10022_v44 = vpop.permute.xlu1 %2213  ;;  %v10024_v49 = vpop.permute.xlu0 %730 }
 0x2ef   : > { %12061 = vst [vmem:[#allocation275_spill] sm:$0xff] %v10022_v44  ;;  %12062 = vst [vmem:[#allocation276_spill] sm:$0xff] %v10024_v49  ;;  %2461 = vperm.xlu1 %8312, %v8370_v36   ;;  %1040 = vperm.xlu0 %8314, %v9487_v16   ;;  %v8372_v36 = vld [vmem:[%s11770_s1 + $0x378] sm:$0xff]  ;;  %v12067_v16 = vld [vmem:[#allocation183_spill] sm:$0xff] }
 0x2f0   : > { %v12151_v49 = vld [vmem:[#allocation133_spill] sm:$0xff] }
 0x2f2   : > { %v10030_v11 = vpop.permute.xlu1 %2221  ;;  %v10032_v3 = vpop.permute.xlu0 %740 }
 0x2f3   : > { %12063 = vst [vmem:[#allocation277_spill] sm:$0xff] %v10030_v11  ;;  %12064 = vst [vmem:[#allocation278_spill] sm:$0xff] %v10032_v3  ;;  %2469 = vperm.xlu1 %8312, %v8371_v0   ;;  %1050 = vperm.xlu0 %8314, %v9498_v42   ;;  %v8373_v0 = vld [vmem:[%s11770_s1 + $0x388] sm:$0xff] }
 0x2f4   : > { %v12070_v42 = vld [vmem:[#allocation186_spill] sm:$0xff] }
 0x2f6   : > { %v10038_v35 = vpop.permute.xlu1 %2229  ;;  %v10040_v2 = vpop.permute.xlu0 %750 }
 0x2f7   : > { %12065 = vst [vmem:[#allocation279_spill] sm:$0xff] %v10038_v35  ;;  %12066 = vst [vmem:[#allocation280_spill] sm:$0xff] %v10040_v2  ;;  %2477 = vperm.xlu1 %8312, %v8372_v36   ;;  %1060 = vperm.xlu0 %8314, %v12067_v16   ;;  %v8374_v36 = vld [vmem:[%s11770_s1 + $0x398] sm:$0xff] }
 0x2f8   : > { %v12073_v16 = vld [vmem:[#allocation189_spill] sm:$0xff] }
 0x2fa   : > { %v10046_v58 = vpop.permute.xlu1 %2237  ;;  %v10048_v24 = vpop.permute.xlu0 %760 }
 0x2fb   : > { %12068 = vst [vmem:[#allocation183_spill] sm:$0xff] %v10046_v58  ;;  %12069 = vst [vmem:[#allocation281_spill] sm:$0xff] %v10048_v24  ;;  %2485 = vperm.xlu1 %8312, %v8373_v0   ;;  %1070 = vperm.xlu0 %8314, %v12070_v42   ;;  %v8375_v0 = vld [vmem:[%s11770_s1 + $0x3a8] sm:$0xff]  ;;  %v12076_v42 = vld [vmem:[#allocation192_spill] sm:$0xff] }
 0x2fc   : > { %v2862_v58 = vld [vmem:[%s11771_s2 + $0x1d0] sm:$0xff] }
 0x2fe   : > { %v10054_v6 = vpop.permute.xlu1 %2245  ;;  %v10056_v39 = vpop.permute.xlu0 %770 }
 0x2ff   : > { %12071 = vst [vmem:[#allocation186_spill] sm:$0xff] %v10054_v6  ;;  %12072 = vst [vmem:[#allocation282_spill] sm:$0xff] %v10056_v39  ;;  %2493 = vperm.xlu1 %8312, %v8374_v36   ;;  %1080 = vperm.xlu0 %8314, %v12073_v16   ;;  %v8376_v36 = vld [vmem:[%s11770_s1 + $0x3b8] sm:$0xff]  ;;  %v12079_v16 = vld [vmem:[#allocation195_spill] sm:$0xff] }
 0x302   : > { %v10062_v41 = vpop.permute.xlu1 %2253  ;;  %v10064_v38 = vpop.permute.xlu0 %780 }
 0x303   : > { %12074 = vst [vmem:[#allocation189_spill] sm:$0xff] %v10062_v41  ;;  %12075 = vst [vmem:[#allocation283_spill] sm:$0xff] %v10064_v38  ;;  %2501 = vperm.xlu1 %8312, %v8375_v0   ;;  %1090 = vperm.xlu0 %8314, %v12076_v42   ;;  %v8377_v0 = vld [vmem:[%s11770_s1 + $0x3c8] sm:$0xff] }
 0x304   : > { %v12082_v42 = vld [vmem:[#allocation198_spill] sm:$0xff] }
 0x306   : > { %v10070_v62 = vpop.permute.xlu1 %2261  ;;  %v10072_v39 = vpop.permute.xlu0 %790 }
 0x307   : > { %12077 = vst [vmem:[#allocation192_spill] sm:$0xff] %v10070_v62  ;;  %12078 = vst [vmem:[#allocation284_spill] sm:$0xff] %v10072_v39  ;;  %2509 = vperm.xlu1 %8312, %v8376_v36   ;;  %1100 = vperm.xlu0 %8314, %v12079_v16   ;;  %v8378_v36 = vld [vmem:[%s11770_s1 + $0x3d8] sm:$0xff] }
 0x308   : > { %v12085_v16 = vld [vmem:[#allocation201_spill] sm:$0xff] }
 0x30a   : > { %v10078_v41 = vpop.permute.xlu1 %2269  ;;  %v10080_v38 = vpop.permute.xlu0 %800 }
 0x30b   : > { %12080 = vst [vmem:[#allocation195_spill] sm:$0xff] %v10078_v41  ;;  %12081 = vst [vmem:[#allocation285_spill] sm:$0xff] %v10080_v38  ;;  %2517 = vperm.xlu1 %8312, %v8377_v0   ;;  %1110 = vperm.xlu0 %8314, %v12082_v42   ;;  %v2804_v38 = vld [vmem:[%s11771_s2] sm:$0xff]  ;;  %v8379_v42 = vld [vmem:[%s11770_s1 + $0x3e8] sm:$0xff] }
 0x30e   : > { %v10086_v62 = vpop.permute.xlu1 %2277  ;;  %v10088_v39 = vpop.permute.xlu0 %810 }
 0x30f   : > { %12083 = vst [vmem:[#allocation198_spill] sm:$0xff] %v10086_v62  ;;  %12084 = vst [vmem:[#allocation286_spill] sm:$0xff] %v10088_v39  ;;  %2525 = vperm.xlu1 %8312, %v8378_v36   ;;  %1120 = vperm.xlu0 %8314, %v12085_v16   ;;  %v2807_v36 = vld [vmem:[%s11771_s2 + $0x18] sm:$0xff] }
 0x312   : > { %v10097_v41 = vpop.permute.xlu1 %2285  ;;  %v10099_v0 = vpop.permute.xlu0 %820 }
 0x313   : > { %12086 = vst [vmem:[#allocation201_spill] sm:$0xff] %v10097_v41  ;;  %12087 = vst [vmem:[#allocation287_spill] sm:$0xff] %v10099_v0  ;;  %2533 = vperm.xlu1 %8312, %v8379_v42   ;;  %2934 = vperm.xlu0 %8314, %v2804_v38   ;;  %v8380_v41 = vld [vmem:[%s11770_s1 + $0x3f8] sm:$0xff]  ;;  %v2809_v0 = vld [vmem:[%s11771_s2 + $0x28] sm:$0xff] }
 0x314   : > { %v2805_v38 = vld [vmem:[%s11771_s2 + $0x8] sm:$0xff] }
 0x316   : > { %v10107_v39 = vpop.permute.xlu1 %2293  ;;  %v10109_v16 = vpop.permute.xlu0 %830 }
 0x317   : > { %12088 = vst [vmem:[#allocation288_spill] sm:$0xff] %v10107_v39  ;;  %12089 = vst [vmem:[#allocation289_spill] sm:$0xff] %v10109_v16  ;;  %2541 = vperm.xlu1 %8312, %v8380_v41   ;;  %2949 = vperm.xlu0 %8314, %v2807_v36   ;;  %v12092_v39 = vmov 0   ;;  %v2811_v41 = vld [vmem:[%s11771_s2 + $0x38] sm:$0xff]  ;;  %v2806_v36 = vld [vmem:[%s11771_s2 + $0x10] sm:$0xff] }
 0x31a   : > { %v10120_v42 = vpop.permute.xlu1 %2301  ;;  %v10122_v62 = vpop.permute.xlu0 %840 }
 0x31b   : > { %12090 = vst [vmem:[#allocation290_spill] sm:$0xff] %v10120_v42  ;;  %12091 = vst [vmem:[#allocation291_spill] sm:$0xff] %v10122_v62  ;;  %8315 = vset.pattern.permute.xlu1 %v12092_v39  ;;  %2959 = vperm.xlu0 %8314, %v2809_v0   ;;  %v2813_v39 = vld [vmem:[%s11771_s2 + $0x48] sm:$0xff]  ;;  %v2808_v0 = vld [vmem:[%s11771_s2 + $0x20] sm:$0xff]  ;;  %v1128_v42 = vlaneseq }
 0x31c   : > { %2939 = vperm.xlu1 %8315, %v2805_v38  }
 0x31d   : > { %v1129_v6 = vshrl.u32 %v1128_v42, 7  ;;  %v2865_v42 = vld [vmem:[%s11771_s2 + $0x1e8] sm:$0xff] }
 0x31e   : > { %v10131_v16 = vpop.permute.xlu1 %2309  ;;  %v10133_v24 = vpop.permute.xlu0 %850 }
 0x31f   : > { %12093 = vst [vmem:[#allocation292_spill] sm:$0xff] %v10131_v16  ;;  %12094 = vst [vmem:[#allocation293_spill] sm:$0xff] %v10133_v24  ;;  %2969 = vperm.xlu0 %8314, %v2811_v41   ;;  %v2815_v24 = vld [vmem:[%s11771_s2 + $0x58] sm:$0xff]  ;;  %v2810_v41 = vld [vmem:[%s11771_s2 + $0x30] sm:$0xff]  ;;  %v1130_v2 = vsub.s32 0, %v1129_v6 }
 0x320   : > { %2944 = vperm.xlu1 %8315, %v2806_v36  }
 0x322   : > { %v10141_v38 = vpop.permute.xlu1 %2317  ;;  %v10143_v62 = vpop.permute.xlu0 %860 }
 0x323   : > { %12095 = vst [vmem:[#allocation294_spill] sm:$0xff] %v10141_v38  ;;  %12096 = vst [vmem:[#allocation295_spill] sm:$0xff] %v10143_v62  ;;  %2979 = vperm.xlu0 %8314, %v2813_v39   ;;  %v2817_v62 = vld [vmem:[%s11771_s2 + $0x68] sm:$0xff]  ;;  %v2812_v39 = vld [vmem:[%s11771_s2 + $0x40] sm:$0xff] }
 0x324   : > { %2954 = vperm.xlu1 %8315, %v2808_v0  }
 0x326   : > { %v10151_v36 = vpop.permute.xlu1 %2325  ;;  %v10153_v16 = vpop.permute.xlu0 %870 }
 0x327   : > { %12097 = vst [vmem:[#allocation296_spill] sm:$0xff] %v10151_v36  ;;  %12098 = vst [vmem:[#allocation297_spill] sm:$0xff] %v10153_v16  ;;  %2989 = vperm.xlu0 %8314, %v2815_v24   ;;  %v2819_v16 = vld [vmem:[%s11771_s2 + $0x78] sm:$0xff]  ;;  %v2814_v24 = vld [vmem:[%s11771_s2 + $0x50] sm:$0xff] }
 0x328   : > { %2964 = vperm.xlu1 %8315, %v2810_v41  }
 0x32a   : > { %v10161_v0 = vpop.permute.xlu1 %2333  ;;  %v10163_v38 = vpop.permute.xlu0 %880 }
 0x32b   : > { %12099 = vst [vmem:[#allocation298_spill] sm:$0xff] %v10161_v0  ;;  %12100 = vst [vmem:[#allocation299_spill] sm:$0xff] %v10163_v38  ;;  %2999 = vperm.xlu0 %8314, %v2817_v62   ;;  %v2821_v38 = vld [vmem:[%s11771_s2 + $0x88] sm:$0xff]  ;;  %v2816_v62 = vld [vmem:[%s11771_s2 + $0x60] sm:$0xff] }
 0x32c   : > { %2974 = vperm.xlu1 %8315, %v2812_v39  }
 0x32e   : > { %v10171_v41 = vpop.permute.xlu1 %2341  ;;  %v10173_v36 = vpop.permute.xlu0 %890 }
 0x32f   : > { %12101 = vst [vmem:[#allocation300_spill] sm:$0xff] %v10171_v41  ;;  %12102 = vst [vmem:[#allocation301_spill] sm:$0xff] %v10173_v36  ;;  %3009 = vperm.xlu0 %8314, %v2819_v16   ;;  %v2823_v36 = vld [vmem:[%s11771_s2 + $0x98] sm:$0xff]  ;;  %v2818_v16 = vld [vmem:[%s11771_s2 + $0x70] sm:$0xff] }
 0x330   : > { %2984 = vperm.xlu1 %8315, %v2814_v24  }
 0x332   : > { %v10181_v39 = vpop.permute.xlu1 %2349  ;;  %v10183_v0 = vpop.permute.xlu0 %900 }
 0x333   : > { %12103 = vst [vmem:[#allocation302_spill] sm:$0xff] %v10181_v39  ;;  %12104 = vst [vmem:[#allocation303_spill] sm:$0xff] %v10183_v0  ;;  %3019 = vperm.xlu0 %8314, %v2821_v38   ;;  %v2825_v0 = vld [vmem:[%s11771_s2 + $0xa8] sm:$0xff]  ;;  %v2820_v38 = vld [vmem:[%s11771_s2 + $0x80] sm:$0xff] }
 0x334   : > { %2994 = vperm.xlu1 %8315, %v2816_v62  }
 0x336   : > { %v10191_v24 = vpop.permute.xlu1 %2357  ;;  %v10193_v41 = vpop.permute.xlu0 %910 }
 0x337   : > { %12105 = vst [vmem:[#allocation304_spill] sm:$0xff] %v10191_v24  ;;  %12106 = vst [vmem:[#allocation305_spill] sm:$0xff] %v10193_v41  ;;  %3029 = vperm.xlu0 %8314, %v2823_v36   ;;  %v2827_v41 = vld [vmem:[%s11771_s2 + $0xb8] sm:$0xff]  ;;  %v2822_v36 = vld [vmem:[%s11771_s2 + $0x90] sm:$0xff] }
 0x338   : > { %3004 = vperm.xlu1 %8315, %v2818_v16  }
 0x33a   : > { %v10201_v62 = vpop.permute.xlu1 %2365  ;;  %v10203_v39 = vpop.permute.xlu0 %920 }
 0x33b   : > { %12107 = vst [vmem:[#allocation306_spill] sm:$0xff] %v10201_v62  ;;  %12108 = vst [vmem:[#allocation307_spill] sm:$0xff] %v10203_v39  ;;  %3039 = vperm.xlu0 %8314, %v2825_v0   ;;  %v2829_v39 = vld [vmem:[%s11771_s2 + $0xc8] sm:$0xff]  ;;  %v2824_v0 = vld [vmem:[%s11771_s2 + $0xa0] sm:$0xff] }
 0x33c   : > { %3014 = vperm.xlu1 %8315, %v2820_v38  }
 0x33e   : > { %v10211_v16 = vpop.permute.xlu1 %2373  ;;  %v10213_v24 = vpop.permute.xlu0 %930 }
 0x33f   : > { %12109 = vst [vmem:[#allocation308_spill] sm:$0xff] %v10211_v16  ;;  %12110 = vst [vmem:[#allocation309_spill] sm:$0xff] %v10213_v24  ;;  %3049 = vperm.xlu0 %8314, %v2827_v41   ;;  %v2831_v24 = vld [vmem:[%s11771_s2 + $0xd8] sm:$0xff]  ;;  %v2826_v41 = vld [vmem:[%s11771_s2 + $0xb0] sm:$0xff] }
 0x340   : > { %3024 = vperm.xlu1 %8315, %v2822_v36  }
 0x342   : > { %v10221_v38 = vpop.permute.xlu1 %2381  ;;  %v10223_v62 = vpop.permute.xlu0 %940 }
 0x343   : > { %12111 = vst [vmem:[#allocation310_spill] sm:$0xff] %v10221_v38  ;;  %12112 = vst [vmem:[#allocation311_spill] sm:$0xff] %v10223_v62  ;;  %3059 = vperm.xlu0 %8314, %v2829_v39   ;;  %v2833_v62 = vld [vmem:[%s11771_s2 + $0xe8] sm:$0xff]  ;;  %v2828_v39 = vld [vmem:[%s11771_s2 + $0xc0] sm:$0xff] }
 0x344   : > { %3034 = vperm.xlu1 %8315, %v2824_v0  }
 0x346   : > { %v10231_v36 = vpop.permute.xlu1 %2389  ;;  %v10233_v16 = vpop.permute.xlu0 %950 }
 0x347   : > { %12113 = vst [vmem:[#allocation312_spill] sm:$0xff] %v10231_v36  ;;  %12114 = vst [vmem:[#allocation313_spill] sm:$0xff] %v10233_v16  ;;  %3069 = vperm.xlu0 %8314, %v2831_v24   ;;  %v2835_v16 = vld [vmem:[%s11771_s2 + $0xf8] sm:$0xff]  ;;  %v2830_v24 = vld [vmem:[%s11771_s2 + $0xd0] sm:$0xff] }
 0x348   : > { %3044 = vperm.xlu1 %8315, %v2826_v41  }
 0x34a   : > { %v10241_v0 = vpop.permute.xlu1 %2397  ;;  %v10243_v38 = vpop.permute.xlu0 %960 }
 0x34b   : > { %12115 = vst [vmem:[#allocation314_spill] sm:$0xff] %v10241_v0  ;;  %12116 = vst [vmem:[#allocation315_spill] sm:$0xff] %v10243_v38  ;;  %3079 = vperm.xlu0 %8314, %v2833_v62   ;;  %v2837_v38 = vld [vmem:[%s11771_s2 + $0x108] sm:$0xff]  ;;  %v2832_v62 = vld [vmem:[%s11771_s2 + $0xe0] sm:$0xff] }
 0x34c   : > { %3054 = vperm.xlu1 %8315, %v2828_v39  }
 0x34e   : > { %v10251_v41 = vpop.permute.xlu1 %2405  ;;  %v10253_v36 = vpop.permute.xlu0 %970 }
 0x34f   : > { %12117 = vst [vmem:[#allocation316_spill] sm:$0xff] %v10251_v41  ;;  %12118 = vst [vmem:[#allocation317_spill] sm:$0xff] %v10253_v36  ;;  %3089 = vperm.xlu0 %8314, %v2835_v16   ;;  %v2839_v36 = vld [vmem:[%s11771_s2 + $0x118] sm:$0xff]  ;;  %v2834_v16 = vld [vmem:[%s11771_s2 + $0xf0] sm:$0xff] }
 0x350   : > { %3064 = vperm.xlu1 %8315, %v2830_v24  }
 0x352   : > { %v10261_v39 = vpop.permute.xlu1 %2413  ;;  %v10263_v0 = vpop.permute.xlu0 %980 }
 0x353   : > { %12119 = vst [vmem:[#allocation318_spill] sm:$0xff] %v10261_v39  ;;  %12120 = vst [vmem:[#allocation319_spill] sm:$0xff] %v10263_v0  ;;  %3099 = vperm.xlu0 %8314, %v2837_v38   ;;  %v2841_v0 = vld [vmem:[%s11771_s2 + $0x128] sm:$0xff]  ;;  %v2836_v38 = vld [vmem:[%s11771_s2 + $0x100] sm:$0xff] }
 0x354   : > { %3074 = vperm.xlu1 %8315, %v2832_v62  }
 0x356   : > { %v10271_v24 = vpop.permute.xlu1 %2421  ;;  %v10273_v41 = vpop.permute.xlu0 %990 }
 0x357   : > { %12121 = vst [vmem:[#allocation320_spill] sm:$0xff] %v10271_v24  ;;  %12122 = vst [vmem:[#allocation321_spill] sm:$0xff] %v10273_v41  ;;  %3109 = vperm.xlu0 %8314, %v2839_v36   ;;  %v2843_v41 = vld [vmem:[%s11771_s2 + $0x138] sm:$0xff]  ;;  %v2838_v36 = vld [vmem:[%s11771_s2 + $0x110] sm:$0xff] }
 0x358   : > { %3084 = vperm.xlu1 %8315, %v2834_v16  }
 0x35a   : > { %v10281_v62 = vpop.permute.xlu1 %2429  ;;  %v10283_v39 = vpop.permute.xlu0 %1000 }
 0x35b   : > { %12123 = vst [vmem:[#allocation322_spill] sm:$0xff] %v10281_v62  ;;  %12124 = vst [vmem:[#allocation323_spill] sm:$0xff] %v10283_v39  ;;  %3119 = vperm.xlu0 %8314, %v2841_v0   ;;  %v2845_v39 = vld [vmem:[%s11771_s2 + $0x148] sm:$0xff]  ;;  %v2840_v0 = vld [vmem:[%s11771_s2 + $0x120] sm:$0xff] }
 0x35c   : > { %3094 = vperm.xlu1 %8315, %v2836_v38  }
 0x35e   : > { %v10291_v16 = vpop.permute.xlu1 %2437  ;;  %v10293_v24 = vpop.permute.xlu0 %1010 }
 0x35f   : > { %12125 = vst [vmem:[#allocation324_spill] sm:$0xff] %v10291_v16  ;;  %12126 = vst [vmem:[#allocation325_spill] sm:$0xff] %v10293_v24  ;;  %3129 = vperm.xlu0 %8314, %v2843_v41   ;;  %v2847_v24 = vld [vmem:[%s11771_s2 + $0x158] sm:$0xff]  ;;  %v2842_v41 = vld [vmem:[%s11771_s2 + $0x130] sm:$0xff] }
 0x360   : > { %3104 = vperm.xlu1 %8315, %v2838_v36  }
 0x362   : > { %v10301_v38 = vpop.permute.xlu1 %2445  ;;  %v10303_v62 = vpop.permute.xlu0 %1020 }
 0x363   : > { %12127 = vst [vmem:[#allocation326_spill] sm:$0xff] %v10301_v38  ;;  %12128 = vst [vmem:[#allocation327_spill] sm:$0xff] %v10303_v62  ;;  %3139 = vperm.xlu0 %8314, %v2845_v39   ;;  %v2849_v62 = vld [vmem:[%s11771_s2 + $0x168] sm:$0xff]  ;;  %v2844_v39 = vld [vmem:[%s11771_s2 + $0x140] sm:$0xff] }
 0x364   : > { %3114 = vperm.xlu1 %8315, %v2840_v0  }
 0x366   : > { %v10311_v36 = vpop.permute.xlu1 %2453  ;;  %v10313_v16 = vpop.permute.xlu0 %1030 }
 0x367   : > { %12129 = vst [vmem:[#allocation328_spill] sm:$0xff] %v10311_v36  ;;  %12130 = vst [vmem:[#allocation329_spill] sm:$0xff] %v10313_v16  ;;  %3149 = vperm.xlu0 %8314, %v2847_v24   ;;  %v2851_v16 = vld [vmem:[%s11771_s2 + $0x178] sm:$0xff]  ;;  %v2846_v24 = vld [vmem:[%s11771_s2 + $0x150] sm:$0xff] }
 0x368   : > { %3124 = vperm.xlu1 %8315, %v2842_v41  }
 0x36a   : > { %v10321_v0 = vpop.permute.xlu1 %2461  ;;  %v10323_v38 = vpop.permute.xlu0 %1040 }
 0x36b   : > { %12131 = vst [vmem:[#allocation330_spill] sm:$0xff] %v10321_v0  ;;  %12132 = vst [vmem:[#allocation331_spill] sm:$0xff] %v10323_v38  ;;  %3159 = vperm.xlu0 %8314, %v2849_v62   ;;  %v2853_v38 = vld [vmem:[%s11771_s2 + $0x188] sm:$0xff]  ;;  %v2848_v62 = vld [vmem:[%s11771_s2 + $0x160] sm:$0xff] }
 0x36c   : > { %3134 = vperm.xlu1 %8315, %v2844_v39  }
 0x36e   : > { %v10331_v41 = vpop.permute.xlu1 %2469  ;;  %v10333_v36 = vpop.permute.xlu0 %1050 }
 0x36f   : > { %12133 = vst [vmem:[#allocation332_spill] sm:$0xff] %v10331_v41  ;;  %12134 = vst [vmem:[#allocation333_spill] sm:$0xff] %v10333_v36  ;;  %3169 = vperm.xlu0 %8314, %v2851_v16   ;;  %v2855_v36 = vld [vmem:[%s11771_s2 + $0x198] sm:$0xff]  ;;  %v2850_v16 = vld [vmem:[%s11771_s2 + $0x170] sm:$0xff] }
 0x370   : > { %3144 = vperm.xlu1 %8315, %v2846_v24  }
 0x372   : > { %v10341_v39 = vpop.permute.xlu1 %2477  ;;  %v10343_v0 = vpop.permute.xlu0 %1060 }
 0x373   : > { %12135 = vst [vmem:[#allocation334_spill] sm:$0xff] %v10341_v39  ;;  %12136 = vst [vmem:[#allocation335_spill] sm:$0xff] %v10343_v0  ;;  %3179 = vperm.xlu0 %8314, %v2853_v38   ;;  %v2857_v0 = vld [vmem:[%s11771_s2 + $0x1a8] sm:$0xff]  ;;  %v2852_v38 = vld [vmem:[%s11771_s2 + $0x180] sm:$0xff] }
 0x374   : > { %3154 = vperm.xlu1 %8315, %v2848_v62  }
 0x376   : > { %v10351_v24 = vpop.permute.xlu1 %2485  ;;  %v10353_v41 = vpop.permute.xlu0 %1070 }
 0x377   : > { %12137 = vst [vmem:[#allocation336_spill] sm:$0xff] %v10351_v24  ;;  %12138 = vst [vmem:[#allocation337_spill] sm:$0xff] %v10353_v41  ;;  %3189 = vperm.xlu0 %8314, %v2855_v36   ;;  %v2859_v41 = vld [vmem:[%s11771_s2 + $0x1b8] sm:$0xff]  ;;  %v2854_v36 = vld [vmem:[%s11771_s2 + $0x190] sm:$0xff] }
 0x378   : > { %3164 = vperm.xlu1 %8315, %v2850_v16  }
 0x37a   : > { %v10361_v62 = vpop.permute.xlu1 %2493  ;;  %v10363_v39 = vpop.permute.xlu0 %1080 }
 0x37b   : > { %12139 = vst [vmem:[#allocation338_spill] sm:$0xff] %v10361_v62  ;;  %12140 = vst [vmem:[#allocation339_spill] sm:$0xff] %v10363_v39  ;;  %3199 = vperm.xlu0 %8314, %v2857_v0   ;;  %v2861_v0 = vld [vmem:[%s11771_s2 + $0x1c8] sm:$0xff] }
 0x37c   : > { %3174 = vperm.xlu1 %8315, %v2852_v38   ;;  %v2856_v38 = vld [vmem:[%s11771_s2 + $0x1a0] sm:$0xff] }
 0x37e   : > { %v10371_v16 = vpop.permute.xlu1 %2501  ;;  %v10373_v24 = vpop.permute.xlu0 %1090 }
 0x37f   : > { %12141 = vst [vmem:[#allocation340_spill] sm:$0xff] %v10371_v16  ;;  %12142 = vst [vmem:[#allocation341_spill] sm:$0xff] %v10373_v24  ;;  %3209 = vperm.xlu0 %8314, %v2859_v41   ;;  %v2863_v41 = vld [vmem:[%s11771_s2 + $0x1d8] sm:$0xff] }
 0x380   : > { %3184 = vperm.xlu1 %8315, %v2854_v36   ;;  %v2858_v36 = vld [vmem:[%s11771_s2 + $0x1b0] sm:$0xff] }
 0x382   : > { %v10381_v39 = vpop.permute.xlu1 %2509  ;;  %v10383_v62 = vpop.permute.xlu0 %1100 }
 0x383   : > { %12143 = vst [vmem:[#allocation342_spill] sm:$0xff] %v10381_v39  ;;  %12144 = vst [vmem:[#allocation343_spill] sm:$0xff] %v10383_v62  ;;  %3219 = vperm.xlu0 %8314, %v2861_v0   ;;  %v359_v0 = vld [vmem:[%s11769_s0] sm:$0x7]  ;;  %v1774_v62 = vsub.s32 1, %v1129_v6  ;;  %v2546_v39 = vsub.s32 2, %v1129_v6 }
 0x384   : > { %3194 = vperm.xlu1 %8315, %v2856_v38   ;;  %v2860_v38 = vld [vmem:[%s11771_s2 + $0x1c0] sm:$0xff] }
 0x385   : > { %v10416_v3 = vrot.slane %v359_v0, %v1774_v62  ;;  %v10418_v35 = vrot.slane %v359_v0, %v2546_v39  ;;  %v12152_v62 = vld [vmem:[#allocation7_spill] sm:$0xff] }
 0x386   : > { %v10391_v24 = vpop.permute.xlu1 %2517  ;;  %v10393_v16 = vpop.permute.xlu0 %1110 }
 0x387   : > { %12145 = vst [vmem:[#allocation344_spill] sm:$0xff] %v10391_v24  ;;  %12146 = vst [vmem:[#allocation345_spill] sm:$0xff] %v10393_v16  ;;  %3229 = vperm.xlu0 %8314, %v2863_v41   ;;  %v10408_v41 = vrot.slane %v359_v0, %v1130_v2  ;;  %v1777_v11 = vmul.f32 %v10416_v3, %v12151_v49  ;;  %v2548_v39 = vmul.f32 %v10418_v35, %v9838_v23 }
 0x388   : > { %3204 = vperm.xlu1 %8315, %v2858_v36   ;;  %v2867_v36 = vld [vmem:[%s11771_s2 + $0x1f8] sm:$0xff]  ;;  %v1778_v45 = vmul.f32 %v10416_v3, %v12156_v40  ;;  %v1781_v47 = vmul.f32 %v10416_v3, %v12157_v30  ;;  %v2550_v40 = vmul.f32 %v10418_v35, %v9846_v22  ;;  %v2553_v22 = vmul.f32 %v10418_v35, %v9862_v19 }
 0x389   : > { %v1132_v6 = vmul.f32 %v10408_v41, %v9832_v59  ;;  %v1133_v2 = vmul.f32 %v10408_v41, %v9840_v33  ;;  %v2869_v59 = vld [vmem:[%s11771_s2 + $0x208] sm:$0xff]  ;;  %v2864_v33 = vld [vmem:[%s11771_s2 + $0x1e0] sm:$0xff]  ;;  %v1135_v0 = vmul.f32 %v10408_v41, %v12152_v62  ;;  %v2549_v62 = vmul.f32 %v10418_v35, %v12158_v27  ;;  %v2866_v27 = vld [vmem:[%s11771_s2 + $0x1f0] sm:$0xff] }
 0x38a   : > { %v10404_v24 = vpop.permute.xlu1 %2525  ;;  %v10406_v16 = vpop.permute.xlu0 %1120  ;;  %v1136_v30 = vmul.f32 %v10408_v41, %v9848_v25  ;;  %v1138_v19 = vmul.f32 %v10408_v41, %v9856_v26  ;;  %v2555_v26 = vmul.f32 %v10418_v35, %v9870_v17 }
 0x38b   : > { %12147 = vst [vmem:[#allocation346_spill] sm:$0xff] %v10404_v24  ;;  %12148 = vst [vmem:[#allocation347_spill] sm:$0xff] %v10406_v16  ;;  %3239 = vperm.xlu0 %8314, %v2865_v42   ;;  %v12150_v16 = vld [vmem:[#allocation6_spill] sm:$0xff]  ;;  %v1905_v49 = vadd.f32 %v1777_v11, %v1133_v2  ;;  %v12159_v2 = vld [vmem:[#allocation5_spill] sm:$0xff] }
 0x38c   : > { %3214 = vperm.xlu1 %8315, %v2860_v38   ;;  %v1776_v24 = vmul.f32 %v10416_v3, %v12150_v16 }
 0x38e   : > { %v10424_v42 = vpop.permute.xlu1 %2533  ;;  %v2935_v38 = vpop.permute.xlu0 %2934 }
 0x38f   : > { %12149 = vst [vmem:[#allocation348_spill] sm:$0xff] %v10424_v42  ;;  %3249 = vperm.xlu0 %8314, %v2867_v36   ;;  %v12153_v36 = vld [vmem:[#allocation8_spill] sm:$0xff]  ;;  %v1904_v42 = vadd.f32 %v1776_v24, %v1132_v6  ;;  %v2551_v24 = vmul.f32 %v10418_v35, %v9854_v20 }
 0x390   : > { %3224 = vperm.xlu1 %8315, %v2862_v58   ;;  %v1779_v16 = vmul.f32 %v10416_v3, %v12153_v36  ;;  %v12155_v58 = vld [vmem:[#allocation9_spill] sm:$0xff]  ;;  %v1134_v36 = vmul.f32 %v10408_v41, %v12159_v2 }
 0x391   : > { %v1137_v44 = vmul.f32 %v10408_v41, %v12155_v58  ;;  %v2676_v11 = vadd.f32 %v2548_v39, %v1904_v42  ;;  %v2871_v6 = vld [vmem:[%s11771_s2 + $0x218] sm:$0xff] }
 0x392   : > { %v10442_v15 = vpop.permute.xlu1 %2541  ;;  %v2950_v23 = vpop.permute.xlu0 %2949  ;;  %v1907_v20 = vadd.f32 %v1779_v16, %v1135_v0  ;;  %v12160_v58 = vld [vmem:[#allocation137_spill] sm:$0xff]  ;;  %v2873_v0 = vld [vmem:[%s11771_s2 + $0x228] sm:$0xff] }
 0x393   : > { %12154 = vst [vmem:[#allocation6_spill] sm:$0xff] %v10442_v15  ;;  %3259 = vperm.xlu0 %8314, %v2869_v59   ;;  %v3572_v42 = vadd.f32 %v2935_v38, %v2676_v11  ;;  %v2677_v59 = vadd.f32 %v2549_v62, %v1905_v49  ;;  %v1780_v15 = vmul.f32 %v10416_v3, %v12160_v58  ;;  %v12161_v38 = vld [vmem:[#allocation11_spill] sm:$0xff]  ;;  %v12165_v58 = vld [vmem:[#allocation136_spill] sm:$0xff] }
 0x394   : > { %3234 = vperm.xlu1 %8315, %v2864_v33   ;;  %v1906_v33 = vadd.f32 %v1778_v45, %v1134_v36  ;;  %v1909_v2 = vadd.f32 %v1781_v47, %v1137_v44  ;;  %v2679_v21 = vadd.f32 %v2551_v24, %v1907_v20  ;;  %v1139_v16 = vmul.f32 %v10408_v41, %v12161_v38  ;;  %v12162_v45 = vld [vmem:[#allocation12_spill] sm:$0xff]  ;;  %v2868_v47 = vld [vmem:[%s11771_s2 + $0x200] sm:$0xff] }
 0x395   : > { %v1783_v49 = vmul.f32 %v10416_v3, %v12162_v45  ;;  %v1908_v62 = vadd.f32 %v1780_v15, %v1136_v30  ;;  %v12163_v36 = vld [vmem:[#allocation13_spill] sm:$0xff]  ;;  %v12164_v20 = vld [vmem:[#allocation14_spill] sm:$0xff]  ;;  %v2552_v15 = vmul.f32 %v10418_v35, %v12165_v58  ;;  %v1140_v45 = vmul.f32 %v10408_v41, %v9864_v28 }
 0x396   : > { %v2960_v39 = vpop.permute.xlu0 %2959  ;;  %v2678_v11 = vadd.f32 %v2550_v40, %v1906_v33  ;;  %v3575_v44 = vadd.f32 %v2950_v23, %v2679_v21  ;;  %v12166_v40 = vld [vmem:[#allocation139_spill] sm:$0xff]  ;;  %v2681_v21 = vadd.f32 %v2553_v22, %v1909_v2  ;;  %v2557_v28 = vmul.f32 %v10418_v35, %v9878_v13  ;;  %v2872_v13 = vld [vmem:[%s11771_s2 + $0x220] sm:$0xff] }
 0x397   : > { %v2940_v48 = vpop.permute.xlu1 %2939  ;;  %3269 = vperm.xlu0 %8314, %v2871_v6   ;;  %v1782_v30 = vmul.f32 %v10416_v3, %v12166_v40  ;;  %v1911_v38 = vadd.f32 %v1783_v49, %v1139_v16 }
 0x398   : > { %v3573_v25 = vadd.f32 %v2940_v48, %v2677_v59  ;;  %3244 = vperm.xlu1 %8315, %v2866_v27   ;;  %v3700_v48 = vmax.f32 %v3572_v42, 0.0  ;;  %v1141_v27 = vmul.f32 %v10408_v41, %v12163_v36  ;;  %v1785_v59 = vmul.f32 %v10416_v3, %v12164_v20 }
 0x399   : > { %v2680_v36 = vadd.f32 %v2552_v15, %v1908_v62  ;;  %v1910_v20 = vadd.f32 %v1782_v30, %v1138_v19  ;;  %v3703_v58 = vmax.f32 %v3575_v44, 0.0  ;;  %v3577_v17 = vadd.f32 %v2960_v39, %v2681_v21  ;;  %v2877_v39 = vld [vmem:[%s11771_s2 + $0x248] sm:$0xff] }
 0x39a   : > { %v3701_v24 = vmax.f32 %v3573_v25, 0.0  ;;  %v2970_v6 = vpop.permute.xlu0 %2969  ;;  %v2875_v25 = vld [vmem:[%s11771_s2 + $0x238] sm:$0xff]  ;;  %v2683_v62 = vadd.f32 %v2555_v26, %v1911_v38  ;;  %v12169_v44 = vld [vmem:[#allocation15_spill] sm:$0xff] }
 0x39b   : > { %v2945_v33 = vpop.permute.xlu1 %2944  ;;  %3279 = vperm.xlu0 %8314, %v2873_v0   ;;  %v2870_v0 = vld [vmem:[%s11771_s2 + $0x210] sm:$0xff]  ;;  %v3705_v26 = vmax.f32 %v3577_v17, 0.0  ;;  %v12171_v38 = vld [vmem:[#allocation17_spill] sm:$0xff] }
 0x39c   : > { %v7452_v23 = vpack.c.bf16 %v3701_v24, %v3700_v48  ;;  %v3574_v42 = vadd.f32 %v2945_v33, %v2678_v11  ;;  %3254 = vperm.xlu1 %8315, %v2868_v47   ;;  %v1913_v11 = vadd.f32 %v1785_v59, %v1141_v27  ;;  %v12167_v47 = vld [vmem:[#allocation138_spill] sm:$0xff]  ;;  %v12168_v24 = vld [vmem:[#allocation141_spill] sm:$0xff]  ;;  %v1143_v27 = vmul.f32 %v10408_v41, %v12169_v44  ;;  %v12170_v59 = vld [vmem:[#allocation16_spill] sm:$0xff] }
 0x39d   : > { %v2554_v48 = vmul.f32 %v10418_v35, %v12167_v47  ;;  %v1784_v16 = vmul.f32 %v10416_v3, %v12168_v24  ;;  %v1787_v40 = vmul.f32 %v10416_v3, %v12170_v59  ;;  %v1142_v33 = vmul.f32 %v10408_v41, %v9872_v29  ;;  %v12174_v29 = vld [vmem:[#allocation143_spill] sm:$0xff] }
 0x39e   : > { %7453 = vst [vmem:[#allocation2] sm:$0xff] %v7452_v23   ;;  %v3702_v2 = vmax.f32 %v3574_v42, 0.0  ;;  %v2980_v22 = vpop.permute.xlu0 %2979  ;;  %v3579_v21 = vadd.f32 %v2970_v6, %v2683_v62  ;;  %v1786_v47 = vmul.f32 %v10416_v3, %v12174_v29  ;;  %v2559_v6 = vmul.f32 %v10418_v35, %v9886_v8 }
 0x39f   : > { %v2955_v49 = vpop.permute.xlu1 %2954  ;;  %3289 = vperm.xlu0 %8314, %v2875_v25   ;;  %v1912_v30 = vadd.f32 %v1784_v16, %v1140_v45  ;;  %v2682_v25 = vadd.f32 %v2554_v48, %v1910_v20  ;;  %v12173_v45 = vld [vmem:[#allocation140_spill] sm:$0xff]  ;;  %v2685_v17 = vadd.f32 %v2557_v28, %v1913_v11 }
 0x3a0   : > { %v7457_v15 = vpack.c.bf16 %v3703_v58, %v3702_v2  ;;  %v3576_v19 = vadd.f32 %v2955_v49, %v2680_v36  ;;  %3264 = vperm.xlu1 %8315, %v2870_v0   ;;  %v1145_v36 = vmul.f32 %v10408_v41, %v12171_v38  ;;  %v12172_v0 = vld [vmem:[#allocation18_spill] sm:$0xff]  ;;  %v2556_v2 = vmul.f32 %v10418_v35, %v12173_v45  ;;  %v2879_v48 = vld [vmem:[%s11771_s2 + $0x258] sm:$0xff] }
 0x3a1   : > { %v1789_v58 = vmul.f32 %v10416_v3, %v12172_v0  ;;  %v1915_v49 = vadd.f32 %v1787_v40, %v1143_v27  ;;  %v1914_v62 = vadd.f32 %v1786_v47, %v1142_v33  ;;  %v3707_v44 = vmax.f32 %v3579_v21, 0.0  ;;  %v12177_v21 = vld [vmem:[#allocation19_spill] sm:$0xff] }
 0x3a2   : > { %7769 = vst [vmem:[#allocation2 + $0x8] sm:$0xff] %v7457_v15   ;;  %v3704_v23 = vmax.f32 %v3576_v19, 0.0  ;;  %v2990_v42 = vpop.permute.xlu0 %2989  ;;  %v2684_v15 = vadd.f32 %v2556_v2, %v1912_v30  ;;  %v2874_v19 = vld [vmem:[%s11771_s2 + $0x230] sm:$0xff]  ;;  %v3581_v8 = vadd.f32 %v2980_v22, %v2685_v17  ;;  %v2561_v30 = vmul.f32 %v10418_v35, %v9894_v4  ;;  %v2881_v22 = vld [vmem:[%s11771_s2 + $0x268] sm:$0xff]  ;;  %v2876_v4 = vld [vmem:[%s11771_s2 + $0x240] sm:$0xff] }
 0x3a3   : > { %v2965_v24 = vpop.permute.xlu1 %2964  ;;  %3299 = vperm.xlu0 %8314, %v2877_v39   ;;  %v1144_v39 = vmul.f32 %v10408_v41, %v9880_v31  ;;  %v1917_v59 = vadd.f32 %v1789_v58, %v1145_v36  ;;  %v2687_v33 = vadd.f32 %v2559_v6, %v1915_v49  ;;  %v1147_v38 = vmul.f32 %v10408_v41, %v12177_v21  ;;  %v12178_v36 = vld [vmem:[#allocation20_spill] sm:$0xff]  ;;  %v12179_v17 = vld [vmem:[#allocation21_spill] sm:$0xff] }
 0x3a4   : > { %v7462_v16 = vpack.c.bf16 %v3705_v26, %v3704_v23  ;;  %v3578_v20 = vadd.f32 %v2965_v24, %v2682_v25  ;;  %3274 = vperm.xlu1 %8315, %v2872_v13   ;;  %v12175_v13 = vld [vmem:[#allocation142_spill] sm:$0xff]  ;;  %v12176_v23 = vld [vmem:[#allocation145_spill] sm:$0xff]  ;;  %v1791_v0 = vmul.f32 %v10416_v3, %v12178_v36  ;;  %v1146_v58 = vmul.f32 %v10408_v41, %v9888_v32  ;;  %v12181_v49 = vld [vmem:[#allocation144_spill] sm:$0xff] }
 0x3a5   : > { %v2558_v26 = vmul.f32 %v10418_v35, %v12175_v13  ;;  %v1788_v27 = vmul.f32 %v10416_v3, %v12176_v23  ;;  %v3709_v29 = vmax.f32 %v3581_v8, 0.0  ;;  %v3583_v47 = vadd.f32 %v2990_v42, %v2687_v33  ;;  %v12184_v21 = vld [vmem:[#allocation149_spill] sm:$0xff] }
 0x3a6   : > { %7770 = vst [vmem:[#allocation2 + $0x10] sm:$0xff] %v7462_v16   ;;  %v3706_v11 = vmax.f32 %v3578_v20, 0.0  ;;  %v3000_v28 = vpop.permute.xlu0 %2999  ;;  %v1149_v16 = vmul.f32 %v10408_v41, %v12179_v17  ;;  %v12180_v20 = vld [vmem:[#allocation22_spill] sm:$0xff]  ;;  %v2560_v32 = vmul.f32 %v10418_v35, %v12181_v49  ;;  %v2563_v42 = vmul.f32 %v10418_v35, %v9902_v60 }
 0x3a7   : > { %v2975_v40 = vpop.permute.xlu1 %2974  ;;  %3309 = vperm.xlu0 %8314, %v2879_v48   ;;  %v2686_v45 = vadd.f32 %v2558_v26, %v1914_v62  ;;  %v1916_v2 = vadd.f32 %v1788_v27, %v1144_v39  ;;  %v1793_v48 = vmul.f32 %v10416_v3, %v12180_v20  ;;  %v12182_v62 = vld [vmem:[#allocation147_spill] sm:$0xff]  ;;  %v2689_v39 = vadd.f32 %v2561_v30, %v1917_v59 }
 0x3a8   : > { %v7467_v25 = vpack.c.bf16 %v3707_v44, %v3706_v11  ;;  %v3580_v31 = vadd.f32 %v2975_v40, %v2684_v15  ;;  %3284 = vperm.xlu1 %8315, %v2874_v19   ;;  %v1790_v15 = vmul.f32 %v10416_v3, %v12182_v62  ;;  %v2883_v11 = vld [vmem:[%s11771_s2 + $0x278] sm:$0xff]  ;;  %v1919_v13 = vadd.f32 %v1791_v0, %v1147_v38  ;;  %v2878_v27 = vld [vmem:[%s11771_s2 + $0x250] sm:$0xff] }
 0x3a9   : > { %v1148_v23 = vmul.f32 %v10408_v41, %v9896_v34  ;;  %v3711_v40 = vmax.f32 %v3583_v47, 0.0  ;;  %v3585_v33 = vadd.f32 %v3000_v28, %v2689_v39  ;;  %v2688_v30 = vadd.f32 %v2560_v32, %v1916_v2  ;;  %v2885_v28 = vld [vmem:[%s11771_s2 + $0x288] sm:$0xff]  ;;  %v12187_v62 = vld [vmem:[#allocation25_spill] sm:$0xff]  ;;  %v12189_v39 = vld [vmem:[#allocation148_spill] sm:$0xff] }
 0x3aa   : > { %7771 = vst [vmem:[#allocation2 + $0x18] sm:$0xff] %v7467_v25   ;;  %v3708_v24 = vmax.f32 %v3580_v31, 0.0  ;;  %v3010_v6 = vpop.permute.xlu0 %3009  ;;  %v1918_v26 = vadd.f32 %v1790_v15, %v1146_v58  ;;  %v1921_v25 = vadd.f32 %v1793_v48, %v1149_v16  ;;  %v12183_v31 = vld [vmem:[#allocation146_spill] sm:$0xff]  ;;  %v1792_v38 = vmul.f32 %v10416_v3, %v12184_v21 }
 0x3ab   : > { %v2985_v19 = vpop.permute.xlu1 %2984  ;;  %3319 = vperm.xlu0 %8314, %v2881_v22   ;;  %v2562_v22 = vmul.f32 %v10418_v35, %v12183_v31  ;;  %v2565_v34 = vmul.f32 %v10418_v35, %v9910_v56  ;;  %v2691_v0 = vadd.f32 %v2563_v42, %v1919_v13  ;;  %v2880_v56 = vld [vmem:[%s11771_s2 + $0x260] sm:$0xff]  ;;  %v1150_v16 = vmul.f32 %v10408_v41, %v9904_v37 }
 0x3ac   : > { %v7472_v44 = vpack.c.bf16 %v3709_v29, %v3708_v24  ;;  %v3582_v8 = vadd.f32 %v2985_v19, %v2686_v45  ;;  %3294 = vperm.xlu1 %8315, %v2876_v4   ;;  %v12185_v4 = vld [vmem:[#allocation23_spill] sm:$0xff]  ;;  %v12186_v29 = vld [vmem:[#allocation24_spill] sm:$0xff]  ;;  %v1920_v24 = vadd.f32 %v1792_v38, %v1148_v23  ;;  %v3713_v20 = vmax.f32 %v3585_v33, 0.0  ;;  %v12188_v19 = vld [vmem:[#allocation26_spill] sm:$0xff] }
 0x3ad   : > { %v1151_v2 = vmul.f32 %v10408_v41, %v12185_v4  ;;  %v1795_v47 = vmul.f32 %v10416_v3, %v12186_v29  ;;  %v2690_v17 = vadd.f32 %v2562_v22, %v1918_v26  ;;  %v3587_v48 = vadd.f32 %v3010_v6, %v2691_v0  ;;  %v12192_v0 = vld [vmem:[#allocation153_spill] sm:$0xff]  ;;  %v12193_v29 = vld [vmem:[#allocation27_spill] sm:$0xff] }
 0x3ae   : > { %7772 = vst [vmem:[#allocation2 + $0x20] sm:$0xff] %v7472_v44   ;;  %v3710_v60 = vmax.f32 %v3582_v8, 0.0  ;;  %v3020_v59 = vpop.permute.xlu0 %3019  ;;  %v1153_v15 = vmul.f32 %v10408_v41, %v12187_v62  ;;  %v1797_v42 = vmul.f32 %v10416_v3, %v12188_v19  ;;  %v2564_v44 = vmul.f32 %v10418_v35, %v12189_v39  ;;  %v12190_v8 = vld [vmem:[#allocation151_spill] sm:$0xff]  ;;  %v12195_v19 = vld [vmem:[#allocation29_spill] sm:$0xff]  ;;  %v12196_v39 = vld [vmem:[#allocation30_spill] sm:$0xff] }
 0x3af   : > { %v2995_v36 = vpop.permute.xlu1 %2994  ;;  %3329 = vperm.xlu0 %8314, %v2883_v11   ;;  %v1794_v11 = vmul.f32 %v10416_v3, %v12190_v8  ;;  %v2567_v37 = vmul.f32 %v10418_v35, %v9918_v57  ;;  %v2693_v6 = vadd.f32 %v2565_v34, %v1921_v25  ;;  %v1152_v33 = vmul.f32 %v10408_v41, %v9912_v43  ;;  %v12197_v8 = vld [vmem:[#allocation152_spill] sm:$0xff] }
 0x3b0   : > { %v7477_v58 = vpack.c.bf16 %v3711_v40, %v3710_v60  ;;  %v3584_v45 = vadd.f32 %v2995_v36, %v2688_v30  ;;  %3304 = vperm.xlu1 %8315, %v2878_v27   ;;  %v2887_v27 = vld [vmem:[%s11771_s2 + $0x298] sm:$0xff]  ;;  %v1923_v40 = vadd.f32 %v1795_v47, %v1151_v2  ;;  %v2692_v60 = vadd.f32 %v2564_v44, %v1920_v24  ;;  %v2882_v30 = vld [vmem:[%s11771_s2 + $0x270] sm:$0xff]  ;;  %v12191_v36 = vld [vmem:[#allocation150_spill] sm:$0xff] }
 0x3b1   : > { %v1922_v31 = vadd.f32 %v1794_v11, %v1150_v16  ;;  %v3715_v22 = vmax.f32 %v3587_v48, 0.0  ;;  %v3589_v57 = vadd.f32 %v3020_v59, %v2693_v6  ;;  %v1925_v38 = vadd.f32 %v1797_v42, %v1153_v15  ;;  %v2889_v59 = vld [vmem:[%s11771_s2 + $0x2a8] sm:$0xff]  ;;  %v12194_v24 = vld [vmem:[#allocation28_spill] sm:$0xff] }
 0x3b2   : > { %7773 = vst [vmem:[#allocation2 + $0x28] sm:$0xff] %v7477_v58   ;;  %v3712_v49 = vmax.f32 %v3584_v45, 0.0  ;;  %v3030_v32 = vpop.permute.xlu0 %3029  ;;  %v2566_v34 = vmul.f32 %v10418_v35, %v12191_v36  ;;  %v1796_v58 = vmul.f32 %v10416_v3, %v12192_v0  ;;  %v2569_v43 = vmul.f32 %v10418_v35, %v9926_v5  ;;  %v2884_v5 = vld [vmem:[%s11771_s2 + $0x280] sm:$0xff] }
 0x3b3   : > { %v3005_v13 = vpop.permute.xlu1 %3004  ;;  %3339 = vperm.xlu0 %8314, %v2885_v28   ;;  %v2695_v28 = vadd.f32 %v2567_v37, %v1923_v40  ;;  %v1155_v47 = vmul.f32 %v10408_v41, %v12193_v29  ;;  %v1154_v16 = vmul.f32 %v10408_v41, %v9920_v46  ;;  %v1157_v42 = vmul.f32 %v10408_v41, %v12195_v19  ;;  %v12198_v46 = vld [vmem:[#allocation155_spill] sm:$0xff]  ;;  %v12199_v36 = vld [vmem:[#allocation154_spill] sm:$0xff]  ;;  %v12200_v0 = vld [vmem:[#allocation157_spill] sm:$0xff] }
 0x3b4   : > { %v7482_v26 = vpack.c.bf16 %v3713_v20, %v3712_v49  ;;  %v3586_v23 = vadd.f32 %v3005_v13, %v2690_v17  ;;  %3314 = vperm.xlu1 %8315, %v2880_v56   ;;  %v1799_v17 = vmul.f32 %v10416_v3, %v12194_v24  ;;  %v1924_v56 = vadd.f32 %v1796_v58, %v1152_v33  ;;  %v12202_v29 = vld [vmem:[#allocation32_spill] sm:$0xff]  ;;  %v12204_v19 = vld [vmem:[#allocation34_spill] sm:$0xff] }
 0x3b5   : > { %v3717_v20 = vmax.f32 %v3589_v57, 0.0  ;;  %v3591_v48 = vadd.f32 %v3030_v32, %v2695_v28  ;;  %v2694_v15 = vadd.f32 %v2566_v34, %v1922_v31  ;;  %v1801_v44 = vmul.f32 %v10416_v3, %v12196_v39  ;;  %v12205_v39 = vld [vmem:[#allocation156_spill] sm:$0xff] }
 0x3b6   : > { %7774 = vst [vmem:[#allocation2 + $0x30] sm:$0xff] %v7482_v26   ;;  %v3714_v25 = vmax.f32 %v3586_v23, 0.0  ;;  %v3040_v21 = vpop.permute.xlu0 %3039  ;;  %v2568_v11 = vmul.f32 %v10418_v35, %v12197_v8  ;;  %v1798_v13 = vmul.f32 %v10416_v3, %v12198_v46  ;;  %v2571_v32 = vmul.f32 %v10418_v35, %v9934_v54 }
 0x3b7   : > { %v3015_v45 = vpop.permute.xlu1 %3014  ;;  %3349 = vperm.xlu0 %8314, %v2887_v27   ;;  %v2697_v6 = vadd.f32 %v2569_v43, %v1925_v38  ;;  %v2891_v27 = vld [vmem:[%s11771_s2 + $0x2b8] sm:$0xff]  ;;  %v1927_v40 = vadd.f32 %v1799_v17, %v1155_v47  ;;  %v1156_v31 = vmul.f32 %v10408_v41, %v9928_v52  ;;  %v1929_v38 = vadd.f32 %v1801_v44, %v1157_v42  ;;  %v12206_v44 = vld [vmem:[#allocation159_spill] sm:$0xff] }
 0x3b8   : > { %v7487_v4 = vpack.c.bf16 %v3715_v22, %v3714_v25  ;;  %v3588_v2 = vadd.f32 %v3015_v45, %v2692_v60  ;;  %3324 = vperm.xlu1 %8315, %v2882_v30   ;;  %v1926_v33 = vadd.f32 %v1798_v13, %v1154_v16  ;;  %v2696_v60 = vadd.f32 %v2568_v11, %v1924_v56  ;;  %v2886_v30 = vld [vmem:[%s11771_s2 + $0x290] sm:$0xff] }
 0x3b9   : > { %v3719_v22 = vmax.f32 %v3591_v48, 0.0  ;;  %v3593_v54 = vadd.f32 %v3040_v21, %v2697_v6  ;;  %v2570_v34 = vmul.f32 %v10418_v35, %v12199_v36  ;;  %v1800_v58 = vmul.f32 %v10416_v3, %v12200_v0  ;;  %v2893_v21 = vld [vmem:[%s11771_s2 + $0x2c8] sm:$0xff] }
 0x3ba   : > { %7775 = vst [vmem:[#allocation2 + $0x38] sm:$0xff] %v7487_v4   ;;  %v3716_v49 = vmax.f32 %v3588_v2, 0.0  ;;  %v3050_v62 = vpop.permute.xlu0 %3049  ;;  %v2573_v43 = vmul.f32 %v10418_v35, %v9942_v53  ;;  %v2699_v28 = vadd.f32 %v2571_v32, %v1927_v40  ;;  %v12201_v2 = vld [vmem:[#allocation31_spill] sm:$0xff]  ;;  %v1803_v47 = vmul.f32 %v10416_v3, %v12202_v29  ;;  %v2888_v53 = vld [vmem:[%s11771_s2 + $0x2a0] sm:$0xff]  ;;  %v2895_v32 = vld [vmem:[%s11771_s2 + $0x2d8] sm:$0xff] }
 0x3bb   : > { %v3025_v37 = vpop.permute.xlu1 %3024  ;;  %3359 = vperm.xlu0 %8314, %v2889_v59   ;;  %v1159_v59 = vmul.f32 %v10408_v41, %v12201_v2  ;;  %v1158_v24 = vmul.f32 %v10408_v41, %v9936_v55  ;;  %v2698_v17 = vadd.f32 %v2570_v34, %v1926_v33  ;;  %v1928_v56 = vadd.f32 %v1800_v58, %v1156_v31 }
 0x3bc   : > { %v7492_v26 = vpack.c.bf16 %v3717_v20, %v3716_v49  ;;  %v3590_v23 = vadd.f32 %v3025_v37, %v2694_v15  ;;  %3334 = vperm.xlu1 %8315, %v2884_v5   ;;  %v3721_v16 = vmax.f32 %v3593_v54, 0.0  ;;  %v3595_v5 = vadd.f32 %v3050_v62, %v2699_v28  ;;  %v12203_v49 = vld [vmem:[#allocation33_spill] sm:$0xff]  ;;  %v12210_v28 = vld [vmem:[#allocation36_spill] sm:$0xff] }
 0x3bd   : > { %v1161_v15 = vmul.f32 %v10408_v41, %v12203_v49  ;;  %v1805_v42 = vmul.f32 %v10416_v3, %v12204_v19  ;;  %v2572_v55 = vmul.f32 %v10418_v35, %v12205_v39  ;;  %v1802_v8 = vmul.f32 %v10416_v3, %v12206_v44  ;;  %v12214_v49 = vld [vmem:[#allocation163_spill] sm:$0xff] }
 0x3be   : > { %7776 = vst [vmem:[#allocation2 + $0x40] sm:$0xff] %v7492_v26   ;;  %v3718_v57 = vmax.f32 %v3590_v23, 0.0  ;;  %v3060_v25 = vpop.permute.xlu0 %3059  ;;  %v2575_v62 = vmul.f32 %v10418_v35, %v9950_v51  ;;  %v2701_v46 = vadd.f32 %v2573_v43, %v1929_v38  ;;  %v1931_v6 = vadd.f32 %v1803_v47, %v1159_v59 }
 0x3bf   : > { %v3035_v45 = vpop.permute.xlu1 %3034  ;;  %3369 = vperm.xlu0 %8314, %v2891_v27   ;;  %v1930_v26 = vadd.f32 %v1802_v8, %v1158_v24  ;;  %v1160_v23 = vmul.f32 %v10408_v41, %v9944_v61  ;;  %v2890_v27 = vld [vmem:[%s11771_s2 + $0x2b0] sm:$0xff]  ;;  %v3723_v40 = vmax.f32 %v3595_v5, 0.0  ;;  %v1933_v31 = vadd.f32 %v1805_v42, %v1161_v15 }
 0x3c0   : > { %v7497_v4 = vpack.c.bf16 %v3719_v22, %v3718_v57  ;;  %v3592_v52 = vadd.f32 %v3035_v45, %v2696_v60  ;;  %3344 = vperm.xlu1 %8315, %v2886_v30   ;;  %v3597_v33 = vadd.f32 %v3060_v25, %v2701_v46  ;;  %v2700_v30 = vadd.f32 %v2572_v55, %v1928_v56  ;;  %v12207_v22 = vld [vmem:[#allocation158_spill] sm:$0xff]  ;;  %v12208_v57 = vld [vmem:[#allocation161_spill] sm:$0xff]  ;;  %v12209_v45 = vld [vmem:[#allocation35_spill] sm:$0xff] }
 0x3c1   : > { %v2574_v54 = vmul.f32 %v10418_v35, %v12207_v22  ;;  %v1804_v38 = vmul.f32 %v10416_v3, %v12208_v57  ;;  %v2577_v61 = vmul.f32 %v10418_v35, %v9958_v50  ;;  %v2703_v34 = vadd.f32 %v2575_v62, %v1931_v6  ;;  %v2897_v25 = vld [vmem:[%s11771_s2 + $0x2e8] sm:$0xff]  ;;  %v2892_v50 = vld [vmem:[%s11771_s2 + $0x2c0] sm:$0xff]  ;;  %v12213_v5 = vld [vmem:[#allocation160_spill] sm:$0xff] }
 0x3c2   : > { %7777 = vst [vmem:[#allocation2 + $0x48] sm:$0xff] %v7497_v4   ;;  %v3720_v20 = vmax.f32 %v3592_v52, 0.0  ;;  %v3070_v48 = vpop.permute.xlu0 %3069  ;;  %v1163_v43 = vmul.f32 %v10408_v41, %v12209_v45  ;;  %v1807_v4 = vmul.f32 %v10416_v3, %v12210_v28  ;;  %v1162_v2 = vmul.f32 %v10408_v41, %v9952_v1  ;;  %v12212_v56 = vld [vmem:[#allocation38_spill] sm:$0xff]  ;;  %v2899_v55 = vld [vmem:[%s11771_s2 + $0x2f8] sm:$0xff]  ;;  %v2894_v62 = vld [vmem:[%s11771_s2 + $0x2d0] sm:$0xff] }
 0x3c3   : > { %v3045_v11 = vpop.permute.xlu1 %3044  ;;  %3379 = vperm.xlu0 %8314, %v2893_v21   ;;  %v1932_v52 = vadd.f32 %v1804_v38, %v1160_v23  ;;  %v2702_v21 = vadd.f32 %v2574_v54, %v1930_v26  ;;  %v3725_v59 = vmax.f32 %v3597_v33, 0.0  ;;  %v3599_v29 = vadd.f32 %v3070_v48, %v2703_v34  ;;  %v12215_v26 = vld [vmem:[#allocation162_spill] sm:$0xff]  ;;  %v12217_v22 = vld [vmem:[#allocation39_spill] sm:$0xff]  ;;  %v12218_v57 = vld [vmem:[#allocation40_spill] sm:$0xff] }
 0x3c4   : > { %v7502_v13 = vpack.c.bf16 %v3721_v16, %v3720_v20  ;;  %v3594_v37 = vadd.f32 %v3045_v11, %v2698_v17  ;;  %3354 = vperm.xlu1 %8315, %v2888_v53   ;;  %v12211_v17 = vld [vmem:[#allocation37_spill] sm:$0xff]  ;;  %v1809_v16 = vmul.f32 %v10416_v3, %v12212_v56  ;;  %v2576_v20 = vmul.f32 %v10418_v35, %v12213_v5 }
 0x3c5   : > { %v1165_v53 = vmul.f32 %v10408_v41, %v12211_v17  ;;  %v1806_v15 = vmul.f32 %v10416_v3, %v12214_v49  ;;  %v2579_v1 = vmul.f32 %v10418_v35, %v9966_v63  ;;  %v2705_v48 = vadd.f32 %v2577_v61, %v1933_v31 }
 0x3c6   : > { %7778 = vst [vmem:[#allocation2 + $0x50] sm:$0xff] %v7502_v13   ;;  %v3722_v51 = vmax.f32 %v3594_v37, 0.0  ;;  %v3080_v60 = vpop.permute.xlu0 %3079  ;;  %v1935_v44 = vadd.f32 %v1807_v4, %v1163_v43  ;;  %v1164_v8 = vmul.f32 %v10408_v41, %v9960_v9  ;;  %v2704_v11 = vadd.f32 %v2576_v20, %v1932_v52  ;;  %v12219_v43 = vld [vmem:[#allocation41_spill] sm:$0xff]  ;;  %v12220_v4 = vld [vmem:[#allocation42_spill] sm:$0xff]  ;;  %v2898_v20 = vld [vmem:[%s11771_s2 + $0x2f0] sm:$0xff] }
 0x3c7   : > { %v3055_v36 = vpop.permute.xlu1 %3054  ;;  %3389 = vperm.xlu0 %8314, %v2895_v32   ;;  %v1934_v46 = vadd.f32 %v1806_v15, %v1162_v2  ;;  %v3727_v13 = vmax.f32 %v3599_v29, 0.0  ;;  %v3601_v63 = vadd.f32 %v3080_v60, %v2705_v48  ;;  %v1937_v6 = vadd.f32 %v1809_v16, %v1165_v53  ;;  %v2901_v60 = vld [vmem:[%s11771_s2 + $0x308] sm:$0xff]  ;;  %v2903_v53 = vld [vmem:[%s11771_s2 + $0x318] sm:$0xff] }
 0x3c8   : > { %v7507_v0 = vpack.c.bf16 %v3723_v40, %v3722_v51  ;;  %v3596_v58 = vadd.f32 %v3055_v36, %v2700_v30  ;;  %3364 = vperm.xlu1 %8315, %v2890_v27   ;;  %v2578_v23 = vmul.f32 %v10418_v35, %v12215_v26  ;;  %v12216_v27 = vld [vmem:[#allocation165_spill] sm:$0xff]  ;;  %v2581_v9 = vmul.f32 %v10418_v35, %v9974_v10  ;;  %v12227_v26 = vld [vmem:[#allocation267_spill] sm:$0xff] }
 0x3c9   : > { %v1808_v40 = vmul.f32 %v10416_v3, %v12216_v27  ;;  %v2707_v51 = vadd.f32 %v2579_v1, %v1935_v44  ;;  %v1167_v54 = vmul.f32 %v10408_v41, %v12217_v22  ;;  %v1811_v38 = vmul.f32 %v10416_v3, %v12218_v57  ;;  %v2896_v10 = vld [vmem:[%s11771_s2 + $0x2e0] sm:$0xff]  ;;  %v12230_v57 = vld [vmem:[#allocation168_spill] sm:$0xff] }
 0x3ca   : > { %7779 = vst [vmem:[#allocation2 + $0x58] sm:$0xff] %v7507_v0   ;;  %v3724_v47 = vmax.f32 %v3596_v58, 0.0  ;;  %v3090_v24 = vpop.permute.xlu0 %3089  ;;  %v1166_v61 = vmul.f32 %v10408_v41, %v9968_v12  ;;  %v3729_v34 = vmax.f32 %v3601_v63, 0.0  ;;  %v2706_v45 = vadd.f32 %v2578_v23, %v1934_v46  ;;  %v12222_v12 = vld [vmem:[#allocation167_spill] sm:$0xff]  ;;  %v12229_v22 = vld [vmem:[#allocation46_spill] sm:$0xff] }
 0x3cb   : > { %v3065_v19 = vpop.permute.xlu1 %3064  ;;  %3399 = vperm.xlu0 %8314, %v2897_v25   ;;  %v1936_v36 = vadd.f32 %v1808_v40, %v1164_v8  ;;  %v3603_v0 = vadd.f32 %v3090_v24, %v2707_v51  ;;  %v1169_v28 = vmul.f32 %v10408_v41, %v12219_v43  ;;  %v1813_v52 = vmul.f32 %v10416_v3, %v12220_v4  ;;  %v12225_v63 = vld [vmem:[#allocation43_spill] sm:$0xff]  ;;  %v2907_v43 = vld [vmem:[%s11771_s2 + $0x338] sm:$0xff] }
 0x3cc   : > { %v7512_v42 = vpack.c.bf16 %v3725_v59, %v3724_v47  ;;  %v3598_v39 = vadd.f32 %v3065_v19, %v2702_v21  ;;  %3374 = vperm.xlu1 %8315, %v2892_v50   ;;  %v12221_v21 = vld [vmem:[#allocation164_spill] sm:$0xff]  ;;  %v1810_v2 = vmul.f32 %v10416_v3, %v12222_v12  ;;  %v2583_v29 = vmul.f32 %v10418_v35, %v9982_v7 }
 0x3cd   : > { %v2580_v50 = vmul.f32 %v10418_v35, %v12221_v21  ;;  %v2709_v47 = vadd.f32 %v2581_v9, %v1937_v6  ;;  %v1939_v56 = vadd.f32 %v1811_v38, %v1167_v54  ;;  %v1168_v49 = vmul.f32 %v10408_v41, %v9976_v18 }
 0x3ce   : > { %7780 = vst [vmem:[#allocation2 + $0x60] sm:$0xff] %v7512_v42   ;;  %v3726_v37 = vmax.f32 %v3598_v39, 0.0  ;;  %v3100_v32 = vpop.permute.xlu0 %3099  ;;  %v1938_v16 = vadd.f32 %v1810_v2, %v1166_v61  ;;  %v3731_v15 = vmax.f32 %v3603_v0, 0.0  ;;  %v1941_v48 = vadd.f32 %v1813_v52, %v1169_v28  ;;  %v12223_v42 = vld [vmem:[#allocation166_spill] sm:$0xff]  ;;  %v12233_v52 = vld [vmem:[#allocation268_spill] sm:$0xff] }
 0x3cf   : > { %v3075_v33 = vpop.permute.xlu1 %3074  ;;  %3409 = vperm.xlu0 %8314, %v2899_v55   ;;  %v2708_v5 = vadd.f32 %v2580_v50, %v1936_v36  ;;  %v3605_v7 = vadd.f32 %v3100_v32, %v2709_v47  ;;  %v2582_v39 = vmul.f32 %v10418_v35, %v12223_v42  ;;  %v12224_v55 = vld [vmem:[#allocation169_spill] sm:$0xff]  ;;  %v12226_v32 = vld [vmem:[#allocation44_spill] sm:$0xff]  ;;  %v1170_v23 = vmul.f32 %v10408_v41, %v12227_v26  ;;  %v12231_v36 = vld [vmem:[#allocation171_spill] sm:$0xff] }
 0x3d0   : > { %v7517_v30 = vpack.c.bf16 %v3727_v13, %v3726_v37  ;;  %v3600_v31 = vadd.f32 %v3075_v33, %v2704_v11  ;;  %3384 = vperm.xlu1 %8315, %v2894_v62   ;;  %v1812_v44 = vmul.f32 %v10416_v3, %v12224_v55  ;;  %v2585_v11 = vmul.f32 %v10418_v35, %v9990_v14  ;;  %v2905_v13 = vld [vmem:[%s11771_s2 + $0x328] sm:$0xff]  ;;  %v2900_v14 = vld [vmem:[%s11771_s2 + $0x300] sm:$0xff]  ;;  %v2902_v50 = vld [vmem:[%s11771_s2 + $0x310] sm:$0xff] }
 0x3d1   : > { %v2711_v62 = vadd.f32 %v2583_v29, %v1939_v56  ;;  %v1171_v37 = vmul.f32 %v10408_v41, %v12225_v63  ;;  %v1815_v6 = vmul.f32 %v10416_v3, %v12226_v32  ;;  %v2710_v27 = vadd.f32 %v2582_v39, %v1938_v16  ;;  %v12235_v56 = vld [vmem:[#allocation173_spill] sm:$0xff]  ;;  %v12238_v39 = vld [vmem:[#allocation48_spill] sm:$0xff]  ;;  %v12241_v26 = vld [vmem:[#allocation50_spill] sm:$0xff] }
 0x3d2   : > { %7781 = vst [vmem:[#allocation2 + $0x68] sm:$0xff] %v7517_v30   ;;  %v3728_v58 = vmax.f32 %v3600_v31, 0.0  ;;  %v3110_v25 = vpop.permute.xlu0 %3109  ;;  %v1940_v40 = vadd.f32 %v1812_v44, %v1168_v49  ;;  %v3733_v33 = vmax.f32 %v3605_v7, 0.0  ;;  %v12228_v31 = vld [vmem:[#allocation45_spill] sm:$0xff]  ;;  %v1817_v54 = vmul.f32 %v10416_v3, %v12229_v22 }
 0x3d3   : > { %v3085_v59 = vpop.permute.xlu1 %3084  ;;  %3419 = vperm.xlu0 %8314, %v2901_v60   ;;  %v3607_v9 = vadd.f32 %v3110_v25, %v2711_v62  ;;  %v1173_v60 = vmul.f32 %v10408_v41, %v12228_v31  ;;  %v2584_v38 = vmul.f32 %v10418_v35, %v12230_v57  ;;  %v1814_v61 = vmul.f32 %v10416_v3, %v12231_v36  ;;  %v12239_v62 = vld [vmem:[#allocation270_spill] sm:$0xff]  ;;  %v12240_v32 = vld [vmem:[#allocation49_spill] sm:$0xff] }
 0x3d4   : > { %v7522_v24 = vpack.c.bf16 %v3729_v34, %v3728_v58  ;;  %v3602_v17 = vadd.f32 %v3085_v59, %v2706_v45  ;;  %3394 = vperm.xlu1 %8315, %v2896_v10   ;;  %v12232_v34 = vld [vmem:[#allocation269_spill] sm:$0xff]  ;;  %v2713_v58 = vadd.f32 %v2585_v11, %v1941_v48  ;;  %v1943_v28 = vadd.f32 %v1815_v6, %v1171_v37  ;;  %v12237_v48 = vld [vmem:[#allocation47_spill] sm:$0xff] }
 0x3d5   : > { %v2587_v0 = vmul.f32 %v10418_v35, %v12232_v34  ;;  %v1942_v4 = vadd.f32 %v1814_v61, %v1170_v23  ;;  %v1172_v21 = vmul.f32 %v10408_v41, %v12233_v52  ;;  %v3735_v12 = vmax.f32 %v3607_v9, 0.0  ;;  %v2904_v11 = vld [vmem:[%s11771_s2 + $0x320] sm:$0xff] }
 0x3d6   : > { %7782 = vst [vmem:[#allocation2 + $0x70] sm:$0xff] %v7522_v24   ;;  %v3730_v19 = vmax.f32 %v3602_v17, 0.0  ;;  %v3120_v1 = vpop.permute.xlu0 %3119  ;;  %v2712_v47 = vadd.f32 %v2584_v38, %v1940_v40  ;;  %v1945_v24 = vadd.f32 %v1817_v54, %v1173_v60  ;;  %v12234_v17 = vld [vmem:[#allocation170_spill] sm:$0xff]  ;;  %v1816_v16 = vmul.f32 %v10416_v3, %v12235_v56  ;;  %v12243_v40 = vld [vmem:[#allocation175_spill] sm:$0xff]  ;;  %v2911_v54 = vld [vmem:[%s11771_s2 + $0x358] sm:$0xff] }
 0x3d7   : > { %v3095_v8 = vpop.permute.xlu1 %3094  ;;  %3429 = vperm.xlu0 %8314, %v2903_v53   ;;  %v3609_v2 = vadd.f32 %v3120_v1, %v2713_v58  ;;  %v2586_v53 = vmul.f32 %v10418_v35, %v12234_v17  ;;  %v2909_v1 = vld [vmem:[%s11771_s2 + $0x348] sm:$0xff]  ;;  %v1175_v42 = vmul.f32 %v10408_v41, %v12237_v48  ;;  %v1819_v55 = vmul.f32 %v10416_v3, %v12238_v39  ;;  %v12245_v38 = vld [vmem:[#allocation272_spill] sm:$0xff]  ;;  %v12247_v52 = vld [vmem:[#allocation177_spill] sm:$0xff] }
 0x3d8   : > { %v7527_v46 = vpack.c.bf16 %v3731_v15, %v3730_v19  ;;  %v3604_v18 = vadd.f32 %v3095_v8, %v2708_v5  ;;  %3404 = vperm.xlu1 %8315, %v2898_v20   ;;  %v12236_v20 = vld [vmem:[#allocation271_spill] sm:$0xff]  ;;  %v2715_v15 = vadd.f32 %v2587_v0, %v1943_v28  ;;  %v1944_v44 = vadd.f32 %v1816_v16, %v1172_v21  ;;  %v12246_v28 = vld [vmem:[#allocation174_spill] sm:$0xff]  ;;  %v12250_v56 = vld [vmem:[#allocation52_spill] sm:$0xff] }
 0x3d9   : > { %v2589_v49 = vmul.f32 %v10418_v35, %v12236_v20  ;;  %v2714_v8 = vadd.f32 %v2586_v53, %v1942_v4  ;;  %v1177_v6 = vmul.f32 %v10408_v41, %v12240_v32  ;;  %v1821_v23 = vmul.f32 %v10416_v3, %v12241_v26  ;;  %v12249_v17 = vld [vmem:[#allocation51_spill] sm:$0xff]  ;;  %v12251_v20 = vld [vmem:[#allocation274_spill] sm:$0xff]  ;;  %v12252_v39 = vld [vmem:[#allocation53_spill] sm:$0xff] }
 0x3da   : > { %7783 = vst [vmem:[#allocation2 + $0x78] sm:$0xff] %v7527_v46   ;;  %v3732_v51 = vmax.f32 %v3604_v18, 0.0  ;;  %v3130_v30 = vpop.permute.xlu0 %3129  ;;  %v1174_v46 = vmul.f32 %v10408_v41, %v12239_v62  ;;  %v3737_v18 = vmax.f32 %v3609_v2, 0.0  ;;  %v1947_v57 = vadd.f32 %v1819_v55, %v1175_v42 }
 0x3db   : > { %v3105_v10 = vpop.permute.xlu1 %3104  ;;  %3439 = vperm.xlu0 %8314, %v2905_v13   ;;  %v3611_v13 = vadd.f32 %v3130_v30, %v2715_v15  ;;  %v2717_v31 = vadd.f32 %v2589_v49, %v1945_v24  ;;  %v1176_v36 = vmul.f32 %v10408_v41, %v12245_v38  ;;  %v2590_v4 = vmul.f32 %v10418_v35, %v12246_v28  ;;  %v2908_v15 = vld [vmem:[%s11771_s2 + $0x340] sm:$0xff]  ;;  %v12261_v28 = vld [vmem:[#allocation55_spill] sm:$0xff] }
 0x3dc   : > { %v7532_v25 = vpack.c.bf16 %v3733_v33, %v3732_v51  ;;  %v3606_v45 = vadd.f32 %v3105_v10, %v2710_v27  ;;  %3414 = vperm.xlu1 %8315, %v2900_v14   ;;  %v12242_v27 = vld [vmem:[#allocation172_spill] sm:$0xff]  ;;  %v1818_v33 = vmul.f32 %v10416_v3, %v12243_v40  ;;  %v12244_v51 = vld [vmem:[#allocation273_spill] sm:$0xff]  ;;  %v1820_v21 = vmul.f32 %v10416_v3, %v12247_v52 }
 0x3dd   : > { %v2588_v14 = vmul.f32 %v10418_v35, %v12242_v27  ;;  %v2591_v30 = vmul.f32 %v10418_v35, %v12244_v51  ;;  %v2906_v10 = vld [vmem:[%s11771_s2 + $0x330] sm:$0xff]  ;;  %v3739_v0 = vmax.f32 %v3611_v13, 0.0  ;;  %v1179_v53 = vmul.f32 %v10408_v41, %v12249_v17 }
 0x3de   : > { %7784 = vst [vmem:[#allocation2 + $0x80] sm:$0xff] %v7532_v25   ;;  %v3734_v59 = vmax.f32 %v3606_v45, 0.0  ;;  %v3140_v29 = vpop.permute.xlu0 %3139  ;;  %v1946_v34 = vadd.f32 %v1818_v33, %v1174_v46  ;;  %v1823_v16 = vmul.f32 %v10416_v3, %v12250_v56  ;;  %v1178_v49 = vmul.f32 %v10408_v41, %v12251_v20  ;;  %v12255_v46 = vld [vmem:[#allocation179_spill] sm:$0xff]  ;;  %v12262_v52 = vld [vmem:[#allocation56_spill] sm:$0xff]  ;;  %v12264_v56 = vld [vmem:[#allocation57_spill] sm:$0xff] }
 0x3df   : > { %v3115_v5 = vpop.permute.xlu1 %3114  ;;  %3449 = vperm.xlu0 %8314, %v2907_v43   ;;  %v2716_v61 = vadd.f32 %v2588_v14, %v1944_v44  ;;  %v3613_v58 = vadd.f32 %v3140_v29, %v2717_v31  ;;  %v1949_v43 = vadd.f32 %v1821_v23, %v1177_v6  ;;  %v2913_v29 = vld [vmem:[%s11771_s2 + $0x368] sm:$0xff]  ;;  %v1181_v55 = vmul.f32 %v10408_v41, %v12252_v39  ;;  %v2915_v23 = vld [vmem:[%s11771_s2 + $0x378] sm:$0xff]  ;;  %v2910_v33 = vld [vmem:[%s11771_s2 + $0x350] sm:$0xff] }
 0x3e0   : > { %v7537_v7 = vpack.c.bf16 %v3735_v12, %v3734_v59  ;;  %v3608_v19 = vadd.f32 %v3115_v5, %v2712_v47  ;;  %3424 = vperm.xlu1 %8315, %v2902_v50   ;;  %v12248_v12 = vld [vmem:[#allocation275_spill] sm:$0xff]  ;;  %v2719_v59 = vadd.f32 %v2591_v30, %v1947_v57  ;;  %v1948_v5 = vadd.f32 %v1820_v21, %v1176_v36  ;;  %v12253_v44 = vld [vmem:[#allocation54_spill] sm:$0xff]  ;;  %v12259_v36 = vld [vmem:[#allocation181_spill] sm:$0xff] }
 0x3e1   : > { %v2593_v2 = vmul.f32 %v10418_v35, %v12248_v12  ;;  %v2718_v42 = vadd.f32 %v2590_v4, %v1946_v34  ;;  %v1951_v27 = vadd.f32 %v1823_v16, %v1179_v53  ;;  %v12258_v57 = vld [vmem:[#allocation178_spill] sm:$0xff]  ;;  %v12260_v34 = vld [vmem:[#allocation279_spill] sm:$0xff]  ;;  %v1183_v4 = vmul.f32 %v10408_v41, %v12261_v28 }
 0x3e2   : > { %7785 = vst [vmem:[#allocation2 + $0x88] sm:$0xff] %v7537_v7   ;;  %v3736_v63 = vmax.f32 %v3608_v19, 0.0  ;;  %v3150_v37 = vpop.permute.xlu0 %3149  ;;  %v3741_v7 = vmax.f32 %v3613_v58, 0.0  ;;  %v2594_v38 = vmul.f32 %v10418_v35, %v12258_v57  ;;  %v1827_v21 = vmul.f32 %v10416_v3, %v12262_v52  ;;  %v12273_v57 = vld [vmem:[#allocation59_spill] sm:$0xff]  ;;  %v12276_v52 = vld [vmem:[#allocation61_spill] sm:$0xff] }
 0x3e3   : > { %v3125_v9 = vpop.permute.xlu1 %3124  ;;  %3459 = vperm.xlu0 %8314, %v2909_v1   ;;  %v3615_v19 = vadd.f32 %v3150_v37, %v2719_v59  ;;  %v2721_v32 = vadd.f32 %v2593_v2, %v1949_v43  ;;  %v2912_v59 = vld [vmem:[%s11771_s2 + $0x360] sm:$0xff]  ;;  %v1185_v16 = vmul.f32 %v10408_v41, %v12264_v56 }
 0x3e4   : > { %v7542_v60 = vpack.c.bf16 %v3737_v18, %v3736_v63  ;;  %v3610_v22 = vadd.f32 %v3125_v9, %v2714_v8  ;;  %3434 = vperm.xlu1 %8315, %v2904_v11   ;;  %v1825_v8 = vmul.f32 %v10416_v3, %v12253_v44  ;;  %v12254_v11 = vld [vmem:[#allocation176_spill] sm:$0xff]  ;;  %v1822_v18 = vmul.f32 %v10416_v3, %v12255_v46  ;;  %v12256_v63 = vld [vmem:[#allocation277_spill] sm:$0xff] }
 0x3e5   : > { %v2592_v62 = vmul.f32 %v10418_v35, %v12254_v11  ;;  %v2595_v37 = vmul.f32 %v10418_v35, %v12256_v63  ;;  %v12257_v9 = vld [vmem:[#allocation276_spill] sm:$0xff]  ;;  %v3743_v30 = vmax.f32 %v3615_v19, 0.0  ;;  %v1955_v11 = vadd.f32 %v1827_v21, %v1183_v4 }
 0x3e6   : > { %7786 = vst [vmem:[#allocation2 + $0x90] sm:$0xff] %v7542_v60   ;;  %v3738_v25 = vmax.f32 %v3610_v22, 0.0  ;;  %v3160_v45 = vpop.permute.xlu0 %3159  ;;  %v1950_v14 = vadd.f32 %v1822_v18, %v1178_v49  ;;  %v1180_v51 = vmul.f32 %v10408_v41, %v12257_v9  ;;  %v12266_v49 = vld [vmem:[#allocation180_spill] sm:$0xff]  ;;  %v1189_v21 = vmul.f32 %v10408_v41, %v12276_v52 }
 0x3e7   : > { %v3135_v50 = vpop.permute.xlu1 %3134  ;;  %3469 = vperm.xlu0 %8314, %v2911_v54   ;;  %v2720_v40 = vadd.f32 %v2592_v62, %v1948_v5  ;;  %v3617_v31 = vadd.f32 %v3160_v45, %v2721_v32  ;;  %v1953_v54 = vadd.f32 %v1825_v8, %v1181_v55  ;;  %v2723_v58 = vadd.f32 %v2595_v37, %v1951_v27  ;;  %v2917_v45 = vld [vmem:[%s11771_s2 + $0x388] sm:$0xff]  ;;  %v2919_v8 = vld [vmem:[%s11771_s2 + $0x398] sm:$0xff] }
 0x3e8   : > { %v7547_v47 = vpack.c.bf16 %v3739_v0, %v3738_v25  ;;  %v3612_v24 = vadd.f32 %v3135_v50, %v2716_v61  ;;  %3444 = vperm.xlu1 %8315, %v2906_v10   ;;  %v1824_v61 = vmul.f32 %v10416_v3, %v12259_v36  ;;  %v2597_v0 = vmul.f32 %v10418_v35, %v12260_v34  ;;  %v12263_v50 = vld [vmem:[#allocation278_spill] sm:$0xff]  ;;  %v12269_v46 = vld [vmem:[#allocation280_spill] sm:$0xff] }
 0x3e9   : > { %v1182_v12 = vmul.f32 %v10408_v41, %v12263_v50  ;;  %v2722_v2 = vadd.f32 %v2594_v38, %v1950_v14  ;;  %v12265_v5 = vld [vmem:[#allocation58_spill] sm:$0xff]  ;;  %v1184_v18 = vmul.f32 %v10408_v41, %v12269_v46  ;;  %v1187_v38 = vmul.f32 %v10408_v41, %v12273_v57  ;;  %v12274_v36 = vld [vmem:[#allocation60_spill] sm:$0xff]  ;;  %v12283_v46 = vld [vmem:[#allocation193_spill] sm:$0xff] }
 0x3ea   : > { %7787 = vst [vmem:[#allocation2 + $0x98] sm:$0xff] %v7547_v47   ;;  %v3740_v1 = vmax.f32 %v3612_v24, 0.0  ;;  %v3170_v48 = vpop.permute.xlu0 %3169  ;;  %v1952_v47 = vadd.f32 %v1824_v61, %v1180_v51  ;;  %v3745_v24 = vmax.f32 %v3617_v31, 0.0  ;;  %v1829_v20 = vmul.f32 %v10416_v3, %v12265_v5  ;;  %v12270_v27 = vld [vmem:[#allocation182_spill] sm:$0xff] }
 0x3eb   : > { %v3145_v13 = vpop.permute.xlu1 %3144  ;;  %3479 = vperm.xlu0 %8314, %v2913_v29   ;;  %v3619_v29 = vadd.f32 %v3170_v48, %v2723_v58  ;;  %v2725_v39 = vadd.f32 %v2597_v0, %v1953_v54  ;;  %v2598_v14 = vmul.f32 %v10418_v35, %v12270_v27  ;;  %v12272_v51 = vld [vmem:[#allocation186_spill] sm:$0xff]  ;;  %v1831_v61 = vmul.f32 %v10416_v3, %v12274_v36  ;;  %v12275_v58 = vld [vmem:[#allocation281_spill] sm:$0xff]  ;;  %v12285_v27 = vld [vmem:[#allocation63_spill] sm:$0xff] }
 0x3ec   : > { %v7552_v6 = vpack.c.bf16 %v3741_v7, %v3740_v1  ;;  %v3614_v26 = vadd.f32 %v3145_v13, %v2718_v42  ;;  %3454 = vperm.xlu1 %8315, %v2908_v15   ;;  %v2596_v15 = vmul.f32 %v10418_v35, %v12266_v49  ;;  %v12267_v7 = vld [vmem:[#allocation184_spill] sm:$0xff]  ;;  %v12268_v42 = vld [vmem:[#allocation183_spill] sm:$0xff]  ;;  %v2916_v0 = vld [vmem:[%s11771_s2 + $0x380] sm:$0xff] }
 0x3ed   : > { %v1826_v19 = vmul.f32 %v10416_v3, %v12267_v7  ;;  %v2599_v48 = vmul.f32 %v10418_v35, %v12268_v42  ;;  %v2914_v13 = vld [vmem:[%s11771_s2 + $0x370] sm:$0xff]  ;;  %v3747_v63 = vmax.f32 %v3619_v29, 0.0  ;;  %v12277_v50 = vld [vmem:[#allocation62_spill] sm:$0xff]  ;;  %v1959_v49 = vadd.f32 %v1831_v61, %v1187_v38  ;;  %v12288_v36 = vld [vmem:[#allocation65_spill] sm:$0xff] }
 0x3ee   : > { %7788 = vst [vmem:[#allocation2 + $0xa0] sm:$0xff] %v7552_v6   ;;  %v3742_v60 = vmax.f32 %v3614_v26, 0.0  ;;  %v3180_v22 = vpop.permute.xlu0 %3179  ;;  %v2724_v26 = vadd.f32 %v2596_v15, %v1952_v47  ;;  %v12279_v47 = vld [vmem:[#allocation190_spill] sm:$0xff]  ;;  %v1193_v61 = vmul.f32 %v10408_v41, %v12288_v36 }
 0x3ef   : > { %v3155_v10 = vpop.permute.xlu1 %3154  ;;  %3489 = vperm.xlu0 %8314, %v2915_v23   ;;  %v1954_v62 = vadd.f32 %v1826_v19, %v1182_v12  ;;  %v3621_v37 = vadd.f32 %v3180_v22, %v2725_v39  ;;  %v1957_v23 = vadd.f32 %v1829_v20, %v1185_v16  ;;  %v2727_v31 = vadd.f32 %v2599_v48, %v1955_v11  ;;  %v2921_v22 = vld [vmem:[%s11771_s2 + $0x3a8] sm:$0xff]  ;;  %v2923_v20 = vld [vmem:[%s11771_s2 + $0x3b8] sm:$0xff] }
 0x3f0   : > { %v7557_v25 = vpack.c.bf16 %v3743_v30, %v3742_v60  ;;  %v3616_v43 = vadd.f32 %v3155_v10, %v2720_v40  ;;  %3464 = vperm.xlu1 %8315, %v2910_v33   ;;  %v12271_v40 = vld [vmem:[#allocation187_spill] sm:$0xff]  ;;  %v2601_v30 = vmul.f32 %v10418_v35, %v12272_v51  ;;  %v1833_v12 = vmul.f32 %v10416_v3, %v12277_v50  ;;  %v12281_v15 = vld [vmem:[#allocation282_spill] sm:$0xff]  ;;  %v12282_v11 = vld [vmem:[#allocation188_spill] sm:$0xff] }
 0x3f1   : > { %v1828_v33 = vmul.f32 %v10416_v3, %v12271_v40  ;;  %v2726_v34 = vadd.f32 %v2598_v14, %v1954_v62  ;;  %v1188_v7 = vmul.f32 %v10408_v41, %v12281_v15  ;;  %v2602_v62 = vmul.f32 %v10418_v35, %v12282_v11  ;;  %v12286_v40 = vld [vmem:[#allocation64_spill] sm:$0xff]  ;;  %v12287_v51 = vld [vmem:[#allocation283_spill] sm:$0xff] }
 0x3f2   : > { %7789 = vst [vmem:[#allocation2 + $0xa8] sm:$0xff] %v7557_v25   ;;  %v3744_v17 = vmax.f32 %v3616_v43, 0.0  ;;  %v3190_v53 = vpop.permute.xlu0 %3189  ;;  %v1186_v25 = vmul.f32 %v10408_v41, %v12275_v58  ;;  %v3749_v43 = vmax.f32 %v3621_v37, 0.0  ;;  %v2729_v56 = vadd.f32 %v2601_v30, %v1957_v23  ;;  %v12297_v11 = vld [vmem:[#allocation67_spill] sm:$0xff] }
 0x3f3   : > { %v3165_v1 = vpop.permute.xlu1 %3164  ;;  %3499 = vperm.xlu0 %8314, %v2917_v45   ;;  %v1956_v10 = vadd.f32 %v1828_v33, %v1184_v18  ;;  %v3623_v45 = vadd.f32 %v3190_v53, %v2727_v31  ;;  %v1832_v18 = vmul.f32 %v10416_v3, %v12283_v46  ;;  %v1191_v14 = vmul.f32 %v10408_v41, %v12285_v27  ;;  %v2920_v31 = vld [vmem:[%s11771_s2 + $0x3a0] sm:$0xff]  ;;  %v12298_v46 = vld [vmem:[#allocation68_spill] sm:$0xff] }
 0x3f4   : > { %v7562_v55 = vpack.c.bf16 %v3745_v24, %v3744_v17  ;;  %v3618_v44 = vadd.f32 %v3165_v1, %v2722_v2  ;;  %3474 = vperm.xlu1 %8315, %v2912_v59   ;;  %v12278_v2 = vld [vmem:[#allocation185_spill] sm:$0xff]  ;;  %v1830_v24 = vmul.f32 %v10416_v3, %v12279_v47  ;;  %v2918_v1 = vld [vmem:[%s11771_s2 + $0x390] sm:$0xff]  ;;  %v1835_v33 = vmul.f32 %v10416_v3, %v12286_v40 }
 0x3f5   : > { %v2600_v59 = vmul.f32 %v10418_v35, %v12278_v2  ;;  %v12280_v17 = vld [vmem:[#allocation189_spill] sm:$0xff]  ;;  %v3751_v48 = vmax.f32 %v3623_v45, 0.0  ;;  %v1190_v30 = vmul.f32 %v10408_v41, %v12287_v51 }
 0x3f6   : > { %7790 = vst [vmem:[#allocation2 + $0xb0] sm:$0xff] %v7562_v55   ;;  %v3746_v32 = vmax.f32 %v3618_v44, 0.0  ;;  %v3200_v6 = vpop.permute.xlu0 %3199  ;;  %v2603_v53 = vmul.f32 %v10418_v35, %v12280_v17  ;;  %v1958_v42 = vadd.f32 %v1830_v24, %v1186_v25  ;;  %v12291_v25 = vld [vmem:[#allocation196_spill] sm:$0xff]  ;;  %v1963_v2 = vadd.f32 %v1835_v33, %v1191_v14  ;;  %v12300_v40 = vld [vmem:[#allocation69_spill] sm:$0xff] }
 0x3f7   : > { %v3175_v9 = vpop.permute.xlu1 %3174  ;;  %3509 = vperm.xlu0 %8314, %v2919_v8   ;;  %v2728_v19 = vadd.f32 %v2600_v59, %v1956_v10  ;;  %v3625_v39 = vadd.f32 %v3200_v6, %v2729_v56  ;;  %v1961_v8 = vadd.f32 %v1833_v12, %v1189_v21  ;;  %v2925_v6 = vld [vmem:[%s11771_s2 + $0x3c8] sm:$0xff]  ;;  %v2927_v12 = vld [vmem:[%s11771_s2 + $0x3d8] sm:$0xff]  ;;  %v2922_v24 = vld [vmem:[%s11771_s2 + $0x3b0] sm:$0xff]  ;;  %v1197_v33 = vmul.f32 %v10408_v41, %v12300_v40 }
 0x3f8   : > { %v7567_v60 = vpack.c.bf16 %v3747_v63, %v3746_v32  ;;  %v3620_v54 = vadd.f32 %v3175_v9, %v2724_v26  ;;  %3484 = vperm.xlu1 %8315, %v2914_v13   ;;  %v12284_v63 = vld [vmem:[#allocation192_spill] sm:$0xff]  ;;  %v2731_v32 = vadd.f32 %v2603_v53, %v1959_v49  ;;  %v1960_v9 = vadd.f32 %v1832_v18, %v1188_v7  ;;  %v12289_v10 = vld [vmem:[#allocation66_spill] sm:$0xff]  ;;  %v12295_v7 = vld [vmem:[#allocation199_spill] sm:$0xff] }
 0x3f9   : > { %v2605_v37 = vmul.f32 %v10418_v35, %v12284_v63  ;;  %v2730_v38 = vadd.f32 %v2602_v62, %v1958_v42  ;;  %v12294_v49 = vld [vmem:[#allocation194_spill] sm:$0xff]  ;;  %v1195_v62 = vmul.f32 %v10408_v41, %v12297_v11  ;;  %v1839_v18 = vmul.f32 %v10416_v3, %v12298_v46 }
 0x3fa   : > { %7791 = vst [vmem:[#allocation2 + $0xb8] sm:$0xff] %v7567_v60   ;;  %v3748_v28 = vmax.f32 %v3620_v54, 0.0  ;;  %v3210_v4 = vpop.permute.xlu0 %3209  ;;  %v3753_v60 = vmax.f32 %v3625_v39, 0.0  ;;  %v2606_v15 = vmul.f32 %v10418_v35, %v12294_v49  ;;  %v12296_v42 = vld [vmem:[#allocation198_spill] sm:$0xff] }
 0x3fb   : > { %v3185_v29 = vpop.permute.xlu1 %3184  ;;  %3519 = vperm.xlu0 %8314, %v2921_v22   ;;  %v3627_v54 = vadd.f32 %v3210_v4, %v2731_v32  ;;  %v2733_v52 = vadd.f32 %v2605_v37, %v1961_v8  ;;  %v2924_v32 = vld [vmem:[%s11771_s2 + $0x3c0] sm:$0xff] }
 0x3fc   : > { %v7572_v16 = vpack.c.bf16 %v3749_v43, %v3748_v28  ;;  %v3622_v5 = vadd.f32 %v3185_v29, %v2726_v34  ;;  %3494 = vperm.xlu1 %8315, %v2916_v0   ;;  %v1837_v34 = vmul.f32 %v10416_v3, %v12289_v10  ;;  %v12290_v0 = vld [vmem:[#allocation191_spill] sm:$0xff]  ;;  %v1834_v43 = vmul.f32 %v10416_v3, %v12291_v25  ;;  %v12293_v29 = vld [vmem:[#allocation284_spill] sm:$0xff]  ;;  %v12305_v25 = vld [vmem:[#allocation286_spill] sm:$0xff] }
 0x3fd   : > { %v2604_v58 = vmul.f32 %v10418_v35, %v12290_v0  ;;  %v12292_v28 = vld [vmem:[#allocation195_spill] sm:$0xff]  ;;  %v1192_v17 = vmul.f32 %v10408_v41, %v12293_v29  ;;  %v3755_v53 = vmax.f32 %v3627_v54, 0.0  ;;  %v1967_v0 = vadd.f32 %v1839_v18, %v1195_v62  ;;  %v12312_v62 = vld [vmem:[#allocation73_spill] sm:$0xff]  ;;  %v12313_v18 = vld [vmem:[#allocation74_spill] sm:$0xff] }
 0x3fe   : > { %7792 = vst [vmem:[#allocation2 + $0xc0] sm:$0xff] %v7572_v16   ;;  %v3750_v55 = vmax.f32 %v3622_v5, 0.0  ;;  %v3220_v44 = vpop.permute.xlu0 %3219  ;;  %v2607_v4 = vmul.f32 %v10418_v35, %v12292_v28  ;;  %v1962_v59 = vadd.f32 %v1834_v43, %v1190_v30  ;;  %v12302_v30 = vld [vmem:[#allocation197_spill] sm:$0xff]  ;;  %v1196_v43 = vmul.f32 %v10408_v41, %v12305_v25  ;;  %v12320_v25 = vld [vmem:[#allocation208_spill] sm:$0xff] }
 0x3ff   : > { %v3195_v13 = vpop.permute.xlu1 %3194  ;;  %3529 = vperm.xlu0 %8314, %v2923_v20   ;;  %v2732_v47 = vadd.f32 %v2604_v58, %v1960_v9  ;;  %v3629_v56 = vadd.f32 %v3220_v44, %v2733_v52  ;;  %v1965_v20 = vadd.f32 %v1837_v34, %v1193_v61  ;;  %v2929_v44 = vld [vmem:[%s11771_s2 + $0x3e8] sm:$0xff]  ;;  %v2931_v34 = vld [vmem:[%s11771_s2 + $0x3f8] sm:$0xff]  ;;  %v1201_v46 = vmul.f32 %v10408_v41, %v12312_v62 }
 0x400   : > { %v7577_v26 = vpack.c.bf16 %v3751_v48, %v3750_v55  ;;  %v3624_v23 = vadd.f32 %v3195_v13, %v2728_v19  ;;  %3504 = vperm.xlu1 %8315, %v2918_v1   ;;  %v1836_v19 = vmul.f32 %v10416_v3, %v12295_v7  ;;  %v2609_v48 = vmul.f32 %v10418_v35, %v12296_v42  ;;  %v12299_v13 = vld [vmem:[#allocation285_spill] sm:$0xff]  ;;  %v12301_v9 = vld [vmem:[#allocation70_spill] sm:$0xff] }
 0x401   : > { %v2735_v39 = vadd.f32 %v2607_v4, %v1963_v2  ;;  %v1194_v63 = vmul.f32 %v10408_v41, %v12299_v13  ;;  %v2734_v37 = vadd.f32 %v2606_v15, %v1962_v59  ;;  %v1841_v51 = vmul.f32 %v10416_v3, %v12301_v9  ;;  %v12306_v2 = vld [vmem:[#allocation200_spill] sm:$0xff]  ;;  %v2928_v42 = vld [vmem:[%s11771_s2 + $0x3e0] sm:$0xff] }
 0x402   : > { %7793 = vst [vmem:[#allocation2 + $0xc8] sm:$0xff] %v7577_v26   ;;  %v3752_v22 = vmax.f32 %v3624_v23, 0.0  ;;  %v3230_v57 = vpop.permute.xlu0 %3229  ;;  %v1964_v26 = vadd.f32 %v1836_v19, %v1192_v17  ;;  %v3757_v23 = vmax.f32 %v3629_v56, 0.0  ;;  %v2737_v36 = vadd.f32 %v2609_v48, %v1965_v20  ;;  %v12308_v17 = vld [vmem:[#allocation288_spill] sm:$0xff]  ;;  %v12311_v48 = vld [vmem:[#allocation287_spill] sm:$0xff] }
 0x403   : > { %v3205_v45 = vpop.permute.xlu1 %3204  ;;  %3539 = vperm.xlu0 %8314, %v2925_v6   ;;  %v3631_v6 = vadd.f32 %v3230_v57, %v2735_v39  ;;  %v2610_v59 = vmul.f32 %v10418_v35, %v12306_v2  ;;  %v12310_v15 = vld [vmem:[#allocation72_spill] sm:$0xff]  ;;  %v1198_v39 = vmul.f32 %v10408_v41, %v12311_v48  ;;  %v1845_v13 = vmul.f32 %v10416_v3, %v12313_v18 }
 0x404   : > { %v7582_v21 = vpack.c.bf16 %v3753_v60, %v3752_v22  ;;  %v3626_v50 = vadd.f32 %v3205_v45, %v2730_v38  ;;  %3514 = vperm.xlu1 %8315, %v2920_v31   ;;  %v2608_v31 = vmul.f32 %v10418_v35, %v12302_v30  ;;  %v12303_v60 = vld [vmem:[#allocation202_spill] sm:$0xff]  ;;  %v12304_v38 = vld [vmem:[#allocation201_spill] sm:$0xff]  ;;  %v2926_v45 = vld [vmem:[%s11771_s2 + $0x3d0] sm:$0xff]  ;;  %v1843_v7 = vmul.f32 %v10416_v3, %v12310_v15 }
 0x405   : > { %v1838_v54 = vmul.f32 %v10416_v3, %v12303_v60  ;;  %v2611_v57 = vmul.f32 %v10418_v35, %v12304_v38  ;;  %v3759_v28 = vmax.f32 %v3631_v6, 0.0  ;;  %v12316_v6 = vld [vmem:[#allocation290_spill] sm:$0xff]  ;;  %v2930_v60 = vld [vmem:[%s11771_s2 + $0x3f0] sm:$0xff] }
 0x406   : > { %7794 = vst [vmem:[#allocation2 + $0xd0] sm:$0xff] %v7582_v21   ;;  %v3754_v16 = vmax.f32 %v3626_v50, 0.0  ;;  %v3240_v5 = vpop.permute.xlu0 %3239  ;;  %v2736_v50 = vadd.f32 %v2608_v31, %v1964_v26  ;;  %v12325_v15 = vld [vmem:[#allocation78_spill] sm:$0xff] }
 0x407   : > { %v3215_v1 = vpop.permute.xlu1 %3214  ;;  %3549 = vperm.xlu0 %8314, %v2927_v12   ;;  %v1966_v58 = vadd.f32 %v1838_v54, %v1194_v63  ;;  %v3633_v4 = vadd.f32 %v3240_v5, %v2737_v36  ;;  %v1969_v12 = vadd.f32 %v1841_v51, %v1197_v33  ;;  %v2739_v56 = vadd.f32 %v2611_v57, %v1967_v0  ;;  %v12309_v5 = vld [vmem:[#allocation71_spill] sm:$0xff]  ;;  %v12317_v51 = vld [vmem:[#allocation289_spill] sm:$0xff] }
 0x408   : > { %v7587_v55 = vpack.c.bf16 %v3755_v53, %v3754_v16  ;;  %v3628_v8 = vadd.f32 %v3215_v1, %v2732_v47  ;;  %3524 = vperm.xlu1 %8315, %v2922_v24   ;;  %v12307_v47 = vld [vmem:[#allocation204_spill] sm:$0xff]  ;;  %v2613_v53 = vmul.f32 %v10418_v35, %v12308_v17  ;;  %v1199_v49 = vmul.f32 %v10408_v41, %v12309_v5  ;;  %v12314_v63 = vld [vmem:[#allocation203_spill] sm:$0xff]  ;;  %v12319_v0 = vld [vmem:[#allocation205_spill] sm:$0xff] }
 0x409   : > { %v1840_v24 = vmul.f32 %v10416_v3, %v12307_v47  ;;  %v2738_v1 = vadd.f32 %v2610_v59, %v1966_v58  ;;  %v1200_v30 = vmul.f32 %v10408_v41, %v12317_v51  ;;  %v2614_v58 = vmul.f32 %v10418_v35, %v12319_v0  ;;  %v12323_v47 = vld [vmem:[#allocation291_spill] sm:$0xff]  ;;  %v12324_v5 = vld [vmem:[#allocation77_spill] sm:$0xff] }
 0x40a   : > { %7795 = vst [vmem:[#allocation2 + $0xd8] sm:$0xff] %v7587_v55   ;;  %v3756_v27 = vmax.f32 %v3628_v8, 0.0  ;;  %v3250_v14 = vpop.permute.xlu0 %3249  ;;  %v3761_v55 = vmax.f32 %v3633_v4, 0.0  ;;  %v1971_v9 = vadd.f32 %v1843_v7, %v1199_v49  ;;  %v1205_v49 = vmul.f32 %v10408_v41, %v12324_v5 }
 0x40b   : > { %v3225_v22 = vpop.permute.xlu1 %3224  ;;  %3559 = vperm.xlu0 %8314, %v2929_v44   ;;  %v1968_v19 = vadd.f32 %v1840_v24, %v1196_v43  ;;  %v3635_v8 = vadd.f32 %v3250_v14, %v2739_v56  ;;  %v2741_v14 = vadd.f32 %v2613_v53, %v1969_v12  ;;  %v1844_v43 = vmul.f32 %v10416_v3, %v12320_v25  ;;  %v12322_v12 = vld [vmem:[#allocation76_spill] sm:$0xff] }
 0x40c   : > { %v7592_v61 = vpack.c.bf16 %v3757_v23, %v3756_v27  ;;  %v3630_v10 = vadd.f32 %v3225_v22, %v2734_v37  ;;  %3534 = vperm.xlu1 %8315, %v2924_v32   ;;  %v2612_v37 = vmul.f32 %v10418_v35, %v12314_v63  ;;  %v12315_v32 = vld [vmem:[#allocation206_spill] sm:$0xff]  ;;  %v2615_v27 = vmul.f32 %v10418_v35, %v12316_v6  ;;  %v12329_v63 = vld [vmem:[#allocation293_spill] sm:$0xff] }
 0x40d   : > { %v1842_v26 = vmul.f32 %v10416_v3, %v12315_v32  ;;  %v3763_v22 = vmax.f32 %v3635_v8, 0.0  ;;  %v1847_v2 = vmul.f32 %v10416_v3, %v12322_v12  ;;  %v1972_v59 = vadd.f32 %v1844_v43, %v1200_v30  ;;  %v12332_v30 = vld [vmem:[#allocation296_spill] sm:$0xff]  ;;  %v12338_v12 = vld [vmem:[#allocation211_spill] sm:$0xff] }
 0x40e   : > { %7796 = vst [vmem:[#allocation2 + $0xe0] sm:$0xff] %v7592_v61   ;;  %v3758_v52 = vmax.f32 %v3630_v10, 0.0  ;;  %v3260_v21 = vpop.permute.xlu0 %3259  ;;  %v2740_v31 = vadd.f32 %v2612_v37, %v1968_v19  ;;  %v1973_v61 = vadd.f32 %v1845_v13, %v1201_v46  ;;  %v12318_v10 = vld [vmem:[#allocation75_spill] sm:$0xff]  ;;  %v1202_v24 = vmul.f32 %v10408_v41, %v12323_v47 }
 0x40f   : > { %v3235_v29 = vpop.permute.xlu1 %3234  ;;  %3569 = vperm.xlu0 %8314, %v2931_v34   ;;  %v1970_v54 = vadd.f32 %v1842_v26, %v1198_v39  ;;  %v3637_v38 = vadd.f32 %v3260_v21, %v2741_v14  ;;  %v1203_v34 = vmul.f32 %v10408_v41, %v12318_v10  ;;  %v1849_v7 = vmul.f32 %v10416_v3, %v12325_v15  ;;  %v12326_v19 = vld [vmem:[#allocation207_spill] sm:$0xff]  ;;  %v12330_v14 = vld [vmem:[#allocation209_spill] sm:$0xff] }
 0x410   : > { %v7597_v16 = vpack.c.bf16 %v3759_v28, %v3758_v52  ;;  %v3632_v20 = vadd.f32 %v3235_v29, %v2736_v50  ;;  %3544 = vperm.xlu1 %8315, %v2926_v45   ;;  %v12321_v28 = vld [vmem:[#allocation292_spill] sm:$0xff]  ;;  %v2743_v52 = vadd.f32 %v2615_v27, %v1971_v9  ;;  %v1204_v37 = vmul.f32 %v10408_v41, %v12329_v63  ;;  %v12335_v10 = vld [vmem:[#allocation295_spill] sm:$0xff] }
 0x411   : > { %v2617_v4 = vmul.f32 %v10418_v35, %v12321_v28  ;;  %v3765_v29 = vmax.f32 %v3637_v38, 0.0  ;;  %v1975_v46 = vadd.f32 %v1847_v2, %v1203_v34  ;;  %v1977_v27 = vadd.f32 %v1849_v7, %v1205_v49  ;;  %v12333_v38 = vld [vmem:[#allocation79_spill] sm:$0xff]  ;;  %v12341_v49 = vld [vmem:[#allocation297_spill] sm:$0xff] }
 0x412   : > { %7797 = vst [vmem:[#allocation2 + $0xe8] sm:$0xff] %v7597_v16   ;;  %v3760_v44 = vmax.f32 %v3632_v20, 0.0  ;;  %v3270_v11 = vpop.permute.xlu0 %3269  ;;  %v2742_v16 = vadd.f32 %v2614_v58, %v1970_v54  ;;  %v8474_v20 = vmov 0.0   ;;  %v1206_v34 = vmul.f32 %v10408_v41, %v12335_v10 }
 0x413   : > { %v3245_v23 = vpop.permute.xlu1 %3244  ;;  %v3639_v17 = vadd.f32 %v3270_v11, %v2743_v52  ;;  %4468 = vst [vmem:[#allocation3] sm:$0x1] %v8474_v20  ;;  %v2620_v2 = vmul.f32 %v10418_v35, %v12338_v12  ;;  %v1208_v15 = vmul.f32 %v10408_v41, %v12341_v49 }
 0x414   : > { %v7602_v40 = vpack.c.bf16 %v3761_v55, %v3760_v44  ;;  %v3634_v33 = vadd.f32 %v3245_v23, %v2738_v1  ;;  %3554 = vperm.xlu1 %8315, %v2928_v42   ;;  %v2616_v1 = vmul.f32 %v10418_v35, %v12326_v19  ;;  %v12327_v42 = vld [vmem:[#allocation210_spill] sm:$0xff]  ;;  %v2745_v44 = vadd.f32 %v2617_v4, %v1973_v61  ;;  %v12336_v4 = vld [vmem:[#allocation81_spill] sm:$0xff] }
 0x415   : > { %v1846_v48 = vmul.f32 %v10416_v3, %v12327_v42  ;;  %v12328_v55 = vld [vmem:[#allocation294_spill] sm:$0xff]  ;;  %v3767_v32 = vmax.f32 %v3639_v17, 0.0  ;;  %v1209_v52 = vmul.f32 %v10408_v41, %v12336_v4  ;;  %v12353_v4 = vld [vmem:[#allocation301_spill] sm:$0xff] }
 0x416   : > { %7798 = vst [vmem:[#allocation2 + $0xf0] sm:$0xff] %v7602_v40   ;;  %v3762_v57 = vmax.f32 %v3634_v33, 0.0  ;;  %v3280_v36 = vpop.permute.xlu0 %3279  ;;  %v2619_v8 = vmul.f32 %v10418_v35, %v12328_v55  ;;  %v2744_v13 = vadd.f32 %v2616_v1, %v1972_v59  ;;  %v2618_v40 = vmul.f32 %v10418_v35, %v12330_v14  ;;  %v12331_v33 = vld [vmem:[#allocation212_spill] sm:$0xff]  ;;  %v12339_v59 = vld [vmem:[#allocation214_spill] sm:$0xff]  ;;  %v12342_v55 = vld [vmem:[#allocation213_spill] sm:$0xff] }
 0x417   : > { %v3255_v45 = vpop.permute.xlu1 %3254  ;;  %v1974_v18 = vadd.f32 %v1846_v48, %v1202_v24  ;;  %v3641_v26 = vadd.f32 %v3280_v36, %v2745_v44  ;;  %v1848_v9 = vmul.f32 %v10416_v3, %v12331_v33  ;;  %v12334_v36 = vld [vmem:[#allocation80_spill] sm:$0xff]  ;;  %v1850_v47 = vmul.f32 %v10416_v3, %v12339_v59 }
 0x418   : > { %v7607_v50 = vpack.c.bf16 %v3763_v22, %v3762_v57  ;;  %v3636_v21 = vadd.f32 %v3255_v45, %v2740_v31  ;;  %3564 = vperm.xlu1 %8315, %v2930_v60   ;;  %v2621_v31 = vmul.f32 %v10418_v35, %v12332_v30  ;;  %v2747_v60 = vadd.f32 %v2619_v8, %v1975_v46  ;;  %v12343_v44 = vld [vmem:[#allocation216_spill] sm:$0xff] }
 0x419   : > { %v1207_v57 = vmul.f32 %v10408_v41, %v12333_v38  ;;  %v1851_v61 = vmul.f32 %v10416_v3, %v12334_v36  ;;  %v2746_v0 = vadd.f32 %v2618_v40, %v1974_v18  ;;  %v1976_v58 = vadd.f32 %v1848_v9, %v1204_v37  ;;  %v12344_v46 = vld [vmem:[#allocation300_spill] sm:$0xff]  ;;  %v12347_v40 = vld [vmem:[#allocation299_spill] sm:$0xff] }
 0x41a   : > { %7799 = vst [vmem:[#allocation2 + $0xf8] sm:$0xff] %v7607_v50   ;;  %v3764_v53 = vmax.f32 %v3636_v21, 0.0  ;;  %v3290_v56 = vpop.permute.xlu0 %3289  ;;  %v3769_v25 = vmax.f32 %v3641_v26, 0.0  ;;  %v12337_v50 = vld [vmem:[#allocation82_spill] sm:$0xff]  ;;  %v1978_v5 = vadd.f32 %v1850_v47, %v1206_v34  ;;  %v2622_v8 = vmul.f32 %v10418_v35, %v12342_v55  ;;  %v12359_v55 = vld [vmem:[#allocation303_spill] sm:$0xff] }
 0x41b   : > { %v3265_v39 = vpop.permute.xlu1 %3264  ;;  %v3643_v43 = vadd.f32 %v3290_v56, %v2747_v60  ;;  %v1853_v21 = vmul.f32 %v10416_v3, %v12337_v50  ;;  %v1979_v20 = vadd.f32 %v1851_v61, %v1207_v57  ;;  %v2748_v48 = vadd.f32 %v2620_v2, %v1976_v58  ;;  %v12348_v60 = vld [vmem:[#allocation85_spill] sm:$0xff]  ;;  %v12350_v57 = vld [vmem:[#allocation215_spill] sm:$0xff]  ;;  %v12351_v61 = vld [vmem:[#allocation218_spill] sm:$0xff] }
 0x41c   : > { %v7612_v11 = vpack.c.bf16 %v3765_v29, %v3764_v53  ;;  %v3638_v62 = vadd.f32 %v3265_v39, %v2742_v16  ;;  %v12340_v29 = vld [vmem:[#allocation298_spill] sm:$0xff]  ;;  %v2749_v53 = vadd.f32 %v2621_v31, %v1977_v27  ;;  %v2625_v18 = vmul.f32 %v10418_v35, %v12344_v46 }
 0x41d   : > { %v2623_v17 = vmul.f32 %v10418_v35, %v12340_v29  ;;  %v3771_v7 = vmax.f32 %v3643_v43, 0.0  ;;  %v1981_v39 = vadd.f32 %v1853_v21, %v1209_v52  ;;  %v2750_v14 = vadd.f32 %v2622_v8, %v1978_v5  ;;  %v12354_v29 = vld [vmem:[#allocation217_spill] sm:$0xff] }
 0x41e   : > { %7800 = vst [vmem:[#allocation2 + $0x100] sm:$0xff] %v7612_v11   ;;  %v3766_v23 = vmax.f32 %v3638_v62, 0.0  ;;  %v3300_v6 = vpop.permute.xlu0 %3299  ;;  %v1852_v11 = vmul.f32 %v10416_v3, %v12343_v44  ;;  %v1210_v33 = vmul.f32 %v10408_v41, %v12347_v40  ;;  %v2624_v36 = vmul.f32 %v10418_v35, %v12350_v57  ;;  %v12364_v40 = vld [vmem:[#allocation306_spill] sm:$0xff] }
 0x41f   : > { %v3275_v51 = vpop.permute.xlu1 %3274  ;;  %v3645_v19 = vadd.f32 %v3300_v6, %v2749_v53  ;;  %v1854_v10 = vmul.f32 %v10416_v3, %v12351_v61  ;;  %v1212_v52 = vmul.f32 %v10408_v41, %v12353_v4  ;;  %v12355_v53 = vld [vmem:[#allocation220_spill] sm:$0xff]  ;;  %v1214_v8 = vmul.f32 %v10408_v41, %v12359_v55 }
 0x420   : > { %v7617_v54 = vpack.c.bf16 %v3767_v32, %v3766_v23  ;;  %v3640_v22 = vadd.f32 %v3275_v51, %v2744_v13  ;;  %v2751_v13 = vadd.f32 %v2623_v17, %v1979_v20  ;;  %v12345_v32 = vld [vmem:[#allocation83_spill] sm:$0xff]  ;;  %v12346_v23 = vld [vmem:[#allocation84_spill] sm:$0xff]  ;;  %v1980_v27 = vadd.f32 %v1852_v11, %v1208_v15 }
 0x421   : > { %v1211_v26 = vmul.f32 %v10408_v41, %v12345_v32  ;;  %v1855_v6 = vmul.f32 %v10416_v3, %v12346_v23  ;;  %v3773_v9 = vmax.f32 %v3645_v19, 0.0  ;;  %v1982_v21 = vadd.f32 %v1854_v10, %v1210_v33  ;;  %v12356_v20 = vld [vmem:[#allocation304_spill] sm:$0xff]  ;;  %v12357_v19 = vld [vmem:[#allocation87_spill] sm:$0xff] }
 0x422   : > { %7801 = vst [vmem:[#allocation2 + $0x108] sm:$0xff] %v7617_v54   ;;  %v3768_v45 = vmax.f32 %v3640_v22, 0.0  ;;  %v3310_v28 = vpop.permute.xlu0 %3309  ;;  %v1213_v54 = vmul.f32 %v10408_v41, %v12348_v60  ;;  %v12349_v22 = vld [vmem:[#allocation86_spill] sm:$0xff]  ;;  %v2752_v50 = vadd.f32 %v2624_v36, %v1980_v27  ;;  %v2626_v17 = vmul.f32 %v10418_v35, %v12354_v29 }
 0x423   : > { %v3285_v24 = vpop.permute.xlu1 %3284  ;;  %v3647_v51 = vadd.f32 %v3310_v28, %v2751_v13  ;;  %v1857_v38 = vmul.f32 %v10416_v3, %v12349_v22  ;;  %v1983_v28 = vadd.f32 %v1855_v6, %v1211_v26  ;;  %v2629_v5 = vmul.f32 %v10418_v35, %v12356_v20  ;;  %v12360_v13 = vld [vmem:[#allocation89_spill] sm:$0xff]  ;;  %v12362_v26 = vld [vmem:[#allocation219_spill] sm:$0xff]  ;;  %v12363_v6 = vld [vmem:[#allocation222_spill] sm:$0xff] }
 0x424   : > { %v7622_v56 = vpack.c.bf16 %v3769_v25, %v3768_v45  ;;  %v3642_v16 = vadd.f32 %v3285_v24, %v2746_v0  ;;  %v12352_v0 = vld [vmem:[#allocation302_spill] sm:$0xff]  ;;  %v2753_v25 = vadd.f32 %v2625_v18, %v1981_v39  ;;  %v2754_v18 = vadd.f32 %v2626_v17, %v1982_v21  ;;  %v12365_v22 = vld [vmem:[#allocation305_spill] sm:$0xff] }
 0x425   : > { %v2627_v58 = vmul.f32 %v10418_v35, %v12352_v0  ;;  %v3775_v12 = vmax.f32 %v3647_v51, 0.0  ;;  %v1985_v24 = vadd.f32 %v1857_v38, %v1213_v54  ;;  %v2628_v23 = vmul.f32 %v10418_v35, %v12362_v26  ;;  %v12366_v0 = vld [vmem:[#allocation221_spill] sm:$0xff] }
 0x426   : > { %7802 = vst [vmem:[#allocation2 + $0x110] sm:$0xff] %v7622_v56   ;;  %v3770_v1 = vmax.f32 %v3642_v16, 0.0  ;;  %v3320_v42 = vpop.permute.xlu0 %3319  ;;  %v1856_v56 = vmul.f32 %v10416_v3, %v12355_v53  ;;  %v1858_v27 = vmul.f32 %v10416_v3, %v12363_v6  ;;  %v2631_v33 = vmul.f32 %v10418_v35, %v12364_v40  ;;  %v12378_v40 = vld [vmem:[#allocation225_spill] sm:$0xff] }
 0x427   : > { %v3295_v62 = vpop.permute.xlu1 %3294  ;;  %v3649_v2 = vadd.f32 %v3320_v42, %v2753_v25  ;;  %v2755_v49 = vadd.f32 %v2627_v58, %v1983_v28  ;;  %v12358_v42 = vld [vmem:[#allocation88_spill] sm:$0xff]  ;;  %v1216_v38 = vmul.f32 %v10408_v41, %v12365_v22  ;;  %v2630_v58 = vmul.f32 %v10418_v35, %v12366_v0 }
 0x428   : > { %v7627_v63 = vpack.c.bf16 %v3771_v7, %v3770_v1  ;;  %v3644_v37 = vadd.f32 %v3295_v62, %v2748_v48  ;;  %v1215_v1 = vmul.f32 %v10408_v41, %v12357_v19  ;;  %v1859_v48 = vmul.f32 %v10416_v3, %v12358_v42  ;;  %v12367_v25 = vld [vmem:[#allocation224_spill] sm:$0xff] }
 0x429   : > { %v1984_v39 = vadd.f32 %v1856_v56, %v1212_v52  ;;  %v3777_v44 = vmax.f32 %v3649_v2, 0.0  ;;  %v1986_v60 = vadd.f32 %v1858_v27, %v1214_v8  ;;  %v12368_v28 = vld [vmem:[#allocation308_spill] sm:$0xff]  ;;  %v12376_v8 = vld [vmem:[#allocation310_spill] sm:$0xff] }
 0x42a   : > { %7803 = vst [vmem:[#allocation2 + $0x118] sm:$0xff] %v7627_v63   ;;  %v3772_v30 = vmax.f32 %v3644_v37, 0.0  ;;  %v3330_v31 = vpop.permute.xlu0 %3329  ;;  %v1217_v63 = vmul.f32 %v10408_v41, %v12360_v13  ;;  %v12361_v37 = vld [vmem:[#allocation90_spill] sm:$0xff]  ;;  %v2633_v4 = vmul.f32 %v10418_v35, %v12368_v28 }
 0x42b   : > { %v3305_v34 = vpop.permute.xlu1 %3304  ;;  %v3651_v11 = vadd.f32 %v3330_v31, %v2755_v49  ;;  %v1861_v32 = vmul.f32 %v10416_v3, %v12361_v37  ;;  %v1987_v31 = vadd.f32 %v1859_v48, %v1215_v1  ;;  %v2756_v54 = vadd.f32 %v2628_v23, %v1984_v39  ;;  %v12372_v49 = vld [vmem:[#allocation93_spill] sm:$0xff]  ;;  %v12374_v1 = vld [vmem:[#allocation223_spill] sm:$0xff]  ;;  %v12375_v48 = vld [vmem:[#allocation226_spill] sm:$0xff] }
 0x42c   : > { %v7632_v43 = vpack.c.bf16 %v3773_v9, %v3772_v30  ;;  %v3646_v45 = vadd.f32 %v3305_v34, %v2750_v14  ;;  %v2757_v9 = vadd.f32 %v2629_v5, %v1985_v24  ;;  %v12371_v24 = vld [vmem:[#allocation307_spill] sm:$0xff]  ;;  %v2758_v17 = vadd.f32 %v2630_v58, %v1986_v60 }
 0x42d   : > { %v3779_v57 = vmax.f32 %v3651_v11, 0.0  ;;  %v1989_v34 = vadd.f32 %v1861_v32, %v1217_v63  ;;  %v2759_v52 = vadd.f32 %v2631_v33, %v1987_v31  ;;  %v1218_v29 = vmul.f32 %v10408_v41, %v12371_v24  ;;  %v12377_v63 = vld [vmem:[#allocation309_spill] sm:$0xff]  ;;  %v12380_v31 = vld [vmem:[#allocation312_spill] sm:$0xff]  ;;  %v12383_v58 = vld [vmem:[#allocation311_spill] sm:$0xff] }
 0x42e   : > { %7804 = vst [vmem:[#allocation2 + $0x120] sm:$0xff] %v7632_v43   ;;  %v3774_v59 = vmax.f32 %v3646_v45, 0.0  ;;  %v3340_v47 = vpop.permute.xlu0 %3339  ;;  %v1860_v43 = vmul.f32 %v10416_v3, %v12367_v25  ;;  %v2632_v42 = vmul.f32 %v10418_v35, %v12374_v1  ;;  %v1862_v39 = vmul.f32 %v10416_v3, %v12375_v48 }
 0x42f   : > { %v3315_v16 = vpop.permute.xlu1 %3314  ;;  %v3653_v36 = vadd.f32 %v3340_v47, %v2757_v9  ;;  %v2761_v11 = vadd.f32 %v2633_v4, %v1989_v34  ;;  %v1220_v37 = vmul.f32 %v10408_v41, %v12377_v63  ;;  %v2634_v33 = vmul.f32 %v10418_v35, %v12378_v40  ;;  %v12379_v9 = vld [vmem:[#allocation228_spill] sm:$0xff]  ;;  %v12395_v40 = vld [vmem:[#allocation315_spill] sm:$0xff] }
 0x430   : > { %v7637_v15 = vpack.c.bf16 %v3775_v12, %v3774_v59  ;;  %v3648_v7 = vadd.f32 %v3315_v16, %v2752_v50  ;;  %v12369_v12 = vld [vmem:[#allocation91_spill] sm:$0xff]  ;;  %v12370_v59 = vld [vmem:[#allocation92_spill] sm:$0xff]  ;;  %v1988_v53 = vadd.f32 %v1860_v43, %v1216_v38  ;;  %v1990_v13 = vadd.f32 %v1862_v39, %v1218_v29 }
 0x431   : > { %v1219_v2 = vmul.f32 %v10408_v41, %v12369_v12  ;;  %v1863_v47 = vmul.f32 %v10416_v3, %v12370_v59  ;;  %v3781_v56 = vmax.f32 %v3653_v36, 0.0  ;;  %v2637_v60 = vmul.f32 %v10418_v35, %v12380_v31 }
 0x432   : > { %7805 = vst [vmem:[#allocation2 + $0x128] sm:$0xff] %v7637_v15   ;;  %v3776_v62 = vmax.f32 %v3648_v7, 0.0  ;;  %v3350_v46 = vpop.permute.xlu0 %3349  ;;  %v1221_v15 = vmul.f32 %v10408_v41, %v12372_v49  ;;  %v12373_v7 = vld [vmem:[#allocation94_spill] sm:$0xff]  ;;  %v2760_v27 = vadd.f32 %v2632_v42, %v1988_v53  ;;  %v2762_v0 = vadd.f32 %v2634_v33, %v1990_v13  ;;  %v12389_v49 = vld [vmem:[#allocation313_spill] sm:$0xff] }
 0x433   : > { %v3325_v14 = vpop.permute.xlu1 %3324  ;;  %v3655_v16 = vadd.f32 %v3350_v46, %v2759_v52  ;;  %v1865_v19 = vmul.f32 %v10416_v3, %v12373_v7  ;;  %v1222_v25 = vmul.f32 %v10408_v41, %v12383_v58  ;;  %v12384_v52 = vld [vmem:[#allocation97_spill] sm:$0xff]  ;;  %v1226_v33 = vmul.f32 %v10408_v41, %v12395_v40  ;;  %v12400_v58 = vld [vmem:[#allocation318_spill] sm:$0xff] }
 0x434   : > { %v7642_v51 = vpack.c.bf16 %v3777_v44, %v3776_v62  ;;  %v3650_v30 = vadd.f32 %v3325_v14, %v2754_v18  ;;  %v2635_v44 = vmul.f32 %v10418_v35, %v12376_v8  ;;  %v1991_v18 = vadd.f32 %v1863_v47, %v1219_v2  ;;  %v12386_v2 = vld [vmem:[#allocation227_spill] sm:$0xff]  ;;  %v12387_v47 = vld [vmem:[#allocation230_spill] sm:$0xff]  ;;  %v12390_v8 = vld [vmem:[#allocation229_spill] sm:$0xff] }
 0x435   : > { %v3783_v32 = vmax.f32 %v3655_v16, 0.0  ;;  %v1993_v14 = vadd.f32 %v1865_v19, %v1221_v15  ;;  %v2636_v59 = vmul.f32 %v10418_v35, %v12386_v2  ;;  %v1866_v24 = vmul.f32 %v10416_v3, %v12387_v47 }
 0x436   : > { %7806 = vst [vmem:[#allocation2 + $0x130] sm:$0xff] %v7642_v51   ;;  %v3778_v61 = vmax.f32 %v3650_v30, 0.0  ;;  %v3360_v10 = vpop.permute.xlu0 %3359  ;;  %v1864_v51 = vmul.f32 %v10416_v3, %v12379_v9  ;;  %v1224_v15 = vmul.f32 %v10408_v41, %v12389_v49 }
 0x437   : > { %v3335_v45 = vpop.permute.xlu1 %3334  ;;  %v3657_v26 = vadd.f32 %v3360_v10, %v2761_v11  ;;  %v1994_v19 = vadd.f32 %v1866_v24, %v1222_v25  ;;  %v12391_v11 = vld [vmem:[#allocation232_spill] sm:$0xff]  ;;  %v2643_v25 = vmul.f32 %v10418_v35, %v12400_v58  ;;  %v12414_v58 = vld [vmem:[#allocation237_spill] sm:$0xff] }
 0x438   : > { %v7647_v50 = vpack.c.bf16 %v3779_v57, %v3778_v61  ;;  %v3652_v21 = vadd.f32 %v3335_v45, %v2756_v54  ;;  %v2763_v54 = vadd.f32 %v2635_v44, %v1991_v18  ;;  %v12381_v57 = vld [vmem:[#allocation95_spill] sm:$0xff]  ;;  %v12382_v61 = vld [vmem:[#allocation96_spill] sm:$0xff]  ;;  %v1992_v34 = vadd.f32 %v1864_v51, %v1220_v37 }
 0x439   : > { %v1223_v36 = vmul.f32 %v10408_v41, %v12381_v57  ;;  %v1867_v10 = vmul.f32 %v10416_v3, %v12382_v61  ;;  %v3785_v43 = vmax.f32 %v3657_v26, 0.0  ;;  %v2638_v44 = vmul.f32 %v10418_v35, %v12390_v8  ;;  %v12392_v18 = vld [vmem:[#allocation316_spill] sm:$0xff]  ;;  %v12393_v26 = vld [vmem:[#allocation99_spill] sm:$0xff] }
 0x43a   : > { %7807 = vst [vmem:[#allocation2 + $0x138] sm:$0xff] %v7647_v50   ;;  %v3780_v20 = vmax.f32 %v3652_v21, 0.0  ;;  %v3370_v5 = vpop.permute.xlu0 %3369  ;;  %v1225_v50 = vmul.f32 %v10408_v41, %v12384_v52  ;;  %v12385_v21 = vld [vmem:[#allocation98_spill] sm:$0xff]  ;;  %v2764_v7 = vadd.f32 %v2636_v59, %v1992_v34  ;;  %v2641_v13 = vmul.f32 %v10418_v35, %v12392_v18 }
 0x43b   : > { %v3345_v55 = vpop.permute.xlu1 %3344  ;;  %v3659_v45 = vadd.f32 %v3370_v5, %v2763_v54  ;;  %v1869_v12 = vmul.f32 %v10416_v3, %v12385_v21  ;;  %v1995_v5 = vadd.f32 %v1867_v10, %v1223_v36  ;;  %v12396_v54 = vld [vmem:[#allocation101_spill] sm:$0xff]  ;;  %v12398_v36 = vld [vmem:[#allocation231_spill] sm:$0xff]  ;;  %v12399_v10 = vld [vmem:[#allocation234_spill] sm:$0xff] }
 0x43c   : > { %v7652_v62 = vpack.c.bf16 %v3781_v56, %v3780_v20  ;;  %v3654_v46 = vadd.f32 %v3345_v55, %v2758_v17  ;;  %v12388_v17 = vld [vmem:[#allocation314_spill] sm:$0xff]  ;;  %v2765_v56 = vadd.f32 %v2637_v60, %v1993_v14  ;;  %v2766_v60 = vadd.f32 %v2638_v44, %v1994_v19  ;;  %v12401_v21 = vld [vmem:[#allocation317_spill] sm:$0xff] }
 0x43d   : > { %v2639_v53 = vmul.f32 %v10418_v35, %v12388_v17  ;;  %v3787_v1 = vmax.f32 %v3659_v45, 0.0  ;;  %v1997_v55 = vadd.f32 %v1869_v12, %v1225_v50  ;;  %v2640_v61 = vmul.f32 %v10418_v35, %v12398_v36  ;;  %v12402_v17 = vld [vmem:[#allocation233_spill] sm:$0xff] }
 0x43e   : > { %7808 = vst [vmem:[#allocation2 + $0x140] sm:$0xff] %v7652_v62   ;;  %v3782_v23 = vmax.f32 %v3654_v46, 0.0  ;;  %v3380_v6 = vpop.permute.xlu0 %3379  ;;  %v1868_v62 = vmul.f32 %v10416_v3, %v12391_v11  ;;  %v1870_v34 = vmul.f32 %v10416_v3, %v12399_v10  ;;  %v1228_v12 = vmul.f32 %v10408_v41, %v12401_v21 }
 0x43f   : > { %v3355_v30 = vpop.permute.xlu1 %3354  ;;  %v3661_v42 = vadd.f32 %v3380_v6, %v2765_v56  ;;  %v2767_v63 = vadd.f32 %v2639_v53, %v1995_v5  ;;  %v12394_v6 = vld [vmem:[#allocation100_spill] sm:$0xff]  ;;  %v2642_v53 = vmul.f32 %v10418_v35, %v12402_v17 }
 0x440   : > { %v7657_v22 = vpack.c.bf16 %v3783_v32, %v3782_v23  ;;  %v3656_v38 = vadd.f32 %v3355_v30, %v2760_v27  ;;  %v1227_v23 = vmul.f32 %v10408_v41, %v12393_v26  ;;  %v1871_v27 = vmul.f32 %v10416_v3, %v12394_v6  ;;  %v12403_v56 = vld [vmem:[#allocation236_spill] sm:$0xff] }
 0x441   : > { %v1996_v14 = vadd.f32 %v1868_v62, %v1224_v15  ;;  %v3789_v9 = vmax.f32 %v3661_v42, 0.0  ;;  %v1998_v52 = vadd.f32 %v1870_v34, %v1226_v33  ;;  %v12404_v5 = vld [vmem:[#allocation320_spill] sm:$0xff]  ;;  %v12412_v33 = vld [vmem:[#allocation322_spill] sm:$0xff] }
 0x442   : > { %7809 = vst [vmem:[#allocation2 + $0x148] sm:$0xff] %v7657_v22   ;;  %v3784_v28 = vmax.f32 %v3656_v38, 0.0  ;;  %v3390_v4 = vpop.permute.xlu0 %3389  ;;  %v1229_v22 = vmul.f32 %v10408_v41, %v12396_v54  ;;  %v12397_v38 = vld [vmem:[#allocation102_spill] sm:$0xff]  ;;  %v2645_v49 = vmul.f32 %v10418_v35, %v12404_v5 }
 0x443   : > { %v3365_v29 = vpop.permute.xlu1 %3364  ;;  %v3663_v51 = vadd.f32 %v3390_v4, %v2767_v63  ;;  %v1873_v57 = vmul.f32 %v10416_v3, %v12397_v38  ;;  %v1999_v4 = vadd.f32 %v1871_v27, %v1227_v23  ;;  %v2768_v50 = vadd.f32 %v2640_v61, %v1996_v14  ;;  %v12408_v63 = vld [vmem:[#allocation105_spill] sm:$0xff]  ;;  %v12410_v23 = vld [vmem:[#allocation235_spill] sm:$0xff]  ;;  %v12411_v27 = vld [vmem:[#allocation238_spill] sm:$0xff] }
 0x444   : > { %v7662_v16 = vpack.c.bf16 %v3785_v43, %v3784_v28  ;;  %v3658_v20 = vadd.f32 %v3365_v29, %v2762_v0  ;;  %v2769_v43 = vadd.f32 %v2641_v13, %v1997_v55  ;;  %v12407_v55 = vld [vmem:[#allocation319_spill] sm:$0xff]  ;;  %v2770_v44 = vadd.f32 %v2642_v53, %v1998_v52 }
 0x445   : > { %v3791_v2 = vmax.f32 %v3663_v51, 0.0  ;;  %v2001_v29 = vadd.f32 %v1873_v57, %v1229_v22  ;;  %v2771_v15 = vadd.f32 %v2643_v25, %v1999_v4  ;;  %v1230_v8 = vmul.f32 %v10408_v41, %v12407_v55  ;;  %v12413_v22 = vld [vmem:[#allocation321_spill] sm:$0xff]  ;;  %v12416_v4 = vld [vmem:[#allocation324_spill] sm:$0xff]  ;;  %v12419_v53 = vld [vmem:[#allocation323_spill] sm:$0xff] }
 0x446   : > { %7810 = vst [vmem:[#allocation2 + $0x150] sm:$0xff] %v7662_v16   ;;  %v3786_v48 = vmax.f32 %v3658_v20, 0.0  ;;  %v3400_v39 = vpop.permute.xlu0 %3399  ;;  %v1872_v16 = vmul.f32 %v10416_v3, %v12403_v56  ;;  %v2644_v6 = vmul.f32 %v10418_v35, %v12410_v23  ;;  %v1874_v14 = vmul.f32 %v10416_v3, %v12411_v27 }
 0x447   : > { %v3375_v46 = vpop.permute.xlu1 %3374  ;;  %v3665_v59 = vadd.f32 %v3400_v39, %v2769_v43  ;;  %v2773_v51 = vadd.f32 %v2645_v49, %v2001_v29  ;;  %v1232_v38 = vmul.f32 %v10408_v41, %v12413_v22  ;;  %v2646_v25 = vmul.f32 %v10418_v35, %v12414_v58  ;;  %v12415_v43 = vld [vmem:[#allocation240_spill] sm:$0xff]  ;;  %v12431_v58 = vld [vmem:[#allocation327_spill] sm:$0xff] }
 0x448   : > { %v7667_v37 = vpack.c.bf16 %v3787_v1, %v3786_v48  ;;  %v3660_v32 = vadd.f32 %v3375_v46, %v2764_v7  ;;  %v12405_v1 = vld [vmem:[#allocation103_spill] sm:$0xff]  ;;  %v12406_v48 = vld [vmem:[#allocation104_spill] sm:$0xff]  ;;  %v2000_v11 = vadd.f32 %v1872_v16, %v1228_v12  ;;  %v2002_v54 = vadd.f32 %v1874_v14, %v1230_v8 }
 0x449   : > { %v1231_v42 = vmul.f32 %v10408_v41, %v12405_v1  ;;  %v1875_v39 = vmul.f32 %v10416_v3, %v12406_v48  ;;  %v3793_v62 = vmax.f32 %v3665_v59, 0.0  ;;  %v2649_v52 = vmul.f32 %v10418_v35, %v12416_v4 }
 0x44a   : > { %7811 = vst [vmem:[#allocation2 + $0x158] sm:$0xff] %v7667_v37   ;;  %v3788_v30 = vmax.f32 %v3660_v32, 0.0  ;;  %v3410_v31 = vpop.permute.xlu0 %3409  ;;  %v1233_v37 = vmul.f32 %v10408_v41, %v12408_v63  ;;  %v12409_v32 = vld [vmem:[#allocation106_spill] sm:$0xff]  ;;  %v2772_v34 = vadd.f32 %v2644_v6, %v2000_v11  ;;  %v2774_v17 = vadd.f32 %v2646_v25, %v2002_v54  ;;  %v12425_v63 = vld [vmem:[#allocation325_spill] sm:$0xff] }
 0x44b   : > { %v3385_v0 = vpop.permute.xlu1 %3384  ;;  %v3667_v46 = vadd.f32 %v3410_v31, %v2771_v15  ;;  %v1877_v26 = vmul.f32 %v10416_v3, %v12409_v32  ;;  %v1234_v56 = vmul.f32 %v10408_v41, %v12419_v53  ;;  %v12420_v15 = vld [vmem:[#allocation109_spill] sm:$0xff]  ;;  %v1238_v25 = vmul.f32 %v10408_v41, %v12431_v58  ;;  %v12436_v53 = vld [vmem:[#allocation330_spill] sm:$0xff] }
 0x44c   : > { %v7672_v45 = vpack.c.bf16 %v3789_v9, %v3788_v30  ;;  %v3662_v28 = vadd.f32 %v3385_v0, %v2766_v60  ;;  %v2647_v9 = vmul.f32 %v10418_v35, %v12412_v33  ;;  %v2003_v60 = vadd.f32 %v1875_v39, %v1231_v42  ;;  %v12422_v42 = vld [vmem:[#allocation239_spill] sm:$0xff]  ;;  %v12423_v39 = vld [vmem:[#allocation242_spill] sm:$0xff]  ;;  %v12426_v33 = vld [vmem:[#allocation241_spill] sm:$0xff] }
 0x44d   : > { %v3795_v57 = vmax.f32 %v3667_v46, 0.0  ;;  %v2005_v0 = vadd.f32 %v1877_v26, %v1233_v37  ;;  %v2648_v48 = vmul.f32 %v10418_v35, %v12422_v42  ;;  %v1878_v55 = vmul.f32 %v10416_v3, %v12423_v39 }
 0x44e   : > { %7812 = vst [vmem:[#allocation2 + $0x160] sm:$0xff] %v7672_v45   ;;  %v3790_v47 = vmax.f32 %v3662_v28, 0.0  ;;  %v3420_v24 = vpop.permute.xlu0 %3419  ;;  %v1876_v45 = vmul.f32 %v10416_v3, %v12415_v43  ;;  %v1236_v37 = vmul.f32 %v10408_v41, %v12425_v63 }
 0x44f   : > { %v3395_v20 = vpop.permute.xlu1 %3394  ;;  %v3669_v36 = vadd.f32 %v3420_v24, %v2773_v51  ;;  %v2006_v26 = vadd.f32 %v1878_v55, %v1234_v56  ;;  %v12427_v51 = vld [vmem:[#allocation244_spill] sm:$0xff]  ;;  %v2655_v56 = vmul.f32 %v10418_v35, %v12436_v53  ;;  %v12450_v53 = vld [vmem:[#allocation249_spill] sm:$0xff] }
 0x450   : > { %v7677_v7 = vpack.c.bf16 %v3791_v2, %v3790_v47  ;;  %v3664_v19 = vadd.f32 %v3395_v20, %v2768_v50  ;;  %v2775_v50 = vadd.f32 %v2647_v9, %v2003_v60  ;;  %v12417_v2 = vld [vmem:[#allocation107_spill] sm:$0xff]  ;;  %v12418_v47 = vld [vmem:[#allocation108_spill] sm:$0xff]  ;;  %v2004_v29 = vadd.f32 %v1876_v45, %v1232_v38 }
 0x451   : > { %v1235_v59 = vmul.f32 %v10408_v41, %v12417_v2  ;;  %v1879_v24 = vmul.f32 %v10416_v3, %v12418_v47  ;;  %v3797_v16 = vmax.f32 %v3669_v36, 0.0  ;;  %v2650_v9 = vmul.f32 %v10418_v35, %v12426_v33  ;;  %v12428_v60 = vld [vmem:[#allocation328_spill] sm:$0xff]  ;;  %v12429_v36 = vld [vmem:[#allocation111_spill] sm:$0xff] }
 0x452   : > { %7813 = vst [vmem:[#allocation2 + $0x168] sm:$0xff] %v7677_v7   ;;  %v3792_v18 = vmax.f32 %v3664_v19, 0.0  ;;  %v3430_v13 = vpop.permute.xlu0 %3429  ;;  %v1237_v7 = vmul.f32 %v10408_v41, %v12420_v15  ;;  %v12421_v19 = vld [vmem:[#allocation110_spill] sm:$0xff]  ;;  %v2776_v32 = vadd.f32 %v2648_v48, %v2004_v29  ;;  %v2653_v54 = vmul.f32 %v10418_v35, %v12428_v60 }
 0x453   : > { %v3405_v40 = vpop.permute.xlu1 %3404  ;;  %v3671_v20 = vadd.f32 %v3430_v13, %v2775_v50  ;;  %v1881_v1 = vmul.f32 %v10416_v3, %v12421_v19  ;;  %v2007_v13 = vadd.f32 %v1879_v24, %v1235_v59  ;;  %v12432_v50 = vld [vmem:[#allocation113_spill] sm:$0xff]  ;;  %v12434_v59 = vld [vmem:[#allocation243_spill] sm:$0xff]  ;;  %v12435_v24 = vld [vmem:[#allocation246_spill] sm:$0xff] }
 0x454   : > { %v7682_v30 = vpack.c.bf16 %v3793_v62, %v3792_v18  ;;  %v3666_v31 = vadd.f32 %v3405_v40, %v2770_v44  ;;  %v12424_v44 = vld [vmem:[#allocation326_spill] sm:$0xff]  ;;  %v2777_v62 = vadd.f32 %v2649_v52, %v2005_v0  ;;  %v2778_v52 = vadd.f32 %v2650_v9, %v2006_v26  ;;  %v12437_v19 = vld [vmem:[#allocation329_spill] sm:$0xff] }
 0x455   : > { %v2651_v11 = vmul.f32 %v10418_v35, %v12424_v44  ;;  %v3799_v23 = vmax.f32 %v3671_v20, 0.0  ;;  %v2009_v40 = vadd.f32 %v1881_v1, %v1237_v7  ;;  %v2652_v47 = vmul.f32 %v10418_v35, %v12434_v59  ;;  %v12438_v44 = vld [vmem:[#allocation245_spill] sm:$0xff] }
 0x456   : > { %7814 = vst [vmem:[#allocation2 + $0x170] sm:$0xff] %v7682_v30   ;;  %v3794_v61 = vmax.f32 %v3666_v31, 0.0  ;;  %v3440_v10 = vpop.permute.xlu0 %3439  ;;  %v1880_v30 = vmul.f32 %v10416_v3, %v12427_v51  ;;  %v1882_v29 = vmul.f32 %v10416_v3, %v12435_v24  ;;  %v1240_v1 = vmul.f32 %v10408_v41, %v12437_v19 }
 0x457   : > { %v3415_v28 = vpop.permute.xlu1 %3414  ;;  %v3673_v6 = vadd.f32 %v3440_v10, %v2777_v62  ;;  %v2779_v22 = vadd.f32 %v2651_v11, %v2007_v13  ;;  %v12430_v10 = vld [vmem:[#allocation112_spill] sm:$0xff]  ;;  %v2654_v11 = vmul.f32 %v10418_v35, %v12438_v44 }
 0x458   : > { %v7687_v21 = vpack.c.bf16 %v3795_v57, %v3794_v61  ;;  %v3668_v12 = vadd.f32 %v3415_v28, %v2772_v34  ;;  %v1239_v61 = vmul.f32 %v10408_v41, %v12429_v36  ;;  %v1883_v34 = vmul.f32 %v10416_v3, %v12430_v10  ;;  %v12439_v62 = vld [vmem:[#allocation248_spill] sm:$0xff] }
 0x459   : > { %v2008_v0 = vadd.f32 %v1880_v30, %v1236_v37  ;;  %v3801_v43 = vmax.f32 %v3673_v6, 0.0  ;;  %v2010_v15 = vadd.f32 %v1882_v29, %v1238_v25  ;;  %v12440_v13 = vld [vmem:[#allocation332_spill] sm:$0xff]  ;;  %v12448_v25 = vld [vmem:[#allocation334_spill] sm:$0xff] }
 0x45a   : > { %7815 = vst [vmem:[#allocation2 + $0x178] sm:$0xff] %v7687_v21   ;;  %v3796_v5 = vmax.f32 %v3668_v12, 0.0  ;;  %v3450_v49 = vpop.permute.xlu0 %3449  ;;  %v1241_v21 = vmul.f32 %v10408_v41, %v12432_v50  ;;  %v12433_v12 = vld [vmem:[#allocation114_spill] sm:$0xff]  ;;  %v2657_v63 = vmul.f32 %v10418_v35, %v12440_v13 }
 0x45b   : > { %v3425_v8 = vpop.permute.xlu1 %3424  ;;  %v3675_v45 = vadd.f32 %v3450_v49, %v2779_v22  ;;  %v1885_v2 = vmul.f32 %v10416_v3, %v12433_v12  ;;  %v2011_v49 = vadd.f32 %v1883_v34, %v1239_v61  ;;  %v2780_v7 = vadd.f32 %v2652_v47, %v2008_v0  ;;  %v12444_v22 = vld [vmem:[#allocation117_spill] sm:$0xff]  ;;  %v12446_v61 = vld [vmem:[#allocation247_spill] sm:$0xff]  ;;  %v12447_v34 = vld [vmem:[#allocation250_spill] sm:$0xff] }
 0x45c   : > { %v7692_v46 = vpack.c.bf16 %v3797_v16, %v3796_v5  ;;  %v3670_v18 = vadd.f32 %v3425_v8, %v2774_v17  ;;  %v2781_v16 = vadd.f32 %v2653_v54, %v2009_v40  ;;  %v12443_v40 = vld [vmem:[#allocation331_spill] sm:$0xff]  ;;  %v2782_v9 = vadd.f32 %v2654_v11, %v2010_v15 }
 0x45d   : > { %v3803_v42 = vmax.f32 %v3675_v45, 0.0  ;;  %v2013_v8 = vadd.f32 %v1885_v2, %v1241_v21  ;;  %v2783_v37 = vadd.f32 %v2655_v56, %v2011_v49  ;;  %v1242_v33 = vmul.f32 %v10408_v41, %v12443_v40  ;;  %v12449_v21 = vld [vmem:[#allocation333_spill] sm:$0xff]  ;;  %v12452_v49 = vld [vmem:[#allocation336_spill] sm:$0xff]  ;;  %v12455_v11 = vld [vmem:[#allocation335_spill] sm:$0xff] }
 0x45e   : > { %7816 = vst [vmem:[#allocation2 + $0x180] sm:$0xff] %v7692_v46   ;;  %v3798_v27 = vmax.f32 %v3670_v18, 0.0  ;;  %v3460_v14 = vpop.permute.xlu0 %3459  ;;  %v1884_v46 = vmul.f32 %v10416_v3, %v12439_v62  ;;  %v2656_v10 = vmul.f32 %v10418_v35, %v12446_v61  ;;  %v1886_v0 = vmul.f32 %v10416_v3, %v12447_v34 }
 0x45f   : > { %v3435_v31 = vpop.permute.xlu1 %3434  ;;  %v3677_v48 = vadd.f32 %v3460_v14, %v2781_v16  ;;  %v2785_v45 = vadd.f32 %v2657_v63, %v2013_v8  ;;  %v1244_v12 = vmul.f32 %v10408_v41, %v12449_v21  ;;  %v2658_v56 = vmul.f32 %v10418_v35, %v12450_v53  ;;  %v12451_v16 = vld [vmem:[#allocation252_spill] sm:$0xff]  ;;  %v12467_v53 = vld [vmem:[#allocation339_spill] sm:$0xff] }
 0x460   : > { %v7697_v38 = vpack.c.bf16 %v3799_v23, %v3798_v27  ;;  %v3672_v57 = vadd.f32 %v3435_v31, %v2776_v32  ;;  %v12441_v23 = vld [vmem:[#allocation115_spill] sm:$0xff]  ;;  %v12442_v27 = vld [vmem:[#allocation116_spill] sm:$0xff]  ;;  %v2012_v51 = vadd.f32 %v1884_v46, %v1240_v1  ;;  %v2014_v50 = vadd.f32 %v1886_v0, %v1242_v33 }
 0x461   : > { %v1243_v6 = vmul.f32 %v10408_v41, %v12441_v23  ;;  %v1887_v14 = vmul.f32 %v10416_v3, %v12442_v27  ;;  %v3805_v30 = vmax.f32 %v3677_v48, 0.0  ;;  %v2661_v15 = vmul.f32 %v10418_v35, %v12452_v49 }
 0x462   : > { %7817 = vst [vmem:[#allocation2 + $0x188] sm:$0xff] %v7697_v38   ;;  %v3800_v28 = vmax.f32 %v3672_v57, 0.0  ;;  %v3470_v4 = vpop.permute.xlu0 %3469  ;;  %v1245_v38 = vmul.f32 %v10408_v41, %v12444_v22  ;;  %v12445_v57 = vld [vmem:[#allocation118_spill] sm:$0xff]  ;;  %v2784_v29 = vadd.f32 %v2656_v10, %v2012_v51  ;;  %v2786_v44 = vadd.f32 %v2658_v56, %v2014_v50  ;;  %v12461_v22 = vld [vmem:[#allocation337_spill] sm:$0xff] }
 0x463   : > { %v3445_v17 = vpop.permute.xlu1 %3444  ;;  %v3679_v31 = vadd.f32 %v3470_v4, %v2783_v37  ;;  %v1889_v36 = vmul.f32 %v10416_v3, %v12445_v57  ;;  %v1246_v62 = vmul.f32 %v10408_v41, %v12455_v11  ;;  %v12456_v37 = vld [vmem:[#allocation121_spill] sm:$0xff]  ;;  %v1250_v56 = vmul.f32 %v10408_v41, %v12467_v53  ;;  %v12472_v11 = vld [vmem:[#allocation342_spill] sm:$0xff] }
 0x464   : > { %v7702_v20 = vpack.c.bf16 %v3801_v43, %v3800_v28  ;;  %v3674_v5 = vadd.f32 %v3445_v17, %v2778_v52  ;;  %v2659_v43 = vmul.f32 %v10418_v35, %v12448_v25  ;;  %v2015_v52 = vadd.f32 %v1887_v14, %v1243_v6  ;;  %v12458_v6 = vld [vmem:[#allocation251_spill] sm:$0xff]  ;;  %v12459_v14 = vld [vmem:[#allocation254_spill] sm:$0xff]  ;;  %v12462_v25 = vld [vmem:[#allocation253_spill] sm:$0xff] }
 0x465   : > { %v3807_v2 = vmax.f32 %v3679_v31, 0.0  ;;  %v2017_v17 = vadd.f32 %v1889_v36, %v1245_v38  ;;  %v2660_v27 = vmul.f32 %v10418_v35, %v12458_v6  ;;  %v1890_v40 = vmul.f32 %v10416_v3, %v12459_v14 }
 0x466   : > { %7818 = vst [vmem:[#allocation2 + $0x190] sm:$0xff] %v7702_v20   ;;  %v3802_v39 = vmax.f32 %v3674_v5, 0.0  ;;  %v3480_v55 = vpop.permute.xlu0 %3479  ;;  %v1888_v20 = vmul.f32 %v10416_v3, %v12451_v16  ;;  %v1248_v38 = vmul.f32 %v10408_v41, %v12461_v22 }
 0x467   : > { %v3455_v18 = vpop.permute.xlu1 %3454  ;;  %v3681_v59 = vadd.f32 %v3480_v55, %v2785_v45  ;;  %v2018_v36 = vadd.f32 %v1890_v40, %v1246_v62  ;;  %v12463_v45 = vld [vmem:[#allocation256_spill] sm:$0xff]  ;;  %v2667_v62 = vmul.f32 %v10418_v35, %v12472_v11 }
 0x468   : > { %v7707_v32 = vpack.c.bf16 %v3803_v42, %v3802_v39  ;;  %v3676_v26 = vadd.f32 %v3455_v18, %v2780_v7  ;;  %v2787_v7 = vadd.f32 %v2659_v43, %v2015_v52  ;;  %v12453_v42 = vld [vmem:[#allocation119_spill] sm:$0xff]  ;;  %v12454_v39 = vld [vmem:[#allocation120_spill] sm:$0xff]  ;;  %v2016_v8 = vadd.f32 %v1888_v20, %v1244_v12 }
 0x469   : > { %v1247_v48 = vmul.f32 %v10408_v41, %v12453_v42  ;;  %v1891_v55 = vmul.f32 %v10416_v3, %v12454_v39  ;;  %v3809_v46 = vmax.f32 %v3681_v59, 0.0  ;;  %v2662_v43 = vmul.f32 %v10418_v35, %v12462_v25  ;;  %v12464_v52 = vld [vmem:[#allocation340_spill] sm:$0xff]  ;;  %v12465_v59 = vld [vmem:[#allocation123_spill] sm:$0xff] }
 0x46a   : > { %7819 = vst [vmem:[#allocation2 + $0x198] sm:$0xff] %v7707_v32   ;;  %v3804_v60 = vmax.f32 %v3676_v26, 0.0  ;;  %v3490_v54 = vpop.permute.xlu0 %3489  ;;  %v1249_v32 = vmul.f32 %v10408_v41, %v12456_v37  ;;  %v12457_v26 = vld [vmem:[#allocation122_spill] sm:$0xff]  ;;  %v2788_v57 = vadd.f32 %v2660_v27, %v2016_v8  ;;  %v2665_v50 = vmul.f32 %v10418_v35, %v12464_v52 }
 0x46b   : > { %v3465_v58 = vpop.permute.xlu1 %3464  ;;  %v3683_v18 = vadd.f32 %v3490_v54, %v2787_v7  ;;  %v1893_v23 = vmul.f32 %v10416_v3, %v12457_v26  ;;  %v2019_v54 = vadd.f32 %v1891_v55, %v1247_v48  ;;  %v12468_v7 = vld [vmem:[#allocation125_spill] sm:$0xff]  ;;  %v12470_v48 = vld [vmem:[#allocation255_spill] sm:$0xff]  ;;  %v12471_v55 = vld [vmem:[#allocation258_spill] sm:$0xff] }
 0x46c   : > { %v7712_v28 = vpack.c.bf16 %v3805_v30, %v3804_v60  ;;  %v3678_v4 = vadd.f32 %v3465_v58, %v2782_v9  ;;  %v12460_v9 = vld [vmem:[#allocation338_spill] sm:$0xff]  ;;  %v2789_v30 = vadd.f32 %v2661_v15, %v2017_v17  ;;  %v2790_v15 = vadd.f32 %v2662_v43, %v2018_v36  ;;  %v12473_v26 = vld [vmem:[#allocation341_spill] sm:$0xff] }
 0x46d   : > { %v2663_v51 = vmul.f32 %v10418_v35, %v12460_v9  ;;  %v3811_v61 = vmax.f32 %v3683_v18, 0.0  ;;  %v2021_v58 = vadd.f32 %v1893_v23, %v1249_v32  ;;  %v2664_v39 = vmul.f32 %v10418_v35, %v12470_v48  ;;  %v12474_v9 = vld [vmem:[#allocation257_spill] sm:$0xff] }
 0x46e   : > { %7820 = vst [vmem:[#allocation2 + $0x1a0] sm:$0xff] %v7712_v28   ;;  %v3806_v47 = vmax.f32 %v3678_v4, 0.0  ;;  %v3500_v24 = vpop.permute.xlu0 %3499  ;;  %v1892_v28 = vmul.f32 %v10416_v3, %v12463_v45  ;;  %v1894_v8 = vmul.f32 %v10416_v3, %v12471_v55  ;;  %v1252_v23 = vmul.f32 %v10408_v41, %v12473_v26 }
 0x46f   : > { %v3475_v5 = vpop.permute.xlu1 %3474  ;;  %v3685_v10 = vadd.f32 %v3500_v24, %v2789_v30  ;;  %v2791_v21 = vadd.f32 %v2663_v51, %v2019_v54  ;;  %v12466_v24 = vld [vmem:[#allocation124_spill] sm:$0xff]  ;;  %v2666_v51 = vmul.f32 %v10418_v35, %v12474_v9 }
 0x470   : > { %v7717_v19 = vpack.c.bf16 %v3807_v2, %v3806_v47  ;;  %v3680_v1 = vadd.f32 %v3475_v5, %v2784_v29  ;;  %v1251_v47 = vmul.f32 %v10408_v41, %v12465_v59  ;;  %v1895_v29 = vmul.f32 %v10416_v3, %v12466_v24  ;;  %v12475_v30 = vld [vmem:[#allocation260_spill] sm:$0xff]  ;;  %v12482_v59 = vld [vmem:[#allocation259_spill] sm:$0xff]  ;;  %v12483_v24 = vld [vmem:[#allocation262_spill] sm:$0xff] }
 0x471   : > { %v2020_v17 = vadd.f32 %v1892_v28, %v1248_v38  ;;  %v3813_v16 = vmax.f32 %v3685_v10, 0.0  ;;  %v2022_v37 = vadd.f32 %v1894_v8, %v1250_v56  ;;  %v12476_v54 = vld [vmem:[#allocation344_spill] sm:$0xff]  ;;  %v12484_v56 = vld [vmem:[#allocation346_spill] sm:$0xff] }
 0x472   : > { %7821 = vst [vmem:[#allocation2 + $0x1a8] sm:$0xff] %v7717_v19   ;;  %v3808_v13 = vmax.f32 %v3680_v1, 0.0  ;;  %v3510_v63 = vpop.permute.xlu0 %3509  ;;  %v1253_v19 = vmul.f32 %v10408_v41, %v12468_v7  ;;  %v12469_v1 = vld [vmem:[#allocation126_spill] sm:$0xff]  ;;  %v2669_v22 = vmul.f32 %v10418_v35, %v12476_v54 }
 0x473   : > { %v3485_v33 = vpop.permute.xlu1 %3484  ;;  %v3687_v20 = vadd.f32 %v3510_v63, %v2791_v21  ;;  %v1897_v42 = vmul.f32 %v10416_v3, %v12469_v1  ;;  %v2023_v63 = vadd.f32 %v1895_v29, %v1251_v47  ;;  %v2792_v32 = vadd.f32 %v2664_v39, %v2020_v17 }
 0x474   : > { %v7722_v31 = vpack.c.bf16 %v3809_v46, %v3808_v13  ;;  %v3682_v60 = vadd.f32 %v3485_v33, %v2786_v44  ;;  %v2793_v46 = vadd.f32 %v2665_v50, %v2021_v58  ;;  %v12479_v58 = vld [vmem:[#allocation343_spill] sm:$0xff]  ;;  %v2794_v43 = vadd.f32 %v2666_v51, %v2022_v37  ;;  %v12480_v50 = vld [vmem:[#allocation129_spill] sm:$0xff] }
 0x475   : > { %v3815_v6 = vmax.f32 %v3687_v20, 0.0  ;;  %v2025_v33 = vadd.f32 %v1897_v42, %v1253_v19  ;;  %v2795_v38 = vadd.f32 %v2667_v62, %v2023_v63  ;;  %v1254_v25 = vmul.f32 %v10408_v41, %v12479_v58  ;;  %v12485_v19 = vld [vmem:[#allocation345_spill] sm:$0xff]  ;;  %v12487_v62 = vld [vmem:[#allocation264_spill] sm:$0xff]  ;;  %v12491_v51 = vld [vmem:[#allocation347_spill] sm:$0xff] }
 0x476   : > { %7822 = vst [vmem:[#allocation2 + $0x1b0] sm:$0xff] %v7722_v31   ;;  %v3810_v34 = vmax.f32 %v3682_v60, 0.0  ;;  %v3520_v0 = vpop.permute.xlu0 %3519  ;;  %v1896_v31 = vmul.f32 %v10416_v3, %v12475_v30  ;;  %v1257_v21 = vmul.f32 %v10408_v41, %v12480_v50  ;;  %v2668_v47 = vmul.f32 %v10418_v35, %v12482_v59 }
 0x477   : > { %v3495_v4 = vpop.permute.xlu1 %3494  ;;  %v3689_v27 = vadd.f32 %v3520_v0, %v2793_v46  ;;  %v1898_v29 = vmul.f32 %v10416_v3, %v12483_v24  ;;  %v2797_v20 = vadd.f32 %v2669_v22, %v2025_v33  ;;  %v1256_v1 = vmul.f32 %v10408_v41, %v12485_v19  ;;  %v12492_v22 = vld [vmem:[#allocation263_spill] sm:$0xff] }
 0x478   : > { %v7727_v12 = vpack.c.bf16 %v3811_v61, %v3810_v34  ;;  %v3684_v2 = vadd.f32 %v3495_v4, %v2788_v57  ;;  %v12477_v61 = vld [vmem:[#allocation127_spill] sm:$0xff]  ;;  %v12478_v34 = vld [vmem:[#allocation128_spill] sm:$0xff]  ;;  %v2024_v45 = vadd.f32 %v1896_v31, %v1252_v23  ;;  %v1900_v46 = vmul.f32 %v10416_v3, %v12487_v62 }
 0x479   : > { %v1255_v10 = vmul.f32 %v10408_v41, %v12477_v61  ;;  %v1899_v0 = vmul.f32 %v10416_v3, %v12478_v34  ;;  %v3817_v28 = vmax.f32 %v3689_v27, 0.0  ;;  %v2026_v7 = vadd.f32 %v1898_v29, %v1254_v25  ;;  %v12489_v23 = vld [vmem:[#allocation131_spill] sm:$0xff]  ;;  %v12490_v27 = vld [vmem:[#allocation132_spill] sm:$0xff] }
 0x47a   : > { %7823 = vst [vmem:[#allocation2 + $0x1b8] sm:$0xff] %v7727_v12   ;;  %v3812_v5 = vmax.f32 %v3684_v2, 0.0  ;;  %v3530_v49 = vpop.permute.xlu0 %3529  ;;  %v12481_v12 = vld [vmem:[#allocation130_spill] sm:$0xff]  ;;  %v2796_v55 = vadd.f32 %v2668_v47, %v2024_v45  ;;  %v1258_v30 = vmul.f32 %v10408_v41, %v12491_v51 }
 0x47b   : > { %v3505_v44 = vpop.permute.xlu1 %3504  ;;  %v3691_v4 = vadd.f32 %v3530_v49, %v2795_v38  ;;  %v1901_v2 = vmul.f32 %v10416_v3, %v12481_v12  ;;  %v2672_v38 = vmul.f32 %v10418_v35, %v12492_v22  ;;  %v12495_v12 = vld [vmem:[#allocation265_spill] sm:$0xff] }
 0x47c   : > { %v7732_v18 = vpack.c.bf16 %v3813_v16, %v3812_v5  ;;  %v3686_v13 = vadd.f32 %v3505_v44, %v2790_v15  ;;  %v2671_v16 = vmul.f32 %v10418_v35, %v12484_v56  ;;  %v2027_v15 = vadd.f32 %v1899_v0, %v1255_v10  ;;  %v12486_v44 = vld [vmem:[#allocation261_spill] sm:$0xff]  ;;  %v12494_v10 = vld [vmem:[#allocation6_spill] sm:$0xff] }
 0x47d   : > { %v3819_v42 = vmax.f32 %v3691_v4, 0.0  ;;  %v2029_v8 = vadd.f32 %v1901_v2, %v1257_v21  ;;  %v2670_v11 = vmul.f32 %v10418_v35, %v12486_v44  ;;  %v2675_v34 = vmul.f32 %v10418_v35, %v12494_v10 }
 0x47e   : > { %7824 = vst [vmem:[#allocation2 + $0x1c0] sm:$0xff] %v7732_v18   ;;  %v3814_v14 = vmax.f32 %v3686_v13, 0.0  ;;  %v3540_v40 = vpop.permute.xlu0 %3539  ;;  %v12488_v13 = vld [vmem:[#allocation348_spill] sm:$0xff]  ;;  %v2799_v37 = vadd.f32 %v2671_v16, %v2027_v15  ;;  %v2674_v2 = vmul.f32 %v10418_v35, %v12495_v12 }
 0x47f   : > { %v3515_v60 = vpop.permute.xlu1 %3514  ;;  %v3693_v48 = vadd.f32 %v3540_v40, %v2797_v20  ;;  %v2673_v63 = vmul.f32 %v10418_v35, %v12488_v13  ;;  %v2028_v40 = vadd.f32 %v1900_v46, %v1256_v1  ;;  %v2798_v9 = vadd.f32 %v2670_v11, %v2026_v7 }
 0x480   : > { %v7737_v57 = vpack.c.bf16 %v3815_v6, %v3814_v14  ;;  %v3688_v36 = vadd.f32 %v3515_v60, %v2792_v32  ;;  %v1259_v6 = vmul.f32 %v10408_v41, %v12489_v23  ;;  %v1903_v14 = vmul.f32 %v10416_v3, %v12490_v27 }
 0x481   : > { %v3821_v31 = vmax.f32 %v3693_v48, 0.0  ;;  %v2801_v0 = vadd.f32 %v2673_v63, %v2029_v8  ;;  %v2800_v45 = vadd.f32 %v2672_v38, %v2028_v40 }
 0x482   : > { %7825 = vst [vmem:[#allocation2 + $0x1c8] sm:$0xff] %v7737_v57   ;;  %v3816_v52 = vmax.f32 %v3688_v36, 0.0  ;;  %v3550_v17 = vpop.permute.xlu0 %3549  ;;  %v12493_v57 = vld [vmem:[#allocation266_spill] sm:$0xff] }
 0x483   : > { %v3525_v53 = vpop.permute.xlu1 %3524  ;;  %v3695_v60 = vadd.f32 %v3550_v17, %v2799_v37  ;;  %v1902_v36 = vmul.f32 %v10416_v3, %v12493_v57 }
 0x484   : > { %v7742_v5 = vpack.c.bf16 %v3817_v28, %v3816_v52  ;;  %v3690_v49 = vadd.f32 %v3525_v53, %v2794_v43  ;;  %v2031_v43 = vadd.f32 %v1903_v14, %v1259_v6 }
 0x485   : > { %v2030_v41 = vadd.f32 %v1902_v36, %v1258_v30  ;;  %v3823_v28 = vmax.f32 %v3695_v60, 0.0 }
 0x486   : > { %7826 = vst [vmem:[#allocation2 + $0x1d0] sm:$0xff] %v7742_v5   ;;  %v3818_v39 = vmax.f32 %v3690_v49, 0.0  ;;  %v3560_v33 = vpop.permute.xlu0 %3559  ;;  %v2803_v3 = vadd.f32 %v2675_v34, %v2031_v43 }
 0x487   : > { %v3535_v18 = vpop.permute.xlu1 %3534  ;;  %v3697_v4 = vadd.f32 %v3560_v33, %v2801_v0  ;;  %v2802_v53 = vadd.f32 %v2674_v2, %v2030_v41 }
 0x488   : > { %v7747_v32 = vpack.c.bf16 %v3819_v42, %v3818_v39  ;;  %v3692_v26 = vadd.f32 %v3535_v18, %v2796_v55 }
 0x489   : > { %v3825_v24 = vmax.f32 %v3697_v4, 0.0 }
 0x48a   : > { %7827 = vst [vmem:[#allocation2 + $0x1d8] sm:$0xff] %v7747_v32   ;;  %v3820_v54 = vmax.f32 %v3692_v26, 0.0  ;;  %v3570_v50 = vpop.permute.xlu0 %3569 }
 0x48b   : > { %v3545_v61 = vpop.permute.xlu1 %3544  ;;  %v3699_v29 = vadd.f32 %v3570_v50, %v2803_v3 }
 0x48c   : > { %v7752_v58 = vpack.c.bf16 %v3821_v31, %v3820_v54  ;;  %v3694_v25 = vadd.f32 %v3545_v61, %v2798_v9 }
 0x48d   : > { %v3827_v5 = vmax.f32 %v3699_v29, 0.0 }
 0x48e   : > { %7828 = vst [vmem:[#allocation2 + $0x1e0] sm:$0xff] %v7752_v58   ;;  %v3822_v52 = vmax.f32 %v3694_v25, 0.0 }
 0x48f   : > { %v3555_v21 = vpop.permute.xlu1 %3554 }
 0x490   : > { %v7757_v59 = vpack.c.bf16 %v3823_v28, %v3822_v52  ;;  %v3696_v47 = vadd.f32 %v3555_v21, %v2800_v45 }
 0x492   : > { %7829 = vst [vmem:[#allocation2 + $0x1e8] sm:$0xff] %v7757_v59   ;;  %v3824_v17 = vmax.f32 %v3696_v47, 0.0 }
 0x493   : > { %v3565_v56 = vpop.permute.xlu1 %3564 }
 0x494   : > { %v7762_v16 = vpack.c.bf16 %v3825_v24, %v3824_v17  ;;  %v3698_v20 = vadd.f32 %v3565_v56, %v2802_v53 }
 0x496   : > { %7830 = vst [vmem:[#allocation2 + $0x1f0] sm:$0xff] %v7762_v16   ;;  %v3826_v49 = vmax.f32 %v3698_v20, 0.0 }
 0x498   : > { %v7767_v15 = vpack.c.bf16 %v3827_v5, %v3826_v49 }
 0x49a   : > { %7831 = vst [vmem:[#allocation2 + $0x1f8] sm:$0xff] %v7767_v15  }
 0x49b PF: > { %v8383_v7 = vld [vmem:[#allocation2 + $0x78] sm:$0xff]   ;;  %v8475_v35 = vmov 0   ;;  %v8387_v48 = vld [vmem:[#allocation2 + $0x70] sm:$0xff]   ;;  %v8391_v44 = vld [vmem:[#allocation2 + $0x68] sm:$0xff]   ;;  %p7316_p6 = scmp.ne.s32.totalorder %s8461_s26, 3 }
 0x49c   : > { %v8384_v19 = vld [vmem:[#allocation2 + $0xf8] sm:$0xff]   ;;  %8381 = vset.pattern.permute.xlu0 %v8475_v35  ;;  %8382 = vset.pattern.permute.xlu1 %v8475_v35  ;;  %v8388_v39 = vld [vmem:[#allocation2 + $0xf0] sm:$0xff]   ;;  %v8392_v11 = vld [vmem:[#allocation2 + $0xe8] sm:$0xff]  }
 0x49d   : > { %7832 = vmatprep.subr.bf16.mxu0 %v8383_v7  ;;  %v8385_v1 = vld [vmem:[#allocation2 + $0x38] sm:$0xff]   ;;  %7944 = vmatprep.subr.bf16.mxu1 %v8384_v19  ;;  %v8389_v55 = vld [vmem:[#allocation2 + $0x30] sm:$0xff]   ;;  %v8393_v62 = vld [vmem:[#allocation2 + $0x28] sm:$0xff]  }
 0x49e   : > { %v8386_v42 = vld [vmem:[#allocation2 + $0xb8] sm:$0xff]   ;;  %7833 = vmatpush3.bf16.msra.mxu0 %v8385_v1  ;;  %v8390_v8 = vld [vmem:[#allocation2 + $0xb0] sm:$0xff]   ;;  %v8394_v46 = vld [vmem:[#allocation2 + $0xa8] sm:$0xff]  }
 0x49f   : > { %7945 = vmatpush3.bf16.msra.mxu1 %v8386_v42  ;;  %7834 = vmatprep.subr.bf16.mxu0 %v8387_v48  ;;  %v8395_v18 = vld [vmem:[#allocation2 + $0x60] sm:$0xff]   ;;  %v8399_v32 = vld [vmem:[#allocation2 + $0x58] sm:$0xff]   ;;  %v8403_v27 = vld [vmem:[#allocation2 + $0x50] sm:$0xff]  }
 0x4a0   : > { %7946 = vmatprep.subr.bf16.mxu1 %v8388_v39  ;;  %v8396_v13 = vld [vmem:[#allocation2 + $0xe0] sm:$0xff]   ;;  %v8400_v26 = vld [vmem:[#allocation2 + $0xd8] sm:$0xff]   ;;  %v8404_v14 = vld [vmem:[#allocation2 + $0xd0] sm:$0xff]  }
 0x4a1   : > { %v8397_v63 = vld [vmem:[#allocation2 + $0x20] sm:$0xff]   ;;  %v8401_v23 = vld [vmem:[#allocation2 + $0x18] sm:$0xff]   ;;  %v8405_v40 = vld [vmem:[#allocation2 + $0x10] sm:$0xff]  }
 0x4a2   : > { %7835 = vmatpush3.bf16.msra.mxu0 %v8389_v55  ;;  %v8398_v37 = vld [vmem:[#allocation2 + $0xa0] sm:$0xff]   ;;  %v8402_v6 = vld [vmem:[#allocation2 + $0x98] sm:$0xff]   ;;  %v8406_v33 = vld [vmem:[#allocation2 + $0x90] sm:$0xff]  }
 0x4a3   : > { %7947 = vmatpush3.bf16.msra.mxu1 %v8390_v8  ;;  %7836 = vmatprep.subr.bf16.mxu0 %v8391_v44  ;;  %v8407_v9 = vld [vmem:[#allocation2 + $0x48] sm:$0xff]   ;;  %v8411_v60 = vld [vmem:[#allocation2 + $0x40] sm:$0xff]   ;;  %v8415_v43 = vld [vmem:[#allocation2 + $0x178] sm:$0xff]  }
 0x4a4   : > { %7948 = vmatprep.subr.bf16.mxu1 %v8392_v11  ;;  %v8408_v51 = vld [vmem:[#allocation2 + $0xc8] sm:$0xff]   ;;  %v8412_v54 = vld [vmem:[#allocation2 + $0xc0] sm:$0xff]   ;;  %v8416_v45 = vld [vmem:[#allocation2 + $0x138] sm:$0xff]  }
 0x4a5   : > { %v8409_v30 = vld [vmem:[#allocation2 + $0x8] sm:$0xff]   ;;  %v8413_v22 = vld [vmem:[#allocation2] sm:$0xff]   ;;  %v8417_v41 = vld [vmem:[#allocation2 + $0x1f8] sm:$0xff]  }
 0x4a6   : > { %7837 = vmatpush3.bf16.msra.mxu0 %v8393_v62  ;;  %v8410_v31 = vld [vmem:[#allocation2 + $0x88] sm:$0xff]   ;;  %v8414_v38 = vld [vmem:[#allocation2 + $0x80] sm:$0xff]   ;;  %v8418_v28 = vld [vmem:[#allocation2 + $0x1b8] sm:$0xff]  }
 0x4a7   : > { %7949 = vmatpush3.bf16.msra.mxu1 %v8394_v46  ;;  %7838 = vmatprep.subr.bf16.mxu0 %v8395_v18  ;;  %v4469_v57 = vld [vmem:[%s8543_s11] sm:$0xff]  ;;  %v4470_v61 = vld [vmem:[%s8543_s11 + $0x8] sm:$0xff]  ;;  %v8419_v17 = vld [vmem:[#allocation2 + $0x170] sm:$0xff]  }
 0x4a8   : > { %7950 = vmatprep.subr.bf16.mxu1 %v8396_v13  ;;  %v4473_v36 = vld [vmem:[%s8543_s11 + $0x20] sm:$0xff]  ;;  %v4474_v0 = vld [vmem:[%s8543_s11 + $0x28] sm:$0xff]  ;;  %v8420_v16 = vld [vmem:[#allocation2 + $0x130] sm:$0xff]  }
 0x4a9   : > { %v7124_v10 = vcombine.low %v4469_v57, %v4473_v36  ;;  %v7125_v34 = vcombine.high %v4469_v57, %v4473_v36  ;;  %v7126_v58 = vcombine.low %v4470_v61, %v4474_v0  ;;  %v7127_v25 = vcombine.high %v4470_v61, %v4474_v0  ;;  %v4477_v4 = vld [vmem:[%s8543_s11 + $0x40] sm:$0xff]  ;;  %v4478_v21 = vld [vmem:[%s8543_s11 + $0x48] sm:$0xff]  ;;  %v8421_v5 = vld [vmem:[#allocation2 + $0x1f0] sm:$0xff]  }
 0x4aa   : > { %7839 = vmatpush3.bf16.msra.mxu0 %v8397_v63  ;;  %v4481_v52 = vld [vmem:[%s8543_s11 + $0x60] sm:$0xff]  ;;  %v4482_v12 = vld [vmem:[%s8543_s11 + $0x68] sm:$0xff]  ;;  %v8422_v49 = vld [vmem:[#allocation2 + $0x1b0] sm:$0xff]  }
 0x4ab   : > { %7951 = vmatpush3.bf16.msra.mxu1 %v8398_v37  ;;  %7840 = vmatprep.subr.bf16.mxu0 %v8399_v32  ;;  %v7133_v50 = vcombine.high %v4477_v4, %v4481_v52  ;;  %v4485_v2 = vld [vmem:[%s8543_s11 + $0x80] sm:$0xff]  ;;  %v7135_v3 = vcombine.high %v4478_v21, %v4482_v12  ;;  %v4486_v47 = vld [vmem:[%s8543_s11 + $0x88] sm:$0xff]  ;;  %v7132_v29 = vcombine.low %v4477_v4, %v4481_v52  ;;  %v8438_v4 = vld [vmem:[#allocation2 + $0x190] sm:$0xff]  }
 0x4ac   : > { %7952 = vmatprep.subr.bf16.mxu1 %v8400_v26  ;;  %5973 = vmatprep.mubr.bf16.mxu0 %v7125_v34  ;;  %v4489_v59 = vld [vmem:[%s8543_s11 + $0xa0] sm:$0xff]  ;;  %v4490_v24 = vld [vmem:[%s8543_s11 + $0xa8] sm:$0xff]  ;;  %v7134_v53 = vcombine.low %v4478_v21, %v4482_v12 }
 0x4ad   : > { %6134 = vmatprep.mubr.bf16.mxu1 %v7127_v25  ;;  %v7141_v56 = vcombine.high %v4485_v2, %v4489_v59  ;;  %v7143_v20 = vcombine.high %v4486_v47, %v4490_v24  ;;  %v4493_v15 = vld [vmem:[%s8543_s11 + $0xc0] sm:$0xff]  ;;  %v4494_v19 = vld [vmem:[%s8543_s11 + $0xc8] sm:$0xff]  ;;  %v7140_v42 = vcombine.low %v4485_v2, %v4489_v59  ;;  %v7142_v39 = vcombine.low %v4486_v47, %v4490_v24  ;;  %v4727_v25 = vld [vmem:[%s8548_s14 + $0x10] sm:$0xff] }
 0x4ae   : > { %7841 = vmatpush3.bf16.msra.mxu0 %v8401_v23  ;;  %v4497_v7 = vld [vmem:[%s8543_s11 + $0xe0] sm:$0xff]  ;;  %v4498_v35 = vld [vmem:[%s8543_s11 + $0xe8] sm:$0xff]  ;;  %4769 = vperm.xlu1 %8382, %v4727_v25   ;;  %v4731_v47 = vld [vmem:[%s8548_s14 + $0x30] sm:$0xff] }
 0x4af   : > { %7953 = vmatpush3.bf16.msra.mxu1 %v8402_v6  ;;  %7842 = vmatprep.subr.bf16.mxu0 %v8403_v27  ;;  %v8423_v1 = vld [vmem:[#allocation2 + $0x168] sm:$0xff]   ;;  %v7149_v55 = vcombine.high %v4493_v15, %v4497_v7  ;;  %v7151_v44 = vcombine.high %v4494_v19, %v4498_v35  ;;  %v4501_v62 = vld [vmem:[%s8543_s11 + $0x100] sm:$0xff]  ;;  %v7148_v32 = vcombine.low %v4493_v15, %v4497_v7  ;;  %v4732_v15 = vld [vmem:[%s8548_s14 + $0x38] sm:$0xff] }
 0x4b0   : > { %7954 = vmatprep.subr.bf16.mxu1 %v8404_v14  ;;  %v8424_v48 = vld [vmem:[#allocation2 + $0x128] sm:$0xff]   ;;  %v4505_v46 = vld [vmem:[%s8543_s11 + $0x120] sm:$0xff]  ;;  %v7150_v23 = vcombine.low %v4494_v19, %v4498_v35  ;;  %v4744_v25 = vld [vmem:[%s8548_s14 + $0x98] sm:$0xff] }
 0x4b1   : > { %v8425_v8 = vld [vmem:[#allocation2 + $0x1e8] sm:$0xff]   ;;  %v8427_v63 = vld [vmem:[#allocation2 + $0x160] sm:$0xff]   ;;  %v7157_v6 = vcombine.high %v4501_v62, %v4505_v46 }
 0x4b2   : > { %7843 = vmatpush3.bf16.msra.mxu0 %v8405_v40  ;;  %v8426_v11 = vld [vmem:[#allocation2 + $0x1a8] sm:$0xff]   ;;  %v8428_v37 = vld [vmem:[#allocation2 + $0x120] sm:$0xff]  }
 0x4b3   : > { %7955 = vmatpush3.bf16.msra.mxu1 %v8406_v33  ;;  %7844 = vmatprep.subr.bf16.mxu0 %v8407_v9  ;;  %v4502_v18 = vld [vmem:[%s8543_s11 + $0x108] sm:$0xff]  ;;  %v8429_v26 = vld [vmem:[#allocation2 + $0x1e0] sm:$0xff]   ;;  %v8431_v9 = vld [vmem:[#allocation2 + $0x158] sm:$0xff]  }
 0x4b4   : > { %7956 = vmatprep.subr.bf16.mxu1 %v8408_v51  ;;  %v4506_v13 = vld [vmem:[%s8543_s11 + $0x128] sm:$0xff]  ;;  %v8430_v27 = vld [vmem:[#allocation2 + $0x1a0] sm:$0xff]  }
 0x4b5   : > { %v7159_v14 = vcombine.high %v4502_v18, %v4506_v13  ;;  %v4509_v40 = vld [vmem:[%s8543_s11 + $0x140] sm:$0xff]  ;;  %v4510_v51 = vld [vmem:[%s8543_s11 + $0x148] sm:$0xff] }
 0x4b6   : > { %7845 = vmatpush3.bf16.msra.mxu0 %v8409_v30  ;;  %v4513_v33 = vld [vmem:[%s8543_s11 + $0x160] sm:$0xff]  ;;  %v4514_v30 = vld [vmem:[%s8543_s11 + $0x168] sm:$0xff] }
 0x4b7   : > { %7957 = vmatpush3.bf16.msra.mxu1 %v8410_v31  ;;  %7846 = vmatprep.subr.bf16.mxu0 %v8411_v60  ;;  %v8432_v31 = vld [vmem:[#allocation2 + $0x118] sm:$0xff]   ;;  %v7165_v57 = vcombine.high %v4509_v40, %v4513_v33  ;;  %v4725_v36 = vld [vmem:[%s8548_s14] sm:$0xff]  ;;  %v7167_v61 = vcombine.high %v4510_v51, %v4514_v30  ;;  %v7164_v52 = vcombine.low %v4509_v40, %v4513_v33  ;;  %v4730_v59 = vld [vmem:[%s8548_s14 + $0x28] sm:$0xff] }
 0x4b8   : > { %7958 = vmatprep.subr.bf16.mxu1 %v8412_v54  ;;  %v8433_v60 = vld [vmem:[#allocation2 + $0x1d8] sm:$0xff]   ;;  %4759 = vperm.xlu0 %8381, %v4725_v36   ;;  %v4517_v34 = vld [vmem:[%s8543_s11 + $0x180] sm:$0xff]  ;;  %v7166_v21 = vcombine.low %v4510_v51, %v4514_v30  ;;  %v8442_v7 = vld [vmem:[#allocation2 + $0x188] sm:$0xff]  }
 0x4b9   : > { %v8434_v54 = vld [vmem:[#allocation2 + $0x198] sm:$0xff]   ;;  %v4521_v0 = vld [vmem:[%s8543_s11 + $0x1a0] sm:$0xff]  ;;  %v4542_v33 = vld [vmem:[%s8543_s11 + $0x248] sm:$0xff] }
 0x4ba   : > { %7847 = vmatpush3.bf16.msra.mxu0 %v8413_v22  ;;  %v7156_v22 = vcombine.low %v4501_v62, %v4505_v46  ;;  %v7173_v12 = vcombine.high %v4517_v34, %v4521_v0  ;;  %v4729_v2 = vld [vmem:[%s8548_s14 + $0x20] sm:$0xff] }
 0x4bb   : > { %7959 = vmatpush3.bf16.msra.mxu1 %v8414_v38  ;;  %8056 = vmatprep.subr.bf16.mxu0 %v8415_v43  ;;  %v7158_v38 = vcombine.low %v4502_v18, %v4506_v13  ;;  %v4518_v43 = vld [vmem:[%s8543_s11 + $0x188] sm:$0xff]  ;;  %v4525_v24 = vld [vmem:[%s8543_s11 + $0x1c0] sm:$0xff] }
 0x4bc   : > { %8168 = vmatprep.subr.bf16.mxu1 %v8417_v41  ;;  %v8437_v41 = vld [vmem:[#allocation2 + $0x1d0] sm:$0xff]   ;;  %v8443_v62 = vld [vmem:[#allocation2 + $0x140] sm:$0xff]  }
 0x4bd   : > { %5974 = vmatmul.mubr.bf16.vlgmr.msra.gmra.mxu0 %v7124_v10  ;;  %v4726_v10 = vld [vmem:[%s8548_s14 + $0x8] sm:$0xff]  ;;  %v4737_v46 = vld [vmem:[%s8548_s14 + $0x60] sm:$0xff] }
 0x4be   : > { %6135 = vmatmul.mubr.bf16.vlgmr.msra.gmra.mxu1 %v7126_v58  ;;  %8057 = vmatpush3.bf16.msra.mxu0 %v8416_v45  ;;  %v8435_v58 = vld [vmem:[#allocation2 + $0x150] sm:$0xff]   ;;  %v8444_v18 = vld [vmem:[#allocation2 + $0x100] sm:$0xff]  }
 0x4bf   : > { %8169 = vmatpush3.bf16.msra.mxu1 %v8418_v28  ;;  %5981 = vmatprep.mubr.bf16.mxu0 %v7133_v50  ;;  %v8436_v45 = vld [vmem:[#allocation2 + $0x110] sm:$0xff]   ;;  %v4522_v28 = vld [vmem:[%s8543_s11 + $0x1a8] sm:$0xff]  ;;  %v4728_v50 = vld [vmem:[%s8548_s14 + $0x18] sm:$0xff] }
 0x4c0   : > { %6142 = vmatprep.mubr.bf16.mxu1 %v7135_v3  ;;  %8058 = vmatprep.subr.bf16.mxu0 %v8419_v17  ;;  %v7175_v3 = vcombine.high %v4518_v43, %v4522_v28  ;;  %v8439_v17 = vld [vmem:[#allocation2 + $0x148] sm:$0xff]   ;;  %v7174_v19 = vcombine.low %v4518_v43, %v4522_v28  ;;  %v4545_v40 = vld [vmem:[%s8543_s11 + $0x260] sm:$0xff]  ;;  %v4747_v28 = vld [vmem:[%s8548_s14 + $0xb0] sm:$0xff] }
 0x4c1   : > { %8170 = vmatprep.subr.bf16.mxu1 %v8421_v5  ;;  %4764 = vperm.xlu0 %8381, %v4726_v10   ;;  %v8441_v5 = vld [vmem:[#allocation2 + $0x1c8] sm:$0xff]   ;;  %v4741_v51 = vld [vmem:[%s8548_s14 + $0x80] sm:$0xff] }
 0x4c2   : > { %8059 = vmatpush3.bf16.msra.mxu0 %v8420_v16  ;;  %4774 = vperm.xlu1 %8382, %v4728_v50   ;;  %v8440_v16 = vld [vmem:[#allocation2 + $0x108] sm:$0xff]   ;;  %v4549_v36 = vld [vmem:[%s8543_s11 + $0x280] sm:$0xff] }
 0x4c3   : > { %8171 = vmatpush3.bf16.msra.mxu1 %v8422_v49  ;;  %8060 = vmatprep.subr.bf16.mxu0 %v8423_v1  ;;  %v7172_v49 = vcombine.low %v4517_v34, %v4521_v0  ;;  %v4550_v10 = vld [vmem:[%s8543_s11 + $0x288] sm:$0xff]  ;;  %v4745_v0 = vld [vmem:[%s8548_s14 + $0xa0] sm:$0xff] }
 0x4c4   : > { %8172 = vmatprep.subr.bf16.mxu1 %v8425_v8  ;;  %v4534_v8 = vld [vmem:[%s8543_s11 + $0x208] sm:$0xff]  ;;  %v4561_v50 = vld [vmem:[%s8543_s11 + $0x2e0] sm:$0xff] }
 0x4c5   : > { %5982 = vmatmul.mubr.bf16.gmra.mxu0 %v7132_v29  ;;  %4779 = vperm.xlu0 %8381, %v4729_v2   ;;  %v4529_v29 = vld [vmem:[%s8543_s11 + $0x1e0] sm:$0xff]  ;;  %v4554_v34 = vld [vmem:[%s8543_s11 + $0x2a8] sm:$0xff] }
 0x4c6   : > { %6143 = vmatmul.mubr.bf16.gmra.mxu1 %v7134_v53  ;;  %5989 = vmatprep.mubr.bf16.mxu0 %v7141_v56  ;;  %v4526_v53 = vld [vmem:[%s8543_s11 + $0x1c8] sm:$0xff]  ;;  %v7181_v35 = vcombine.high %v4525_v24, %v4529_v29  ;;  %v7180_v13 = vcombine.low %v4525_v24, %v4529_v29  ;;  %v4749_v2 = vld [vmem:[%s8548_s14 + $0xc0] sm:$0xff] }
 0x4c7   : > { %6150 = vmatprep.mubr.bf16.mxu1 %v7143_v20  ;;  %8061 = vmatpush3.bf16.msra.mxu0 %v8424_v48  ;;  %v4530_v56 = vld [vmem:[%s8543_s11 + $0x1e8] sm:$0xff]  ;;  %v4733_v20 = vld [vmem:[%s8548_s14 + $0x40] sm:$0xff] }
 0x4c8   : > { %8173 = vmatpush3.bf16.msra.mxu1 %v8426_v11  ;;  %8062 = vmatprep.subr.bf16.mxu0 %v8427_v63  ;;  %v7183_v1 = vcombine.high %v4526_v53, %v4530_v56  ;;  %v4533_v48 = vld [vmem:[%s8543_s11 + $0x200] sm:$0xff]  ;;  %v4736_v11 = vld [vmem:[%s8548_s14 + $0x58] sm:$0xff] }
 0x4c9   : > { %8174 = vmatprep.subr.bf16.mxu1 %v8429_v26  ;;  %4789 = vperm.xlu0 %8381, %v4731_v47   ;;  %v8445_v63 = vld [vmem:[#allocation2 + $0x1c0] sm:$0xff]   ;;  %v7206_v47 = vcombine.low %v4550_v10, %v4554_v34 }
 0x4ca   : > { %4784 = vperm.xlu1 %8382, %v4730_v59   ;;  %v8446_v26 = vld [vmem:[#allocation2 + $0x180] sm:$0xff]   ;;  %v4748_v59 = vld [vmem:[%s8548_s14 + $0xb8] sm:$0xff] }
 0x4cb   : > { %8063 = vmatpush3.bf16.msra.mxu0 %v8428_v37  ;;  %v7182_v37 = vcombine.low %v4526_v53, %v4530_v56  ;;  %v4750_v53 = vld [vmem:[%s8548_s14 + $0xc8] sm:$0xff]  ;;  %v4565_v56 = vld [vmem:[%s8543_s11 + $0x300] sm:$0xff] }
 0x4cc   : > { %8175 = vmatpush3.bf16.msra.mxu1 %v8430_v27  ;;  %8064 = vmatprep.subr.bf16.mxu0 %v8431_v9  ;;  %v4738_v27 = vld [vmem:[%s8548_s14 + $0x68] sm:$0xff] }
 0x4cd   : > { %5990 = vmatmul.mubr.bf16.gmra.mxu0 %v7140_v42  ;;  %8176 = vmatprep.subr.bf16.mxu1 %v8433_v60  ;;  %v4735_v42 = vld [vmem:[%s8548_s14 + $0x50] sm:$0xff]  ;;  %v4546_v9 = vld [vmem:[%s8543_s11 + $0x268] sm:$0xff] }
 0x4ce   : > { %6151 = vmatmul.mubr.bf16.gmra.mxu1 %v7142_v39  ;;  %5997 = vmatprep.mubr.bf16.mxu0 %v7149_v55  ;;  %v4537_v39 = vld [vmem:[%s8543_s11 + $0x220] sm:$0xff]  ;;  %v4734_v55 = vld [vmem:[%s8548_s14 + $0x48] sm:$0xff]  ;;  %v7198_v43 = vcombine.low %v4542_v33, %v4546_v9 }
 0x4cf   : > { %6158 = vmatprep.mubr.bf16.mxu1 %v7151_v44  ;;  %8065 = vmatpush3.bf16.msra.mxu0 %v8432_v31  ;;  %v4538_v44 = vld [vmem:[%s8543_s11 + $0x228] sm:$0xff]  ;;  %v7188_v30 = vcombine.low %v4533_v48, %v4537_v39  ;;  %v4740_v31 = vld [vmem:[%s8548_s14 + $0x78] sm:$0xff] }
 0x4d0   : > { %8177 = vmatpush3.bf16.msra.mxu1 %v8434_v54  ;;  %8066 = vmatprep.subr.bf16.mxu0 %v8435_v58  ;;  %v7190_v60 = vcombine.low %v4534_v8, %v4538_v44 }
 0x4d1   : > { %8178 = vmatprep.subr.bf16.mxu1 %v8437_v41  ;;  %4799 = vperm.xlu0 %8381, %v4733_v20   ;;  %v7207_v41 = vcombine.high %v4550_v10, %v4554_v34  ;;  %v4566_v20 = vld [vmem:[%s8543_s11 + $0x308] sm:$0xff]  ;;  %v6628_v10 = vld [vmem:[%s8553_s17 + $0x50] sm:$0xff] }
 0x4d2   : > { %4794 = vperm.xlu1 %8382, %v4732_v15  }
 0x4d3   : > { %8067 = vmatpush3.bf16.msra.mxu0 %v8436_v45 }
 0x4d4   : > { %8179 = vmatpush3.bf16.msra.mxu1 %v8438_v4  ;;  %8068 = vmatprep.subr.bf16.mxu0 %v8439_v17  ;;  %v4746_v4 = vld [vmem:[%s8548_s14 + $0xa8] sm:$0xff]  ;;  %v4751_v17 = vld [vmem:[%s8548_s14 + $0xd0] sm:$0xff] }
 0x4d5   : > { %5998 = vmatmul.mubr.bf16.gmra.mxu0 %v7148_v32  ;;  %8180 = vmatprep.subr.bf16.mxu1 %v8441_v5  ;;  %v7189_v32 = vcombine.high %v4533_v48, %v4537_v39  ;;  %v4570_v5 = vld [vmem:[%s8543_s11 + $0x328] sm:$0xff]  ;;  %v6618_v48 = vld [vmem:[%s8553_s17] sm:$0xff] }
 0x4d6   : > { %6159 = vmatmul.mubr.bf16.gmra.mxu1 %v7150_v23  ;;  %6005 = vmatprep.mubr.bf16.mxu0 %v7157_v6  ;;  %v7191_v23 = vcombine.high %v4534_v8, %v4538_v44  ;;  %v4739_v6 = vld [vmem:[%s8548_s14 + $0x70] sm:$0xff]  ;;  %v4573_v39 = vld [vmem:[%s8543_s11 + $0x340] sm:$0xff]  ;;  %v4574_v8 = vld [vmem:[%s8543_s11 + $0x348] sm:$0xff] }
 0x4d7   : > { %6166 = vmatprep.mubr.bf16.mxu1 %v7159_v14  ;;  %8069 = vmatpush3.bf16.msra.mxu0 %v8440_v16  ;;  %v4541_v14 = vld [vmem:[%s8543_s11 + $0x240] sm:$0xff]  ;;  %v4578_v44 = vld [vmem:[%s8543_s11 + $0x368] sm:$0xff] }
 0x4d8   : > { %8181 = vmatpush3.bf16.msra.mxu1 %v8442_v7  ;;  %4809 = vperm.xlu0 %8381, %v4735_v42   ;;  %v7197_v54 = vcombine.high %v4541_v14, %v4545_v40  ;;  %v7196_v58 = vcombine.low %v4541_v14, %v4545_v40  ;;  %v4569_v16 = vld [vmem:[%s8543_s11 + $0x320] sm:$0xff]  ;;  %v4752_v7 = vld [vmem:[%s8548_s14 + $0xd8] sm:$0xff]  ;;  %v6619_v42 = vld [vmem:[%s8553_s17 + $0x8] sm:$0xff] }
 0x4d9   : > { %4804 = vperm.xlu1 %8382, %v4734_v55   ;;  %8070 = vmatprep.subr.bf16.mxu0 %v8443_v62  ;;  %v4577_v55 = vld [vmem:[%s8543_s11 + $0x360] sm:$0xff]  ;;  %v7220_v62 = vcombine.low %v4565_v56, %v4569_v16  ;;  %v6625_v14 = vld [vmem:[%s8553_s17 + $0x38] sm:$0xff] }
 0x4da   : > { %8182 = vmatprep.subr.bf16.mxu1 %v8445_v63  ;;  %v7231_v63 = vcombine.high %v4574_v8, %v4578_v44  ;;  %v7228_v40 = vcombine.low %v4573_v39, %v4577_v55 }
 0x4db   : > { %8071 = vmatpush3.bf16.msra.mxu0 %v8444_v18  ;;  %v7222_v18 = vcombine.low %v4566_v20, %v4570_v5 }
 0x4dc   : > { %4819 = vperm.xlu0 %8381, %v4737_v46   ;;  %8183 = vmatpush3.bf16.msra.mxu1 %v8446_v26  ;;  %v6620_v46 = vld [vmem:[%s8553_s17 + $0x10] sm:$0xff]  ;;  %v4581_v26 = vld [vmem:[%s8543_s11 + $0x380] sm:$0xff] }
 0x4dd   : > { %6006 = vmatmul.mubr.bf16.gmra.mxu0 %v7156_v22  ;;  %4814 = vperm.xlu1 %8382, %v4736_v11   ;;  %v7199_v22 = vcombine.high %v4542_v33, %v4546_v9  ;;  %v6621_v11 = vld [vmem:[%s8553_s17 + $0x18] sm:$0xff]  ;;  %v6624_v33 = vld [vmem:[%s8553_s17 + $0x30] sm:$0xff]  ;;  %v7230_v9 = vcombine.low %v4574_v8, %v4578_v44 }
 0x4de   : > { %6167 = vmatmul.mubr.bf16.gmra.mxu1 %v7158_v38  ;;  %6013 = vmatprep.mubr.bf16.mxu0 %v7165_v57  ;;  %v4743_v38 = vld [vmem:[%s8548_s14 + $0x90] sm:$0xff]  ;;  %v4742_v57 = vld [vmem:[%s8548_s14 + $0x88] sm:$0xff] }
 0x4df   : > { %6174 = vmatprep.mubr.bf16.mxu1 %v7167_v61  ;;  %v4553_v61 = vld [vmem:[%s8543_s11 + $0x2a0] sm:$0xff]  ;;  %v6640_v8 = vld [vmem:[%s8553_s17 + $0xb0] sm:$0xff] }
 0x4e0   : > { %4829 = vperm.xlu0 %8381, %v4739_v6   ;;  %v7205_v45 = vcombine.high %v4549_v36, %v4553_v61  ;;  %v4582_v6 = vld [vmem:[%s8543_s11 + $0x388] sm:$0xff] }
 0x4e1   : > { %4824 = vperm.xlu1 %8382, %v4738_v27   ;;  %v4586_v27 = vld [vmem:[%s8543_s11 + $0x3a8] sm:$0xff] }
 0x4e2   : > { %v7238_v34 = vcombine.low %v4582_v6, %v4586_v27 }
 0x4e4   : > { %4839 = vperm.xlu0 %8381, %v4741_v51  }
 0x4e5   : > { %6014 = vmatmul.mubr.bf16.gmra.mxu0 %v7164_v52  ;;  %4834 = vperm.xlu1 %8382, %v4740_v31   ;;  %v4557_v52 = vld [vmem:[%s8543_s11 + $0x2c0] sm:$0xff]  ;;  %v6627_v31 = vld [vmem:[%s8553_s17 + $0x48] sm:$0xff] }
 0x4e6   : > { %6175 = vmatmul.mubr.bf16.gmra.mxu1 %v7166_v21  ;;  %6021 = vmatprep.mubr.bf16.mxu0 %v7173_v12  ;;  %v4558_v21 = vld [vmem:[%s8543_s11 + $0x2c8] sm:$0xff]  ;;  %v7213_v24 = vcombine.high %v4557_v52, %v4561_v50  ;;  %v7212_v15 = vcombine.low %v4557_v52, %v4561_v50  ;;  %v6633_v52 = vld [vmem:[%s8553_s17 + $0x78] sm:$0xff] }
 0x4e7   : > { %6182 = vmatprep.mubr.bf16.mxu1 %v7175_v3  ;;  %v4562_v12 = vld [vmem:[%s8543_s11 + $0x2e8] sm:$0xff]  ;;  %v7204_v3 = vcombine.low %v4549_v36, %v4553_v61  ;;  %v6629_v36 = vld [vmem:[%s8553_s17 + $0x58] sm:$0xff] }
 0x4e8   : > { %4849 = vperm.xlu0 %8381, %v4743_v38   ;;  %v7215_v29 = vcombine.high %v4558_v21, %v4562_v12  ;;  %v4590_v38 = vld [vmem:[%s8543_s11 + $0x3c8] sm:$0xff] }
 0x4e9   : > { %4844 = vperm.xlu1 %8382, %v4742_v57   ;;  %v4594_v57 = vld [vmem:[%s8543_s11 + $0x3e8] sm:$0xff] }
 0x4ec   : > { %4859 = vperm.xlu0 %8381, %v4745_v0  }
 0x4ed   : > { %6022 = vmatmul.mubr.bf16.gmra.mxu0 %v7172_v49  ;;  %4854 = vperm.xlu1 %8382, %v4744_v25   ;;  %v4753_v49 = vld [vmem:[%s8548_s14 + $0xe0] sm:$0xff]  ;;  %v6631_v25 = vld [vmem:[%s8553_s17 + $0x68] sm:$0xff] }
 0x4ee   : > { %6183 = vmatmul.mubr.bf16.gmra.mxu1 %v7174_v19  ;;  %6029 = vmatprep.mubr.bf16.mxu0 %v7181_v35  ;;  %v7214_v19 = vcombine.low %v4558_v21, %v4562_v12  ;;  %v7221_v35 = vcombine.high %v4565_v56, %v4569_v16  ;;  %v6632_v21 = vld [vmem:[%s8553_s17 + $0x70] sm:$0xff]  ;;  %v7246_v12 = vcombine.low %v4590_v38, %v4594_v57  ;;  %v6637_v56 = vld [vmem:[%s8553_s17 + $0x98] sm:$0xff] }
 0x4ef   : > { %6190 = vmatprep.mubr.bf16.mxu1 %v7183_v1  ;;  %v7223_v1 = vcombine.high %v4566_v20, %v4570_v5  ;;  %v6636_v20 = vld [vmem:[%s8553_s17 + $0x90] sm:$0xff] }
 0x4f0   : > { %4869 = vperm.xlu0 %8381, %v4747_v28   ;;  %v4472_v28 = vld [vmem:[%s8543_s11 + $0x18] sm:$0xff] }
 0x4f1   : > { %4864 = vperm.xlu1 %8382, %v4746_v4   ;;  %v4476_v4 = vld [vmem:[%s8543_s11 + $0x38] sm:$0xff] }
 0x4f2   : > { %v7130_v5 = vcombine.low %v4472_v28, %v4476_v4 }
 0x4f4   : > { %4879 = vperm.xlu0 %8381, %v4749_v2  }
 0x4f5   : > { %6030 = vmatmul.mubr.bf16.gmra.mxu0 %v7180_v13  ;;  %4874 = vperm.xlu1 %8382, %v4748_v59   ;;  %v7229_v13 = vcombine.high %v4573_v39, %v4577_v55  ;;  %v6635_v59 = vld [vmem:[%s8553_s17 + $0x88] sm:$0xff]  ;;  %v6641_v39 = vld [vmem:[%s8553_s17 + $0xb8] sm:$0xff] }
 0x4f6   : > { %6191 = vmatmul.mubr.bf16.gmra.mxu1 %v7182_v37  ;;  %6037 = vmatprep.mubr.bf16.mxu0 %v7189_v32  ;;  %v6623_v37 = vld [vmem:[%s8553_s17 + $0x28] sm:$0xff]  ;;  %v6622_v32 = vld [vmem:[%s8553_s17 + $0x20] sm:$0xff] }
 0x4f7   : > { %6198 = vmatprep.mubr.bf16.mxu1 %v7191_v23  ;;  %v4585_v23 = vld [vmem:[%s8543_s11 + $0x3a0] sm:$0xff] }
 0x4f8   : > { %4889 = vperm.xlu0 %8381, %v4751_v17   ;;  %v7237_v51 = vcombine.high %v4581_v26, %v4585_v23  ;;  %v7236_v61 = vcombine.low %v4581_v26, %v4585_v23  ;;  %v4480_v17 = vld [vmem:[%s8543_s11 + $0x58] sm:$0xff]  ;;  %v6643_v26 = vld [vmem:[%s8553_s17 + $0xc8] sm:$0xff] }
 0x4f9   : > { %4884 = vperm.xlu1 %8382, %v4750_v53   ;;  %v4484_v53 = vld [vmem:[%s8543_s11 + $0x78] sm:$0xff] }
 0x4fa   : > { %v7138_v44 = vcombine.low %v4480_v17, %v4484_v53 }
 0x4fc   : > { %4899 = vperm.xlu0 %8381, %v4753_v49  }
 0x4fd   : > { %6038 = vmatmul.mubr.bf16.gmra.mxu0 %v7188_v30  ;;  %4894 = vperm.xlu1 %8382, %v4752_v7   ;;  %v7239_v30 = vcombine.high %v4582_v6, %v4586_v27  ;;  %v6639_v7 = vld [vmem:[%s8553_s17 + $0xa8] sm:$0xff]  ;;  %v4755_v6 = vld [vmem:[%s8548_s14 + $0xf0] sm:$0xff] }
 0x4fe   : > { %6199 = vmatmul.mubr.bf16.gmra.mxu1 %v7190_v60  ;;  %6045 = vmatprep.mubr.bf16.mxu0 %v7197_v54  ;;  %v6626_v60 = vld [vmem:[%s8553_s17 + $0x40] sm:$0xff] }
 0x4ff   : > { %6206 = vmatprep.mubr.bf16.mxu1 %v7199_v22  ;;  %v4589_v54 = vld [vmem:[%s8543_s11 + $0x3c0] sm:$0xff] }
 0x500   : > { %6657 = vperm.xlu0 %8381, %v6619_v42   ;;  %v4593_v22 = vld [vmem:[%s8543_s11 + $0x3e0] sm:$0xff]  ;;  %v4488_v42 = vld [vmem:[%s8543_s11 + $0x98] sm:$0xff] }
 0x501   : > { %6652 = vperm.xlu1 %8382, %v6618_v48   ;;  %v7245_v0 = vcombine.high %v4589_v54, %v4593_v22  ;;  %v7244_v50 = vcombine.low %v4589_v54, %v4593_v22  ;;  %v4492_v48 = vld [vmem:[%s8543_s11 + $0xb8] sm:$0xff]  ;;  %v6646_v54 = vld [vmem:[%s8553_s17 + $0xe0] sm:$0xff] }
 0x502   : > { %v7146_v27 = vcombine.low %v4488_v42, %v4492_v48 }
 0x504   : > { %6667 = vperm.xlu0 %8381, %v6621_v11  }
 0x505   : > { %6046 = vmatmul.mubr.bf16.gmra.mxu0 %v7196_v58  ;;  %6662 = vperm.xlu1 %8382, %v6620_v46   ;;  %v7247_v58 = vcombine.high %v4590_v38, %v4594_v57  ;;  %v6642_v46 = vld [vmem:[%s8553_s17 + $0xc0] sm:$0xff]  ;;  %v6645_v38 = vld [vmem:[%s8553_s17 + $0xd8] sm:$0xff] }
 0x506   : > { %6207 = vmatmul.mubr.bf16.gmra.mxu1 %v7198_v43  ;;  %6053 = vmatprep.mubr.bf16.mxu0 %v7205_v45  ;;  %v6630_v43 = vld [vmem:[%s8553_s17 + $0x60] sm:$0xff]  ;;  %v4471_v45 = vld [vmem:[%s8543_s11 + $0x10] sm:$0xff] }
 0x507   : > { %6214 = vmatprep.mubr.bf16.mxu1 %v7207_v41  ;;  %v4475_v41 = vld [vmem:[%s8543_s11 + $0x30] sm:$0xff] }
 0x508   : > { %6677 = vperm.xlu0 %8381, %v6623_v37   ;;  %v7129_v2 = vcombine.high %v4471_v45, %v4475_v41  ;;  %v7128_v16 = vcombine.low %v4471_v45, %v4475_v41  ;;  %v4496_v37 = vld [vmem:[%s8543_s11 + $0xd8] sm:$0xff] }
 0x509   : > { %6672 = vperm.xlu1 %8382, %v6622_v32   ;;  %v4500_v32 = vld [vmem:[%s8543_s11 + $0xf8] sm:$0xff] }
 0x50a   : > { %v7154_v57 = vcombine.low %v4496_v37, %v4500_v32  ;;  %v6649_v41 = vld [vmem:[%s8553_s17 + $0xf8] sm:$0xff] }
 0x50c   : > { %6687 = vperm.xlu0 %8381, %v6625_v14  }
 0x50d   : > { %6054 = vmatmul.mubr.bf16.gmra.mxu0 %v7204_v3  ;;  %6682 = vperm.xlu1 %8382, %v6624_v33   ;;  %v7131_v3 = vcombine.high %v4472_v28, %v4476_v4  ;;  %v6644_v33 = vld [vmem:[%s8553_s17 + $0xd0] sm:$0xff] }
 0x50e   : > { %6215 = vmatmul.mubr.bf16.gmra.mxu1 %v7206_v47  ;;  %6061 = vmatprep.mubr.bf16.mxu0 %v7213_v24  ;;  %v6634_v47 = vld [vmem:[%s8553_s17 + $0x80] sm:$0xff]  ;;  %v4479_v24 = vld [vmem:[%s8543_s11 + $0x50] sm:$0xff] }
 0x50f   : > { %6222 = vmatprep.mubr.bf16.mxu1 %v7215_v29  ;;  %v4483_v29 = vld [vmem:[%s8543_s11 + $0x70] sm:$0xff] }
 0x510   : > { %6697 = vperm.xlu0 %8381, %v6627_v31   ;;  %v7137_v49 = vcombine.high %v4479_v24, %v4483_v29  ;;  %v7136_v55 = vcombine.low %v4479_v24, %v4483_v29  ;;  %v4504_v31 = vld [vmem:[%s8543_s11 + $0x118] sm:$0xff] }
 0x511   : > { %6692 = vperm.xlu1 %8382, %v6626_v60   ;;  %v4508_v60 = vld [vmem:[%s8543_s11 + $0x138] sm:$0xff] }
 0x512   : > { %v7162_v28 = vcombine.low %v4504_v31, %v4508_v60 }
 0x514   : > { %6707 = vperm.xlu0 %8381, %v6629_v36  }
 0x515   : > { %6062 = vmatmul.mubr.bf16.gmra.mxu0 %v7212_v15  ;;  %6702 = vperm.xlu1 %8382, %v6628_v10   ;;  %v7139_v15 = vcombine.high %v4480_v17, %v4484_v53  ;;  %v6648_v10 = vld [vmem:[%s8553_s17 + $0xf0] sm:$0xff] }
 0x516   : > { %6223 = vmatmul.mubr.bf16.gmra.mxu1 %v7214_v19  ;;  %6069 = vmatprep.mubr.bf16.mxu0 %v7221_v35  ;;  %v6638_v19 = vld [vmem:[%s8553_s17 + $0xa0] sm:$0xff]  ;;  %v4487_v35 = vld [vmem:[%s8543_s11 + $0x90] sm:$0xff] }
 0x517   : > { %6230 = vmatprep.mubr.bf16.mxu1 %v7223_v1  ;;  %v4491_v1 = vld [vmem:[%s8543_s11 + $0xb0] sm:$0xff] }
 0x518   : > { %6717 = vperm.xlu0 %8381, %v6631_v25   ;;  %v7145_v11 = vcombine.high %v4487_v35, %v4491_v1  ;;  %v7144_v23 = vcombine.low %v4487_v35, %v4491_v1  ;;  %v4512_v25 = vld [vmem:[%s8543_s11 + $0x158] sm:$0xff] }
 0x519   : > { %6712 = vperm.xlu1 %8382, %v6630_v43   ;;  %v4516_v43 = vld [vmem:[%s8543_s11 + $0x178] sm:$0xff] }
 0x51a   : > { %v7170_v24 = vcombine.low %v4512_v25, %v4516_v43 }
 0x51c   : > { %6727 = vperm.xlu0 %8381, %v6633_v52   ;;  %v7171_v52 = vcombine.high %v4512_v25, %v4516_v43 }
 0x51d   : > { %6070 = vmatmul.mubr.bf16.gmra.mxu0 %v7220_v62  ;;  %6722 = vperm.xlu1 %8382, %v6632_v21   ;;  %v7147_v62 = vcombine.high %v4488_v42, %v4492_v48  ;;  %v4519_v21 = vld [vmem:[%s8543_s11 + $0x190] sm:$0xff] }
 0x51e   : > { %6231 = vmatmul.mubr.bf16.gmra.mxu1 %v7222_v18  ;;  %6077 = vmatprep.mubr.bf16.mxu0 %v7229_v13  ;;  %v4754_v18 = vld [vmem:[%s8548_s14 + $0xe8] sm:$0xff]  ;;  %v4495_v13 = vld [vmem:[%s8543_s11 + $0xd0] sm:$0xff] }
 0x51f   : > { %6238 = vmatprep.mubr.bf16.mxu1 %v7231_v63  ;;  %v4499_v63 = vld [vmem:[%s8543_s11 + $0xf0] sm:$0xff] }
 0x520   : > { %6737 = vperm.xlu0 %8381, %v6635_v59   ;;  %v7153_v14 = vcombine.high %v4495_v13, %v4499_v63  ;;  %v7152_v22 = vcombine.low %v4495_v13, %v4499_v63  ;;  %v4524_v59 = vld [vmem:[%s8543_s11 + $0x1b8] sm:$0xff]  ;;  %v4535_v42 = vld [vmem:[%s8543_s11 + $0x210] sm:$0xff] }
 0x521   : > { %6732 = vperm.xlu1 %8382, %v6634_v47   ;;  %v4539_v48 = vld [vmem:[%s8543_s11 + $0x230] sm:$0xff]  ;;  %v4544_v63 = vld [vmem:[%s8543_s11 + $0x258] sm:$0xff] }
 0x522   : > { %v4547_v13 = vld [vmem:[%s8543_s11 + $0x270] sm:$0xff] }
 0x524   : > { %6747 = vperm.xlu0 %8381, %v6637_v56   ;;  %v4527_v56 = vld [vmem:[%s8543_s11 + $0x1d0] sm:$0xff] }
 0x525   : > { %6078 = vmatmul.mubr.bf16.gmra.mxu0 %v7228_v40  ;;  %6742 = vperm.xlu1 %8382, %v6636_v20   ;;  %v7155_v40 = vcombine.high %v4496_v37, %v4500_v32  ;;  %v4548_v37 = vld [vmem:[%s8543_s11 + $0x278] sm:$0xff]  ;;  %v7192_v32 = vcombine.low %v4535_v42, %v4539_v48 }
 0x526   : > { %6239 = vmatmul.mubr.bf16.gmra.mxu1 %v7230_v9  ;;  %6085 = vmatprep.mubr.bf16.mxu0 %v7237_v51  ;;  %v4756_v9 = vld [vmem:[%s8548_s14 + $0xf8] sm:$0xff]  ;;  %v4503_v51 = vld [vmem:[%s8543_s11 + $0x110] sm:$0xff] }
 0x527   : > { %6246 = vmatprep.mubr.bf16.mxu1 %v7239_v30  ;;  %v4507_v30 = vld [vmem:[%s8543_s11 + $0x130] sm:$0xff] }
 0x528   : > { %6757 = vperm.xlu0 %8381, %v6639_v7   ;;  %v7161_v36 = vcombine.high %v4503_v51, %v4507_v30  ;;  %v7160_v45 = vcombine.low %v4503_v51, %v4507_v30  ;;  %v4551_v51 = vld [vmem:[%s8543_s11 + $0x290] sm:$0xff] }
 0x529   : > { %6752 = vperm.xlu1 %8382, %v6638_v19   ;;  %v4555_v30 = vld [vmem:[%s8543_s11 + $0x2b0] sm:$0xff] }
 0x52c   : > { %6767 = vperm.xlu0 %8381, %v6641_v39   ;;  %v4536_v39 = vld [vmem:[%s8543_s11 + $0x218] sm:$0xff] }
 0x52d   : > { %6086 = vmatmul.mubr.bf16.gmra.mxu0 %v7236_v61  ;;  %6762 = vperm.xlu1 %8382, %v6640_v8   ;;  %v7163_v61 = vcombine.high %v4504_v31, %v4508_v60 }
 0x52e   : > { %6247 = vmatmul.mubr.bf16.gmra.mxu1 %v7238_v34  ;;  %6093 = vmatprep.mubr.bf16.mxu0 %v7245_v0  ;;  %v6647_v34 = vld [vmem:[%s8553_s17 + $0xe8] sm:$0xff]  ;;  %v4511_v0 = vld [vmem:[%s8543_s11 + $0x150] sm:$0xff] }
 0x52f   : > { %6254 = vmatprep.mubr.bf16.mxu1 %v7247_v58  ;;  %v4515_v58 = vld [vmem:[%s8543_s11 + $0x170] sm:$0xff] }
 0x530   : > { %6772 = vperm.xlu0 %8381, %v6642_v46   ;;  %v7169_v4 = vcombine.high %v4511_v0, %v4515_v58  ;;  %v7168_v47 = vcombine.low %v4511_v0, %v4515_v58  ;;  %v7202_v0 = vcombine.low %v4544_v63, %v4548_v37  ;;  %v7209_v58 = vcombine.high %v4551_v51, %v4555_v30 }
 0x531   : > { %4904 = vperm.xlu1 %8382, %v4754_v18   ;;  %v4543_v18 = vld [vmem:[%s8543_s11 + $0x250] sm:$0xff] }
 0x534   : > { %6777 = vperm.xlu0 %8381, %v6643_v26  }
 0x535   : > { %6094 = vmatmul.mubr.bf16.gmra.mxu0 %v7244_v50  ;;  %4909 = vperm.xlu1 %8382, %v4755_v6   ;;  %v11542_v50 = vpop.permute.xlu1 %4769  ;;  %v7201_v6 = vcombine.high %v4543_v18, %v4547_v13 }
 0x536   : > { %6255 = vmatmul.mubr.bf16.gmra.mxu1 %v7246_v12  ;;  %6295 = vmatprep.mubr.bf16.mxu0 %v7129_v2  ;;  %v4523_v12 = vld [vmem:[%s8543_s11 + $0x1b0] sm:$0xff] }
 0x537   : > { %6456 = vmatprep.mubr.bf16.mxu1 %v7131_v3  ;;  %v4520_v3 = vld [vmem:[%s8543_s11 + $0x198] sm:$0xff]  ;;  %v7177_v29 = vcombine.high %v4519_v21, %v4523_v12 }
 0x538   : > { %6782 = vperm.xlu0 %8381, %v6644_v33   ;;  %v7179_v17 = vcombine.high %v4520_v3, %v4524_v59  ;;  %v7178_v7 = vcombine.low %v4520_v3, %v4524_v59 }
 0x539   : > { %4914 = vperm.xlu1 %8382, %v4756_v9  }
 0x53c   : > { %6792 = vperm.xlu0 %8381, %v6646_v54  }
 0x53d   : > { %6296 = vmatmul.mubr.bf16.vlgmr.msra.gmra.mxu0 %v7128_v16  ;;  %6787 = vperm.xlu1 %8382, %v6645_v38   ;;  %v11546_v2 = vpop.permute.xlu1 %4774  ;;  %v4531_v16 = vld [vmem:[%s8543_s11 + $0x1f0] sm:$0xff]  ;;  %v4556_v38 = vld [vmem:[%s8543_s11 + $0x2b8] sm:$0xff] }
 0x53e   : > { %6457 = vmatmul.mubr.bf16.vlgmr.msra.gmra.mxu1 %v7130_v5  ;;  %6303 = vmatprep.mubr.bf16.mxu0 %v7137_v49  ;;  %v4528_v5 = vld [vmem:[%s8543_s11 + $0x1d8] sm:$0xff]  ;;  %v7185_v19 = vcombine.high %v4527_v56, %v4531_v16  ;;  %v7184_v8 = vcombine.low %v4527_v56, %v4531_v16 }
 0x53f   : > { %6464 = vmatprep.mubr.bf16.mxu1 %v7139_v15  ;;  %v4532_v49 = vld [vmem:[%s8543_s11 + $0x1f8] sm:$0xff]  ;;  %v7176_v15 = vcombine.low %v4519_v21, %v4523_v12 }
 0x540   : > { %6802 = vperm.xlu0 %8381, %v6648_v10   ;;  %v7187_v35 = vcombine.high %v4528_v5, %v4532_v49 }
 0x541   : > { %6797 = vperm.xlu1 %8382, %v6647_v34  }
 0x545   : > { %6304 = vmatmul.mubr.bf16.gmra.mxu0 %v7136_v55  ;;  %6807 = vperm.xlu1 %8382, %v6649_v41   ;;  %v11550_v53 = vpop.permute.xlu1 %4784  ;;  %v4540_v55 = vld [vmem:[%s8543_s11 + $0x238] sm:$0xff] }
 0x546   : > { %6465 = vmatmul.mubr.bf16.gmra.mxu1 %v7138_v44  ;;  %6311 = vmatprep.mubr.bf16.mxu0 %v7145_v11  ;;  %v7186_v44 = vcombine.low %v4528_v5, %v4532_v49  ;;  %v7193_v11 = vcombine.high %v4535_v42, %v4539_v48  ;;  %v4560_v5 = vld [vmem:[%s8543_s11 + $0x2d8] sm:$0xff] }
 0x547   : > { %6472 = vmatprep.mubr.bf16.mxu1 %v7147_v62  ;;  %v7195_v62 = vcombine.high %v4536_v39, %v4540_v55  ;;  %v4564_v49 = vld [vmem:[%s8543_s11 + $0x2f8] sm:$0xff] }
 0x54d   : > { %6312 = vmatmul.mubr.bf16.gmra.mxu0 %v7144_v23  ;;  %v11554_v20 = vpop.permute.xlu1 %4794  ;;  %v7194_v23 = vcombine.low %v4536_v39, %v4540_v55 }
 0x54e   : > { %6473 = vmatmul.mubr.bf16.gmra.mxu1 %v7146_v27  ;;  %6319 = vmatprep.mubr.bf16.mxu0 %v7153_v14  ;;  %v7203_v27 = vcombine.high %v4544_v63, %v4548_v37 }
 0x54f   : > { %6480 = vmatprep.mubr.bf16.mxu1 %v7155_v40  ;;  %v4760_v40 = vpop.permute.xlu0 %4759 }
 0x553   : > { %v4765_v43 = vpop.permute.xlu0 %4764 }
 0x554   : > { %v11558_v1 = vpop.permute.xlu1 %4804 }
 0x555   : > { %6320 = vmatmul.mubr.bf16.gmra.mxu0 %v7152_v22  ;;  %v4552_v22 = vld [vmem:[%s8543_s11 + $0x298] sm:$0xff] }
 0x556   : > { %6481 = vmatmul.mubr.bf16.gmra.mxu1 %v7154_v57  ;;  %6327 = vmatprep.mubr.bf16.mxu0 %v7161_v36  ;;  %v7210_v48 = vcombine.low %v4552_v22, %v4556_v38 }
 0x557   : > { %6488 = vmatprep.mubr.bf16.mxu1 %v7163_v61  ;;  %v7200_v61 = vcombine.low %v4543_v18, %v4547_v13 }
 0x558   : > { %v11564_v46 = vpop.permute.xlu1 %4814 }
 0x55c   : > { %v11570_v26 = vpop.permute.xlu1 %4824 }
 0x55d   : > { %6328 = vmatmul.mubr.bf16.gmra.mxu0 %v7160_v45  ;;  %v7211_v45 = vcombine.high %v4552_v22, %v4556_v38 }
 0x55e   : > { %6489 = vmatmul.mubr.bf16.gmra.mxu1 %v7162_v28  ;;  %6335 = vmatprep.mubr.bf16.mxu0 %v7169_v4 }
 0x55f   : > { %6496 = vmatprep.mubr.bf16.mxu1 %v7171_v52 }
 0x560   : > { %v11574_v31 = vpop.permute.xlu1 %4834 }
 0x564   : > { %v11580_v12 = vpop.permute.xlu1 %4844 }
 0x565   : > { %6336 = vmatmul.mubr.bf16.gmra.mxu0 %v7168_v47 }
 0x566   : > { %6497 = vmatmul.mubr.bf16.gmra.mxu1 %v7170_v24  ;;  %6343 = vmatprep.mubr.bf16.mxu0 %v7177_v29  ;;  %v4559_v24 = vld [vmem:[%s8543_s11 + $0x2d0] sm:$0xff] }
 0x567   : > { %6504 = vmatprep.mubr.bf16.mxu1 %v7179_v17  ;;  %v4563_v29 = vld [vmem:[%s8543_s11 + $0x2f0] sm:$0xff] }
 0x568   : > { %v7217_v39 = vcombine.high %v4559_v24, %v4563_v29 }
 0x56d   : > { %6344 = vmatmul.mubr.bf16.gmra.mxu0 %v7176_v15 }
 0x56e   : > { %6505 = vmatmul.mubr.bf16.gmra.mxu1 %v7178_v7  ;;  %6351 = vmatprep.mubr.bf16.mxu0 %v7185_v19  ;;  %v7208_v19 = vcombine.low %v4551_v51, %v4555_v30  ;;  %v4572_v51 = vld [vmem:[%s8543_s11 + $0x338] sm:$0xff] }
 0x56f   : > { %6512 = vmatprep.mubr.bf16.mxu1 %v7187_v35 }
 0x575   : > { %6352 = vmatmul.mubr.bf16.gmra.mxu0 %v7184_v8  ;;  %v7219_v8 = vcombine.high %v4560_v5, %v4564_v49 }
 0x576   : > { %6513 = vmatmul.mubr.bf16.gmra.mxu1 %v7186_v44  ;;  %6359 = vmatprep.mubr.bf16.mxu0 %v7193_v11  ;;  %v11589_v44 = vpop.permute.xlu1 %4854 }
 0x577   : > { %6520 = vmatprep.mubr.bf16.mxu1 %v7195_v62 }
 0x57a   : > { %v11600_v22 = vpop.permute.xlu1 %4864 }
 0x57d   : > { %v7848_v14 = vpop.f32.mrf.mxu0  ;;  %6360 = vmatmul.mubr.bf16.gmra.mxu0 %v7192_v32 }
 0x57e   : > { %v7960_v33 = vpop.f32.mrf.mxu1  ;;  %6521 = vmatmul.mubr.bf16.gmra.mxu1 %v7194_v23  ;;  %6367 = vmatprep.mubr.bf16.mxu0 %v7201_v6  ;;  %v4780_v23 = vpop.permute.xlu0 %4779  ;;  %v4567_v6 = vld [vmem:[%s8543_s11 + $0x310] sm:$0xff] }
 0x57f   : > { %v7849_v9 = vpop.f32.mrf.mxu0  ;;  %6528 = vmatprep.mubr.bf16.mxu1 %v7203_v27  ;;  %v4571_v27 = vld [vmem:[%s8543_s11 + $0x330] sm:$0xff] }
 0x580   : > { %v7850_v60 = vadd.f32 %v7849_v9, %v7848_v14  ;;  %v7961_v54 = vpop.f32.mrf.mxu1  ;;  %v4568_v9 = vld [vmem:[%s8543_s11 + $0x318] sm:$0xff] }
 0x581   : > { %v7962_v57 = vadd.f32 %v7961_v54, %v7960_v33  ;;  %v7851_v36 = vpop.f32.mrf.mxu0  ;;  %v7216_v54 = vcombine.low %v4559_v24, %v4563_v29  ;;  %v4576_v29 = vld [vmem:[%s8543_s11 + $0x358] sm:$0xff] }
 0x582   : > { %v5976_v10 = vadd.f32 %v7850_v60, %v4760_v40  ;;  %v7963_v34 = vpop.f32.mrf.mxu1 }
 0x583   : > { %v7852_v25 = vpop.f32.mrf.mxu0 }
 0x584   : > { %v11578_v41 = vadd.f32 %v7962_v57, %v5976_v10  ;;  %v7853_v28 = vadd.f32 %v7852_v25, %v7851_v36  ;;  %v7964_v4 = vpop.f32.mrf.mxu1  ;;  %v7218_v57 = vcombine.low %v4560_v5, %v4564_v49  ;;  %v7225_v36 = vcombine.high %v4567_v6, %v4571_v27 }
 0x585   : > { %v7965_v52 = vadd.f32 %v7964_v4, %v7963_v34  ;;  %v7854_v21 = vpop.f32.mrf.mxu0  ;;  %6368 = vmatmul.mubr.bf16.gmra.mxu0 %v7200_v61  ;;  %v7227_v10 = vcombine.high %v4568_v9, %v4572_v51 }
 0x586   : > { %v5979_v3 = vadd.f32 %v7853_v28, %v4765_v43  ;;  %v7966_v59 = vpop.f32.mrf.mxu1  ;;  %6529 = vmatmul.mubr.bf16.gmra.mxu1 %v7202_v0  ;;  %6375 = vmatprep.mubr.bf16.mxu0 %v7209_v58 }
 0x587   : > { %v7855_v47 = vpop.f32.mrf.mxu0  ;;  %6536 = vmatprep.mubr.bf16.mxu1 %v7211_v45 }
 0x588   : > { %v11584_v17 = vadd.f32 %v7965_v52, %v5979_v3  ;;  %v7856_v56 = vadd.f32 %v7855_v47, %v7854_v21  ;;  %v7967_v16 = vpop.f32.mrf.mxu1  ;;  %v4575_v52 = vld [vmem:[%s8543_s11 + $0x350] sm:$0xff]  ;;  %v11607_v3 = vpop.permute.xlu1 %4874 }
 0x589   : > { %v7968_v15 = vadd.f32 %v7967_v16, %v7966_v59  ;;  %v7857_v7 = vpop.f32.mrf.mxu0  ;;  %v4579_v21 = vld [vmem:[%s8543_s11 + $0x370] sm:$0xff]  ;;  %v4790_v16 = vpop.permute.xlu0 %4789 }
 0x58a   : > { %v5984_v35 = vadd.f32 %v7856_v56, %v11542_v50  ;;  %v7969_v42 = vpop.f32.mrf.mxu1  ;;  %v4580_v56 = vld [vmem:[%s8543_s11 + $0x378] sm:$0xff] }
 0x58b   : > { %v7858_v55 = vpop.f32.mrf.mxu0 }
 0x58c   : > { %v11591_v11 = vadd.f32 %v7968_v15, %v5984_v35  ;;  %v7859_v62 = vadd.f32 %v7858_v55, %v7857_v7  ;;  %v7970_v18 = vpop.f32.mrf.mxu1  ;;  %v7224_v15 = vcombine.low %v4567_v6, %v4571_v27  ;;  %v7233_v35 = vcombine.high %v4575_v52, %v4579_v21 }
 0x58d   : > { %v7971_v13 = vadd.f32 %v7970_v18, %v7969_v42  ;;  %v7860_v63 = vpop.f32.mrf.mxu0  ;;  %6376 = vmatmul.mubr.bf16.gmra.mxu0 %v7208_v19  ;;  %v7226_v19 = vcombine.low %v4568_v9, %v4572_v51  ;;  %v4588_v9 = vld [vmem:[%s8543_s11 + $0x3b8] sm:$0xff]  ;;  %v4800_v51 = vpop.permute.xlu0 %4799 }
 0x58e   : > { %v5987_v50 = vadd.f32 %v7859_v62, %v11546_v2  ;;  %v7972_v37 = vpop.f32.mrf.mxu1  ;;  %6537 = vmatmul.mubr.bf16.gmra.mxu1 %v7210_v48  ;;  %6383 = vmatprep.mubr.bf16.mxu0 %v7217_v39  ;;  %v7235_v48 = vcombine.high %v4576_v29, %v4580_v56 }
 0x58f   : > { %v7861_v32 = vpop.f32.mrf.mxu0  ;;  %6544 = vmatprep.mubr.bf16.mxu1 %v7219_v8 }
 0x590   : > { %v11596_v14 = vadd.f32 %v7971_v13, %v5987_v50  ;;  %v7862_v40 = vadd.f32 %v7861_v32, %v7860_v63  ;;  %v7973_v33 = vpop.f32.mrf.mxu1  ;;  %v11615_v13 = vpop.permute.xlu1 %4884  ;;  %v4583_v32 = vld [vmem:[%s8543_s11 + $0x390] sm:$0xff] }
 0x591   : > { %v7974_v30 = vadd.f32 %v7973_v33, %v7972_v37  ;;  %v7863_v60 = vpop.f32.mrf.mxu0  ;;  %v4584_v33 = vld [vmem:[%s8543_s11 + $0x398] sm:$0xff] }
 0x592   : > { %v5992_v2 = vadd.f32 %v7862_v40, %v4780_v23  ;;  %v7975_v38 = vpop.f32.mrf.mxu1  ;;  %v4587_v23 = vld [vmem:[%s8543_s11 + $0x3b0] sm:$0xff] }
 0x593   : > { %v7864_v61 = vpop.f32.mrf.mxu0 }
 0x594   : > { %v11602_v34 = vadd.f32 %v7974_v30, %v5992_v2  ;;  %v7865_v0 = vadd.f32 %v7864_v61, %v7863_v60  ;;  %v7976_v58 = vpop.f32.mrf.mxu1  ;;  %v7243_v61 = vcombine.high %v4584_v33, %v4588_v9 }
 0x595   : > { %v7977_v25 = vadd.f32 %v7976_v58, %v7975_v38  ;;  %v7866_v43 = vpop.f32.mrf.mxu0  ;;  %6384 = vmatmul.mubr.bf16.gmra.mxu0 %v7216_v54  ;;  %v7232_v54 = vcombine.low %v4575_v52, %v4579_v21  ;;  %v4591_v21 = vld [vmem:[%s8543_s11 + $0x3d0] sm:$0xff] }
 0x596   : > { %v5995_v45 = vadd.f32 %v7865_v0, %v11550_v53  ;;  %v7978_v28 = vpop.f32.mrf.mxu1  ;;  %6545 = vmatmul.mubr.bf16.gmra.mxu1 %v7218_v57  ;;  %6391 = vmatprep.mubr.bf16.mxu0 %v7225_v36  ;;  %v7241_v57 = vcombine.high %v4583_v32, %v4587_v23 }
 0x597   : > { %v7867_v4 = vpop.f32.mrf.mxu0  ;;  %6552 = vmatprep.mubr.bf16.mxu1 %v7227_v10  ;;  %v11624_v10 = vpop.permute.xlu1 %4894 }
 0x598   : > { %v11609_v59 = vadd.f32 %v7977_v25, %v5995_v45  ;;  %v7868_v47 = vadd.f32 %v7867_v4, %v7866_v43  ;;  %v7979_v24 = vpop.f32.mrf.mxu1 }
 0x599   : > { %v7980_v5 = vadd.f32 %v7979_v24, %v7978_v28  ;;  %v7869_v49 = vpop.f32.mrf.mxu0  ;;  %v4810_v24 = vpop.permute.xlu0 %4809 }
 0x59a   : > { %v6000_v53 = vadd.f32 %v7868_v47, %v4790_v16  ;;  %v7981_v7 = vpop.f32.mrf.mxu1  ;;  %v4595_v47 = vld [vmem:[%s8543_s11 + $0x3f0] sm:$0xff] }
 0x59b   : > { %v7870_v42 = vpop.f32.mrf.mxu0 }
 0x59c   : > { %v11613_v39 = vadd.f32 %v7980_v5, %v6000_v53  ;;  %v7871_v55 = vadd.f32 %v7870_v42, %v7869_v49  ;;  %v7982_v8 = vpop.f32.mrf.mxu1  ;;  %v4592_v5 = vld [vmem:[%s8543_s11 + $0x3d8] sm:$0xff]  ;;  %v7242_v42 = vcombine.low %v4584_v33, %v4588_v9 }
 0x59d   : > { %v7983_v62 = vadd.f32 %v7982_v8, %v7981_v7  ;;  %v7872_v18 = vpop.f32.mrf.mxu0  ;;  %6392 = vmatmul.mubr.bf16.gmra.mxu0 %v7224_v15  ;;  %v4596_v49 = vld [vmem:[%s8543_s11 + $0x3f8] sm:$0xff]  ;;  %v7240_v7 = vcombine.low %v4583_v32, %v4587_v23  ;;  %s6886_s11 = sld [smem:[#allocation4]] (!%p7316_p6) }
 0x59e   : > { %v6003_v63 = vadd.f32 %v7871_v55, %v11554_v20  ;;  %v7984_v50 = vpop.f32.mrf.mxu1  ;;  %6553 = vmatmul.mubr.bf16.gmra.mxu1 %v7226_v19  ;;  %6399 = vmatprep.mubr.bf16.mxu0 %v7233_v35  ;;  %v7234_v20 = vcombine.low %v4576_v29, %v4580_v56  ;;  %v11635_v19 = vpop.permute.xlu1 %6652  ;;  %v7251_v8 = vcombine.high %v4592_v5, %v4596_v49 }
 0x59f   : > { %v7873_v37 = vpop.f32.mrf.mxu0  ;;  %6560 = vmatprep.mubr.bf16.mxu1 %v7235_v48  ;;  %v7249_v48 = vcombine.high %v4591_v21, %v4595_v47 }
 0x5a0   : > { %v11620_v6 = vadd.f32 %v7983_v62, %v6003_v63  ;;  %v7874_v27 = vadd.f32 %v7873_v37, %v7872_v18  ;;  %v7985_v40 = vpop.f32.mrf.mxu1 }
 0x5a1   : > { %v7986_v30 = vadd.f32 %v7985_v40, %v7984_v50  ;;  %v7875_v60 = vpop.f32.mrf.mxu0 }
 0x5a2   : > { %v6008_v2 = vadd.f32 %v7874_v27, %v4800_v51  ;;  %v7987_v38 = vpop.f32.mrf.mxu1  ;;  %v11640_v23 = vpop.permute.xlu1 %6662 }
 0x5a3   : > { %v7876_v36 = vpop.f32.mrf.mxu0 }
 0x5a4   : > { %v11626_v0 = vadd.f32 %v7986_v30, %v6008_v2  ;;  %v7877_v58 = vadd.f32 %v7876_v36, %v7875_v60  ;;  %v7988_v25 = vpop.f32.mrf.mxu1  ;;  %v4820_v30 = vpop.permute.xlu0 %4819  ;;  %v7248_v2 = vcombine.low %v4591_v21, %v4595_v47 }
 0x5a5   : > { %v7989_v43 = vadd.f32 %v7988_v25, %v7987_v38  ;;  %v7878_v45 = vpop.f32.mrf.mxu0  ;;  %6400 = vmatmul.mubr.bf16.gmra.mxu0 %v7232_v54 }
 0x5a6   : > { %v6011_v28 = vadd.f32 %v7877_v58, %v11558_v1  ;;  %v7990_v4 = vpop.f32.mrf.mxu1  ;;  %6561 = vmatmul.mubr.bf16.gmra.mxu1 %v7234_v20  ;;  %6407 = vmatprep.mubr.bf16.mxu0 %v7241_v57  ;;  %v7250_v57 = vcombine.low %v4592_v5, %v4596_v49 }
 0x5a7   : > { %v7879_v52 = vpop.f32.mrf.mxu0  ;;  %6568 = vmatprep.mubr.bf16.mxu1 %v7243_v61 }
 0x5a8   : > { %v11631_v29 = vadd.f32 %v7989_v43, %v6011_v28  ;;  %v7880_v56 = vadd.f32 %v7879_v52, %v7878_v45  ;;  %v7991_v16 = vpop.f32.mrf.mxu1  ;;  %v11646_v45 = vpop.permute.xlu1 %6672 }
 0x5a9   : > { %v7992_v15 = vadd.f32 %v7991_v16, %v7990_v4  ;;  %v7881_v53 = vpop.f32.mrf.mxu0 }
 0x5aa   : > { %v6016_v1 = vadd.f32 %v7880_v56, %v4810_v24  ;;  %v7993_v35 = vpop.f32.mrf.mxu1  ;;  %v4830_v56 = vpop.permute.xlu0 %4829 }
 0x5ab   : > { %v7882_v55 = vpop.f32.mrf.mxu0 }
 0x5ac   : > { %v11637_v62 = vadd.f32 %v7992_v15, %v6016_v1  ;;  %v7883_v18 = vadd.f32 %v7882_v55, %v7881_v53  ;;  %v7994_v63 = vpop.f32.mrf.mxu1 }
 0x5ad   : > { %v7995_v50 = vadd.f32 %v7994_v63, %v7993_v35  ;;  %v7884_v37 = vpop.f32.mrf.mxu0  ;;  %6408 = vmatmul.mubr.bf16.gmra.mxu0 %v7240_v7  ;;  %v11651_v7 = vpop.permute.xlu1 %6682 }
 0x5ae   : > { %v6019_v27 = vadd.f32 %v7883_v18, %v11564_v46  ;;  %v7996_v40 = vpop.f32.mrf.mxu1  ;;  %6569 = vmatmul.mubr.bf16.gmra.mxu1 %v7242_v42  ;;  %6415 = vmatprep.mubr.bf16.mxu0 %v7249_v48  ;;  %v4840_v63 = vpop.permute.xlu0 %4839 }
 0x5af   : > { %v7885_v32 = vpop.f32.mrf.mxu0  ;;  %6576 = vmatprep.mubr.bf16.mxu1 %v7251_v8 }
 0x5b0   : > { %v11642_v33 = vadd.f32 %v7995_v50, %v6019_v27  ;;  %v7886_v9 = vadd.f32 %v7885_v32, %v7884_v37  ;;  %v7997_v51 = vpop.f32.mrf.mxu1 }
 0x5b1   : > { %v7998_v60 = vadd.f32 %v7997_v51, %v7996_v40  ;;  %v7887_v54 = vpop.f32.mrf.mxu0 }
 0x5b2   : > { %v6024_v38 = vadd.f32 %v7886_v9, %v4820_v30  ;;  %v7999_v20 = vpop.f32.mrf.mxu1  ;;  %v11658_v9 = vpop.permute.xlu1 %6692 }
 0x5b3   : > { %v7888_v36 = vpop.f32.mrf.mxu0 }
 0x5b4   : > { %v11644_v46 = vadd.f32 %v7998_v60, %v6024_v38  ;;  %v7889_v61 = vadd.f32 %v7888_v36, %v7887_v54  ;;  %v8000_v58 = vpop.f32.mrf.mxu1 }
 0x5b5   : > { %v8001_v25 = vadd.f32 %v8000_v58, %v7999_v20  ;;  %v7890_v43 = vpop.f32.mrf.mxu0  ;;  %6416 = vmatmul.mubr.bf16.gmra.mxu0 %v7248_v2 }
 0x5b6   : > { %v6027_v28 = vadd.f32 %v7889_v61, %v11570_v26  ;;  %v8002_v4 = vpop.f32.mrf.mxu1  ;;  %6577 = vmatmul.mubr.bf16.gmra.mxu1 %v7250_v57  ;;  %v11663_v58 = vpop.permute.xlu1 %6702 }
 0x5b7   : > { %v7891_v52 = vpop.f32.mrf.mxu0 }
 0x5b8   : > { %v11649_v24 = vadd.f32 %v8001_v25, %v6027_v28  ;;  %v7892_v21 = vadd.f32 %v7891_v52, %v7890_v43  ;;  %v8003_v47 = vpop.f32.mrf.mxu1 }
 0x5b9   : > { %v8004_v16 = vadd.f32 %v8003_v47, %v8002_v4  ;;  %v7893_v5 = vpop.f32.mrf.mxu0  ;;  %v4850_v4 = vpop.permute.xlu0 %4849 }
 0x5ba   : > { %v6032_v49 = vadd.f32 %v7892_v21, %v4830_v56  ;;  %v8005_v15 = vpop.f32.mrf.mxu1 }
 0x5bb   : > { %v7894_v53 = vpop.f32.mrf.mxu0 }
 0x5bc   : > { %v11653_v1 = vadd.f32 %v8004_v16, %v6032_v49  ;;  %v7895_v35 = vadd.f32 %v7894_v53, %v7893_v5  ;;  %v8006_v42 = vpop.f32.mrf.mxu1 }
 0x5bd   : > { %v8007_v26 = vadd.f32 %v8006_v42, %v8005_v15  ;;  %v7896_v48 = vpop.f32.mrf.mxu0 }
 0x5be   : > { %v6035_v55 = vadd.f32 %v7895_v35, %v11574_v31  ;;  %v8008_v8 = vpop.f32.mrf.mxu1  ;;  %v11669_v35 = vpop.permute.xlu1 %6712 }
 0x5bf   : > { %v7897_v18 = vpop.f32.mrf.mxu0 }
 0x5c0   : > { %v11656_v50 = vadd.f32 %v8007_v26, %v6035_v55  ;;  %v7898_v37 = vadd.f32 %v7897_v18, %v7896_v48  ;;  %v8009_v27 = vpop.f32.mrf.mxu1 }
 0x5c1   : > { %v8010_v40 = vadd.f32 %v8009_v27, %v8008_v8  ;;  %v7899_v32 = vpop.f32.mrf.mxu0 }
 0x5c2   : > { %v6040_v51 = vadd.f32 %v7898_v37, %v4840_v63  ;;  %v8011_v30 = vpop.f32.mrf.mxu1  ;;  %v4860_v63 = vpop.permute.xlu0 %4859 }
 0x5c3   : > { %v7900_v60 = vpop.f32.mrf.mxu0 }
 0x5c4   : > { %v11660_v54 = vadd.f32 %v8010_v40, %v6040_v51  ;;  %v7901_v2 = vadd.f32 %v7900_v60, %v7899_v32  ;;  %v8012_v38 = vpop.f32.mrf.mxu1 }
 0x5c5   : > { %v8013_v20 = vadd.f32 %v8012_v38, %v8011_v30  ;;  %v7902_v31 = vpop.f32.mrf.mxu0  ;;  %v11674_v30 = vpop.permute.xlu1 %6722 }
 0x5c6   : > { %v6043_v57 = vadd.f32 %v7901_v2, %v11580_v12  ;;  %v8014_v36 = vpop.f32.mrf.mxu1 }
 0x5c7   : > { %v7903_v61 = vpop.f32.mrf.mxu0 }
 0x5c8   : > { %v11665_v25 = vadd.f32 %v8013_v20, %v6043_v57  ;;  %v7904_v43 = vadd.f32 %v7903_v61, %v7902_v31  ;;  %v8015_v28 = vpop.f32.mrf.mxu1  ;;  %v4870_v61 = vpop.permute.xlu0 %4869 }
 0x5c9   : > { %v8016_v52 = vadd.f32 %v8015_v28, %v8014_v36  ;;  %v7905_v21 = vpop.f32.mrf.mxu0 }
 0x5ca   : > { %v6048_v47 = vadd.f32 %v7904_v43, %v4850_v4  ;;  %v8017_v56 = vpop.f32.mrf.mxu1 }
 0x5cb   : > { %v7906_v16 = vpop.f32.mrf.mxu0 }
 0x5cc   : > { %v11667_v5 = vadd.f32 %v8016_v52, %v6048_v47  ;;  %v7907_v49 = vadd.f32 %v7906_v16, %v7905_v21  ;;  %v8018_v15 = vpop.f32.mrf.mxu1  ;;  %v11681_v47 = vpop.permute.xlu1 %6732 }
 0x5cd   : > { %v8019_v53 = vadd.f32 %v8018_v15, %v8017_v56  ;;  %v7908_v12 = vpop.f32.mrf.mxu0 }
 0x5ce   : > { %v6051_v42 = vadd.f32 %v7907_v49, %v11589_v44  ;;  %v8020_v26 = vpop.f32.mrf.mxu1 }
 0x5cf   : > { %v7909_v48 = vpop.f32.mrf.mxu0 }
 0x5d0   : > { %v11672_v55 = vadd.f32 %v8019_v53, %v6051_v42  ;;  %v7910_v8 = vadd.f32 %v7909_v48, %v7908_v12  ;;  %v8021_v18 = vpop.f32.mrf.mxu1 }
 0x5d1   : > { %v8022_v37 = vadd.f32 %v8021_v18, %v8020_v26  ;;  %v7911_v27 = vpop.f32.mrf.mxu0  ;;  %v11686_v18 = vpop.permute.xlu1 %6742 }
 0x5d2   : > { %v6056_v40 = vadd.f32 %v7910_v8, %v4860_v63  ;;  %v8023_v32 = vpop.f32.mrf.mxu1 }
 0x5d3   : > { %v7912_v51 = vpop.f32.mrf.mxu0 }
 0x5d4   : > { %v11676_v60 = vadd.f32 %v8022_v37, %v6056_v40  ;;  %v7913_v2 = vadd.f32 %v7912_v51, %v7911_v27  ;;  %v8024_v38 = vpop.f32.mrf.mxu1  ;;  %v4880_v40 = vpop.permute.xlu0 %4879 }
 0x5d5   : > { %v8025_v20 = vadd.f32 %v8024_v38, %v8023_v32  ;;  %v7914_v44 = vpop.f32.mrf.mxu0 }
 0x5d6   : > { %v6059_v31 = vadd.f32 %v7913_v2, %v11600_v22  ;;  %v8026_v57 = vpop.f32.mrf.mxu1 }
 0x5d7   : > { %v7915_v36 = vpop.f32.mrf.mxu0 }
 0x5d8   : > { %v11679_v43 = vadd.f32 %v8025_v20, %v6059_v31  ;;  %v7916_v28 = vadd.f32 %v7915_v36, %v7914_v44  ;;  %v8027_v4 = vpop.f32.mrf.mxu1 }
 0x5d9   : > { %v8028_v52 = vadd.f32 %v8027_v4, %v8026_v57  ;;  %v7917_v21 = vpop.f32.mrf.mxu0 }
 0x5da   : > { %v6064_v56 = vadd.f32 %v7916_v28, %v4870_v61  ;;  %v8029_v16 = vpop.f32.mrf.mxu1  ;;  %v11692_v61 = vpop.permute.xlu1 %6752 }
 0x5db   : > { %v7918_v49 = vpop.f32.mrf.mxu0 }
 0x5dc   : > { %v11683_v15 = vadd.f32 %v8028_v52, %v6064_v56  ;;  %v7919_v53 = vadd.f32 %v7918_v49, %v7917_v21  ;;  %v8030_v12 = vpop.f32.mrf.mxu1  ;;  %v4890_v49 = vpop.permute.xlu0 %4889 }
 0x5dd   : > { %v8031_v42 = vadd.f32 %v8030_v12, %v8029_v16  ;;  %v7920_v22 = vpop.f32.mrf.mxu0 }
 0x5de   : > { %v6067_v26 = vadd.f32 %v7919_v53, %v11607_v3  ;;  %v8032_v48 = vpop.f32.mrf.mxu1 }
 0x5df   : > { %v7921_v8 = vpop.f32.mrf.mxu0 }
 0x5e0   : > { %v11688_v63 = vadd.f32 %v8031_v42, %v6067_v26  ;;  %v7922_v37 = vadd.f32 %v7921_v8, %v7920_v22  ;;  %v8033_v27 = vpop.f32.mrf.mxu1 }
 0x5e1   : > { %v8034_v32 = vadd.f32 %v8033_v27, %v8032_v48  ;;  %v7923_v51 = vpop.f32.mrf.mxu0  ;;  %v11697_v48 = vpop.permute.xlu1 %6762 }
 0x5e2   : > { %v6072_v2 = vadd.f32 %v7922_v37, %v4880_v40  ;;  %v8035_v38 = vpop.f32.mrf.mxu1 }
 0x5e3   : > { %v7924_v20 = vpop.f32.mrf.mxu0 }
 0x5e4   : > { %v11690_v44 = vadd.f32 %v8034_v32, %v6072_v2  ;;  %v7925_v31 = vadd.f32 %v7924_v20, %v7923_v51  ;;  %v8036_v57 = vpop.f32.mrf.mxu1 }
 0x5e5   : > { %v8037_v36 = vadd.f32 %v8036_v57, %v8035_v38  ;;  %v7926_v3 = vpop.f32.mrf.mxu0  ;;  %v4900_v38 = vpop.permute.xlu0 %4899 }
 0x5e6   : > { %v6075_v28 = vadd.f32 %v7925_v31, %v11615_v13  ;;  %v8038_v4 = vpop.f32.mrf.mxu1 }
 0x5e7   : > { %v7927_v52 = vpop.f32.mrf.mxu0 }
 0x5e8   : > { %v11695_v21 = vadd.f32 %v8037_v36, %v6075_v28  ;;  %v7928_v56 = vadd.f32 %v7927_v52, %v7926_v3  ;;  %v8039_v16 = vpop.f32.mrf.mxu1  ;;  %v4905_v28 = vpop.permute.xlu1 %4904 }
 0x5e9   : > { %v8040_v53 = vadd.f32 %v8039_v16, %v8038_v4  ;;  %v7929_v12 = vpop.f32.mrf.mxu0 }
 0x5ea   : > { %v6080_v42 = vadd.f32 %v7928_v56, %v4890_v49  ;;  %v8041_v22 = vpop.f32.mrf.mxu1 }
 0x5eb   : > { %v7930_v26 = vpop.f32.mrf.mxu0 }
 0x5ec   : > { %v11699_v8 = vadd.f32 %v8040_v53, %v6080_v42  ;;  %v7931_v37 = vadd.f32 %v7930_v26, %v7929_v12  ;;  %v8042_v27 = vpop.f32.mrf.mxu1 }
 0x5ed   : > { %v8043_v40 = vadd.f32 %v8042_v27, %v8041_v22  ;;  %v7932_v13 = vpop.f32.mrf.mxu0 }
 0x5ee   : > { %v6083_v32 = vadd.f32 %v7931_v37, %v11624_v10  ;;  %v8044_v51 = vpop.f32.mrf.mxu1  ;;  %v4910_v37 = vpop.permute.xlu1 %4909 }
 0x5ef   : > { %v7933_v2 = vpop.f32.mrf.mxu0 }
 0x5f0   : > { %v11702_v20 = vadd.f32 %v8043_v40, %v6083_v32  ;;  %v7934_v31 = vadd.f32 %v7933_v2, %v7932_v13  ;;  %v8045_v57 = vpop.f32.mrf.mxu1 }
 0x5f1   : > { %v8046_v36 = vadd.f32 %v8045_v57, %v8044_v51  ;;  %v7935_v3 = vpop.f32.mrf.mxu0 }
 0x5f2   : > { %v6088_v4 = vadd.f32 %v7934_v31, %v4900_v38  ;;  %v8047_v52 = vpop.f32.mrf.mxu1 }
 0x5f3   : > { %v7936_v56 = vpop.f32.mrf.mxu0 }
 0x5f4   : > { %v11704_v16 = vadd.f32 %v8046_v36, %v6088_v4  ;;  %v7937_v49 = vadd.f32 %v7936_v56, %v7935_v3  ;;  %v8048_v53 = vpop.f32.mrf.mxu1 }
 0x5f5   : > { %v8049_v12 = vadd.f32 %v8048_v53, %v8047_v52  ;;  %v7938_v42 = vpop.f32.mrf.mxu0  ;;  %v4915_v52 = vpop.permute.xlu1 %4914 }
 0x5f6   : > { %12496 = vst [vmem:[#allocation349_spill] sm:$0xff] %v11704_v16  ;;  %v6091_v10 = vadd.f32 %v7937_v49, %v4905_v28  ;;  %v8050_v22 = vpop.f32.mrf.mxu1 }
 0x5f7   : > { %v7939_v26 = vpop.f32.mrf.mxu0 }
 0x5f8   : > { %v11706_v27 = vadd.f32 %v8049_v12, %v6091_v10  ;;  %v7940_v40 = vadd.f32 %v7939_v26, %v7938_v42  ;;  %v8051_v13 = vpop.f32.mrf.mxu1 }
 0x5f9   : > { %v8052_v32 = vadd.f32 %v8051_v13, %v8050_v22  ;;  %v7941_v51 = vpop.f32.mrf.mxu0 }
 0x5fa   : > { %v6096_v2 = vadd.f32 %v7940_v40, %v4910_v37  ;;  %v8053_v38 = vpop.f32.mrf.mxu1 }
 0x5fb   : > { %v7942_v31 = vpop.f32.mrf.mxu0 }
 0x5fc   : > { %v11708_v57 = vadd.f32 %v8052_v32, %v6096_v2  ;;  %v7943_v36 = vadd.f32 %v7942_v31, %v7941_v51  ;;  %v8054_v3 = vpop.f32.mrf.mxu1 }
 0x5fd   : > { %v8055_v4 = vadd.f32 %v8054_v3, %v8053_v38  ;;  %v8072_v56 = vpop.f32.mrf.mxu0 }
 0x5fe   : > { %12497 = vst [vmem:[#allocation350_spill] sm:$0xff] %v11708_v57  ;;  %v6099_v28 = vadd.f32 %v7943_v36, %v4915_v52  ;;  %v8184_v49 = vpop.f32.mrf.mxu1 }
 0x5ff   : > { %v8073_v53 = vpop.f32.mrf.mxu0 }
 0x600   : > { %v11710_v16 = vadd.f32 %v8055_v4, %v6099_v28  ;;  %v8074_v12 = vadd.f32 %v8073_v53, %v8072_v56  ;;  %v8185_v42 = vpop.f32.mrf.mxu1 }
 0x601   : > { %v8186_v10 = vadd.f32 %v8185_v42, %v8184_v49  ;;  %v8075_v22 = vpop.f32.mrf.mxu0 }
 0x602   : > { %12498 = vst [vmem:[#allocation351_spill] sm:$0xff] %v11710_v16  ;;  %v6298_v26 = vadd.f32 %v8074_v12, %v11578_v41  ;;  %v8187_v37 = vpop.f32.mrf.mxu1  ;;  %v6658_v16 = vpop.permute.xlu0 %6657 }
 0x603   : > { %v8076_v40 = vpop.f32.mrf.mxu0 }
 0x604   : > { %v6459_v13 = vadd.f32 %v8186_v10, %v6298_v26  ;;  %v8077_v32 = vadd.f32 %v8076_v40, %v8075_v22  ;;  %v8188_v51 = vpop.f32.mrf.mxu1 }
 0x605   : > { %v8078_v2 = vpop.f32.mrf.mxu0  ;;  %v8189_v31 = vadd.f32 %v8188_v51, %v8187_v37 }
 0x606   : > { %v6301_v38 = vadd.f32 %v8077_v32, %v11584_v17  ;;  %v8190_v36 = vpop.f32.mrf.mxu1  ;;  %v6585_v52 = vmax.f32 %v6459_v13, 0.0 }
 0x607   : > { %v8079_v3 = vpop.f32.mrf.mxu0 }
 0x608   : > { %v6462_v4 = vadd.f32 %v8189_v31, %v6301_v38  ;;  %v8080_v28 = vadd.f32 %v8079_v3, %v8078_v2  ;;  %v8191_v56 = vpop.f32.mrf.mxu1  ;;  %v6810_v22 = vmul.f32 %v11635_v19, %v6585_v52 }
 0x609   : > { %v8081_v53 = vpop.f32.mrf.mxu0  ;;  %v8192_v41 = vadd.f32 %v8191_v56, %v8190_v36 }
 0x60a   : > { %v6586_v49 = vmax.f32 %v6462_v4, 0.0  ;;  %v6306_v42 = vadd.f32 %v8080_v28, %v11591_v11  ;;  %v8193_v12 = vpop.f32.mrf.mxu1 }
 0x60b   : > { %v8082_v10 = vpop.f32.mrf.mxu0 }
 0x60c   : > { %v6811_v26 = vmul.f32 %v6658_v16, %v6586_v49  ;;  %v6467_v40 = vadd.f32 %v8192_v41, %v6306_v42  ;;  %v8083_v17 = vadd.f32 %v8082_v10, %v8081_v53  ;;  %v8194_v37 = vpop.f32.mrf.mxu1  ;;  %v6668_v49 = vpop.permute.xlu0 %6667 }
 0x60d   : > { %v8084_v32 = vpop.f32.mrf.mxu0  ;;  %v8195_v38 = vadd.f32 %v8194_v37, %v8193_v12 }
 0x60e   : > { %v6842_v51 = vadd.f32 %v6811_v26, %v6810_v22  ;;  %v6587_v13 = vmax.f32 %v6467_v40, 0.0  ;;  %v6309_v2 = vadd.f32 %v8083_v17, %v11596_v14  ;;  %v8196_v31 = vpop.f32.mrf.mxu1 }
 0x60f   : > { %v8085_v3 = vpop.f32.mrf.mxu0 }
 0x610   : > { %v6812_v11 = vmul.f32 %v11640_v23, %v6587_v13  ;;  %v6470_v36 = vadd.f32 %v8195_v38, %v6309_v2  ;;  %v8086_v4 = vadd.f32 %v8085_v3, %v8084_v32  ;;  %v8197_v28 = vpop.f32.mrf.mxu1 }
 0x611   : > { %v8087_v56 = vpop.f32.mrf.mxu0  ;;  %v8198_v52 = vadd.f32 %v8197_v28, %v8196_v31  ;;  %v6678_v28 = vpop.permute.xlu0 %6677 }
 0x612   : > { %v6843_v57 = vadd.f32 %v6842_v51, %v6812_v11  ;;  %v6588_v19 = vmax.f32 %v6470_v36, 0.0  ;;  %v6314_v16 = vadd.f32 %v8086_v4, %v11602_v34  ;;  %v8199_v53 = vpop.f32.mrf.mxu1 }
 0x613   : > { %v8088_v42 = vpop.f32.mrf.mxu0 }
 0x614   : > { %v6813_v41 = vmul.f32 %v6668_v49, %v6588_v19  ;;  %v6475_v10 = vadd.f32 %v8198_v52, %v6314_v16  ;;  %v8089_v14 = vadd.f32 %v8088_v42, %v8087_v56  ;;  %v8200_v12 = vpop.f32.mrf.mxu1 }
 0x615   : > { %v8090_v22 = vpop.f32.mrf.mxu0  ;;  %v8201_v17 = vadd.f32 %v8200_v12, %v8199_v53 }
 0x616   : > { %v6844_v26 = vadd.f32 %v6843_v57, %v6813_v41  ;;  %v6589_v40 = vmax.f32 %v6475_v10, 0.0  ;;  %v6317_v23 = vadd.f32 %v8089_v14, %v11609_v59  ;;  %v8202_v37 = vpop.f32.mrf.mxu1 }
 0x617   : > { %v8091_v32 = vpop.f32.mrf.mxu0 }
 0x618   : > { %v6814_v51 = vmul.f32 %v11646_v45, %v6589_v40  ;;  %v6478_v13 = vadd.f32 %v8201_v17, %v6317_v23  ;;  %v8092_v34 = vadd.f32 %v8091_v32, %v8090_v22  ;;  %v8203_v2 = vpop.f32.mrf.mxu1 }
 0x619   : > { %v8093_v38 = vpop.f32.mrf.mxu0  ;;  %v8204_v36 = vadd.f32 %v8203_v2, %v8202_v37 }
 0x61a   : > { %v6845_v31 = vadd.f32 %v6844_v26, %v6814_v51  ;;  %v6590_v3 = vmax.f32 %v6478_v13, 0.0  ;;  %v6322_v11 = vadd.f32 %v8092_v34, %v11613_v39  ;;  %v8205_v4 = vpop.f32.mrf.mxu1  ;;  %v6688_v51 = vpop.permute.xlu0 %6687 }
 0x61b   : > { %v8094_v57 = vpop.f32.mrf.mxu0 }
 0x61c   : > { %v6815_v56 = vmul.f32 %v6678_v28, %v6590_v3  ;;  %v6483_v19 = vadd.f32 %v8204_v36, %v6322_v11  ;;  %v8095_v59 = vadd.f32 %v8094_v57, %v8093_v38  ;;  %v8206_v16 = vpop.f32.mrf.mxu1 }
 0x61d   : > { %v8096_v52 = vpop.f32.mrf.mxu0  ;;  %v8207_v42 = vadd.f32 %v8206_v16, %v8205_v4 }
 0x61e   : > { %v6846_v53 = vadd.f32 %v6845_v31, %v6815_v56  ;;  %v6591_v49 = vmax.f32 %v6483_v19, 0.0  ;;  %v6325_v45 = vadd.f32 %v8095_v59, %v11620_v6  ;;  %v8208_v41 = vpop.f32.mrf.mxu1 }
 0x61f   : > { %v8097_v10 = vpop.f32.mrf.mxu0 }
 0x620   : > { %v6816_v14 = vmul.f32 %v11651_v7, %v6591_v49  ;;  %v6486_v12 = vadd.f32 %v8207_v42, %v6325_v45  ;;  %v8098_v39 = vadd.f32 %v8097_v10, %v8096_v52  ;;  %v8209_v22 = vpop.f32.mrf.mxu1  ;;  %v6698_v42 = vpop.permute.xlu0 %6697 }
 0x621   : > { %v8099_v26 = vpop.f32.mrf.mxu0  ;;  %v8210_v37 = vadd.f32 %v8209_v22, %v8208_v41 }
 0x622   : > { %v6847_v40 = vadd.f32 %v6846_v53, %v6816_v14  ;;  %v6592_v23 = vmax.f32 %v6486_v12, 0.0  ;;  %v6330_v17 = vadd.f32 %v8098_v39, %v11626_v0  ;;  %v8211_v32 = vpop.f32.mrf.mxu1 }
 0x623   : > { %v8100_v13 = vpop.f32.mrf.mxu0 }
 0x624   : > { %v6817_v34 = vmul.f32 %v6688_v51, %v6592_v23  ;;  %v6491_v2 = vadd.f32 %v8210_v37, %v6330_v17  ;;  %v8101_v6 = vadd.f32 %v8100_v13, %v8099_v26  ;;  %v8212_v38 = vpop.f32.mrf.mxu1 }
 0x625   : > { %v8102_v31 = vpop.f32.mrf.mxu0  ;;  %v8213_v36 = vadd.f32 %v8212_v38, %v8211_v32 }
 0x626   : > { %v6848_v3 = vadd.f32 %v6847_v40, %v6817_v34  ;;  %v6593_v11 = vmax.f32 %v6491_v2, 0.0  ;;  %v6333_v7 = vadd.f32 %v8101_v6, %v11631_v29  ;;  %v8214_v4 = vpop.f32.mrf.mxu1 }
 0x627   : > { %v8103_v28 = vpop.f32.mrf.mxu0 }
 0x628   : > { %v6818_v57 = vmul.f32 %v11658_v9, %v6593_v11  ;;  %v6494_v56 = vadd.f32 %v8213_v36, %v6333_v7  ;;  %v8104_v0 = vadd.f32 %v8103_v28, %v8102_v31  ;;  %v8215_v19 = vpop.f32.mrf.mxu1 }
 0x629   : > { %v8105_v59 = vpop.f32.mrf.mxu0  ;;  %v8216_v49 = vadd.f32 %v8215_v19, %v8214_v4 }
 0x62a   : > { %v6849_v16 = vadd.f32 %v6848_v3, %v6818_v57  ;;  %v6594_v52 = vmax.f32 %v6494_v56, 0.0  ;;  %v6338_v53 = vadd.f32 %v8104_v0, %v11637_v62  ;;  %v8217_v45 = vpop.f32.mrf.mxu1  ;;  %v6708_v3 = vpop.permute.xlu0 %6707 }
 0x62b   : > { %v8106_v41 = vpop.f32.mrf.mxu0 }
 0x62c   : > { %v6819_v10 = vmul.f32 %v6698_v42, %v6594_v52  ;;  %v6499_v14 = vadd.f32 %v8216_v49, %v6338_v53  ;;  %v8107_v29 = vadd.f32 %v8106_v41, %v8105_v59  ;;  %v8218_v12 = vpop.f32.mrf.mxu1 }
 0x62d   : > { %v8108_v39 = vpop.f32.mrf.mxu0  ;;  %v8219_v40 = vadd.f32 %v8218_v12, %v8217_v45 }
 0x62e   : > { %v6850_v22 = vadd.f32 %v6849_v16, %v6819_v10  ;;  %v6595_v26 = vmax.f32 %v6499_v14, 0.0  ;;  %v6341_v9 = vadd.f32 %v8107_v29, %v11642_v33  ;;  %v8220_v23 = vpop.f32.mrf.mxu1  ;;  %v6718_v29 = vpop.permute.xlu0 %6717 }
 0x62f   : > { %v8109_v17 = vpop.f32.mrf.mxu0 }
 0x630   : > { %v6820_v37 = vmul.f32 %v11663_v58, %v6595_v26  ;;  %v6502_v32 = vadd.f32 %v8219_v40, %v6341_v9  ;;  %v8110_v62 = vadd.f32 %v8109_v17, %v8108_v39  ;;  %v8221_v51 = vpop.f32.mrf.mxu1 }
 0x631   : > { %v8111_v13 = vpop.f32.mrf.mxu0  ;;  %v8222_v38 = vadd.f32 %v8221_v51, %v8220_v23 }
 0x632   : > { %v6851_v34 = vadd.f32 %v6850_v22, %v6820_v37  ;;  %v6596_v2 = vmax.f32 %v6502_v32, 0.0  ;;  %v6346_v6 = vadd.f32 %v8110_v62, %v11644_v46  ;;  %v8223_v31 = vpop.f32.mrf.mxu1 }
 0x633   : > { %v8112_v11 = vpop.f32.mrf.mxu0 }
 0x634   : > { %v6821_v7 = vmul.f32 %v6708_v3, %v6596_v2  ;;  %v6507_v36 = vadd.f32 %v8222_v38, %v6346_v6  ;;  %v8113_v33 = vadd.f32 %v8112_v11, %v8111_v13  ;;  %v8224_v4 = vpop.f32.mrf.mxu1  ;;  %v6728_v11 = vpop.permute.xlu0 %6727 }
 0x635   : > { %v8114_v28 = vpop.f32.mrf.mxu0  ;;  %v8225_v0 = vadd.f32 %v8224_v4, %v8223_v31 }
 0x636   : > { %v6852_v57 = vadd.f32 %v6851_v34, %v6821_v7  ;;  %v6597_v56 = vmax.f32 %v6507_v36, 0.0  ;;  %v6349_v58 = vadd.f32 %v8113_v33, %v11649_v24  ;;  %v8226_v19 = vpop.f32.mrf.mxu1 }
 0x637   : > { %v8115_v59 = vpop.f32.mrf.mxu0 }
 0x638   : > { %v6822_v16 = vmul.f32 %v11669_v35, %v6597_v56  ;;  %v6510_v52 = vadd.f32 %v8225_v0, %v6349_v58  ;;  %v8116_v46 = vadd.f32 %v8115_v59, %v8114_v28  ;;  %v8227_v53 = vpop.f32.mrf.mxu1 }
 0x639   : > { %v8117_v49 = vpop.f32.mrf.mxu0  ;;  %v8228_v10 = vadd.f32 %v8227_v53, %v8226_v19 }
 0x63a   : > { %v6853_v45 = vadd.f32 %v6852_v57, %v6822_v16  ;;  %v6598_v42 = vmax.f32 %v6510_v52, 0.0  ;;  %v6354_v41 = vadd.f32 %v8116_v46, %v11653_v1  ;;  %v8229_v14 = vpop.f32.mrf.mxu1 }
 0x63b   : > { %v8118_v12 = vpop.f32.mrf.mxu0 }
 0x63c   : > { %v6823_v39 = vmul.f32 %v6718_v29, %v6598_v42  ;;  %v6515_v22 = vadd.f32 %v8228_v10, %v6354_v41  ;;  %v8119_v24 = vadd.f32 %v8118_v12, %v8117_v49  ;;  %v8230_v26 = vpop.f32.mrf.mxu1  ;;  %v6738_v10 = vpop.permute.xlu0 %6737 }
 0x63d   : > { %v8120_v9 = vpop.f32.mrf.mxu0  ;;  %v8231_v17 = vadd.f32 %v8230_v26, %v8229_v14 }
 0x63e   : > { %v6854_v40 = vadd.f32 %v6853_v45, %v6823_v39  ;;  %v6599_v23 = vmax.f32 %v6515_v22, 0.0  ;;  %v6357_v35 = vadd.f32 %v8119_v24, %v11656_v50  ;;  %v8232_v37 = vpop.f32.mrf.mxu1 }
 0x63f   : > { %v8121_v32 = vpop.f32.mrf.mxu0 }
 0x640   : > { %v6824_v62 = vmul.f32 %v11674_v30, %v6599_v23  ;;  %v6518_v51 = vadd.f32 %v8231_v17, %v6357_v35  ;;  %v8122_v1 = vadd.f32 %v8121_v32, %v8120_v9  ;;  %v8233_v13 = vpop.f32.mrf.mxu1  ;;  %v6748_v32 = vpop.permute.xlu0 %6747 }
 0x641   : > { %v8123_v34 = vpop.f32.mrf.mxu0  ;;  %v8234_v31 = vadd.f32 %v8233_v13, %v8232_v37 }
 0x642   : > { %v6855_v2 = vadd.f32 %v6854_v40, %v6824_v62  ;;  %v6600_v6 = vmax.f32 %v6518_v51, 0.0  ;;  %v6362_v38 = vadd.f32 %v8122_v1, %v11660_v54  ;;  %v8235_v3 = vpop.f32.mrf.mxu1 }
 0x643   : > { %v8124_v7 = vpop.f32.mrf.mxu0 }
 0x644   : > { %v6825_v36 = vmul.f32 %v6728_v11, %v6600_v6  ;;  %v6523_v33 = vadd.f32 %v8234_v31, %v6362_v38  ;;  %v8125_v50 = vadd.f32 %v8124_v7, %v8123_v34  ;;  %v8236_v4 = vpop.f32.mrf.mxu1 }
 0x645   : > { %v8126_v28 = vpop.f32.mrf.mxu0  ;;  %v8237_v58 = vadd.f32 %v8236_v4, %v8235_v3  ;;  %v6758_v4 = vpop.permute.xlu0 %6757 }
 0x646   : > { %v6856_v57 = vadd.f32 %v6855_v2, %v6825_v36  ;;  %v6601_v56 = vmax.f32 %v6523_v33, 0.0  ;;  %v6365_v30 = vadd.f32 %v8125_v50, %v11665_v25  ;;  %v8238_v0 = vpop.f32.mrf.mxu1 }
 0x647   : > { %v8127_v19 = vpop.f32.mrf.mxu0 }
 0x648   : > { %v6826_v59 = vmul.f32 %v11681_v47, %v6601_v56  ;;  %v6526_v16 = vadd.f32 %v8237_v58, %v6365_v30  ;;  %v8128_v54 = vadd.f32 %v8127_v19, %v8126_v28  ;;  %v8239_v52 = vpop.f32.mrf.mxu1 }
 0x649   : > { %v8129_v46 = vpop.f32.mrf.mxu0  ;;  %v8240_v42 = vadd.f32 %v8239_v52, %v8238_v0 }
 0x64a   : > { %v6857_v53 = vadd.f32 %v6856_v57, %v6826_v59  ;;  %v6602_v49 = vmax.f32 %v6526_v16, 0.0  ;;  %v6370_v45 = vadd.f32 %v8128_v54, %v11667_v5  ;;  %v8241_v41 = vpop.f32.mrf.mxu1 }
 0x64b   : > { %v8130_v14 = vpop.f32.mrf.mxu0 }
 0x64c   : > { %v6827_v29 = vmul.f32 %v6738_v10, %v6602_v49  ;;  %v6531_v12 = vadd.f32 %v8240_v42, %v6370_v45  ;;  %v8131_v25 = vadd.f32 %v8130_v14, %v8129_v46  ;;  %v8242_v39 = vpop.f32.mrf.mxu1  ;;  %v6768_v45 = vpop.permute.xlu0 %6767 }
 0x64d   : > { %v8132_v22 = vpop.f32.mrf.mxu0  ;;  %v8243_v9 = vadd.f32 %v8242_v39, %v8241_v41 }
 0x64e   : > { %v6858_v24 = vadd.f32 %v6857_v53, %v6827_v29  ;;  %v6603_v26 = vmax.f32 %v6531_v12, 0.0  ;;  %v6373_v47 = vadd.f32 %v8131_v25, %v11672_v55  ;;  %v8244_v40 = vpop.f32.mrf.mxu1 }
 0x64f   : > { %v8133_v23 = vpop.f32.mrf.mxu0 }
 0x650   : > { %v6828_v35 = vmul.f32 %v11686_v18, %v6603_v26  ;;  %v6534_v17 = vadd.f32 %v8243_v9, %v6373_v47  ;;  %v8134_v5 = vadd.f32 %v8133_v23, %v8132_v22  ;;  %v8245_v37 = vpop.f32.mrf.mxu1 }
 0x651   : > { %v8135_v62 = vpop.f32.mrf.mxu0  ;;  %v8246_v34 = vadd.f32 %v8245_v37, %v8244_v40 }
 0x652   : > { %v6859_v51 = vadd.f32 %v6858_v24, %v6828_v35  ;;  %v6604_v1 = vmax.f32 %v6534_v17, 0.0  ;;  %v6378_v13 = vadd.f32 %v8134_v5, %v11676_v60  ;;  %v8247_v2 = vpop.f32.mrf.mxu1  ;;  %v6773_v35 = vpop.permute.xlu0 %6772 }
 0x653   : > { %v8136_v6 = vpop.f32.mrf.mxu0 }
 0x654   : > { %v6829_v38 = vmul.f32 %v6748_v32, %v6604_v1  ;;  %v6539_v31 = vadd.f32 %v8246_v34, %v6378_v13  ;;  %v8137_v55 = vadd.f32 %v8136_v6, %v8135_v62  ;;  %v8248_v3 = vpop.f32.mrf.mxu1 }
 0x655   : > { %v8138_v11 = vpop.f32.mrf.mxu0  ;;  %v8249_v33 = vadd.f32 %v8248_v3, %v8247_v2 }
 0x656   : > { %v6860_v7 = vadd.f32 %v6859_v51, %v6829_v38  ;;  %v6605_v36 = vmax.f32 %v6539_v31, 0.0  ;;  %v6381_v18 = vadd.f32 %v8137_v55, %v11679_v43  ;;  %v8250_v50 = vpop.f32.mrf.mxu1  ;;  %v6778_v55 = vpop.permute.xlu0 %6777 }
 0x657   : > { %v8139_v28 = vpop.f32.mrf.mxu0 }
 0x658   : > { %v6830_v57 = vmul.f32 %v11692_v61, %v6605_v36  ;;  %v6542_v56 = vadd.f32 %v8249_v33, %v6381_v18  ;;  %v8140_v60 = vadd.f32 %v8139_v28, %v8138_v11  ;;  %v8251_v30 = vpop.f32.mrf.mxu1 }
 0x659   : > { %v8141_v58 = vpop.f32.mrf.mxu0  ;;  %v8252_v16 = vadd.f32 %v8251_v30, %v8250_v50 }
 0x65a   : > { %v6861_v0 = vadd.f32 %v6860_v7, %v6830_v57  ;;  %v6606_v19 = vmax.f32 %v6542_v56, 0.0  ;;  %v6386_v59 = vadd.f32 %v8140_v60, %v11683_v15  ;;  %v8253_v54 = vpop.f32.mrf.mxu1 }
 0x65b   : > { %v8142_v52 = vpop.f32.mrf.mxu0 }
 0x65c   : > { %v6831_v46 = vmul.f32 %v6758_v4, %v6606_v19  ;;  %v6547_v53 = vadd.f32 %v8252_v16, %v6386_v59  ;;  %v8143_v43 = vadd.f32 %v8142_v52, %v8141_v58  ;;  %v8254_v49 = vpop.f32.mrf.mxu1  ;;  %v6783_v59 = vpop.permute.xlu0 %6782 }
 0x65d   : > { %v8144_v42 = vpop.f32.mrf.mxu0  ;;  %v8255_v14 = vadd.f32 %v8254_v49, %v8253_v54 }
 0x65e   : > { %v6862_v41 = vadd.f32 %v6861_v0, %v6831_v46  ;;  %v6607_v10 = vmax.f32 %v6547_v53, 0.0  ;;  %v6389_v61 = vadd.f32 %v8143_v43, %v11688_v63  ;;  %v8256_v29 = vpop.f32.mrf.mxu1 }
 0x65f   : > { %v8145_v12 = vpop.f32.mrf.mxu0 }
 0x660   : > { %v6832_v25 = vmul.f32 %v11697_v48, %v6607_v10  ;;  %v6550_v39 = vadd.f32 %v8255_v14, %v6389_v61  ;;  %v8146_v15 = vadd.f32 %v8145_v12, %v8144_v42  ;;  %v8257_v22 = vpop.f32.mrf.mxu1  ;;  %v6788_v61 = vpop.permute.xlu1 %6787 }
 0x661   : > { %v8147_v24 = vpop.f32.mrf.mxu0  ;;  %v8258_v40 = vadd.f32 %v8257_v22, %v8256_v29 }
 0x662   : > { %v6863_v26 = vadd.f32 %v6862_v41, %v6832_v25  ;;  %v6608_v47 = vmax.f32 %v6550_v39, 0.0  ;;  %v6394_v9 = vadd.f32 %v8146_v15, %v11690_v44  ;;  %v8259_v23 = vpop.f32.mrf.mxu1 }
 0x663   : > { %v8148_v17 = vpop.f32.mrf.mxu0 }
 0x664   : > { %v6833_v5 = vmul.f32 %v6768_v45, %v6608_v47  ;;  %v6555_v37 = vadd.f32 %v8258_v40, %v6394_v9  ;;  %v8149_v63 = vadd.f32 %v8148_v17, %v8147_v24  ;;  %v8260_v32 = vpop.f32.mrf.mxu1  ;;  %v12499_v45 = vld [vmem:[#allocation349_spill] sm:$0xff]  ;;  %v6793_v9 = vpop.permute.xlu0 %6792 }
 0x665   : > { %v8150_v62 = vpop.f32.mrf.mxu0  ;;  %v8261_v13 = vadd.f32 %v8260_v32, %v8259_v23 }
 0x666   : > { %v6864_v51 = vadd.f32 %v6863_v26, %v6833_v5  ;;  %v6609_v1 = vmax.f32 %v6555_v37, 0.0  ;;  %v6397_v48 = vadd.f32 %v8149_v63, %v11695_v21  ;;  %v8262_v34 = vpop.f32.mrf.mxu1 }
 0x667   : > { %v8151_v2 = vpop.f32.mrf.mxu0 }
 0x668   : > { %v6834_v6 = vmul.f32 %v6773_v35, %v6609_v1  ;;  %v6558_v38 = vadd.f32 %v8261_v13, %v6397_v48  ;;  %v8152_v31 = vadd.f32 %v8151_v2, %v8150_v62  ;;  %v8263_v44 = vpop.f32.mrf.mxu1  ;;  %v12500_v62 = vld [vmem:[#allocation350_spill] sm:$0xff]  ;;  %v6798_v13 = vpop.permute.xlu1 %6797 }
 0x669   : > { %v8153_v3 = vpop.f32.mrf.mxu0  ;;  %v8264_v18 = vadd.f32 %v8263_v44, %v8262_v34 }
 0x66a   : > { %v6865_v11 = vadd.f32 %v6864_v51, %v6834_v6  ;;  %v6610_v7 = vmax.f32 %v6558_v38, 0.0  ;;  %v6402_v36 = vadd.f32 %v8152_v31, %v11699_v8  ;;  %v8265_v33 = vpop.f32.mrf.mxu1 }
 0x66b   : > { %v8154_v50 = vpop.f32.mrf.mxu0 }
 0x66c   : > { %v6835_v4 = vmul.f32 %v6778_v55, %v6610_v7  ;;  %v6563_v28 = vadd.f32 %v8264_v18, %v6402_v36  ;;  %v8155_v57 = vadd.f32 %v8154_v50, %v8153_v3  ;;  %v8266_v21 = vpop.f32.mrf.mxu1  ;;  %v12501_v55 = vld [vmem:[#allocation351_spill] sm:$0xff]  ;;  %v6803_v7 = vpop.permute.xlu0 %6802 }
 0x66d   : > { %v8156_v56 = vpop.f32.mrf.mxu0  ;;  %v8267_v0 = vadd.f32 %v8266_v21, %v8265_v33 }
 0x66e   : > { %v6866_v60 = vadd.f32 %v6865_v11, %v6835_v4  ;;  %v6611_v30 = vmax.f32 %v6563_v28, 0.0  ;;  %v6405_v58 = vadd.f32 %v8155_v57, %v11702_v20  ;;  %v8268_v19 = vpop.f32.mrf.mxu1  ;;  %v6808_v4 = vpop.permute.xlu1 %6807 }
 0x66f   : > { %v8157_v16 = vpop.f32.mrf.mxu0 }
 0x670   : > { %v6836_v54 = vmul.f32 %v6783_v59, %v6611_v30  ;;  %v6566_v52 = vadd.f32 %v8267_v0, %v6405_v58  ;;  %v8158_v46 = vadd.f32 %v8157_v16, %v8156_v56  ;;  %v8269_v8 = vpop.f32.mrf.mxu1  ;;  %v6617_v0 = vld [vmem:[#allocation3] sm:$0x1] }
 0x671   : > { %v8159_v53 = vpop.f32.mrf.mxu0  ;;  %v8270_v41 = vadd.f32 %v8269_v8, %v8268_v19 }
 0x672   : > { %v6867_v43 = vadd.f32 %v6866_v60, %v6836_v54  ;;  %v6612_v49 = vmax.f32 %v6566_v52, 0.0  ;;  %v6410_v42 = vadd.f32 %v8158_v46, %v12499_v45  ;;  %v8271_v10 = vpop.f32.mrf.mxu1 }
 0x673   : > { %v8160_v14 = vpop.f32.mrf.mxu0 }
 0x674   : > { %v6837_v29 = vmul.f32 %v6788_v61, %v6612_v49  ;;  %v6571_v12 = vadd.f32 %v8270_v41, %v6410_v42  ;;  %v8161_v20 = vadd.f32 %v8160_v14, %v8159_v53  ;;  %v8272_v25 = vpop.f32.mrf.mxu1 }
 0x675   : > { %v8162_v39 = vpop.f32.mrf.mxu0  ;;  %v8273_v26 = vadd.f32 %v8272_v25, %v8271_v10 }
 0x676   : > { %v6868_v15 = vadd.f32 %v6867_v43, %v6837_v29  ;;  %v6613_v22 = vmax.f32 %v6571_v12, 0.0  ;;  %v6413_v24 = vadd.f32 %v8161_v20, %v11706_v27  ;;  %v8274_v47 = vpop.f32.mrf.mxu1 }
 0x677   : > { %v8163_v40 = vpop.f32.mrf.mxu0 }
 0x678   : > { %v6838_v23 = vmul.f32 %v6793_v9, %v6613_v22  ;;  %v6574_v35 = vadd.f32 %v8273_v26, %v6413_v24  ;;  %v8164_v17 = vadd.f32 %v8163_v40, %v8162_v39  ;;  %v8275_v5 = vpop.f32.mrf.mxu1 }
 0x679   : > { %v8165_v37 = vpop.f32.mrf.mxu0  ;;  %v8276_v1 = vadd.f32 %v8275_v5, %v8274_v47 }
 0x67a   : > { %v6869_v63 = vadd.f32 %v6868_v15, %v6838_v23  ;;  %v6614_v32 = vmax.f32 %v6574_v35, 0.0  ;;  %v6418_v51 = vadd.f32 %v8164_v17, %v12500_v62  ;;  %v8277_v48 = vpop.f32.mrf.mxu1 }
 0x67b   : > { %v8166_v34 = vpop.f32.mrf.mxu0 }
 0x67c   : > { %v6839_v2 = vmul.f32 %v6798_v13, %v6614_v32  ;;  %v6579_v6 = vadd.f32 %v8276_v1, %v6418_v51  ;;  %v8167_v27 = vadd.f32 %v8166_v34, %v8165_v37  ;;  %v8278_v38 = vpop.f32.mrf.mxu1 }
 0x67d   : > { %v8279_v11 = vadd.f32 %v8278_v38, %v8277_v48 }
 0x67e   : > { %v6870_v31 = vadd.f32 %v6869_v63, %v6839_v2  ;;  %v6615_v44 = vmax.f32 %v6579_v6, 0.0  ;;  %v6421_v3 = vadd.f32 %v8167_v27, %v12501_v55 }
 0x680   : > { %v6840_v36 = vmul.f32 %v6803_v7, %v6615_v44  ;;  %v6582_v18 = vadd.f32 %v8279_v11, %v6421_v3 }
 0x682   : > { %v6871_v33 = vadd.f32 %v6870_v31, %v6840_v36  ;;  %v6616_v50 = vmax.f32 %v6582_v18, 0.0 }
 0x684   : > { %v6841_v28 = vmul.f32 %v6808_v4, %v6616_v50 }
 0x686   : > { %v6872_v57 = vadd.f32 %v6871_v33, %v6841_v28 }
 0x688   : > { %v6873_v21 = vrot.slane %v6872_v57, 4 }
 0x68a   : > { %v6874_v56 = vadd.f32 %v6873_v21, %v6872_v57 }
 0x68c   : > { %v6875_v60 = vrot.slane %v6874_v56, 2 }
 0x68e   : > { %v6876_v30 = vadd.f32 %v6875_v60, %v6874_v56 }
 0x690   : > { %v6877_v58 = vrot.slane %v6876_v30, 1 }
 0x692   : > { %v6878_v19 = vadd.f32 %v6877_v58, %v6876_v30  ;;  %6884 = sbr.rel (%p7316_p6) target bundleno = 1699 (0x6a3), region = 56 }
 0x694   : > { %v6879_v59 = vadd.f32 %v6878_v19, %v6617_v0 }
 0x696   : > { %6880 = vst [vmem:[#allocation3] sm:$0x1] %v6879_v59 }
 0x697   : > { %v6887_v54 = vstv %s6886_s11 }
 0x69d   : > { %v6885_v16 = vld [vmem:[#allocation3] sm:$0x1] }
 0x69e   : > { %v6888_v52 = vadd.f32 %v6887_v54, %v6885_v16 }
 0x6a0   : > { %v6889_v46 = vmax.f32 %v6888_v52, 0.0 }
 0x6a2   : > { %6890 = vst [vmem:[%s11776_s7] sm:$0x1] %v6889_v46 }
 0x6a3 PF: > { %s18_s28 = sadd.s32 1, %s8469_s28   ;;  %s12502_s26 = smov %s8465_s27 }
 0x6a4   : > { %p15_p7 = scmp.ge.s32.totalorder %s18_s28, 6   ;;  %s12503_s27 = smov %s12505_s6 }
 0x6a6   :  { %17 = sbr.rel (!%p15_p7) target bundleno = 2 (0x2), region = 95 }

</bundles_post_ra>
